<compile_context>
chip_gen: v7x
topology: tpu7x:2x2x1
jax: 0.10.0
libtpu: 0.0.40
codegen_flags: <defaults>
</compile_context>

<pallas_src>
import jax
import jax.numpy as jnp
from jax.experimental import pallas as pl
from jax.experimental.pallas import tpu as pltpu

BN_EPS = 1e-5


# ------------------------- Pallas kernels -------------------------

def _conv_pool_kernel(t00_ref, t01_ref, t10_ref, t11_ref,
                      w_ref, b_ref, s_ref, h_ref, o_ref):
    """Fused 3x3 conv (im2col matmul) + bias + ReLU + BN affine + 2x2 max pool.

    t{ph}{pw}_ref : (tm, 9*Cin) bf16 im2col rows for pooling-window corner (ph, pw)
    w_ref         : (9*Cin, Cout) bf16 reshaped conv weight
    b/s/h_ref     : (1, Cout) f32 conv bias / BN scale / BN shift
    o_ref         : (tm, Cout) f32 pooled output
    """
    w = w_ref[...]
    b = b_ref[...]
    s = s_ref[...]
    h = h_ref[...]

    def branch(t_ref):
        y = jnp.dot(t_ref[...], w, preferred_element_type=jnp.float32)
        return jnp.maximum(y + b, 0.0) * s + h          # bias + ReLU + BN (f32)

    o_ref[...] = jnp.maximum(
        jnp.maximum(branch(t00_ref), branch(t01_ref)),
        jnp.maximum(branch(t10_ref), branch(t11_ref)))


def _mlp_kernel(x_ref, w1_ref, b1_ref, s1_ref, t1_ref, w2_ref, b2_ref, o_ref):
    """linear1 + ReLU + BN1d(affine) + (dropout=identity) + linear2 + sigmoid."""
    h = jnp.dot(x_ref[...], w1_ref[...], preferred_element_type=jnp.float32)
    h = jnp.maximum(h + b1_ref[...], 0.0)
    h = h * s1_ref[...] + t1_ref[...]
    # TODO(synk): Dropout(p=0.5) in training mode is omitted; inference identity used.
    z = jnp.dot(h.astype(w2_ref.dtype), w2_ref[...],
                preferred_element_type=jnp.float32) + b2_ref[...]
    o_ref[...] = 1.0 / (1.0 + jnp.exp(-z))


# ------------------------- wrappers -------------------------

def conv_bn_relu_pool(x_nhwc, w2d, b_row, s_row, h_row):
    """One fused stage: 3x3/s1/p1 conv (cross-corr) + bias + ReLU + BN + 2x2/s2 pool."""
    B, H, W, Cin = x_nhwc.shape
    K9, Cout = w2d.shape
    Ho, Wo = H // 2, W // 2
    Mo = B * Ho * Wo

    # im2col: one (Mo, 9*Cin) matrix per pooling-window corner (ph, pw).
    xp = jnp.pad(x_nhwc, ((0, 0), (1, 1), (1, 1), (0, 0)))

    def tap_matrix(ph, pw):
        cols = [xp[:, ph + dh: ph + dh + H: 2, pw + dw: pw + dw + W: 2, :]
                for dh in range(3) for dw in range(3)]
        return jnp.concatenate(cols, axis=-1).reshape(Mo, K9).astype(jnp.bfloat16)

    taps = [tap_matrix(ph, pw) for ph in (0, 1) for pw in (0, 1)]

    # M tile: whole problem at B=2 (grid=(1,)); gridded & "parallel" so larger
    # batches shard across v7x's two TensorCores while bounding VMEM.
    tm = Mo
    for cand in (2048, 1024, 512, 256, 128, 64, 32, 16, 8):
        if Mo >= cand and Mo % cand == 0:
            tm = cand
            break

    flops = 2 * 4 * Mo * K9 * Cout
    bytes_accessed = 4 * Mo * K9 * 2 + K9 * Cout * 2 + Mo * Cout * 4 + 3 * Cout * 4

    out = pl.pallas_call(
        _conv_pool_kernel,
        out_shape=jax.ShapeDtypeStruct((Mo, Cout), jnp.float32),
        grid=(Mo // tm,),
        in_specs=[pl.BlockSpec((tm, K9), lambda i: (i, 0))] * 4 + [
            pl.BlockSpec((K9, Cout), lambda i: (0, 0)),
            pl.BlockSpec((1, Cout), lambda i: (0, 0)),
            pl.BlockSpec((1, Cout), lambda i: (0, 0)),
            pl.BlockSpec((1, Cout), lambda i: (0, 0)),
        ],
        out_specs=pl.BlockSpec((tm, Cout), lambda i: (i, 0)),
        compiler_params=pltpu.CompilerParams(dimension_semantics=("parallel",)),
        cost_estimate=pl.CostEstimate(flops=flops, transcendentals=0,
                                      bytes_accessed=bytes_accessed),
    )(*taps, w2d, b_row, s_row, h_row)
    return out.reshape(B, Ho, Wo, Cout)


def mlp_head(x_flat, w1, b1_row, s1_row, t1_row, w2, b2_row):
    B, K1 = x_flat.shape
    N1 = w1.shape[1]
    N2 = w2.shape[1]
    flops = 2 * B * (K1 * N1 + N1 * N2)
    bytes_accessed = (B * K1 * 2 + K1 * N1 * 2 + N1 * N2 * 2
                      + B * N2 * 4 + 3 * N1 * 4 + N2 * 4)
    return pl.pallas_call(
        _mlp_kernel,
        out_shape=jax.ShapeDtypeStruct((B, N2), jnp.float32),
        cost_estimate=pl.CostEstimate(flops=flops, transcendentals=B * N2,
                                      bytes_accessed=bytes_accessed),
    )(x_flat, w1, b1_row, s1_row, t1_row, w2, b2_row)


def _bn_fold(gamma, beta, mean, var):
    scale = gamma / jnp.sqrt(var + BN_EPS)
    shift = beta - mean * scale
    return scale, shift


def prepare_params(p):
    """One-time (outside jit) parameter folding / layout prep.

    - BN running stats folded into per-channel scale/shift (inference semantics).
    - Conv weights reshaped HWIO -> (9*Cin, Cout) and cast to bf16.
    - lin1 rows permuted from torch's NCHW flatten order to the NHWC flatten the
      kernels produce (removes the runtime transpose before the MLP).
    - lin2 zero-padded to a 128-lane multiple for a lane-dense final store.
    """
    f32 = jnp.float32
    s1, t1 = _bn_fold(p["bn1_g"], p["bn1_b"], p["bn1_m"], p["bn1_v"])
    s2, t2 = _bn_fold(p["bn2_g"], p["bn2_b"], p["bn2_m"], p["bn2_v"])
    s3, t3 = _bn_fold(p["bn3_g"], p["bn3_b"], p["bn3_m"], p["bn3_v"])

    c1 = p["conv1_w"]                      # (3,3,Cin,Cout) HWIO
    c2 = p["conv2_w"]
    lin1_w = p["lin1_w"]                   # rows in torch NCHW-flatten order
    lin2_w = p["lin2_w"]

    C2 = c2.shape[-1]
    HW2 = lin1_w.shape[0] // C2
    H2 = int(round(HW2 ** 0.5))
    N1 = lin1_w.shape[1]
    N2 = lin2_w.shape[1]
    N2p = ((N2 + 127) // 128) * 128

    # (C,H,W,N1) -> (H,W,C,N1): row j = h*W*C + w*C + c picks lin1_w[c*H*W + h*W + w]
    lin1_perm = jnp.transpose(
        lin1_w.reshape(C2, H2, H2, N1), (1, 2, 0, 3)).reshape(HW2 * C2, N1)

    q = {
        "conv1_w": c1.reshape(-1, c1.shape[-1]).astype(jnp.bfloat16),
        "conv1_b": p["conv1_b"].reshape(1, -1).astype(f32),
        "bn1_s": s1.reshape(1, -1).astype(f32),
        "bn1_t": t1.reshape(1, -1).astype(f32),
        "conv2_w": c2.reshape(-1, c2.shape[-1]).astype(jnp.bfloat16),
        "conv2_b": p["conv2_b"].reshape(1, -1).astype(f32),
        "bn2_s": s2.reshape(1, -1).astype(f32),
        "bn2_t": t2.reshape(1, -1).astype(f32),
        "lin1_w": lin1_perm.astype(jnp.bfloat16),
        "lin1_b": p["lin1_b"].reshape(1, -1).astype(f32),
        "bn3_s": s3.reshape(1, -1).astype(f32),
        "bn3_t": t3.reshape(1, -1).astype(f32),
        "lin2_w": jnp.pad(lin2_w, ((0, 0), (0, N2p - N2))).astype(jnp.bfloat16),
        "lin2_b": jnp.pad(p["lin2_b"], (0, N2p - N2)).reshape(1, -1).astype(f32),
    }
    return q, N2


def cnn_forward(x_nchw, q):
    """Matches CNN.forward (inference): conv1->relu->bn->pool, conv2->relu->bn->pool,
    flatten, lin1->relu->bn1d->drop(=id), lin2->sigmoid.  Returns lane-padded logits."""
    x = jnp.transpose(x_nchw, (0, 2, 3, 1))                       # NCHW -> NHWC
    x = conv_bn_relu_pool(x, q["conv1_w"], q["conv1_b"], q["bn1_s"], q["bn1_t"])
    x = conv_bn_relu_pool(x, q["conv2_w"], q["conv2_b"], q["bn2_s"], q["bn2_t"])
    B = x.shape[0]
    xf = x.reshape(B, -1).astype(jnp.bfloat16)    # NHWC flatten; lin1_w rows pre-permuted
    return mlp_head(xf, q["lin1_w"], q["lin1_b"], q["bn3_s"], q["bn3_t"],
                    q["lin2_w"], q["lin2_b"])


# ------------------------- pure-JAX reference -------------------------

def reference_forward(x_nchw, p):
    x = jnp.transpose(x_nchw, (0, 2, 3, 1))
    s1, t1 = _bn_fold(p["bn1_g"], p["bn1_b"], p["bn1_m"], p["bn1_v"])
    s2, t2 = _bn_fold(p["bn2_g"], p["bn2_b"], p["bn2_m"], p["bn2_v"])
    s3, t3 = _bn_fold(p["bn3_g"], p["bn3_b"], p["bn3_m"], p["bn3_v"])

    def block(x, w, b, scale, shift):
        y = jax.lax.conv_general_dilated(
            x, w, window_strides=(1, 1), padding=((1, 1), (1, 1)),
            dimension_numbers=("NHWC", "HWIO", "NHWC"))
        y = jnp.maximum(y + b, 0.0) * scale + shift
        B, H, W, C = y.shape
        return y.reshape(B, H // 2, 2, W // 2, 2, C).max(axis=(2, 4))

    x = block(x, p["conv1_w"], p["conv1_b"], s1, t1)
    x = block(x, p["conv2_w"], p["conv2_b"], s2, t2)
    B = x.shape[0]
    xf = jnp.transpose(x, (0, 3, 1, 2)).reshape(B, -1)   # torch NCHW-order flatten
    h = jnp.maximum(xf @ p["lin1_w"] + p["lin1_b"], 0.0) * s3 + t3
    z = h @ p["lin2_w"] + p["lin2_b"]
    return 1.0 / (1.0 + jnp.exp(-z))


# ------------------------- main -------------------------

if __name__ == "__main__":
    key = jax.random.PRNGKey(0)
    ks = jax.random.split(key, 20)
    f32 = jnp.float32

    params = {
        "conv1_w": jax.random.normal(ks[0], (3, 3, 3, 32), f32) * 0.1,
        "conv1_b": jax.random.normal(ks[1], (32,), f32) * 0.1,
        "bn1_g": 1.0 + 0.1 * jax.random.normal(ks[2], (32,), f32),
        "bn1_b": 0.1 * jax.random.normal(ks[3], (32,), f32),
        "bn1_m": 0.1 * jax.random.normal(ks[4], (32,), f32),
        "bn1_v": jax.random.uniform(ks[5], (32,), f32, 0.5, 1.5),

        "conv2_w": jax.random.normal(ks[6], (3, 3, 32, 64), f32) * 0.05,
        "conv2_b": jax.random.normal(ks[7], (64,), f32) * 0.1,
        "bn2_g": 1.0 + 0.1 * jax.random.normal(ks[8], (64,), f32),
        "bn2_b": 0.1 * jax.random.normal(ks[9], (64,), f32),
        "bn2_m": 0.1 * jax.random.normal(ks[10], (64,), f32),
        "bn2_v": jax.random.uniform(ks[11], (64,), f32, 0.5, 1.5),

        "lin1_w": jax.random.normal(ks[12], (64 * 8 * 8, 256), f32) * 0.01,
        "lin1_b": jax.random.normal(ks[13], (256,), f32) * 0.05,
        "bn3_g": 1.0 + 0.1 * jax.random.normal(ks[14], (256,), f32),
        "bn3_b": 0.1 * jax.random.normal(ks[15], (256,), f32),
        "bn3_m": 0.1 * jax.random.normal(ks[16], (256,), f32),
        "bn3_v": jax.random.uniform(ks[17], (256,), f32, 0.5, 1.5),

        "lin2_w": jax.random.normal(ks[18], (256, 225), f32) * 0.05,
        "lin2_b": 0.05 * jnp.ones((225,), f32),
    }

    # Input: NCHW like the PyTorch module; 32x32 spatial is implied by Linear(64*8*8, 256).
    x = jax.random.normal(ks[19], (2, 3, 32, 32), f32)

    q, n_out = prepare_params(params)          # one-time layout/fold prep (outside jit)

    out_padded = jax.jit(cnn_forward)(x, q)
    out_padded = jax.block_until_ready(out_padded)
    out = out_padded[:, :n_out]                # strip the lane-padding (256 -> 225)

    ref = reference_forward(x, params)
    assert out.shape == (2, 225) and out.dtype == jnp.float32
    assert bool(jnp.all(jnp.isfinite(out)))
    assert bool(jnp.allclose(out, ref, atol=2e-2, rtol=2e-2))

    print("KERNEL_OK")
</pallas_src>

<mosaic_0001>
module attributes {stable_mosaic.version = 11 : i64} {
  func.func @_conv_pool_kernel(%arg0: i32, %arg1: memref<512x27xbf16, #tpu.memory_space<vmem>>, %arg2: memref<512x27xbf16, #tpu.memory_space<vmem>>, %arg3: memref<512x27xbf16, #tpu.memory_space<vmem>>, %arg4: memref<512x27xbf16, #tpu.memory_space<vmem>>, %arg5: memref<27x32xbf16, #tpu.memory_space<vmem>>, %arg6: memref<1x32xf32, #tpu.memory_space<vmem>>, %arg7: memref<1x32xf32, #tpu.memory_space<vmem>>, %arg8: memref<1x32xf32, #tpu.memory_space<vmem>>, %arg9: memref<512x32xf32, #tpu.memory_space<vmem>>) attributes {dimension_semantics = [#tpu.dimension_semantics<parallel>], iteration_bounds = array<i64: 1>, scalar_prefetch = 0 : i64, scratch_operands = 0 : i64, tpu.core_type = #tpu.core_type<tc>, window_params = [{transform_indices = @transform_0, window_bounds = array<i64: 512, 27>}, {transform_indices = @transform_1, window_bounds = array<i64: 512, 27>}, {transform_indices = @transform_2, window_bounds = array<i64: 512, 27>}, {transform_indices = @transform_3, window_bounds = array<i64: 512, 27>}, {pipeline_mode = #tpu.pipeline_mode<synchronous>, transform_indices = @transform_4, window_bounds = array<i64: 27, 32>}, {pipeline_mode = #tpu.pipeline_mode<synchronous>, transform_indices = @transform_5, window_bounds = array<i64: 1, 32>}, {pipeline_mode = #tpu.pipeline_mode<synchronous>, transform_indices = @transform_6, window_bounds = array<i64: 1, 32>}, {pipeline_mode = #tpu.pipeline_mode<synchronous>, transform_indices = @transform_7, window_bounds = array<i64: 1, 32>}, {transform_indices = @transform_8, window_bounds = array<i64: 512, 32>}]} {
    %c0 = arith.constant 0 : index
    %c0_0 = arith.constant 0 : index
    %0 = vector.load %arg5[%c0, %c0_0] : memref<27x32xbf16, #tpu.memory_space<vmem>>, vector<27x32xbf16>
    %c0_1 = arith.constant 0 : index
    %c0_2 = arith.constant 0 : index
    %1 = vector.load %arg6[%c0_1, %c0_2] : memref<1x32xf32, #tpu.memory_space<vmem>>, vector<1x32xf32>
    %c0_3 = arith.constant 0 : index
    %c0_4 = arith.constant 0 : index
    %2 = vector.load %arg7[%c0_3, %c0_4] : memref<1x32xf32, #tpu.memory_space<vmem>>, vector<1x32xf32>
    %c0_5 = arith.constant 0 : index
    %c0_6 = arith.constant 0 : index
    %3 = vector.load %arg8[%c0_5, %c0_6] : memref<1x32xf32, #tpu.memory_space<vmem>>, vector<1x32xf32>
    %c0_7 = arith.constant 0 : index
    %c0_8 = arith.constant 0 : index
    %4 = vector.load %arg1[%c0_7, %c0_8] : memref<512x27xbf16, #tpu.memory_space<vmem>>, vector<512x27xbf16>
    %cst = arith.constant dense<0.000000e+00> : vector<512x32xf32>
    %5 = tpu.matmul %4, %0, %cst {dimension_numbers = #tpu.dot_dimension_numbers<[1], [0], [0], [1], [0, 0, 1, 1], [], []>} : vector<512x27xbf16>, vector<27x32xbf16>, vector<512x32xf32> -> vector<512x32xf32>
    %6 = vector.broadcast %1 : vector<1x32xf32> to vector<512x32xf32>
    %7 = arith.addf %5, %6 : vector<512x32xf32>
    %cst_9 = arith.constant 0.000000e+00 : f32
    %8 = vector.broadcast %cst_9 : f32 to vector<512x32xf32>
    %9 = arith.maximumf %7, %8 : vector<512x32xf32>
    %10 = vector.broadcast %2 : vector<1x32xf32> to vector<512x32xf32>
    %11 = arith.mulf %9, %10 : vector<512x32xf32>
    %12 = vector.broadcast %3 : vector<1x32xf32> to vector<512x32xf32>
    %13 = arith.addf %11, %12 : vector<512x32xf32>
    %c0_10 = arith.constant 0 : index
    %c0_11 = arith.constant 0 : index
    %14 = vector.load %arg2[%c0_10, %c0_11] : memref<512x27xbf16, #tpu.memory_space<vmem>>, vector<512x27xbf16>
    %cst_12 = arith.constant dense<0.000000e+00> : vector<512x32xf32>
    %15 = tpu.matmul %14, %0, %cst_12 {dimension_numbers = #tpu.dot_dimension_numbers<[1], [0], [0], [1], [0, 0, 1, 1], [], []>} : vector<512x27xbf16>, vector<27x32xbf16>, vector<512x32xf32> -> vector<512x32xf32>
    %16 = vector.broadcast %1 : vector<1x32xf32> to vector<512x32xf32>
    %17 = arith.addf %15, %16 : vector<512x32xf32>
    %cst_13 = arith.constant 0.000000e+00 : f32
    %18 = vector.broadcast %cst_13 : f32 to vector<512x32xf32>
    %19 = arith.maximumf %17, %18 : vector<512x32xf32>
    %20 = vector.broadcast %2 : vector<1x32xf32> to vector<512x32xf32>
    %21 = arith.mulf %19, %20 : vector<512x32xf32>
    %22 = vector.broadcast %3 : vector<1x32xf32> to vector<512x32xf32>
    %23 = arith.addf %21, %22 : vector<512x32xf32>
    %24 = arith.maximumf %13, %23 : vector<512x32xf32>
    %c0_14 = arith.constant 0 : index
    %c0_15 = arith.constant 0 : index
    %25 = vector.load %arg3[%c0_14, %c0_15] : memref<512x27xbf16, #tpu.memory_space<vmem>>, vector<512x27xbf16>
    %cst_16 = arith.constant dense<0.000000e+00> : vector<512x32xf32>
    %26 = tpu.matmul %25, %0, %cst_16 {dimension_numbers = #tpu.dot_dimension_numbers<[1], [0], [0], [1], [0, 0, 1, 1], [], []>} : vector<512x27xbf16>, vector<27x32xbf16>, vector<512x32xf32> -> vector<512x32xf32>
    %27 = vector.broadcast %1 : vector<1x32xf32> to vector<512x32xf32>
    %28 = arith.addf %26, %27 : vector<512x32xf32>
    %cst_17 = arith.constant 0.000000e+00 : f32
    %29 = vector.broadcast %cst_17 : f32 to vector<512x32xf32>
    %30 = arith.maximumf %28, %29 : vector<512x32xf32>
    %31 = vector.broadcast %2 : vector<1x32xf32> to vector<512x32xf32>
    %32 = arith.mulf %30, %31 : vector<512x32xf32>
    %33 = vector.broadcast %3 : vector<1x32xf32> to vector<512x32xf32>
    %34 = arith.addf %32, %33 : vector<512x32xf32>
    %c0_18 = arith.constant 0 : index
    %c0_19 = arith.constant 0 : index
    %35 = vector.load %arg4[%c0_18, %c0_19] : memref<512x27xbf16, #tpu.memory_space<vmem>>, vector<512x27xbf16>
    %cst_20 = arith.constant dense<0.000000e+00> : vector<512x32xf32>
    %36 = tpu.matmul %35, %0, %cst_20 {dimension_numbers = #tpu.dot_dimension_numbers<[1], [0], [0], [1], [0, 0, 1, 1], [], []>} : vector<512x27xbf16>, vector<27x32xbf16>, vector<512x32xf32> -> vector<512x32xf32>
    %37 = vector.broadcast %1 : vector<1x32xf32> to vector<512x32xf32>
    %38 = arith.addf %36, %37 : vector<512x32xf32>
    %cst_21 = arith.constant 0.000000e+00 : f32
    %39 = vector.broadcast %cst_21 : f32 to vector<512x32xf32>
    %40 = arith.maximumf %38, %39 : vector<512x32xf32>
    %41 = vector.broadcast %2 : vector<1x32xf32> to vector<512x32xf32>
    %42 = arith.mulf %40, %41 : vector<512x32xf32>
    %43 = vector.broadcast %3 : vector<1x32xf32> to vector<512x32xf32>
    %44 = arith.addf %42, %43 : vector<512x32xf32>
    %45 = arith.maximumf %34, %44 : vector<512x32xf32>
    %46 = arith.maximumf %24, %45 : vector<512x32xf32>
    %c0_22 = arith.constant 0 : index
    %c0_23 = arith.constant 0 : index
    %47 = vector.load %arg9[%c0_22, %c0_23] : memref<512x32xf32, #tpu.memory_space<vmem>>, vector<512x32xf32>
    tpu.vector_store %arg9[%c0_22, %c0_23], %46 {strides = array<i32>} : memref<512x32xf32, #tpu.memory_space<vmem>>, vector<512x32xf32>,
    return
  }
  func.func @transform_0(%arg0: i32) -> (i32, i32) {
    %c0_i32 = arith.constant 0 : i32
    %c0_i32_0 = arith.constant 0 : i32
    return %arg0, %c0_i32 : i32, i32
  }
  func.func @transform_1(%arg0: i32) -> (i32, i32) {
    %c0_i32 = arith.constant 0 : i32
    %c0_i32_0 = arith.constant 0 : i32
    return %arg0, %c0_i32 : i32, i32
  }
  func.func @transform_2(%arg0: i32) -> (i32, i32) {
    %c0_i32 = arith.constant 0 : i32
    %c0_i32_0 = arith.constant 0 : i32
    return %arg0, %c0_i32 : i32, i32
  }
  func.func @transform_3(%arg0: i32) -> (i32, i32) {
    %c0_i32 = arith.constant 0 : i32
    %c0_i32_0 = arith.constant 0 : i32
    return %arg0, %c0_i32 : i32, i32
  }
  func.func @transform_4(%arg0: i32) -> (i32, i32) {
    %c0_i32 = arith.constant 0 : i32
    %c0_i32_0 = arith.constant 0 : i32
    %c0_i32_1 = arith.constant 0 : i32
    return %c0_i32, %c0_i32_0 : i32, i32
  }
  func.func @transform_5(%arg0: i32) -> (i32, i32) {
    %c0_i32 = arith.constant 0 : i32
    %c0_i32_0 = arith.constant 0 : i32
    %c0_i32_1 = arith.constant 0 : i32
    return %c0_i32, %c0_i32_0 : i32, i32
  }
  func.func @transform_6(%arg0: i32) -> (i32, i32) {
    %c0_i32 = arith.constant 0 : i32
    %c0_i32_0 = arith.constant 0 : i32
    %c0_i32_1 = arith.constant 0 : i32
    return %c0_i32, %c0_i32_0 : i32, i32
  }
  func.func @transform_7(%arg0: i32) -> (i32, i32) {
    %c0_i32 = arith.constant 0 : i32
    %c0_i32_0 = arith.constant 0 : i32
    %c0_i32_1 = arith.constant 0 : i32
    return %c0_i32, %c0_i32_0 : i32, i32
  }
  func.func @transform_8(%arg0: i32) -> (i32, i32) {
    %c0_i32 = arith.constant 0 : i32
    %c0_i32_0 = arith.constant 0 : i32
    return %arg0, %c0_i32 : i32, i32
  }
}

module attributes {stable_mosaic.version = 11 : i64} {
  func.func @_mlp_kernel(%arg0: memref<2x4096xbf16, #tpu.memory_space<vmem>>, %arg1: memref<4096x256xbf16, #tpu.memory_space<vmem>>, %arg2: memref<1x256xf32, #tpu.memory_space<vmem>>, %arg3: memref<1x256xf32, #tpu.memory_space<vmem>>, %arg4: memref<1x256xf32, #tpu.memory_space<vmem>>, %arg5: memref<256x256xbf16, #tpu.memory_space<vmem>>, %arg6: memref<1x256xf32, #tpu.memory_space<vmem>>, %arg7: memref<2x256xf32, #tpu.memory_space<vmem>>) attributes {dimension_semantics = [], scalar_prefetch = 0 : i64, scratch_operands = 0 : i64, tpu.core_type = #tpu.core_type<tc>} {
    %c0 = arith.constant 0 : index
    %c0_0 = arith.constant 0 : index
    %0 = vector.load %arg0[%c0, %c0_0] : memref<2x4096xbf16, #tpu.memory_space<vmem>>, vector<2x4096xbf16>
    %c0_1 = arith.constant 0 : index
    %c0_2 = arith.constant 0 : index
    %1 = vector.load %arg1[%c0_1, %c0_2] : memref<4096x256xbf16, #tpu.memory_space<vmem>>, vector<4096x256xbf16>
    %cst = arith.constant dense<0.000000e+00> : vector<2x256xf32>
    %2 = tpu.matmul %0, %1, %cst {dimension_numbers = #tpu.dot_dimension_numbers<[1], [0], [0], [1], [0, 0, 1, 1], [], []>} : vector<2x4096xbf16>, vector<4096x256xbf16>, vector<2x256xf32> -> vector<2x256xf32>
    %c0_3 = arith.constant 0 : index
    %c0_4 = arith.constant 0 : index
    %3 = vector.load %arg2[%c0_3, %c0_4] : memref<1x256xf32, #tpu.memory_space<vmem>>, vector<1x256xf32>
    %4 = vector.broadcast %3 : vector<1x256xf32> to vector<2x256xf32>
    %5 = arith.addf %2, %4 : vector<2x256xf32>
    %cst_5 = arith.constant 0.000000e+00 : f32
    %6 = vector.broadcast %cst_5 : f32 to vector<2x256xf32>
    %7 = arith.maximumf %5, %6 : vector<2x256xf32>
    %c0_6 = arith.constant 0 : index
    %c0_7 = arith.constant 0 : index
    %8 = vector.load %arg3[%c0_6, %c0_7] : memref<1x256xf32, #tpu.memory_space<vmem>>, vector<1x256xf32>
    %9 = vector.broadcast %8 : vector<1x256xf32> to vector<2x256xf32>
    %10 = arith.mulf %7, %9 : vector<2x256xf32>
    %c0_8 = arith.constant 0 : index
    %c0_9 = arith.constant 0 : index
    %11 = vector.load %arg4[%c0_8, %c0_9] : memref<1x256xf32, #tpu.memory_space<vmem>>, vector<1x256xf32>
    %12 = vector.broadcast %11 : vector<1x256xf32> to vector<2x256xf32>
    %13 = arith.addf %10, %12 : vector<2x256xf32>
    %14 = arith.truncf %13 : vector<2x256xf32> to vector<2x256xbf16>
    %c0_10 = arith.constant 0 : index
    %c0_11 = arith.constant 0 : index
    %15 = vector.load %arg5[%c0_10, %c0_11] : memref<256x256xbf16, #tpu.memory_space<vmem>>, vector<256x256xbf16>
    %cst_12 = arith.constant dense<0.000000e+00> : vector<2x256xf32>
    %16 = tpu.matmul %14, %15, %cst_12 {dimension_numbers = #tpu.dot_dimension_numbers<[1], [0], [0], [1], [0, 0, 1, 1], [], []>} : vector<2x256xbf16>, vector<256x256xbf16>, vector<2x256xf32> -> vector<2x256xf32>
    %c0_13 = arith.constant 0 : index
    %c0_14 = arith.constant 0 : index
    %17 = vector.load %arg6[%c0_13, %c0_14] : memref<1x256xf32, #tpu.memory_space<vmem>>, vector<1x256xf32>
    %18 = vector.broadcast %17 : vector<1x256xf32> to vector<2x256xf32>
    %19 = arith.addf %16, %18 : vector<2x256xf32>
    %cst_15 = arith.constant 0.000000e+00 : f32
    %20 = vector.broadcast %cst_15 : f32 to vector<2x256xf32>
    %21 = arith.subf %20, %19 : vector<2x256xf32>
    %22 = math.exp %21 : vector<2x256xf32>
    %cst_16 = arith.constant 1.000000e+00 : f32
    %23 = vector.broadcast %cst_16 : f32 to vector<2x256xf32>
    %24 = arith.addf %23, %22 : vector<2x256xf32>
    %cst_17 = arith.constant 1.000000e+00 : f32
    %25 = vector.broadcast %cst_17 : f32 to vector<2x256xf32>
    %26 = arith.divf %25, %24 : vector<2x256xf32>
    %c0_18 = arith.constant 0 : index
    %c0_19 = arith.constant 0 : index
    %27 = vector.load %arg7[%c0_18, %c0_19] : memref<2x256xf32, #tpu.memory_space<vmem>>, vector<2x256xf32>
    tpu.vector_store %arg7[%c0_18, %c0_19], %26 {strides = array<i32>} : memref<2x256xf32, #tpu.memory_space<vmem>>, vector<2x256xf32>,
    return
  }
}

module attributes {stable_mosaic.version = 11 : i64} {
  func.func @_conv_pool_kernel(%arg0: i32, %arg1: memref<128x288xbf16, #tpu.memory_space<vmem>>, %arg2: memref<128x288xbf16, #tpu.memory_space<vmem>>, %arg3: memref<128x288xbf16, #tpu.memory_space<vmem>>, %arg4: memref<128x288xbf16, #tpu.memory_space<vmem>>, %arg5: memref<288x64xbf16, #tpu.memory_space<vmem>>, %arg6: memref<1x64xf32, #tpu.memory_space<vmem>>, %arg7: memref<1x64xf32, #tpu.memory_space<vmem>>, %arg8: memref<1x64xf32, #tpu.memory_space<vmem>>, %arg9: memref<128x64xf32, #tpu.memory_space<vmem>>) attributes {dimension_semantics = [#tpu.dimension_semantics<parallel>], iteration_bounds = array<i64: 1>, scalar_prefetch = 0 : i64, scratch_operands = 0 : i64, tpu.core_type = #tpu.core_type<tc>, window_params = [{transform_indices = @transform_0, window_bounds = array<i64: 128, 288>}, {transform_indices = @transform_1, window_bounds = array<i64: 128, 288>}, {transform_indices = @transform_2, window_bounds = array<i64: 128, 288>}, {transform_indices = @transform_3, window_bounds = array<i64: 128, 288>}, {pipeline_mode = #tpu.pipeline_mode<synchronous>, transform_indices = @transform_4, window_bounds = array<i64: 288, 64>}, {pipeline_mode = #tpu.pipeline_mode<synchronous>, transform_indices = @transform_5, window_bounds = array<i64: 1, 64>}, {pipeline_mode = #tpu.pipeline_mode<synchronous>, transform_indices = @transform_6, window_bounds = array<i64: 1, 64>}, {pipeline_mode = #tpu.pipeline_mode<synchronous>, transform_indices = @transform_7, window_bounds = array<i64: 1, 64>}, {transform_indices = @transform_8, window_bounds = array<i64: 128, 64>}]} {
    %c0 = arith.constant 0 : index
    %c0_0 = arith.constant 0 : index
    %0 = vector.load %arg5[%c0, %c0_0] : memref<288x64xbf16, #tpu.memory_space<vmem>>, vector<288x64xbf16>
    %c0_1 = arith.constant 0 : index
    %c0_2 = arith.constant 0 : index
    %1 = vector.load %arg6[%c0_1, %c0_2] : memref<1x64xf32, #tpu.memory_space<vmem>>, vector<1x64xf32>
    %c0_3 = arith.constant 0 : index
    %c0_4 = arith.constant 0 : index
    %2 = vector.load %arg7[%c0_3, %c0_4] : memref<1x64xf32, #tpu.memory_space<vmem>>, vector<1x64xf32>
    %c0_5 = arith.constant 0 : index
    %c0_6 = arith.constant 0 : index
    %3 = vector.load %arg8[%c0_5, %c0_6] : memref<1x64xf32, #tpu.memory_space<vmem>>, vector<1x64xf32>
    %c0_7 = arith.constant 0 : index
    %c0_8 = arith.constant 0 : index
    %4 = vector.load %arg1[%c0_7, %c0_8] : memref<128x288xbf16, #tpu.memory_space<vmem>>, vector<128x288xbf16>
    %cst = arith.constant dense<0.000000e+00> : vector<128x64xf32>
    %5 = tpu.matmul %4, %0, %cst {dimension_numbers = #tpu.dot_dimension_numbers<[1], [0], [0], [1], [0, 0, 1, 1], [], []>} : vector<128x288xbf16>, vector<288x64xbf16>, vector<128x64xf32> -> vector<128x64xf32>
    %6 = vector.broadcast %1 : vector<1x64xf32> to vector<128x64xf32>
    %7 = arith.addf %5, %6 : vector<128x64xf32>
    %cst_9 = arith.constant 0.000000e+00 : f32
    %8 = vector.broadcast %cst_9 : f32 to vector<128x64xf32>
    %9 = arith.maximumf %7, %8 : vector<128x64xf32>
    %10 = vector.broadcast %2 : vector<1x64xf32> to vector<128x64xf32>
    %11 = arith.mulf %9, %10 : vector<128x64xf32>
    %12 = vector.broadcast %3 : vector<1x64xf32> to vector<128x64xf32>
    %13 = arith.addf %11, %12 : vector<128x64xf32>
    %c0_10 = arith.constant 0 : index
    %c0_11 = arith.constant 0 : index
    %14 = vector.load %arg2[%c0_10, %c0_11] : memref<128x288xbf16, #tpu.memory_space<vmem>>, vector<128x288xbf16>
    %cst_12 = arith.constant dense<0.000000e+00> : vector<128x64xf32>
    %15 = tpu.matmul %14, %0, %cst_12 {dimension_numbers = #tpu.dot_dimension_numbers<[1], [0], [0], [1], [0, 0, 1, 1], [], []>} : vector<128x288xbf16>, vector<288x64xbf16>, vector<128x64xf32> -> vector<128x64xf32>
    %16 = vector.broadcast %1 : vector<1x64xf32> to vector<128x64xf32>
    %17 = arith.addf %15, %16 : vector<128x64xf32>
    %cst_13 = arith.constant 0.000000e+00 : f32
    %18 = vector.broadcast %cst_13 : f32 to vector<128x64xf32>
    %19 = arith.maximumf %17, %18 : vector<128x64xf32>
    %20 = vector.broadcast %2 : vector<1x64xf32> to vector<128x64xf32>
    %21 = arith.mulf %19, %20 : vector<128x64xf32>
    %22 = vector.broadcast %3 : vector<1x64xf32> to vector<128x64xf32>
    %23 = arith.addf %21, %22 : vector<128x64xf32>
    %24 = arith.maximumf %13, %23 : vector<128x64xf32>
    %c0_14 = arith.constant 0 : index
    %c0_15 = arith.constant 0 : index
    %25 = vector.load %arg3[%c0_14, %c0_15] : memref<128x288xbf16, #tpu.memory_space<vmem>>, vector<128x288xbf16>
    %cst_16 = arith.constant dense<0.000000e+00> : vector<128x64xf32>
    %26 = tpu.matmul %25, %0, %cst_16 {dimension_numbers = #tpu.dot_dimension_numbers<[1], [0], [0], [1], [0, 0, 1, 1], [], []>} : vector<128x288xbf16>, vector<288x64xbf16>, vector<128x64xf32> -> vector<128x64xf32>
    %27 = vector.broadcast %1 : vector<1x64xf32> to vector<128x64xf32>
    %28 = arith.addf %26, %27 : vector<128x64xf32>
    %cst_17 = arith.constant 0.000000e+00 : f32
    %29 = vector.broadcast %cst_17 : f32 to vector<128x64xf32>
    %30 = arith.maximumf %28, %29 : vector<128x64xf32>
    %31 = vector.broadcast %2 : vector<1x64xf32> to vector<128x64xf32>
    %32 = arith.mulf %30, %31 : vector<128x64xf32>
    %33 = vector.broadcast %3 : vector<1x64xf32> to vector<128x64xf32>
    %34 = arith.addf %32, %33 : vector<128x64xf32>
    %c0_18 = arith.constant 0 : index
    %c0_19 = arith.constant 0 : index
    %35 = vector.load %arg4[%c0_18, %c0_19] : memref<128x288xbf16, #tpu.memory_space<vmem>>, vector<128x288xbf16>
    %cst_20 = arith.constant dense<0.000000e+00> : vector<128x64xf32>
    %36 = tpu.matmul %35, %0, %cst_20 {dimension_numbers = #tpu.dot_dimension_numbers<[1], [0], [0], [1], [0, 0, 1, 1], [], []>} : vector<128x288xbf16>, vector<288x64xbf16>, vector<128x64xf32> -> vector<128x64xf32>
    %37 = vector.broadcast %1 : vector<1x64xf32> to vector<128x64xf32>
    %38 = arith.addf %36, %37 : vector<128x64xf32>
    %cst_21 = arith.constant 0.000000e+00 : f32
    %39 = vector.broadcast %cst_21 : f32 to vector<128x64xf32>
    %40 = arith.maximumf %38, %39 : vector<128x64xf32>
    %41 = vector.broadcast %2 : vector<1x64xf32> to vector<128x64xf32>
    %42 = arith.mulf %40, %41 : vector<128x64xf32>
    %43 = vector.broadcast %3 : vector<1x64xf32> to vector<128x64xf32>
    %44 = arith.addf %42, %43 : vector<128x64xf32>
    %45 = arith.maximumf %34, %44 : vector<128x64xf32>
    %46 = arith.maximumf %24, %45 : vector<128x64xf32>
    %c0_22 = arith.constant 0 : index
    %c0_23 = arith.constant 0 : index
    %47 = vector.load %arg9[%c0_22, %c0_23] : memref<128x64xf32, #tpu.memory_space<vmem>>, vector<128x64xf32>
    tpu.vector_store %arg9[%c0_22, %c0_23], %46 {strides = array<i32>} : memref<128x64xf32, #tpu.memory_space<vmem>>, vector<128x64xf32>,
    return
  }
  func.func @transform_0(%arg0: i32) -> (i32, i32) {
    %c0_i32 = arith.constant 0 : i32
    %c0_i32_0 = arith.constant 0 : i32
    return %arg0, %c0_i32 : i32, i32
  }
  func.func @transform_1(%arg0: i32) -> (i32, i32) {
    %c0_i32 = arith.constant 0 : i32
    %c0_i32_0 = arith.constant 0 : i32
    return %arg0, %c0_i32 : i32, i32
  }
  func.func @transform_2(%arg0: i32) -> (i32, i32) {
    %c0_i32 = arith.constant 0 : i32
    %c0_i32_0 = arith.constant 0 : i32
    return %arg0, %c0_i32 : i32, i32
  }
  func.func @transform_3(%arg0: i32) -> (i32, i32) {
    %c0_i32 = arith.constant 0 : i32
    %c0_i32_0 = arith.constant 0 : i32
    return %arg0, %c0_i32 : i32, i32
  }
  func.func @transform_4(%arg0: i32) -> (i32, i32) {
    %c0_i32 = arith.constant 0 : i32
    %c0_i32_0 = arith.constant 0 : i32
    %c0_i32_1 = arith.constant 0 : i32
    return %c0_i32, %c0_i32_0 : i32, i32
  }
  func.func @transform_5(%arg0: i32) -> (i32, i32) {
    %c0_i32 = arith.constant 0 : i32
    %c0_i32_0 = arith.constant 0 : i32
    %c0_i32_1 = arith.constant 0 : i32
    return %c0_i32, %c0_i32_0 : i32, i32
  }
  func.func @transform_6(%arg0: i32) -> (i32, i32) {
    %c0_i32 = arith.constant 0 : i32
    %c0_i32_0 = arith.constant 0 : i32
    %c0_i32_1 = arith.constant 0 : i32
    return %c0_i32, %c0_i32_0 : i32, i32
  }
  func.func @transform_7(%arg0: i32) -> (i32, i32) {
    %c0_i32 = arith.constant 0 : i32
    %c0_i32_0 = arith.constant 0 : i32
    %c0_i32_1 = arith.constant 0 : i32
    return %c0_i32, %c0_i32_0 : i32, i32
  }
  func.func @transform_8(%arg0: i32) -> (i32, i32) {
    %c0_i32 = arith.constant 0 : i32
    %c0_i32_0 = arith.constant 0 : i32
    return %arg0, %c0_i32 : i32, i32
  }
}

</mosaic_0001>

<bundles_post_ra>
// kernel: cnn_forward.3
= control target key start
LH: loop header
LB: loop body
LE: loop exit
PB: predicated region body
PF: predicated region fallthrough
CT: control target
= control target key end

     0   :  { %vm375_vm0 = vcmask 1044480   ;;  %vm376_vm1 = vcmask 1045504   ;;  %vm278_vm2 = vcmask 220160   ;;  %v4347_v1 = vmov 65535   ;;  %s7038_s4 = inlined_call_operand.vmem [shape: bf16[27,32], index: 4, kind: input, shape index: {}]   ;;  %s7039_s0 = inlined_call_operand.vmem [shape: bf16[512,27], index: 0, kind: input, shape index: {}]   ;;  %s7040_s1 = inlined_call_operand.vmem [shape: bf16[512,27], index: 1, kind: input, shape index: {}]   ;;  %s7041_s2 = inlined_call_operand.vmem [shape: bf16[512,27], index: 2, kind: input, shape index: {}]   ;;  %s7042_s3 = inlined_call_operand.vmem [shape: bf16[512,27], index: 3, kind: input, shape index: {}]   ;;  %s7043_s5 = inlined_call_operand.vmem [shape: f32[1,32], index: 5, kind: input, shape index: {}]   ;;  %s7044_s6 = inlined_call_operand.vmem [shape: f32[1,32], index: 6, kind: input, shape index: {}]   ;;  %s7045_s7 = inlined_call_operand.vmem [shape: f32[1,32], index: 7, kind: input, shape index: {}]   ;;  %s7046_s8 = inlined_call_operand.vmem [shape: f32[512,32], index: 8, kind: output, shape index: {}]  }
   0x1   :  { %v4209_v0 = vld [vmem:[%s7038_s4] sm:$0xff]   ;;  %v377_v2 = vsel %vm375_vm0, 4294967295, %v4347_v1  ;;  %v4210_v3 = vld [vmem:[%s7038_s4 + $0x8] sm:$0x3f]   ;;  %v4215_v10 = vld [vmem:[%s7039_s0 + $0x10] sm:$0xff]   ;;  %vm3470_vm3 = vcmask 261120  }
   0x2   :  { %3936 = vmatprep.subr.bf16.mxu0 %v4209_v0  ;;  %4004 = vmatprep.subr.bf16.mxu1 %v4209_v0  ;;  %v378_v4 = vsel %vm376_vm1, %v377_v2, 0  ;;  %v4211_v5 = vld [vmem:[%s7039_s0] sm:$0xff]   ;;  %v4213_v8 = vld [vmem:[%s7039_s0 + $0x8] sm:$0xff]   ;;  %v4216_v11 = vld [vmem:[%s7040_s1 + $0x10] sm:$0xff]  }
   0x3   :  { %3937 = vmatpush3.bf16.msra.mxu0 %v4209_v0  ;;  %4005 = vmatpush3.bf16.msra.mxu1 %v4209_v0  ;;  %v380_v6 = vand.u32 %v4210_v3, %v378_v4  ;;  %v4212_v7 = vld [vmem:[%s7040_s1] sm:$0xff]   ;;  %v4214_v9 = vld [vmem:[%s7040_s1 + $0x8] sm:$0xff]   ;;  %v4217_v12 = vld [vmem:[%s7039_s0 + $0x18] sm:$0xff]  }
   0x4   :  { %3940 = vmatprep.mubr.msk.bf16.mxu0 %vm278_vm2, %v4211_v5  ;;  %4008 = vmatprep.mubr.msk.bf16.mxu1 %vm278_vm2, %v4212_v7  ;;  %v4218_v13 = vld [vmem:[%s7040_s1 + $0x18] sm:$0xff]   ;;  %v4219_v14 = vld [vmem:[%s7039_s0 + $0x20] sm:$0xff]   ;;  %v4221_v16 = vld [vmem:[%s7039_s0 + $0x28] sm:$0xff]  }
   0x5   :  { %3938 = vmatprep.subr.bf16.mxu0 %v380_v6  ;;  %4006 = vmatprep.subr.bf16.mxu1 %v380_v6  ;;  %v4220_v15 = vld [vmem:[%s7040_s1 + $0x20] sm:$0xff]   ;;  %v4222_v17 = vld [vmem:[%s7040_s1 + $0x28] sm:$0xff]   ;;  %v4223_v18 = vld [vmem:[%s7039_s0 + $0x30] sm:$0xff]  }
   0x6   :  { %v4224_v19 = vld [vmem:[%s7040_s1 + $0x30] sm:$0xff]   ;;  %v4225_v20 = vld [vmem:[%s7039_s0 + $0x38] sm:$0xff]   ;;  %v4227_v22 = vld [vmem:[%s7039_s0 + $0x40] sm:$0xff]  }
   0x7   :  { %3939 = vmatpush3.bf16.msra.mxu0 %v380_v6  ;;  %4007 = vmatpush3.bf16.msra.mxu1 %v380_v6  ;;  %v4226_v21 = vld [vmem:[%s7040_s1 + $0x38] sm:$0xff]   ;;  %v4228_v23 = vld [vmem:[%s7040_s1 + $0x40] sm:$0xff]   ;;  %v4229_v24 = vld [vmem:[%s7039_s0 + $0x48] sm:$0xff]  }
   0x8   :  { %4072 = vmatprep.subr.bf16.mxu0 %v4209_v0  ;;  %4140 = vmatprep.subr.bf16.mxu1 %v4209_v0  ;;  %v4230_v25 = vld [vmem:[%s7040_s1 + $0x48] sm:$0xff]   ;;  %v4231_v26 = vld [vmem:[%s7039_s0 + $0x50] sm:$0xff]   ;;  %v4233_v28 = vld [vmem:[%s7039_s0 + $0x58] sm:$0xff]  }
   0x9   :  { %v4232_v27 = vld [vmem:[%s7040_s1 + $0x50] sm:$0xff]   ;;  %v4234_v29 = vld [vmem:[%s7040_s1 + $0x58] sm:$0xff]   ;;  %v4235_v30 = vld [vmem:[%s7039_s0 + $0x60] sm:$0xff]  }
   0xa   :  { %3941 = vmatmul.mubr.msk.bf16.vlgmr.msra.gmra.mrb[0].mxu0 %vm278_vm2, %v4213_v8  ;;  %4009 = vmatmul.mubr.msk.bf16.vlgmr.msra.gmra.mrb[0].mxu1 %vm278_vm2, %v4214_v9  ;;  %v4236_v31 = vld [vmem:[%s7040_s1 + $0x60] sm:$0xff]   ;;  %v4237_v32 = vld [vmem:[%s7039_s0 + $0x68] sm:$0xff]   ;;  %v4239_v34 = vld [vmem:[%s7039_s0 + $0x70] sm:$0xff]  }
   0xb   :  { %4073 = vmatpush3.bf16.msra.mxu0 %v4209_v0  ;;  %4141 = vmatpush3.bf16.msra.mxu1 %v4209_v0  ;;  %v4238_v33 = vld [vmem:[%s7040_s1 + $0x68] sm:$0xff]   ;;  %v4240_v35 = vld [vmem:[%s7040_s1 + $0x70] sm:$0xff]   ;;  %v4241_v36 = vld [vmem:[%s7039_s0 + $0x78] sm:$0xff]  }
   0xc   :  { %3944 = vmatprep.mubr.msk.bf16.mxu0 %vm278_vm2, %v4215_v10  ;;  %4012 = vmatprep.mubr.msk.bf16.mxu1 %vm278_vm2, %v4216_v11  ;;  %v4242_v37 = vld [vmem:[%s7040_s1 + $0x78] sm:$0xff]   ;;  %v4243_v38 = vld [vmem:[%s7039_s0 + $0x80] sm:$0xff]   ;;  %v4245_v40 = vld [vmem:[%s7039_s0 + $0x88] sm:$0xff]  }
   0xd   :  { %4074 = vmatprep.subr.bf16.mxu0 %v380_v6  ;;  %4142 = vmatprep.subr.bf16.mxu1 %v380_v6  ;;  %v4244_v39 = vld [vmem:[%s7040_s1 + $0x80] sm:$0xff]   ;;  %v4246_v41 = vld [vmem:[%s7040_s1 + $0x88] sm:$0xff]   ;;  %v4247_v42 = vld [vmem:[%s7039_s0 + $0x90] sm:$0xff]  }
   0xe   :  { %v4248_v43 = vld [vmem:[%s7040_s1 + $0x90] sm:$0xff]   ;;  %v4249_v44 = vld [vmem:[%s7039_s0 + $0x98] sm:$0xff]   ;;  %v4251_v46 = vld [vmem:[%s7039_s0 + $0xa0] sm:$0xff]  }
   0xf   :  { %4075 = vmatpush3.bf16.msra.mxu0 %v380_v6  ;;  %4143 = vmatpush3.bf16.msra.mxu1 %v380_v6  ;;  %v4250_v45 = vld [vmem:[%s7040_s1 + $0x98] sm:$0xff]   ;;  %v4252_v47 = vld [vmem:[%s7040_s1 + $0xa0] sm:$0xff]   ;;  %v4253_v48 = vld [vmem:[%s7039_s0 + $0xa8] sm:$0xff]  }
  0x10   :  { %v4254_v49 = vld [vmem:[%s7040_s1 + $0xa8] sm:$0xff]   ;;  %v4255_v50 = vld [vmem:[%s7039_s0 + $0xb0] sm:$0xff]   ;;  %v4257_v52 = vld [vmem:[%s7039_s0 + $0xb8] sm:$0xff]  }
  0x11   :  { %v4256_v51 = vld [vmem:[%s7040_s1 + $0xb0] sm:$0xff]   ;;  %v4258_v53 = vld [vmem:[%s7040_s1 + $0xb8] sm:$0xff]   ;;  %v4259_v54 = vld [vmem:[%s7039_s0 + $0xc0] sm:$0xff]  }
  0x12   :  { %3945 = vmatmul.mubr.msk.bf16.gmra.mrb[4].mxu0 %vm278_vm2, %v4217_v12  ;;  %4013 = vmatmul.mubr.msk.bf16.gmra.mrb[4].mxu1 %vm278_vm2, %v4218_v13  ;;  %v4260_v55 = vld [vmem:[%s7040_s1 + $0xc0] sm:$0xff]   ;;  %v4261_v56 = vld [vmem:[%s7039_s0 + $0xc8] sm:$0xff]   ;;  %v4263_v58 = vld [vmem:[%s7039_s0 + $0xd0] sm:$0xff]  }
  0x13   :  { %3948 = vmatprep.mubr.msk.bf16.mxu0 %vm278_vm2, %v4219_v14  ;;  %4016 = vmatprep.mubr.msk.bf16.mxu1 %vm278_vm2, %v4220_v15  ;;  %v4262_v57 = vld [vmem:[%s7040_s1 + $0xc8] sm:$0xff]   ;;  %v4264_v59 = vld [vmem:[%s7040_s1 + $0xd0] sm:$0xff]   ;;  %v4265_v60 = vld [vmem:[%s7039_s0 + $0xd8] sm:$0xff]  }
  0x14   :  { %v4266_v61 = vld [vmem:[%s7040_s1 + $0xd8] sm:$0xff]   ;;  %v4267_v62 = vld [vmem:[%s7039_s0 + $0xe0] sm:$0xff]   ;;  %v4269_v0 = vld [vmem:[%s7039_s0 + $0xe8] sm:$0xff]  }
  0x15   :  { %v4268_v63 = vld [vmem:[%s7040_s1 + $0xe0] sm:$0xff]   ;;  %v4270_v1 = vld [vmem:[%s7040_s1 + $0xe8] sm:$0xff]   ;;  %v4271_v2 = vld [vmem:[%s7039_s0 + $0xf0] sm:$0xff]  }
  0x16   :  { %v4272_v3 = vld [vmem:[%s7040_s1 + $0xf0] sm:$0xff]   ;;  %v4273_v4 = vld [vmem:[%s7039_s0 + $0xf8] sm:$0xff]   ;;  %v4275_v6 = vld [vmem:[%s7041_s2] sm:$0xff]  }
  0x17   :  { %v4274_v5 = vld [vmem:[%s7040_s1 + $0xf8] sm:$0xff]   ;;  %v4276_v7 = vld [vmem:[%s7042_s3] sm:$0xff]   ;;  %v4277_v8 = vld [vmem:[%s7041_s2 + $0x8] sm:$0xff]  }
  0x18   :  { %v4278_v9 = vld [vmem:[%s7042_s3 + $0x8] sm:$0xff]   ;;  %v4279_v10 = vld [vmem:[%s7041_s2 + $0x10] sm:$0xff]   ;;  %v4281_v12 = vld [vmem:[%s7041_s2 + $0x18] sm:$0xff]  }
  0x19   :  { %v4280_v11 = vld [vmem:[%s7042_s3 + $0x10] sm:$0xff]   ;;  %v4282_v13 = vld [vmem:[%s7042_s3 + $0x18] sm:$0xff]   ;;  %v4283_v14 = vld [vmem:[%s7041_s2 + $0x20] sm:$0xff]  }
  0x1a   :  { %3949 = vmatmul.mubr.msk.bf16.gmra.mrb[8].mxu0 %vm278_vm2, %v4221_v16  ;;  %4017 = vmatmul.mubr.msk.bf16.gmra.mrb[8].mxu1 %vm278_vm2, %v4222_v17  ;;  %v4284_v15 = vld [vmem:[%s7042_s3 + $0x20] sm:$0xff]   ;;  %v4285_v16 = vld [vmem:[%s7041_s2 + $0x28] sm:$0xff]  }
  0x1b   :  { %3952 = vmatprep.mubr.msk.bf16.mxu0 %vm278_vm2, %v4223_v18  ;;  %4020 = vmatprep.mubr.msk.bf16.mxu1 %vm278_vm2, %v4224_v19  ;;  %v4286_v17 = vld [vmem:[%s7042_s3 + $0x28] sm:$0xff]   ;;  %v4287_v18 = vld [vmem:[%s7041_s2 + $0x30] sm:$0xff]  }
  0x1c   :  { %v4288_v19 = vld [vmem:[%s7042_s3 + $0x30] sm:$0xff]  }
  0x22   :  { %3953 = vmatmul.mubr.msk.bf16.gmra.mrb[12].mxu0 %vm278_vm2, %v4225_v20  ;;  %4021 = vmatmul.mubr.msk.bf16.gmra.mrb[12].mxu1 %vm278_vm2, %v4226_v21  ;;  %v4289_v20 = vld [vmem:[%s7041_s2 + $0x38] sm:$0xff]  }
  0x23   :  { %3956 = vmatprep.mubr.msk.bf16.mxu0 %vm278_vm2, %v4227_v22  ;;  %4024 = vmatprep.mubr.msk.bf16.mxu1 %vm278_vm2, %v4228_v23  ;;  %v4290_v21 = vld [vmem:[%s7042_s3 + $0x38] sm:$0xff]   ;;  %v4291_v22 = vld [vmem:[%s7041_s2 + $0x40] sm:$0xff]  }
  0x24   :  { %v4292_v23 = vld [vmem:[%s7042_s3 + $0x40] sm:$0xff]  }
  0x2a   :  { %3957 = vmatmul.mubr.msk.bf16.gmra.mrb[16].mxu0 %vm278_vm2, %v4229_v24  ;;  %4025 = vmatmul.mubr.msk.bf16.gmra.mrb[16].mxu1 %vm278_vm2, %v4230_v25  ;;  %v4293_v24 = vld [vmem:[%s7041_s2 + $0x48] sm:$0xff]  }
  0x2b   :  { %3960 = vmatprep.mubr.msk.bf16.mxu0 %vm278_vm2, %v4231_v26  ;;  %4028 = vmatprep.mubr.msk.bf16.mxu1 %vm278_vm2, %v4232_v27  ;;  %v4294_v25 = vld [vmem:[%s7042_s3 + $0x48] sm:$0xff]   ;;  %v4295_v26 = vld [vmem:[%s7041_s2 + $0x50] sm:$0xff]  }
  0x2c   :  { %v4296_v27 = vld [vmem:[%s7042_s3 + $0x50] sm:$0xff]  }
  0x32   :  { %3961 = vmatmul.mubr.msk.bf16.gmra.mrb[20].mxu0 %vm278_vm2, %v4233_v28  ;;  %4029 = vmatmul.mubr.msk.bf16.gmra.mrb[20].mxu1 %vm278_vm2, %v4234_v29  ;;  %v4297_v28 = vld [vmem:[%s7041_s2 + $0x58] sm:$0xff]  }
  0x33   :  { %3964 = vmatprep.mubr.msk.bf16.mxu0 %vm278_vm2, %v4235_v30  ;;  %4032 = vmatprep.mubr.msk.bf16.mxu1 %vm278_vm2, %v4236_v31  ;;  %v4298_v29 = vld [vmem:[%s7042_s3 + $0x58] sm:$0xff]   ;;  %v4299_v30 = vld [vmem:[%s7041_s2 + $0x60] sm:$0xff]  }
  0x34   :  { %v4300_v31 = vld [vmem:[%s7042_s3 + $0x60] sm:$0xff]  }
  0x3a   :  { %3965 = vmatmul.mubr.msk.bf16.gmra.mrb[24].mxu0 %vm278_vm2, %v4237_v32  ;;  %4033 = vmatmul.mubr.msk.bf16.gmra.mrb[24].mxu1 %vm278_vm2, %v4238_v33  ;;  %v4301_v32 = vld [vmem:[%s7041_s2 + $0x68] sm:$0xff]  }
  0x3b   :  { %3968 = vmatprep.mubr.msk.bf16.mxu0 %vm278_vm2, %v4239_v34  ;;  %4036 = vmatprep.mubr.msk.bf16.mxu1 %vm278_vm2, %v4240_v35  ;;  %v4302_v33 = vld [vmem:[%s7042_s3 + $0x68] sm:$0xff]   ;;  %v4303_v34 = vld [vmem:[%s7041_s2 + $0x70] sm:$0xff]  }
  0x3c   :  { %v4304_v35 = vld [vmem:[%s7042_s3 + $0x70] sm:$0xff]  }
  0x42   :  { %3969 = vmatmul.mubr.msk.bf16.gmra.mrb[28].mxu0 %vm278_vm2, %v4241_v36  ;;  %4037 = vmatmul.mubr.msk.bf16.gmra.mrb[28].mxu1 %vm278_vm2, %v4242_v37  ;;  %v4305_v36 = vld [vmem:[%s7041_s2 + $0x78] sm:$0xff]  }
  0x43   :  { %3972 = vmatprep.mubr.msk.bf16.mxu0 %vm278_vm2, %v4243_v38  ;;  %4040 = vmatprep.mubr.msk.bf16.mxu1 %vm278_vm2, %v4244_v39  ;;  %v4306_v37 = vld [vmem:[%s7042_s3 + $0x78] sm:$0xff]   ;;  %v4307_v38 = vld [vmem:[%s7041_s2 + $0x80] sm:$0xff]  }
  0x44   :  { %v4308_v39 = vld [vmem:[%s7042_s3 + $0x80] sm:$0xff]  }
  0x4a   :  { %3973 = vmatmul.mubr.msk.bf16.gmra.mrb[32].mxu0 %vm278_vm2, %v4245_v40  ;;  %4041 = vmatmul.mubr.msk.bf16.gmra.mrb[32].mxu1 %vm278_vm2, %v4246_v41  ;;  %v4309_v40 = vld [vmem:[%s7041_s2 + $0x88] sm:$0xff]  }
  0x4b   :  { %3976 = vmatprep.mubr.msk.bf16.mxu0 %vm278_vm2, %v4247_v42  ;;  %4044 = vmatprep.mubr.msk.bf16.mxu1 %vm278_vm2, %v4248_v43  ;;  %v4310_v41 = vld [vmem:[%s7042_s3 + $0x88] sm:$0xff]   ;;  %v4311_v42 = vld [vmem:[%s7041_s2 + $0x90] sm:$0xff]  }
  0x4c   :  { %v4312_v43 = vld [vmem:[%s7042_s3 + $0x90] sm:$0xff]  }
  0x52   :  { %3977 = vmatmul.mubr.msk.bf16.gmra.mrb[36].mxu0 %vm278_vm2, %v4249_v44  ;;  %4045 = vmatmul.mubr.msk.bf16.gmra.mrb[36].mxu1 %vm278_vm2, %v4250_v45  ;;  %v4313_v44 = vld [vmem:[%s7041_s2 + $0x98] sm:$0xff]  }
  0x53   :  { %3980 = vmatprep.mubr.msk.bf16.mxu0 %vm278_vm2, %v4251_v46  ;;  %4048 = vmatprep.mubr.msk.bf16.mxu1 %vm278_vm2, %v4252_v47  ;;  %v4314_v45 = vld [vmem:[%s7042_s3 + $0x98] sm:$0xff]   ;;  %v4315_v46 = vld [vmem:[%s7041_s2 + $0xa0] sm:$0xff]  }
  0x54   :  { %v4316_v47 = vld [vmem:[%s7042_s3 + $0xa0] sm:$0xff]  }
  0x5a   :  { %3981 = vmatmul.mubr.msk.bf16.gmra.mrb[40].mxu0 %vm278_vm2, %v4253_v48  ;;  %4049 = vmatmul.mubr.msk.bf16.gmra.mrb[40].mxu1 %vm278_vm2, %v4254_v49  ;;  %v4317_v48 = vld [vmem:[%s7041_s2 + $0xa8] sm:$0xff]  }
  0x5b   :  { %3984 = vmatprep.mubr.msk.bf16.mxu0 %vm278_vm2, %v4255_v50  ;;  %4052 = vmatprep.mubr.msk.bf16.mxu1 %vm278_vm2, %v4256_v51  ;;  %v4318_v49 = vld [vmem:[%s7042_s3 + $0xa8] sm:$0xff]   ;;  %v4319_v50 = vld [vmem:[%s7041_s2 + $0xb0] sm:$0xff]  }
  0x5c   :  { %v4320_v51 = vld [vmem:[%s7042_s3 + $0xb0] sm:$0xff]  }
  0x62   :  { %3985 = vmatmul.mubr.msk.bf16.gmra.mrb[44].mxu0 %vm278_vm2, %v4257_v52  ;;  %4053 = vmatmul.mubr.msk.bf16.gmra.mrb[44].mxu1 %vm278_vm2, %v4258_v53  ;;  %v4840_v52 = vld [vmem:[%s7043_s5] ss:$0 sm:$0xff] }
  0x63   :  { %3988 = vmatprep.mubr.msk.bf16.mxu0 %vm278_vm2, %v4259_v54  ;;  %4056 = vmatprep.mubr.msk.bf16.mxu1 %vm278_vm2, %v4260_v55 }
  0x6a   :  { %3989 = vmatmul.mubr.msk.bf16.gmra.mrb[48].mxu0 %vm278_vm2, %v4261_v56  ;;  %4057 = vmatmul.mubr.msk.bf16.gmra.mrb[48].mxu1 %vm278_vm2, %v4262_v57 }
  0x6b   :  { %3992 = vmatprep.mubr.msk.bf16.mxu0 %vm278_vm2, %v4263_v58  ;;  %4060 = vmatprep.mubr.msk.bf16.mxu1 %vm278_vm2, %v4264_v59  ;;  %v4321_v59 = vld [vmem:[%s7041_s2 + $0xb8] sm:$0xff]  }
  0x72   :  { %3993 = vmatmul.mubr.msk.bf16.gmra.mrb[52].mxu0 %vm278_vm2, %v4265_v60  ;;  %4061 = vmatmul.mubr.msk.bf16.gmra.mrb[52].mxu1 %vm278_vm2, %v4266_v61  ;;  %v4322_v60 = vld [vmem:[%s7042_s3 + $0xb8] sm:$0xff]   ;;  %v4855_v61 = vld [vmem:[%s7044_s6] ss:$0 sm:$0xff] }
  0x73   :  { %3996 = vmatprep.mubr.msk.bf16.mxu0 %vm278_vm2, %v4267_v62  ;;  %4064 = vmatprep.mubr.msk.bf16.mxu1 %vm278_vm2, %v4268_v63 }
  0x7a   :  { %3997 = vmatmul.mubr.msk.bf16.gmra.mrb[56].mxu0 %vm278_vm2, %v4269_v0  ;;  %4065 = vmatmul.mubr.msk.bf16.gmra.mrb[56].mxu1 %vm278_vm2, %v4270_v1 }
  0x7b   :  { %4000 = vmatprep.mubr.msk.bf16.mxu0 %vm278_vm2, %v4271_v2  ;;  %4068 = vmatprep.mubr.msk.bf16.mxu1 %vm278_vm2, %v4272_v3  ;;  %v4323_v2 = vld [vmem:[%s7041_s2 + $0xc0] sm:$0xff]  }
  0x7c   :  { %v4324_v3 = vld [vmem:[%s7042_s3 + $0xc0] sm:$0xff]  }
  0x82   :  { %4001 = vmatmul.mubr.msk.bf16.gmra.mrb[60].mxu0 %vm278_vm2, %v4273_v4  ;;  %4069 = vmatmul.mubr.msk.bf16.gmra.mrb[60].mxu1 %vm278_vm2, %v4274_v5 }
  0x83   :  { %4076 = vmatprep.mubr.msk.bf16.mxu0 %vm278_vm2, %v4275_v6  ;;  %4144 = vmatprep.mubr.msk.bf16.mxu1 %vm278_vm2, %v4276_v7 }
  0x8a   :  { %4077 = vmatmul.mubr.msk.bf16.vlgmr.msra.gmra.mrb[64].mxu0 %vm278_vm2, %v4277_v8  ;;  %4145 = vmatmul.mubr.msk.bf16.vlgmr.msra.gmra.mrb[64].mxu1 %vm278_vm2, %v4278_v9 }
  0x8b   :  { %4080 = vmatprep.mubr.msk.bf16.mxu0 %vm278_vm2, %v4279_v10  ;;  %4148 = vmatprep.mubr.msk.bf16.mxu1 %vm278_vm2, %v4280_v11  ;;  %v4870_v10 = vld [vmem:[%s7045_s7] ss:$0 sm:$0xff] }
  0x92   :  { %4081 = vmatmul.mubr.msk.bf16.gmra.mrb[68].mxu0 %vm278_vm2, %v4281_v12  ;;  %4149 = vmatmul.mubr.msk.bf16.gmra.mrb[68].mxu1 %vm278_vm2, %v4282_v13 }
  0x93   :  { %4084 = vmatprep.mubr.msk.bf16.mxu0 %vm278_vm2, %v4283_v14  ;;  %4152 = vmatprep.mubr.msk.bf16.mxu1 %vm278_vm2, %v4284_v15 }
  0x9a   :  { %4085 = vmatmul.mubr.msk.bf16.gmra.mrb[72].mxu0 %vm278_vm2, %v4285_v16  ;;  %4153 = vmatmul.mubr.msk.bf16.gmra.mrb[72].mxu1 %vm278_vm2, %v4286_v17 }
  0x9b   :  { %4088 = vmatprep.mubr.msk.bf16.mxu0 %vm278_vm2, %v4287_v18  ;;  %4156 = vmatprep.mubr.msk.bf16.mxu1 %vm278_vm2, %v4288_v19 }
  0xa2   :  { %4089 = vmatmul.mubr.msk.bf16.gmra.mrb[76].mxu0 %vm278_vm2, %v4289_v20  ;;  %4157 = vmatmul.mubr.msk.bf16.gmra.mrb[76].mxu1 %vm278_vm2, %v4290_v21 }
  0xa3   :  { %4092 = vmatprep.mubr.msk.bf16.mxu0 %vm278_vm2, %v4291_v22  ;;  %4160 = vmatprep.mubr.msk.bf16.mxu1 %vm278_vm2, %v4292_v23 }
  0xaa   :  { %4093 = vmatmul.mubr.msk.bf16.gmra.mrb[80].mxu0 %vm278_vm2, %v4293_v24  ;;  %4161 = vmatmul.mubr.msk.bf16.gmra.mrb[80].mxu1 %vm278_vm2, %v4294_v25 }
  0xab   :  { %4096 = vmatprep.mubr.msk.bf16.mxu0 %vm278_vm2, %v4295_v26  ;;  %4164 = vmatprep.mubr.msk.bf16.mxu1 %vm278_vm2, %v4296_v27 }
  0xb2   :  { %4097 = vmatmul.mubr.msk.bf16.gmra.mrb[84].mxu0 %vm278_vm2, %v4297_v28  ;;  %4165 = vmatmul.mubr.msk.bf16.gmra.mrb[84].mxu1 %vm278_vm2, %v4298_v29 }
  0xb3   :  { %4100 = vmatprep.mubr.msk.bf16.mxu0 %vm278_vm2, %v4299_v30  ;;  %4168 = vmatprep.mubr.msk.bf16.mxu1 %vm278_vm2, %v4300_v31 }
  0xba   :  { %4101 = vmatmul.mubr.msk.bf16.gmra.mrb[88].mxu0 %vm278_vm2, %v4301_v32  ;;  %4169 = vmatmul.mubr.msk.bf16.gmra.mrb[88].mxu1 %vm278_vm2, %v4302_v33 }
  0xbb   :  { %4104 = vmatprep.mubr.msk.bf16.mxu0 %vm278_vm2, %v4303_v34  ;;  %4172 = vmatprep.mubr.msk.bf16.mxu1 %vm278_vm2, %v4304_v35 }
  0xc2   :  { %4105 = vmatmul.mubr.msk.bf16.gmra.mrb[92].mxu0 %vm278_vm2, %v4305_v36  ;;  %4173 = vmatmul.mubr.msk.bf16.gmra.mrb[92].mxu1 %vm278_vm2, %v4306_v37 }
  0xc3   :  { %4108 = vmatprep.mubr.msk.bf16.mxu0 %vm278_vm2, %v4307_v38  ;;  %4176 = vmatprep.mubr.msk.bf16.mxu1 %vm278_vm2, %v4308_v39  ;;  %v4325_v39 = vld [vmem:[%s7041_s2 + $0xc8] sm:$0xff]  }
  0xca   :  { %4109 = vmatmul.mubr.msk.bf16.gmra.mrb[96].mxu0 %vm278_vm2, %v4309_v40  ;;  %4177 = vmatmul.mubr.msk.bf16.gmra.mrb[96].mxu1 %vm278_vm2, %v4310_v41  ;;  %v4326_v40 = vld [vmem:[%s7042_s3 + $0xc8] sm:$0xff]  }
  0xcb   :  { %4112 = vmatprep.mubr.msk.bf16.mxu0 %vm278_vm2, %v4311_v42  ;;  %4180 = vmatprep.mubr.msk.bf16.mxu1 %vm278_vm2, %v4312_v43 }
  0xd2   :  { %4113 = vmatmul.mubr.msk.bf16.gmra.mrb[100].mxu0 %vm278_vm2, %v4313_v44  ;;  %4181 = vmatmul.mubr.msk.bf16.gmra.mrb[100].mxu1 %vm278_vm2, %v4314_v45 }
  0xd3   :  { %4116 = vmatprep.mubr.msk.bf16.mxu0 %vm278_vm2, %v4315_v46  ;;  %4184 = vmatprep.mubr.msk.bf16.mxu1 %vm278_vm2, %v4316_v47  ;;  %v4327_v47 = vld [vmem:[%s7041_s2 + $0xd0] sm:$0xff]  }
  0xda   :  { %4117 = vmatmul.mubr.msk.bf16.gmra.mrb[104].mxu0 %vm278_vm2, %v4317_v48  ;;  %4185 = vmatmul.mubr.msk.bf16.gmra.mrb[104].mxu1 %vm278_vm2, %v4318_v49  ;;  %v4328_v48 = vld [vmem:[%s7042_s3 + $0xd0] sm:$0xff]  }
  0xdb   :  { %4120 = vmatprep.mubr.msk.bf16.mxu0 %vm278_vm2, %v4319_v50  ;;  %4188 = vmatprep.mubr.msk.bf16.mxu1 %vm278_vm2, %v4320_v51 }
  0xdd   :  { %v3942_v53 = vpop.f32.mrb[0].mxu0  ;;  %v4010_v54 = vpop.f32.mrb[0].mxu1 }
  0xde   :  { %v425_v55 = vadd.f32 %v3942_v53, %v4840_v52  ;;  %v1238_v56 = vadd.f32 %v4010_v54, %v4840_v52  ;;  %v416_v57 = vpop.f32.mrb[1].mxu0  ;;  %v1229_v58 = vpop.f32.mrb[1].mxu1 }
  0xdf   :  { %v417_v62 = vadd.f32 %v4840_v52, %v416_v57  ;;  %v1230_v63 = vadd.f32 %v4840_v52, %v1229_v58  ;;  %v3943_v0 = vpop.f32.mrb[2].mxu0  ;;  %v4011_v1 = vpop.f32.mrb[2].mxu1 }
  0xe0   :  { %v673_v4 = vmax.f32 %v425_v55, 0.0  ;;  %v1486_v5 = vmax.f32 %v1238_v56, 0.0  ;;  %v428_v6 = vadd.f32 %v3943_v0, %v4840_v52  ;;  %v1241_v7 = vadd.f32 %v4011_v1, %v4840_v52  ;;  %v419_v8 = vpop.f32.mrb[3].mxu0  ;;  %v1232_v9 = vpop.f32.mrb[3].mxu1 }
  0xe1   :  { %v671_v11 = vmax.f32 %v417_v62, 0.0  ;;  %v1484_v12 = vmax.f32 %v1230_v63, 0.0  ;;  %v420_v13 = vadd.f32 %v4840_v52, %v419_v8  ;;  %v1233_v14 = vadd.f32 %v4840_v52, %v1232_v9 }
  0xe2   :  { %v743_v15 = vmul.f32 %v4855_v61, %v673_v4  ;;  %v1550_v16 = vmul.f32 %v4855_v61, %v1486_v5  ;;  %v674_v17 = vmax.f32 %v428_v6, 0.0  ;;  %v1487_v18 = vmax.f32 %v1241_v7, 0.0  ;;  %4121 = vmatmul.mubr.msk.bf16.gmra.mrb[108].mxu0 %vm278_vm2, %v4321_v59  ;;  %4189 = vmatmul.mubr.msk.bf16.gmra.mrb[108].mxu1 %vm278_vm2, %v4322_v60 }
  0xe3   :  { %v741_v19 = vmul.f32 %v4855_v61, %v671_v11  ;;  %v1548_v20 = vmul.f32 %v4855_v61, %v1484_v12  ;;  %v672_v21 = vmax.f32 %v420_v13, 0.0  ;;  %v1485_v22 = vmax.f32 %v1233_v14, 0.0  ;;  %4124 = vmatprep.mubr.msk.bf16.mxu0 %vm278_vm2, %v4323_v2  ;;  %4192 = vmatprep.mubr.msk.bf16.mxu1 %vm278_vm2, %v4324_v3 }
  0xe4   :  { %v4883_v23 = vadd.f32 %v4870_v10, %v743_v15  ;;  %v4886_v24 = vadd.f32 %v4870_v10, %v1550_v16  ;;  %v744_v25 = vmul.f32 %v4855_v61, %v674_v17  ;;  %v1551_v26 = vmul.f32 %v4855_v61, %v1487_v18 }
  0xe5   :  { %v4891_v27 = vadd.f32 %v4870_v10, %v741_v19  ;;  %v4894_v28 = vadd.f32 %v4870_v10, %v1548_v20  ;;  %v742_v29 = vmul.f32 %v4855_v61, %v672_v21  ;;  %v1549_v30 = vmul.f32 %v4855_v61, %v1485_v22  ;;  %v3946_v31 = vpop.f32.mrb[4].mxu0  ;;  %v4014_v32 = vpop.f32.mrb[4].mxu1  ;;  %v4329_v22 = vld [vmem:[%s7041_s2 + $0xd8] sm:$0xff]  }
  0xe6   :  { %v4901_v34 = vadd.f32 %v4870_v10, %v744_v25  ;;  %v4904_v35 = vadd.f32 %v4870_v10, %v1551_v26  ;;  %v441_v36 = vadd.f32 %v3946_v31, %v4840_v52  ;;  %v432_v37 = vpop.f32.mrb[5].mxu0  ;;  %v1245_v38 = vpop.f32.mrb[5].mxu1  ;;  %v1254_v44 = vadd.f32 %v4014_v32, %v4840_v52  ;;  %v4330_v25 = vld [vmem:[%s7042_s3 + $0xd8] sm:$0xff]  }
  0xe7   :  { %v4916_v42 = vadd.f32 %v4870_v10, %v742_v29  ;;  %v4919_v43 = vadd.f32 %v4870_v10, %v1549_v30  ;;  %v3947_v45 = vpop.f32.mrb[6].mxu0  ;;  %v4015_v46 = vpop.f32.mrb[6].mxu1  ;;  %v433_v51 = vadd.f32 %v4840_v52, %v432_v37  ;;  %v1246_v53 = vadd.f32 %v4840_v52, %v1245_v38  ;;  %v4331_v37 = vld [vmem:[%s7041_s2 + $0xe0] sm:$0xff]  }
  0xe8   :  { %v677_v50 = vmax.f32 %v441_v36, 0.0  ;;  %v435_v54 = vpop.f32.mrb[7].mxu0  ;;  %v1248_v55 = vpop.f32.mrb[7].mxu1  ;;  %v1490_v57 = vmax.f32 %v1254_v44, 0.0  ;;  %v444_v58 = vadd.f32 %v3947_v45, %v4840_v52  ;;  %v1257_v59 = vadd.f32 %v4015_v46, %v4840_v52  ;;  %v4332_v38 = vld [vmem:[%s7042_s3 + $0xe0] sm:$0xff]  }
  0xe9   :  { %v675_v62 = vmax.f32 %v433_v51, 0.0  ;;  %v1488_v63 = vmax.f32 %v1246_v53, 0.0  ;;  %v436_v0 = vadd.f32 %v4840_v52, %v435_v54  ;;  %v1249_v4 = vadd.f32 %v4840_v52, %v1248_v55 }
  0xea   :  { %v747_v60 = vmul.f32 %v4855_v61, %v677_v50  ;;  %4125 = vmatmul.mubr.msk.bf16.gmra.mrb[112].mxu0 %vm278_vm2, %v4325_v39  ;;  %4193 = vmatmul.mubr.msk.bf16.gmra.mrb[112].mxu1 %vm278_vm2, %v4326_v40  ;;  %v1554_v1 = vmul.f32 %v4855_v61, %v1490_v57  ;;  %v678_v2 = vmax.f32 %v444_v58, 0.0  ;;  %v1491_v3 = vmax.f32 %v1257_v59, 0.0 }
  0xeb   :  { %4128 = vmatprep.mubr.msk.bf16.mxu0 %vm278_vm2, %v4327_v47  ;;  %4196 = vmatprep.mubr.msk.bf16.mxu1 %vm278_vm2, %v4328_v48  ;;  %v745_v6 = vmul.f32 %v4855_v61, %v675_v62  ;;  %v1552_v7 = vmul.f32 %v4855_v61, %v1488_v63  ;;  %v676_v8 = vmax.f32 %v436_v0, 0.0  ;;  %v1489_v13 = vmax.f32 %v1249_v4, 0.0 }
  0xec   :  { %v4945_v5 = vadd.f32 %v4870_v10, %v747_v60  ;;  %v4950_v9 = vadd.f32 %v4870_v10, %v1554_v1  ;;  %v748_v11 = vmul.f32 %v4855_v61, %v678_v2  ;;  %v1555_v12 = vmul.f32 %v4855_v61, %v1491_v3 }
  0xed   :  { %v3950_v14 = vpop.f32.mrb[8].mxu0  ;;  %v4018_v15 = vpop.f32.mrb[8].mxu1  ;;  %v4955_v16 = vadd.f32 %v4870_v10, %v745_v6  ;;  %v4958_v17 = vadd.f32 %v4870_v10, %v1552_v7  ;;  %v746_v18 = vmul.f32 %v4855_v61, %v676_v8  ;;  %v1553_v31 = vmul.f32 %v4855_v61, %v1489_v13 }
  0xee   :  { %v457_v19 = vadd.f32 %v3950_v14, %v4840_v52  ;;  %v448_v20 = vpop.f32.mrb[9].mxu0  ;;  %v1261_v21 = vpop.f32.mrb[9].mxu1  ;;  %v4971_v29 = vadd.f32 %v4870_v10, %v748_v11  ;;  %v4974_v30 = vadd.f32 %v4870_v10, %v1555_v12  ;;  %v1270_v45 = vadd.f32 %v4018_v15, %v4840_v52 }
  0xef   :  { %v3951_v32 = vpop.f32.mrb[10].mxu0  ;;  %v4019_v36 = vpop.f32.mrb[10].mxu1  ;;  %v4986_v40 = vadd.f32 %v4870_v10, %v746_v18  ;;  %v4992_v50 = vadd.f32 %v4870_v10, %v1553_v31  ;;  %v449_v51 = vadd.f32 %v4840_v52, %v448_v20  ;;  %v1262_v53 = vadd.f32 %v4840_v52, %v1261_v21  ;;  %v4333_v21 = vld [vmem:[%s7041_s2 + $0xe8] sm:$0xff]  }
  0xf0   :  { %v681_v44 = vmax.f32 %v457_v19, 0.0  ;;  %v451_v46 = vpop.f32.mrb[11].mxu0  ;;  %v1264_v47 = vpop.f32.mrb[11].mxu1  ;;  %v1494_v55 = vmax.f32 %v1270_v45, 0.0  ;;  %v460_v57 = vadd.f32 %v3951_v32, %v4840_v52  ;;  %v1273_v58 = vadd.f32 %v4019_v36, %v4840_v52 }
  0xf1   :  { %v679_v60 = vmax.f32 %v449_v51, 0.0  ;;  %v1492_v62 = vmax.f32 %v1262_v53, 0.0  ;;  %v452_v63 = vadd.f32 %v4840_v52, %v451_v46  ;;  %v1265_v8 = vadd.f32 %v4840_v52, %v1264_v47 }
  0xf2   :  { %v751_v54 = vmul.f32 %v4855_v61, %v681_v44  ;;  %4129 = vmatmul.mubr.msk.bf16.gmra.mrb[116].mxu0 %vm278_vm2, %v4329_v22  ;;  %4197 = vmatmul.mubr.msk.bf16.gmra.mrb[116].mxu1 %vm278_vm2, %v4330_v25  ;;  %v1558_v1 = vmul.f32 %v4855_v61, %v1494_v55  ;;  %v682_v2 = vmax.f32 %v460_v57, 0.0  ;;  %v1495_v3 = vmax.f32 %v1273_v58, 0.0  ;;  %v4335_v44 = vld [vmem:[%s7041_s2 + $0xf0] sm:$0xff]  }
  0xf3   :  { %4132 = vmatprep.mubr.msk.bf16.mxu0 %vm278_vm2, %v4331_v37  ;;  %4200 = vmatprep.mubr.msk.bf16.mxu1 %vm278_vm2, %v4332_v38  ;;  %v749_v4 = vmul.f32 %v4855_v61, %v679_v60  ;;  %v1556_v6 = vmul.f32 %v4855_v61, %v1492_v62  ;;  %v680_v7 = vmax.f32 %v452_v63, 0.0  ;;  %v1493_v32 = vmax.f32 %v1265_v8, 0.0  ;;  %v4334_v38 = vld [vmem:[%s7042_s3 + $0xe8] sm:$0xff]   ;;  %v4336_v55 = vld [vmem:[%s7042_s3 + $0xf0] sm:$0xff]  }
  0xf4   :  { %v5007_v0 = vadd.f32 %v4870_v10, %v751_v54  ;;  %v5014_v13 = vadd.f32 %v4870_v10, %v1558_v1  ;;  %v752_v14 = vmul.f32 %v4855_v61, %v682_v2  ;;  %v1559_v15 = vmul.f32 %v4855_v61, %v1495_v3 }
  0xf5   :  { %v3954_v11 = vpop.f32.mrb[12].mxu0  ;;  %v4022_v12 = vpop.f32.mrb[12].mxu1  ;;  %v5023_v22 = vadd.f32 %v4870_v10, %v749_v4  ;;  %v5026_v25 = vadd.f32 %v4870_v10, %v1556_v6  ;;  %v750_v31 = vmul.f32 %v4855_v61, %v680_v7  ;;  %v1557_v60 = vmul.f32 %v4855_v61, %v1493_v32 }
  0xf6   :  { %v473_v18 = vadd.f32 %v3954_v11, %v4840_v52  ;;  %v464_v19 = vpop.f32.mrb[13].mxu0  ;;  %v1277_v20 = vpop.f32.mrb[13].mxu1  ;;  %v5038_v46 = vadd.f32 %v4870_v10, %v752_v14  ;;  %v5041_v47 = vadd.f32 %v4870_v10, %v1559_v15  ;;  %v1286_v62 = vadd.f32 %v4022_v12, %v4840_v52 }
  0xf7   :  { %v3955_v36 = vpop.f32.mrb[14].mxu0  ;;  %v4023_v37 = vpop.f32.mrb[14].mxu1  ;;  %v5049_v58 = vadd.f32 %v4870_v10, %v750_v31  ;;  %v465_v2 = vadd.f32 %v4840_v52, %v464_v19  ;;  %v1278_v3 = vadd.f32 %v4840_v52, %v1277_v20  ;;  %v5060_v4 = vadd.f32 %v4870_v10, %v1557_v60 }
  0xf8   :  { %v685_v51 = vmax.f32 %v473_v18, 0.0  ;;  %v467_v53 = vpop.f32.mrb[15].mxu0  ;;  %v1280_v54 = vpop.f32.mrb[15].mxu1  ;;  %v1498_v6 = vmax.f32 %v1286_v62, 0.0  ;;  %v476_v7 = vadd.f32 %v3955_v36, %v4840_v52  ;;  %v1289_v8 = vadd.f32 %v4023_v37, %v4840_v52 }
  0xf9   :  { %7153 = vst [vmem:[#allocation2_spill] sm:$0xff] %v5049_v58  ;;  %7154 = vst [vmem:[#allocation3_spill] sm:$0xff] %v5060_v4  ;;  %v683_v12 = vmax.f32 %v465_v2, 0.0  ;;  %v1496_v14 = vmax.f32 %v1278_v3, 0.0  ;;  %v468_v15 = vadd.f32 %v4840_v52, %v467_v53 }
  0xfa   :  { %v755_v1 = vmul.f32 %v4855_v61, %v685_v51  ;;  %4133 = vmatmul.mubr.msk.bf16.gmra.mrb[120].mxu0 %vm278_vm2, %v4333_v21  ;;  %4201 = vmatmul.mubr.msk.bf16.gmra.mrb[120].mxu1 %vm278_vm2, %v4334_v38  ;;  %v1562_v19 = vmul.f32 %v4855_v61, %v1498_v6  ;;  %v686_v20 = vmax.f32 %v476_v7, 0.0  ;;  %v1499_v21 = vmax.f32 %v1289_v8, 0.0 }
  0xfb   :  { %4136 = vmatprep.mubr.msk.bf16.mxu0 %vm278_vm2, %v4335_v44  ;;  %4204 = vmatprep.mubr.msk.bf16.mxu1 %vm278_vm2, %v4336_v55  ;;  %v753_v36 = vmul.f32 %v4855_v61, %v683_v12  ;;  %v1560_v37 = vmul.f32 %v4855_v61, %v1496_v14  ;;  %v684_v38 = vmax.f32 %v468_v15, 0.0  ;;  %v1281_v44 = vadd.f32 %v4840_v52, %v1280_v54  ;;  %v4337_v55 = vld [vmem:[%s7041_s2 + $0xf8] sm:$0xff]  }
  0xfc   :  { %v5067_v11 = vadd.f32 %v4870_v10, %v755_v1  ;;  %v5081_v60 = vadd.f32 %v4870_v10, %v1562_v19  ;;  %v756_v62 = vmul.f32 %v4855_v61, %v686_v20  ;;  %v1563_v1 = vmul.f32 %v4855_v61, %v1499_v21  ;;  %v4338_v54 = vld [vmem:[%s7042_s3 + $0xf8] sm:$0xff]  }
  0xfd   :  { %v3958_v31 = vpop.f32.mrb[16].mxu0  ;;  %v4026_v32 = vpop.f32.mrb[16].mxu1  ;;  %v5090_v7 = vadd.f32 %v4870_v10, %v753_v36  ;;  %v5093_v8 = vadd.f32 %v4870_v10, %v1560_v37  ;;  %v754_v12 = vmul.f32 %v4855_v61, %v684_v38  ;;  %v1497_v14 = vmax.f32 %v1281_v44, 0.0 }
  0xfe   :  { %7155 = vst [vmem:[#allocation4_spill] sm:$0xff] %v5067_v11  ;;  %v480_v51 = vpop.f32.mrb[17].mxu0  ;;  %v1293_v53 = vpop.f32.mrb[17].mxu1  ;;  %7156 = vst [vmem:[#allocation5_spill] sm:$0xff] %v5081_v60  ;;  %v489_v2 = vadd.f32 %v3958_v31, %v4840_v52  ;;  %v5099_v21 = vadd.f32 %v4870_v10, %v756_v62  ;;  %v5102_v31 = vadd.f32 %v4870_v10, %v1563_v1 }
  0xff   :  { %v3959_v3 = vpop.f32.mrb[18].mxu0  ;;  %v4027_v6 = vpop.f32.mrb[18].mxu1  ;;  %7157 = vst [vmem:[#allocation6_spill] sm:$0xff] %v5090_v7  ;;  %7158 = vst [vmem:[#allocation7_spill] sm:$0xff] %v5093_v8  ;;  %v5107_v37 = vadd.f32 %v4870_v10, %v754_v12  ;;  %v1561_v38 = vmul.f32 %v4855_v61, %v1497_v14  ;;  %v1302_v44 = vadd.f32 %v4026_v32, %v4840_v52 }
 0x100   :  { %v483_v15 = vpop.f32.mrb[19].mxu0  ;;  %v1296_v19 = vpop.f32.mrb[19].mxu1  ;;  %7159 = vst [vmem:[#allocation8_spill] sm:$0xff] %v5099_v21  ;;  %7160 = vst [vmem:[#allocation9_spill] sm:$0xff] %v5102_v31  ;;  %v689_v18 = vmax.f32 %v489_v2, 0.0  ;;  %v481_v1 = vadd.f32 %v4840_v52, %v480_v51  ;;  %v1294_v2 = vadd.f32 %v4840_v52, %v1293_v53  ;;  %v492_v14 = vadd.f32 %v3959_v3, %v4840_v52 }
 0x101   :  { %7161 = vst [vmem:[#allocation10_spill] sm:$0xff] %v5107_v37  ;;  %v5119_v12 = vadd.f32 %v4870_v10, %v1561_v38  ;;  %v1502_v36 = vmax.f32 %v1302_v44, 0.0  ;;  %v1305_v32 = vadd.f32 %v4027_v6, %v4840_v52 }
 0x102   :  { %4137 = vmatmul.mubr.msk.bf16.gmra.mrb[124].mxu0 %vm278_vm2, %v4337_v55  ;;  %v759_v20 = vmul.f32 %v4855_v61, %v689_v18  ;;  %4205 = vmatmul.mubr.msk.bf16.gmra.mrb[124].mxu1 %vm278_vm2, %v4338_v54  ;;  %v687_v62 = vmax.f32 %v481_v1, 0.0  ;;  %v1500_v63 = vmax.f32 %v1294_v2, 0.0  ;;  %v484_v18 = vadd.f32 %v4840_v52, %v483_v15 }
 0x103   :  { %7162 = vst [vmem:[#allocation11_spill] sm:$0xff] %v5119_v12  ;;  %v1566_v54 = vmul.f32 %v4855_v61, %v1502_v36  ;;  %v690_v38 = vmax.f32 %v492_v14, 0.0  ;;  %v1503_v44 = vmax.f32 %v1305_v32, 0.0  ;;  %v1297_v1 = vadd.f32 %v4840_v52, %v1296_v19 }
 0x104   :  { %v5124_v55 = vadd.f32 %v4870_v10, %v759_v20  ;;  %v757_v6 = vmul.f32 %v4855_v61, %v687_v62  ;;  %v1564_v20 = vmul.f32 %v4855_v61, %v1500_v63  ;;  %v688_v59 = vmax.f32 %v484_v18, 0.0 }
 0x105   :  { %v3962_v51 = vpop.f32.mrb[20].mxu0  ;;  %v4030_v57 = vpop.f32.mrb[20].mxu1  ;;  %v5134_v48 = vadd.f32 %v4870_v10, %v1566_v54  ;;  %v760_v53 = vmul.f32 %v4855_v61, %v690_v38  ;;  %v1567_v36 = vmul.f32 %v4855_v61, %v1503_v44  ;;  %v1501_v18 = vmax.f32 %v1297_v1, 0.0 }
 0x106   :  { %7163 = vst [vmem:[#allocation12_spill] sm:$0xff] %v5124_v55  ;;  %v496_v45 = vpop.f32.mrb[21].mxu0  ;;  %v1309_v3 = vpop.f32.mrb[21].mxu1  ;;  %v505_v14 = vadd.f32 %v3962_v51, %v4840_v52  ;;  %v5140_v62 = vadd.f32 %v4870_v10, %v757_v6  ;;  %v5143_v63 = vadd.f32 %v4870_v10, %v1564_v20  ;;  %v758_v19 = vmul.f32 %v4855_v61, %v688_v59 }
 0x107   :  { %v3963_v2 = vpop.f32.mrb[22].mxu0  ;;  %v4031_v15 = vpop.f32.mrb[22].mxu1  ;;  %7164 = vst [vmem:[#allocation13_spill] sm:$0xff] %v5134_v48  ;;  %v5149_v38 = vadd.f32 %v4870_v10, %v760_v53  ;;  %v5152_v44 = vadd.f32 %v4870_v10, %v1567_v36  ;;  %v1565_v20 = vmul.f32 %v4855_v61, %v1501_v18  ;;  %v1318_v59 = vadd.f32 %v4030_v57, %v4840_v52 }
 0x108   :  { %v499_v32 = vpop.f32.mrb[23].mxu0  ;;  %v1312_v39 = vpop.f32.mrb[23].mxu1  ;;  %7165 = vst [vmem:[#allocation14_spill] sm:$0xff] %v5140_v62  ;;  %7166 = vst [vmem:[#allocation15_spill] sm:$0xff] %v5143_v63  ;;  %v693_v51 = vmax.f32 %v505_v14, 0.0  ;;  %v5157_v26 = vadd.f32 %v4870_v10, %v758_v19  ;;  %v497_v54 = vadd.f32 %v4840_v52, %v496_v45  ;;  %v1310_v36 = vadd.f32 %v4840_v52, %v1309_v3 }
 0x109   :  { %7167 = vst [vmem:[#allocation16_spill] sm:$0xff] %v5149_v38  ;;  %7168 = vst [vmem:[#allocation17_spill] sm:$0xff] %v5152_v44  ;;  %v5167_v14 = vadd.f32 %v4870_v10, %v1565_v20  ;;  %v1506_v6 = vmax.f32 %v1318_v59, 0.0  ;;  %v508_v19 = vadd.f32 %v3963_v2, %v4840_v52  ;;  %v1321_v56 = vadd.f32 %v4031_v15, %v4840_v52 }
 0x10a   :  { %7169 = vst [vmem:[#allocation18_spill] sm:$0xff] %v5157_v26  ;;  %v763_v53 = vmul.f32 %v4855_v61, %v693_v51  ;;  %v691_v1 = vmax.f32 %v497_v54, 0.0  ;;  %v1504_v41 = vmax.f32 %v1310_v36, 0.0  ;;  %v500_v51 = vadd.f32 %v4840_v52, %v499_v32 }
 0x10b   :  { %7170 = vst [vmem:[#allocation19_spill] sm:$0xff] %v5167_v14  ;;  %v1570_v20 = vmul.f32 %v4855_v61, %v1506_v6  ;;  %v694_v59 = vmax.f32 %v508_v19, 0.0  ;;  %v1507_v2 = vmax.f32 %v1321_v56, 0.0  ;;  %v1313_v54 = vadd.f32 %v4840_v52, %v1312_v39 }
 0x10c   :  { %v5172_v57 = vadd.f32 %v4870_v10, %v763_v53  ;;  %v761_v38 = vmul.f32 %v4855_v61, %v691_v1  ;;  %v1568_v53 = vmul.f32 %v4855_v61, %v1504_v41  ;;  %v692_v63 = vmax.f32 %v500_v51, 0.0 }
 0x10d   :  { %v3966_v18 = vpop.f32.mrb[24].mxu0  ;;  %v4034_v49 = vpop.f32.mrb[24].mxu1  ;;  %v5182_v62 = vadd.f32 %v4870_v10, %v1570_v20  ;;  %v764_v3 = vmul.f32 %v4855_v61, %v694_v59  ;;  %v1571_v6 = vmul.f32 %v4855_v61, %v1507_v2  ;;  %v1505_v39 = vmax.f32 %v1313_v54, 0.0 }
 0x10e   :  { %7171 = vst [vmem:[#allocation20_spill] sm:$0xff] %v5172_v57  ;;  %v512_v45 = vpop.f32.mrb[25].mxu0  ;;  %v1325_v33 = vpop.f32.mrb[25].mxu1  ;;  %v521_v56 = vadd.f32 %v3966_v18, %v4840_v52  ;;  %v5188_v19 = vadd.f32 %v4870_v10, %v761_v38  ;;  %v5191_v1 = vadd.f32 %v4870_v10, %v1568_v53  ;;  %v762_v41 = vmul.f32 %v4855_v61, %v692_v63 }
 0x10f   :  { %v3967_v44 = vpop.f32.mrb[26].mxu0  ;;  %v4035_v15 = vpop.f32.mrb[26].mxu1  ;;  %7172 = vst [vmem:[#allocation21_spill] sm:$0xff] %v5182_v62  ;;  %v5197_v20 = vadd.f32 %v4870_v10, %v764_v3  ;;  %v5200_v59 = vadd.f32 %v4870_v10, %v1571_v6  ;;  %v1569_v53 = vmul.f32 %v4855_v61, %v1505_v39  ;;  %v1334_v63 = vadd.f32 %v4034_v49, %v4840_v52 }
 0x110   :  { %v515_v36 = vpop.f32.mrb[27].mxu0  ;;  %v1328_v32 = vpop.f32.mrb[27].mxu1  ;;  %7173 = vst [vmem:[#allocation22_spill] sm:$0xff] %v5188_v19  ;;  %7174 = vst [vmem:[#allocation23_spill] sm:$0xff] %v5191_v1  ;;  %v697_v2 = vmax.f32 %v521_v56, 0.0  ;;  %v5205_v18 = vadd.f32 %v4870_v10, %v762_v41  ;;  %v513_v51 = vadd.f32 %v4840_v52, %v512_v45  ;;  %v1326_v6 = vadd.f32 %v4840_v52, %v1325_v33 }
 0x111   :  { %7175 = vst [vmem:[#allocation24_spill] sm:$0xff] %v5197_v20  ;;  %7176 = vst [vmem:[#allocation25_spill] sm:$0xff] %v5200_v59  ;;  %v5215_v38 = vadd.f32 %v4870_v10, %v1569_v53  ;;  %v1510_v41 = vmax.f32 %v1334_v63, 0.0  ;;  %v524_v1 = vadd.f32 %v3967_v44, %v4840_v52  ;;  %v1337_v39 = vadd.f32 %v4035_v15, %v4840_v52 }
 0x112   :  { %7177 = vst [vmem:[#allocation26_spill] sm:$0xff] %v5205_v18  ;;  %v767_v3 = vmul.f32 %v4855_v61, %v697_v2  ;;  %v695_v2 = vmax.f32 %v513_v51, 0.0  ;;  %v1508_v59 = vmax.f32 %v1326_v6, 0.0  ;;  %v516_v45 = vadd.f32 %v4840_v52, %v515_v36 }
 0x113   :  { %7178 = vst [vmem:[#allocation27_spill] sm:$0xff] %v5215_v38  ;;  %v1574_v63 = vmul.f32 %v4855_v61, %v1510_v41  ;;  %v698_v57 = vmax.f32 %v524_v1, 0.0  ;;  %v1511_v44 = vmax.f32 %v1337_v39, 0.0  ;;  %v1329_v51 = vadd.f32 %v4840_v52, %v1328_v32 }
 0x114   :  { %v5220_v54 = vadd.f32 %v4870_v10, %v767_v3  ;;  %v765_v26 = vmul.f32 %v4855_v61, %v695_v2  ;;  %v1572_v3 = vmul.f32 %v4855_v61, %v1508_v59  ;;  %v696_v48 = vmax.f32 %v516_v45, 0.0 }
 0x115   :  { %v3970_v56 = vpop.f32.mrb[28].mxu0  ;;  %v4038_v62 = vpop.f32.mrb[28].mxu1  ;;  %v5230_v36 = vadd.f32 %v4870_v10, %v1574_v63  ;;  %v768_v6 = vmul.f32 %v4855_v61, %v698_v57  ;;  %v1575_v53 = vmul.f32 %v4855_v61, %v1511_v44  ;;  %v1509_v2 = vmax.f32 %v1329_v51, 0.0 }
 0x116   :  { %v528_v49 = vpop.f32.mrb[29].mxu0  ;;  %v1341_v19 = vpop.f32.mrb[29].mxu1  ;;  %7179 = vst [vmem:[#allocation28_spill] sm:$0xff] %v5220_v54  ;;  %v537_v41 = vadd.f32 %v3970_v56, %v4840_v52  ;;  %v5236_v1 = vadd.f32 %v4870_v10, %v765_v26  ;;  %v5239_v39 = vadd.f32 %v4870_v10, %v1572_v3  ;;  %v766_v59 = vmul.f32 %v4855_v61, %v696_v48 }
 0x117   :  { %v3971_v33 = vpop.f32.mrb[30].mxu0  ;;  %v4039_v20 = vpop.f32.mrb[30].mxu1  ;;  %7180 = vst [vmem:[#allocation29_spill] sm:$0xff] %v5230_v36  ;;  %v5245_v45 = vadd.f32 %v4870_v10, %v768_v6  ;;  %v5248_v57 = vadd.f32 %v4870_v10, %v1575_v53  ;;  %v1573_v44 = vmul.f32 %v4855_v61, %v1509_v2  ;;  %v1350_v48 = vadd.f32 %v4038_v62, %v4840_v52 }
 0x118   :  { %v531_v14 = vpop.f32.mrb[31].mxu0  ;;  %v1344_v15 = vpop.f32.mrb[31].mxu1  ;;  %7181 = vst [vmem:[#allocation30_spill] sm:$0xff] %v5236_v1  ;;  %7182 = vst [vmem:[#allocation31_spill] sm:$0xff] %v5239_v39  ;;  %v701_v63 = vmax.f32 %v537_v41, 0.0  ;;  %v5253_v56 = vadd.f32 %v4870_v10, %v766_v59  ;;  %v529_v53 = vadd.f32 %v4840_v52, %v528_v49  ;;  %v1342_v41 = vadd.f32 %v4840_v52, %v1341_v19 }
 0x119   :  { %7183 = vst [vmem:[#allocation32_spill] sm:$0xff] %v5245_v45  ;;  %7184 = vst [vmem:[#allocation33_spill] sm:$0xff] %v5248_v57  ;;  %v5263_v59 = vadd.f32 %v4870_v10, %v1573_v44  ;;  %v1514_v39 = vmax.f32 %v1350_v48, 0.0  ;;  %v540_v2 = vadd.f32 %v3971_v33, %v4840_v52  ;;  %v1353_v62 = vadd.f32 %v4039_v20, %v4840_v52 }
 0x11a   :  { %7185 = vst [vmem:[#allocation34_spill] sm:$0xff] %v5253_v56  ;;  %v771_v32 = vmul.f32 %v4855_v61, %v701_v63  ;;  %v699_v63 = vmax.f32 %v529_v53, 0.0  ;;  %v1512_v57 = vmax.f32 %v1342_v41, 0.0  ;;  %v532_v49 = vadd.f32 %v4840_v52, %v531_v14 }
 0x11b   :  { %7186 = vst [vmem:[#allocation35_spill] sm:$0xff] %v5263_v59  ;;  %v1578_v48 = vmul.f32 %v4855_v61, %v1514_v39  ;;  %v702_v38 = vmax.f32 %v540_v2, 0.0  ;;  %v1515_v33 = vmax.f32 %v1353_v62, 0.0 }
 0x11c   :  { %v5268_v6 = vadd.f32 %v4870_v10, %v771_v32  ;;  %v769_v20 = vmul.f32 %v4855_v61, %v699_v63  ;;  %v1576_v18 = vmul.f32 %v4855_v61, %v1512_v57  ;;  %v700_v55 = vmax.f32 %v532_v49, 0.0 }
 0x11d   :  { %v3974_v3 = vpop.f32.mrb[32].mxu0  ;;  %v4042_v51 = vpop.f32.mrb[32].mxu1  ;;  %v1345_v32 = vadd.f32 %v4840_v52, %v1344_v15  ;;  %v5278_v53 = vadd.f32 %v4870_v10, %v1578_v48  ;;  %v772_v14 = vmul.f32 %v4855_v61, %v702_v38  ;;  %v1579_v41 = vmul.f32 %v4855_v61, %v1515_v33 }
 0x11e   :  { %v544_v36 = vpop.f32.mrb[33].mxu0  ;;  %v1357_v26 = vpop.f32.mrb[33].mxu1  ;;  %7187 = vst [vmem:[#allocation36_spill] sm:$0xff] %v5268_v6  ;;  %v553_v44 = vadd.f32 %v3974_v3, %v4840_v52  ;;  %v5284_v39 = vadd.f32 %v4870_v10, %v769_v20  ;;  %v5287_v2 = vadd.f32 %v4870_v10, %v1576_v18  ;;  %v770_v57 = vmul.f32 %v4855_v61, %v700_v55 }
 0x11f   :  { %v3975_v1 = vpop.f32.mrb[34].mxu0  ;;  %v4043_v54 = vpop.f32.mrb[34].mxu1  ;;  %7188 = vst [vmem:[#allocation37_spill] sm:$0xff] %v5278_v53  ;;  %v1513_v62 = vmax.f32 %v1345_v32, 0.0  ;;  %v5293_v63 = vadd.f32 %v4870_v10, %v772_v14  ;;  %v5296_v38 = vadd.f32 %v4870_v10, %v1579_v41  ;;  %v1366_v20 = vadd.f32 %v4042_v51, %v4840_v52 }
 0x120   :  { %v547_v19 = vpop.f32.mrb[35].mxu0  ;;  %v1360_v45 = vpop.f32.mrb[35].mxu1  ;;  %7189 = vst [vmem:[#allocation38_spill] sm:$0xff] %v5284_v39  ;;  %7190 = vst [vmem:[#allocation39_spill] sm:$0xff] %v5287_v2  ;;  %v705_v49 = vmax.f32 %v553_v44, 0.0  ;;  %v5301_v18 = vadd.f32 %v4870_v10, %v770_v57  ;;  %v545_v44 = vadd.f32 %v4840_v52, %v544_v36  ;;  %v1358_v53 = vadd.f32 %v4840_v52, %v1357_v26 }
 0x121   :  { %7191 = vst [vmem:[#allocation40_spill] sm:$0xff] %v5293_v63  ;;  %7192 = vst [vmem:[#allocation41_spill] sm:$0xff] %v5296_v38  ;;  %v1577_v55 = vmul.f32 %v4855_v61, %v1513_v62  ;;  %v1518_v2 = vmax.f32 %v1366_v20, 0.0  ;;  %v556_v62 = vadd.f32 %v3975_v1, %v4840_v52  ;;  %v1369_v51 = vadd.f32 %v4043_v54, %v4840_v52 }
 0x122   :  { %7193 = vst [vmem:[#allocation42_spill] sm:$0xff] %v5301_v18  ;;  %v775_v41 = vmul.f32 %v4855_v61, %v705_v49  ;;  %v703_v49 = vmax.f32 %v545_v44, 0.0  ;;  %v1516_v38 = vmax.f32 %v1358_v53, 0.0  ;;  %v548_v36 = vadd.f32 %v4840_v52, %v547_v19 }
 0x123   :  { %v5311_v57 = vadd.f32 %v4870_v10, %v1577_v55  ;;  %v1582_v55 = vmul.f32 %v4855_v61, %v1518_v2  ;;  %v706_v63 = vmax.f32 %v556_v62, 0.0  ;;  %v1519_v20 = vmax.f32 %v1369_v51, 0.0 }
 0x124   :  { %v5316_v14 = vadd.f32 %v4870_v10, %v775_v41  ;;  %v773_v1 = vmul.f32 %v4855_v61, %v703_v49  ;;  %v1580_v54 = vmul.f32 %v4855_v61, %v1516_v38  ;;  %v704_v56 = vmax.f32 %v548_v36, 0.0 }
 0x125   :  { %v3978_v3 = vpop.f32.mrb[36].mxu0  ;;  %v4046_v48 = vpop.f32.mrb[36].mxu1  ;;  %7194 = vst [vmem:[#allocation43_spill] sm:$0xff] %v5311_v57  ;;  %v1361_v12 = vadd.f32 %v4840_v52, %v1360_v45  ;;  %v5326_v41 = vadd.f32 %v4870_v10, %v1582_v55  ;;  %v776_v53 = vmul.f32 %v4855_v61, %v706_v63  ;;  %v1583_v19 = vmul.f32 %v4855_v61, %v1519_v20 }
 0x126   :  { %v560_v32 = vpop.f32.mrb[37].mxu0  ;;  %v1373_v15 = vpop.f32.mrb[37].mxu1  ;;  %7195 = vst [vmem:[#allocation44_spill] sm:$0xff] %v5316_v14  ;;  %v569_v44 = vadd.f32 %v3978_v3, %v4840_v52  ;;  %v5332_v2 = vadd.f32 %v4870_v10, %v773_v1  ;;  %v5335_v62 = vadd.f32 %v4870_v10, %v1580_v54  ;;  %v774_v38 = vmul.f32 %v4855_v61, %v704_v56 }
 0x127   :  { %v3979_v6 = vpop.f32.mrb[38].mxu0  ;;  %v4047_v33 = vpop.f32.mrb[38].mxu1  ;;  %7196 = vst [vmem:[#allocation45_spill] sm:$0xff] %v5326_v41  ;;  %v1517_v51 = vmax.f32 %v1361_v12, 0.0  ;;  %v5341_v63 = vadd.f32 %v4870_v10, %v776_v53  ;;  %v5344_v55 = vadd.f32 %v4870_v10, %v1583_v19  ;;  %v1382_v26 = vadd.f32 %v4046_v48, %v4840_v52 }
 0x128   :  { %v563_v39 = vpop.f32.mrb[39].mxu0  ;;  %v1376_v59 = vpop.f32.mrb[39].mxu1  ;;  %7197 = vst [vmem:[#allocation46_spill] sm:$0xff] %v5332_v2  ;;  %7198 = vst [vmem:[#allocation47_spill] sm:$0xff] %v5335_v62  ;;  %v709_v3 = vmax.f32 %v569_v44, 0.0  ;;  %v5349_v56 = vadd.f32 %v4870_v10, %v774_v38  ;;  %v561_v44 = vadd.f32 %v4840_v52, %v560_v32  ;;  %v1374_v14 = vadd.f32 %v4840_v52, %v1373_v15 }
 0x129   :  { %7199 = vst [vmem:[#allocation48_spill] sm:$0xff] %v5341_v63  ;;  %7200 = vst [vmem:[#allocation49_spill] sm:$0xff] %v5344_v55  ;;  %v1581_v12 = vmul.f32 %v4855_v61, %v1517_v51  ;;  %v1522_v62 = vmax.f32 %v1382_v26, 0.0  ;;  %v572_v51 = vadd.f32 %v3979_v6, %v4840_v52  ;;  %v1385_v48 = vadd.f32 %v4047_v33, %v4840_v52 }
 0x12a   :  { %7201 = vst [vmem:[#allocation50_spill] sm:$0xff] %v5349_v56  ;;  %v779_v19 = vmul.f32 %v4855_v61, %v709_v3  ;;  %v707_v53 = vmax.f32 %v561_v44, 0.0  ;;  %v1520_v55 = vmax.f32 %v1374_v14, 0.0  ;;  %v564_v3 = vadd.f32 %v4840_v52, %v563_v39 }
 0x12b   :  { %v5359_v38 = vadd.f32 %v4870_v10, %v1581_v12  ;;  %v1586_v32 = vmul.f32 %v4855_v61, %v1522_v62  ;;  %v710_v63 = vmax.f32 %v572_v51, 0.0  ;;  %v1523_v12 = vmax.f32 %v1385_v48, 0.0 }
 0x12c   :  { %v5364_v2 = vadd.f32 %v4870_v10, %v779_v19  ;;  %v777_v26 = vmul.f32 %v4855_v61, %v707_v53  ;;  %v1584_v6 = vmul.f32 %v4855_v61, %v1520_v55  ;;  %v708_v18 = vmax.f32 %v564_v3, 0.0 }
 0x12d   :  { %v3982_v49 = vpop.f32.mrb[40].mxu0  ;;  %v4050_v45 = vpop.f32.mrb[40].mxu1  ;;  %7202 = vst [vmem:[#allocation51_spill] sm:$0xff] %v5359_v38  ;;  %v1377_v33 = vadd.f32 %v4840_v52, %v1376_v59  ;;  %v5374_v19 = vadd.f32 %v4870_v10, %v1586_v32  ;;  %v780_v14 = vmul.f32 %v4855_v61, %v710_v63  ;;  %v1587_v39 = vmul.f32 %v4855_v61, %v1523_v12 }
 0x12e   :  { %v576_v20 = vpop.f32.mrb[41].mxu0  ;;  %v1389_v1 = vpop.f32.mrb[41].mxu1  ;;  %7203 = vst [vmem:[#allocation52_spill] sm:$0xff] %v5364_v2  ;;  %v585_v44 = vadd.f32 %v3982_v49, %v4840_v52  ;;  %v5382_v51 = vadd.f32 %v4870_v10, %v777_v26  ;;  %v5385_v55 = vadd.f32 %v4870_v10, %v1584_v6  ;;  %v778_v59 = vmul.f32 %v4855_v61, %v708_v18 }
 0x12f   :  { %v3983_v36 = vpop.f32.mrb[42].mxu0  ;;  %v4051_v41 = vpop.f32.mrb[42].mxu1  ;;  %7204 = vst [vmem:[#allocation53_spill] sm:$0xff] %v5374_v19  ;;  %v1521_v53 = vmax.f32 %v1377_v33, 0.0  ;;  %v5395_v49 = vadd.f32 %v4870_v10, %v780_v14  ;;  %v5398_v32 = vadd.f32 %v4870_v10, %v1587_v39  ;;  %v1398_v56 = vadd.f32 %v4050_v45, %v4840_v52 }
 0x130   :  { %v579_v57 = vpop.f32.mrb[43].mxu0  ;;  %v1392_v54 = vpop.f32.mrb[43].mxu1  ;;  %7205 = vst [vmem:[#allocation54_spill] sm:$0xff] %v5382_v51  ;;  %7206 = vst [vmem:[#allocation55_spill] sm:$0xff] %v5385_v55  ;;  %v713_v12 = vmax.f32 %v585_v44, 0.0  ;;  %v5403_v33 = vadd.f32 %v4870_v10, %v778_v59  ;;  %v577_v44 = vadd.f32 %v4840_v52, %v576_v20  ;;  %v1390_v2 = vadd.f32 %v4840_v52, %v1389_v1 }
 0x131   :  { %7207 = vst [vmem:[#allocation56_spill] sm:$0xff] %v5395_v49  ;;  %7208 = vst [vmem:[#allocation57_spill] sm:$0xff] %v5398_v32  ;;  %v1585_v38 = vmul.f32 %v4855_v61, %v1521_v53  ;;  %v1526_v59 = vmax.f32 %v1398_v56, 0.0  ;;  %v588_v53 = vadd.f32 %v3983_v36, %v4840_v52  ;;  %v1401_v45 = vadd.f32 %v4051_v41, %v4840_v52  ;;  %v5431_v41 = vld [vmem:[%s7043_s5] ss:$0 sm:$0xff] }
 0x132   :  { %7209 = vst [vmem:[#allocation58_spill] sm:$0xff] %v5403_v33  ;;  %v783_v39 = vmul.f32 %v4855_v61, %v713_v12  ;;  %v711_v51 = vmax.f32 %v577_v44, 0.0  ;;  %v1524_v37 = vmax.f32 %v1390_v2, 0.0  ;;  %v580_v14 = vadd.f32 %v4840_v52, %v579_v57 }
 0x133   :  { %v5415_v18 = vadd.f32 %v4870_v10, %v1585_v38  ;;  %v1590_v1 = vmul.f32 %v4855_v61, %v1526_v59  ;;  %v714_v12 = vmax.f32 %v588_v53, 0.0  ;;  %v1527_v38 = vmax.f32 %v1401_v45, 0.0  ;;  %v5455_v45 = vld [vmem:[%s7044_s6] ss:$0 sm:$0xff] }
 0x134   :  { %v5420_v55 = vadd.f32 %v4870_v10, %v783_v39  ;;  %v781_v56 = vmul.f32 %v4855_v61, %v711_v51  ;;  %v1588_v36 = vmul.f32 %v4855_v61, %v1524_v37  ;;  %v712_v32 = vmax.f32 %v580_v14, 0.0 }
 0x135   :  { %v3986_v15 = vpop.f32.mrb[44].mxu0  ;;  %v5379_v62 = vpop.f32.mrb[44].mxu1  ;;  %7210 = vst [vmem:[#allocation59_spill] sm:$0xff] %v5415_v18  ;;  %v1393_v2 = vadd.f32 %v5431_v41, %v1392_v54  ;;  %v5437_v39 = vadd.f32 %v4870_v10, %v1590_v1  ;;  %v784_v44 = vmul.f32 %v4855_v61, %v714_v12  ;;  %v1591_v51 = vmul.f32 %v4855_v61, %v1527_v38 }
 0x136   :  { %v5388_v48 = vpop.f32.mrb[45].mxu0  ;;  %v5390_v3 = vpop.f32.mrb[45].mxu1  ;;  %7211 = vst [vmem:[#allocation60_spill] sm:$0xff] %v5420_v55  ;;  %v601_v37 = vadd.f32 %v5431_v41, %v3986_v15  ;;  %v5447_v53 = vadd.f32 %v4870_v10, %v781_v56  ;;  %v5450_v54 = vadd.f32 %v4870_v10, %v1588_v36  ;;  %v782_v1 = vmul.f32 %v5455_v45, %v712_v32 }
 0x137   :  { %v3987_v26 = vpop.f32.mrb[46].mxu0  ;;  %v4055_v6 = vpop.f32.mrb[46].mxu1  ;;  %7212 = vst [vmem:[#allocation61_spill] sm:$0xff] %v5437_v39  ;;  %v1525_v61 = vmax.f32 %v1393_v2, 0.0  ;;  %v5465_v56 = vadd.f32 %v4870_v10, %v784_v44  ;;  %v5468_v36 = vadd.f32 %v4870_v10, %v1591_v51  ;;  %v5477_v2 = vld [vmem:[%s7045_s7] ss:$0 sm:$0xff]  ;;  %v1414_v10 = vadd.f32 %v5431_v41, %v5379_v62 }
 0x138   :  { %v595_v63 = vpop.f32.mrb[47].mxu0  ;;  %v5407_v19 = vpop.f32.mrb[47].mxu1  ;;  %7213 = vst [vmem:[#allocation62_spill] sm:$0xff] %v5447_v53  ;;  %7214 = vst [vmem:[#allocation63_spill] sm:$0xff] %v5450_v54  ;;  %v717_v20 = vmax.f32 %v601_v37, 0.0  ;;  %v5480_v38 = vadd.f32 %v5477_v2, %v782_v1  ;;  %v593_v32 = vadd.f32 %v5431_v41, %v5388_v48  ;;  %v1406_v54 = vadd.f32 %v5431_v41, %v5390_v3 }
 0x139   :  { %7215 = vst [vmem:[#allocation64_spill] sm:$0xff] %v5465_v56  ;;  %7216 = vst [vmem:[#allocation65_spill] sm:$0xff] %v5468_v36  ;;  %v1589_v44 = vmul.f32 %v5455_v45, %v1525_v61  ;;  %v1530_v1 = vmax.f32 %v1414_v10, 0.0  ;;  %v604_v61 = vadd.f32 %v5431_v41, %v3987_v26  ;;  %v1417_v39 = vadd.f32 %v5431_v41, %v4055_v6 }
 0x13a   :  { %7217 = vst [vmem:[#allocation66_spill] sm:$0xff] %v5480_v38  ;;  %v787_v37 = vmul.f32 %v5455_v45, %v717_v20  ;;  %v715_v51 = vmax.f32 %v593_v32, 0.0  ;;  %v1528_v36 = vmax.f32 %v1406_v54, 0.0  ;;  %v596_v20 = vadd.f32 %v5431_v41, %v595_v63 }
 0x13b   :  { %v5493_v53 = vadd.f32 %v5477_v2, %v1589_v44  ;;  %v1594_v3 = vmul.f32 %v5455_v45, %v1530_v1  ;;  %v718_v56 = vmax.f32 %v604_v61, 0.0  ;;  %v1531_v44 = vmax.f32 %v1417_v39, 0.0 }
 0x13c   :  { %v5498_v62 = vadd.f32 %v5477_v2, %v787_v37  ;;  %v785_v26 = vmul.f32 %v5455_v45, %v715_v51  ;;  %v1592_v6 = vmul.f32 %v5455_v45, %v1528_v36  ;;  %v716_v37 = vmax.f32 %v596_v20, 0.0 }
 0x13d   :  { %v3990_v52 = vpop.f32.mrb[48].mxu0  ;;  %v5434_v57 = vpop.f32.mrb[48].mxu1  ;;  %7218 = vst [vmem:[#allocation67_spill] sm:$0xff] %v5493_v53  ;;  %v1409_v54 = vadd.f32 %v5431_v41, %v5407_v19  ;;  %v5515_v48 = vadd.f32 %v5477_v2, %v1594_v3  ;;  %v788_v39 = vmul.f32 %v5455_v45, %v718_v56  ;;  %v1595_v1 = vmul.f32 %v5455_v45, %v1531_v44 }
 0x13e   :  { %v5442_v14 = vpop.f32.mrb[49].mxu0  ;;  %v5444_v59 = vpop.f32.mrb[49].mxu1  ;;  %7219 = vst [vmem:[#allocation68_spill] sm:$0xff] %v5498_v62  ;;  %v617_v61 = vadd.f32 %v5431_v41, %v3990_v52  ;;  %v5525_v20 = vadd.f32 %v5477_v2, %v785_v26  ;;  %v5528_v19 = vadd.f32 %v5477_v2, %v1592_v6  ;;  %v786_v53 = vmul.f32 %v5455_v45, %v716_v37 }
 0x13f   :  { %v5458_v12 = vpop.f32.mrb[50].mxu0  ;;  %v5460_v15 = vpop.f32.mrb[50].mxu1  ;;  %7220 = vst [vmem:[#allocation69_spill] sm:$0xff] %v5515_v48  ;;  %v1529_v3 = vmax.f32 %v1409_v54, 0.0  ;;  %v5538_v44 = vadd.f32 %v5477_v2, %v788_v39  ;;  %v5541_v49 = vadd.f32 %v5477_v2, %v1595_v1  ;;  %v1430_v31 = vadd.f32 %v5431_v41, %v5434_v57 }
 0x140   :  { %v611_v18 = vpop.f32.mrb[51].mxu0  ;;  %v5470_v33 = vpop.f32.mrb[51].mxu1  ;;  %7221 = vst [vmem:[#allocation70_spill] sm:$0xff] %v5525_v20  ;;  %7222 = vst [vmem:[#allocation71_spill] sm:$0xff] %v5528_v19  ;;  %v721_v26 = vmax.f32 %v617_v61, 0.0  ;;  %v5546_v37 = vadd.f32 %v5477_v2, %v786_v53  ;;  %v609_v1 = vadd.f32 %v5431_v41, %v5442_v14  ;;  %v1422_v61 = vadd.f32 %v5431_v41, %v5444_v59 }
 0x141   :  { %7223 = vst [vmem:[#allocation72_spill] sm:$0xff] %v5538_v44  ;;  %7224 = vst [vmem:[#allocation73_spill] sm:$0xff] %v5541_v49  ;;  %v1593_v54 = vmul.f32 %v5455_v45, %v1529_v3  ;;  %v1534_v53 = vmax.f32 %v1430_v31, 0.0  ;;  %v620_v3 = vadd.f32 %v5431_v41, %v5458_v12  ;;  %v1433_v57 = vadd.f32 %v5431_v41, %v5460_v15 }
 0x142   :  { %7225 = vst [vmem:[#allocation74_spill] sm:$0xff] %v5546_v37  ;;  %v791_v39 = vmul.f32 %v5455_v45, %v721_v26  ;;  %v719_v26 = vmax.f32 %v609_v1, 0.0  ;;  %v1532_v49 = vmax.f32 %v1422_v61, 0.0  ;;  %v612_v14 = vadd.f32 %v5431_v41, %v611_v18 }
 0x143   :  { %v5559_v6 = vadd.f32 %v5477_v2, %v1593_v54  ;;  %v1598_v54 = vmul.f32 %v5455_v45, %v1534_v53  ;;  %v722_v12 = vmax.f32 %v620_v3, 0.0  ;;  %v1535_v19 = vmax.f32 %v1433_v57, 0.0 }
 0x144   :  { %v5566_v52 = vadd.f32 %v5477_v2, %v791_v39  ;;  %v789_v39 = vmul.f32 %v5455_v45, %v719_v26  ;;  %v1596_v1 = vmul.f32 %v5455_v45, %v1532_v49  ;;  %v720_v18 = vmax.f32 %v612_v14, 0.0 }
 0x145   :  { %v3994_v55 = vpop.f32.mrb[52].mxu0  ;;  %v5504_v10 = vpop.f32.mrb[52].mxu1  ;;  %7226 = vst [vmem:[#allocation75_spill] sm:$0xff] %v5559_v6  ;;  %v1425_v61 = vadd.f32 %v5431_v41, %v5470_v33  ;;  %v5589_v53 = vadd.f32 %v5477_v2, %v1598_v54  ;;  %v792_v3 = vmul.f32 %v5455_v45, %v722_v12  ;;  %v1599_v57 = vmul.f32 %v5455_v45, %v1535_v19 }
 0x146   :  { %v5510_v32 = vpop.f32.mrb[53].mxu0  ;;  %v5512_v63 = vpop.f32.mrb[53].mxu1  ;;  %7227 = vst [vmem:[#allocation76_spill] sm:$0xff] %v5566_v52  ;;  %v633_v31 = vadd.f32 %v5431_v41, %v3994_v55  ;;  %v5599_v14 = vadd.f32 %v5477_v2, %v789_v39  ;;  %v5602_v33 = vadd.f32 %v5477_v2, %v1596_v1  ;;  %v790_v6 = vmul.f32 %v5455_v45, %v720_v18 }
 0x147   :  { %v5520_v51 = vpop.f32.mrb[54].mxu0  ;;  %v5522_v36 = vpop.f32.mrb[54].mxu1  ;;  %7228 = vst [vmem:[#allocation77_spill] sm:$0xff] %v5589_v53  ;;  %v1533_v54 = vmax.f32 %v1425_v61, 0.0  ;;  %v5608_v19 = vadd.f32 %v5477_v2, %v792_v3  ;;  %v5611_v55 = vadd.f32 %v5477_v2, %v1599_v57  ;;  %v1446_v18 = vadd.f32 %v5431_v41, %v5504_v10 }
 0x148   :  { %v5531_v38 = vpop.f32.mrb[55].mxu0  ;;  %v5533_v56 = vpop.f32.mrb[55].mxu1  ;;  %7229 = vst [vmem:[#allocation78_spill] sm:$0xff] %v5599_v14  ;;  %7230 = vst [vmem:[#allocation79_spill] sm:$0xff] %v5602_v33  ;;  %v725_v37 = vmax.f32 %v633_v31, 0.0  ;;  %v5616_v21 = vadd.f32 %v5477_v2, %v790_v6  ;;  %v625_v57 = vadd.f32 %v5431_v41, %v5510_v32  ;;  %v1438_v31 = vadd.f32 %v5431_v41, %v5512_v63 }
 0x149   :  { %7231 = vst [vmem:[#allocation80_spill] sm:$0xff] %v5608_v19  ;;  %7232 = vst [vmem:[#allocation81_spill] sm:$0xff] %v5611_v55  ;;  %v1597_v1 = vmul.f32 %v5455_v45, %v1533_v54  ;;  %v1538_v6 = vmax.f32 %v1446_v18, 0.0  ;;  %v636_v54 = vadd.f32 %v5431_v41, %v5520_v51  ;;  %v1449_v10 = vadd.f32 %v5431_v41, %v5522_v36 }
 0x14a   :  { %7233 = vst [vmem:[#allocation82_spill] sm:$0xff] %v5616_v21  ;;  %v795_v3 = vmul.f32 %v5455_v45, %v725_v37  ;;  %v723_v32 = vmax.f32 %v625_v57, 0.0  ;;  %v1536_v55 = vmax.f32 %v1438_v31, 0.0  ;;  %v628_v63 = vadd.f32 %v5431_v41, %v5531_v38 }
 0x14b   :  { %v5629_v39 = vadd.f32 %v5477_v2, %v1597_v1  ;;  %v1602_v36 = vmul.f32 %v5455_v45, %v1538_v6  ;;  %v726_v19 = vmax.f32 %v636_v54, 0.0  ;;  %v1539_v33 = vmax.f32 %v1449_v10, 0.0 }
 0x14c   :  { %v5640_v37 = vadd.f32 %v5477_v2, %v795_v3  ;;  %v793_v57 = vmul.f32 %v5455_v45, %v723_v32  ;;  %v1600_v31 = vmul.f32 %v5455_v45, %v1536_v55  ;;  %v724_v38 = vmax.f32 %v628_v63, 0.0 }
 0x14d   :  { %v5569_v44 = vpop.f32.mrb[56].mxu0  ;;  %v5571_v59 = vpop.f32.mrb[56].mxu1  ;;  %7234 = vst [vmem:[#allocation83_spill] sm:$0xff] %v5629_v39  ;;  %v1441_v53 = vadd.f32 %v5431_v41, %v5533_v56  ;;  %v5664_v6 = vadd.f32 %v5477_v2, %v1602_v36  ;;  %v796_v54 = vmul.f32 %v5455_v45, %v726_v19  ;;  %v1603_v10 = vmul.f32 %v5455_v45, %v1539_v33 }
 0x14e   :  { %v5576_v20 = vpop.f32.mrb[57].mxu0  ;;  %v5578_v15 = vpop.f32.mrb[57].mxu1  ;;  %7235 = vst [vmem:[#allocation84_spill] sm:$0xff] %v5640_v37  ;;  %v649_v32 = vadd.f32 %v5431_v41, %v5569_v44  ;;  %v5671_v55 = vadd.f32 %v5477_v2, %v793_v57  ;;  %v5674_v63 = vadd.f32 %v5477_v2, %v1600_v31  ;;  %v794_v56 = vmul.f32 %v5455_v45, %v724_v38 }
 0x14f   :  { %v5584_v48 = vpop.f32.mrb[58].mxu0  ;;  %v5586_v62 = vpop.f32.mrb[58].mxu1  ;;  %7236 = vst [vmem:[#allocation85_spill] sm:$0xff] %v5664_v6  ;;  %v1537_v51 = vmax.f32 %v1441_v53, 0.0  ;;  %v5680_v39 = vadd.f32 %v5477_v2, %v796_v54  ;;  %v5683_v33 = vadd.f32 %v5477_v2, %v1603_v10  ;;  %v1462_v53 = vadd.f32 %v5431_v41, %v5571_v59 }
 0x150   :  { %v5594_v26 = vpop.f32.mrb[59].mxu0  ;;  %v5596_v49 = vpop.f32.mrb[59].mxu1  ;;  %7237 = vst [vmem:[#allocation86_spill] sm:$0xff] %v5671_v55  ;;  %7238 = vst [vmem:[#allocation87_spill] sm:$0xff] %v5674_v63  ;;  %v729_v19 = vmax.f32 %v649_v32, 0.0  ;;  %v5688_v57 = vadd.f32 %v5477_v2, %v794_v56  ;;  %v641_v10 = vadd.f32 %v5431_v41, %v5576_v20  ;;  %v1454_v32 = vadd.f32 %v5431_v41, %v5578_v15 }
 0x151   :  { %7239 = vst [vmem:[#allocation88_spill] sm:$0xff] %v5680_v39  ;;  %7240 = vst [vmem:[#allocation89_spill] sm:$0xff] %v5683_v33  ;;  %v1601_v31 = vmul.f32 %v5455_v45, %v1537_v51  ;;  %v1542_v36 = vmax.f32 %v1462_v53, 0.0  ;;  %v652_v59 = vadd.f32 %v5431_v41, %v5584_v48  ;;  %v1457_v21 = vadd.f32 %v5431_v41, %v5596_v49 }
 0x152   :  { %7241 = vst [vmem:[#allocation90_spill] sm:$0xff] %v5688_v57  ;;  %v799_v54 = vmul.f32 %v5455_v45, %v729_v19  ;;  %v1465_v19 = vadd.f32 %v5431_v41, %v5586_v62  ;;  %v727_v33 = vmax.f32 %v641_v10, 0.0  ;;  %v1540_v39 = vmax.f32 %v1454_v32, 0.0 }
 0x153   :  { %v5705_v51 = vadd.f32 %v5477_v2, %v1601_v31  ;;  %v644_v31 = vadd.f32 %v5431_v41, %v5594_v26  ;;  %v1606_v62 = vmul.f32 %v5455_v45, %v1542_v36  ;;  %v730_v55 = vmax.f32 %v652_v59, 0.0 }
 0x154   :  { %v5716_v15 = vadd.f32 %v5477_v2, %v799_v54  ;;  %v1543_v6 = vmax.f32 %v1465_v19, 0.0  ;;  %v797_v10 = vmul.f32 %v5455_v45, %v727_v33  ;;  %v1604_v32 = vmul.f32 %v5455_v45, %v1540_v39 }
 0x155   :  { %v5635_v12 = vpop.f32.mrb[60].mxu0  ;;  %v5637_v61 = vpop.f32.mrb[60].mxu1  ;;  %7242 = vst [vmem:[#allocation91_spill] sm:$0xff] %v5705_v51  ;;  %v728_v26 = vmax.f32 %v644_v31, 0.0  ;;  %v5736_v7 = vadd.f32 %v5477_v2, %v1606_v62  ;;  %v800_v48 = vmul.f32 %v5455_v45, %v730_v55  ;;  %v1541_v31 = vmax.f32 %v1457_v21, 0.0 }
 0x156   :  { %v5644_v1 = vpop.f32.mrb[61].mxu0  ;;  %v5646_v18 = vpop.f32.mrb[61].mxu1  ;;  %7243 = vst [vmem:[#allocation92_spill] sm:$0xff] %v5716_v15  ;;  %v1607_v36 = vmul.f32 %v5455_v45, %v1543_v6  ;;  %v665_v59 = vadd.f32 %v5431_v41, %v5635_v12  ;;  %v5743_v19 = vadd.f32 %v5477_v2, %v797_v10  ;;  %v5746_v33 = vadd.f32 %v5477_v2, %v1604_v32 }
 0x157   :  { %v5651_v14 = vpop.f32.mrb[62].mxu0  ;;  %v5653_v3 = vpop.f32.mrb[62].mxu1  ;;  %7244 = vst [vmem:[#allocation93_spill] sm:$0xff] %v5736_v7  ;;  %v798_v39 = vmul.f32 %v5455_v45, %v728_v26  ;;  %v5752_v62 = vadd.f32 %v5477_v2, %v800_v48  ;;  %v1605_v32 = vmul.f32 %v5455_v45, %v1541_v31  ;;  %v1478_v21 = vadd.f32 %v5431_v41, %v5637_v61 }
 0x158   :  { %v5659_v52 = vpop.f32.mrb[63].mxu0  ;;  %v5661_v8 = vpop.f32.mrb[63].mxu1  ;;  %7245 = vst [vmem:[#allocation94_spill] sm:$0xff] %v5743_v19  ;;  %7246 = vst [vmem:[#allocation95_spill] sm:$0xff] %v5746_v33  ;;  %v5755_v6 = vadd.f32 %v5477_v2, %v1607_v36  ;;  %v733_v55 = vmax.f32 %v665_v59, 0.0  ;;  %v657_v59 = vadd.f32 %v5431_v41, %v5644_v1  ;;  %v668_v19 = vadd.f32 %v5431_v41, %v5651_v14 }
 0x159   :  { %7247 = vst [vmem:[#allocation96_spill] sm:$0xff] %v5752_v62  ;;  %v5760_v10 = vadd.f32 %v5477_v2, %v798_v39  ;;  %v1470_v39 = vadd.f32 %v5431_v41, %v5646_v18  ;;  %v5781_v61 = vadd.f32 %v5477_v2, %v1605_v32  ;;  %v1546_v33 = vmax.f32 %v1478_v21, 0.0 }
 0x15a   :  { %7248 = vst [vmem:[#allocation97_spill] sm:$0xff] %v5755_v6  ;;  %v803_v36 = vmul.f32 %v5455_v45, %v733_v55  ;;  %v1481_v55 = vadd.f32 %v5431_v41, %v5653_v3  ;;  %v731_v6 = vmax.f32 %v657_v59, 0.0  ;;  %v660_v32 = vadd.f32 %v5431_v41, %v5659_v52 }
 0x15b   :  { %7249 = vst [vmem:[#allocation98_spill] sm:$0xff] %v5760_v10  ;;  %7250 = vst [vmem:[#allocation99_spill] sm:$0xff] %v5781_v61  ;;  %v1544_v62 = vmax.f32 %v1470_v39, 0.0  ;;  %v1610_v3 = vmul.f32 %v5455_v45, %v1546_v33  ;;  %v734_v15 = vmax.f32 %v668_v19, 0.0  ;;  %v1473_v39 = vadd.f32 %v5431_v41, %v5661_v8 }
 0x15c   :  { %v5792_v18 = vadd.f32 %v5477_v2, %v803_v36  ;;  %v1547_v51 = vmax.f32 %v1481_v55, 0.0  ;;  %v801_v57 = vmul.f32 %v5455_v45, %v731_v6  ;;  %v732_v59 = vmax.f32 %v660_v32, 0.0 }
 0x15d   :  { %v5700_v44 = vpop.f32.mrb[64].mxu0  ;;  %v5702_v56 = vpop.f32.mrb[64].mxu1  ;;  %v1608_v36 = vmul.f32 %v5455_v45, %v1544_v62  ;;  %v5808_v52 = vadd.f32 %v5477_v2, %v1610_v3  ;;  %v804_v60 = vmul.f32 %v5455_v45, %v734_v15  ;;  %v1545_v55 = vmax.f32 %v1473_v39, 0.0 }
 0x15e   :  { %v5711_v38 = vpop.f32.mrb[65].mxu0  ;;  %v5713_v20 = vpop.f32.mrb[65].mxu1  ;;  %7251 = vst [vmem:[#allocation100_spill] sm:$0xff] %v5792_v18  ;;  %v1611_v11 = vmul.f32 %v5455_v45, %v1547_v51  ;;  %v2103_v33 = vadd.f32 %v5431_v41, %v5700_v44  ;;  %v5815_v19 = vadd.f32 %v5477_v2, %v801_v57  ;;  %v802_v62 = vmul.f32 %v5455_v45, %v732_v59 }
 0x15f   :  { %v5720_v63 = vpop.f32.mrb[66].mxu0  ;;  %v5722_v53 = vpop.f32.mrb[66].mxu1  ;;  %7252 = vst [vmem:[#allocation101_spill] sm:$0xff] %v5808_v52  ;;  %v5818_v6 = vadd.f32 %v5477_v2, %v1608_v36  ;;  %v5824_v32 = vadd.f32 %v5477_v2, %v804_v60  ;;  %v1609_v59 = vmul.f32 %v5455_v45, %v1545_v55  ;;  %v2904_v60 = vadd.f32 %v5431_v41, %v5702_v56 }
 0x160   :  { %v5727_v37 = vpop.f32.mrb[67].mxu0  ;;  %v5729_v54 = vpop.f32.mrb[67].mxu1  ;;  %7253 = vst [vmem:[#allocation102_spill] sm:$0xff] %v5815_v19  ;;  %v5827_v51 = vadd.f32 %v5477_v2, %v1611_v11  ;;  %v2351_v15 = vmax.f32 %v2103_v33, 0.0  ;;  %v5836_v36 = vadd.f32 %v5477_v2, %v802_v62  ;;  %v2095_v3 = vadd.f32 %v5431_v41, %v5711_v38 }
 0x161   :  { %7254 = vst [vmem:[#allocation103_spill] sm:$0xff] %v5818_v6  ;;  %7255 = vst [vmem:[#allocation104_spill] sm:$0xff] %v5824_v32  ;;  %v5855_v55 = vadd.f32 %v5477_v2, %v1609_v59  ;;  %v3152_v56 = vmax.f32 %v2904_v60, 0.0  ;;  %v2896_v6 = vadd.f32 %v5431_v41, %v5713_v20  ;;  %v2106_v33 = vadd.f32 %v5431_v41, %v5720_v63 }
 0x162   :  { %7256 = vst [vmem:[#allocation105_spill] sm:$0xff] %v5827_v51  ;;  %7257 = vst [vmem:[#allocation106_spill] sm:$0xff] %v5836_v36  ;;  %v2415_v8 = vmul.f32 %v5455_v45, %v2351_v15  ;;  %v2349_v32 = vmax.f32 %v2095_v3, 0.0  ;;  %v2907_v19 = vadd.f32 %v5431_v41, %v5722_v53  ;;  %v2098_v59 = vadd.f32 %v5431_v41, %v5727_v37 }
 0x163   :  { %7258 = vst [vmem:[#allocation107_spill] sm:$0xff] %v5855_v55  ;;  %v3216_v20 = vmul.f32 %v5455_v45, %v3152_v56  ;;  %v3150_v52 = vmax.f32 %v2896_v6, 0.0  ;;  %v2352_v63 = vmax.f32 %v2106_v33, 0.0 }
 0x164   :  { %v2479_v38 = vadd.f32 %v5477_v2, %v2415_v8  ;;  %v2413_v18 = vmul.f32 %v5455_v45, %v2349_v32  ;;  %v3153_v61 = vmax.f32 %v2907_v19, 0.0  ;;  %v2350_v10 = vmax.f32 %v2098_v59, 0.0 }
 0x165   :  { %v5765_v26 = vpop.f32.mrb[68].mxu0  ;;  %v5767_v49 = vpop.f32.mrb[68].mxu1  ;;  %v2899_v8 = vadd.f32 %v5431_v41, %v5729_v54  ;;  %v3280_v3 = vadd.f32 %v5477_v2, %v3216_v20  ;;  %v3214_v53 = vmul.f32 %v5455_v45, %v3150_v52  ;;  %v2416_v37 = vmul.f32 %v5455_v45, %v2352_v63 }
 0x166   :  { %v5776_v12 = vpop.f32.mrb[69].mxu0  ;;  %v5778_v31 = vpop.f32.mrb[69].mxu1  ;;  %v2119_v60 = vadd.f32 %v5431_v41, %v5765_v26  ;;  %v2477_v56 = vadd.f32 %v5477_v2, %v2413_v18  ;;  %v3217_v6 = vmul.f32 %v5455_v45, %v3153_v61  ;;  %v2414_v32 = vmul.f32 %v5455_v45, %v2350_v10 }
 0x167   :  { %v5787_v48 = vpop.f32.mrb[70].mxu0  ;;  %v5789_v1 = vpop.f32.mrb[70].mxu1  ;;  %v3151_v19 = vmax.f32 %v2899_v8, 0.0  ;;  %v3344_v54 = vmax.f32 %v2479_v38, %v3280_v3  ;;  %v3278_v20 = vadd.f32 %v5477_v2, %v3214_v53  ;;  %v2480_v52 = vadd.f32 %v5477_v2, %v2416_v37 }
 0x168   :  { %v5796_v7 = vpop.f32.mrb[71].mxu0  ;;  %v5798_v21 = vpop.f32.mrb[71].mxu1  ;;  %v2355_v63 = vmax.f32 %v2119_v60, 0.0  ;;  %v3281_v18 = vadd.f32 %v5477_v2, %v3217_v6  ;;  %v2478_v61 = vadd.f32 %v5477_v2, %v2414_v32  ;;  %v2920_v8 = vadd.f32 %v5431_v41, %v5767_v49 }
 0x169   :  { %v3215_v10 = vmul.f32 %v5455_v45, %v3151_v19  ;;  %v7260_v60 = vmax.f32 %v4883_v23, %v4886_v24  ;;  %v3342_v53 = vmax.f32 %v2477_v56, %v3278_v20  ;;  %v2111_v6 = vadd.f32 %v5431_v41, %v5776_v12 }
 0x16a   :  { %v2419_v37 = vmul.f32 %v5455_v45, %v2355_v63  ;;  %v3345_v4 = vmax.f32 %v2480_v52, %v3281_v18  ;;  %v3156_v58 = vmax.f32 %v2920_v8, 0.0  ;;  %v7261_v23 = vmax.f32 %v4891_v27, %v4894_v28 }
 0x16b   :  { %v3408_v3 = vmax.f32 %v7260_v60, %v3344_v54  ;;  %v3279_v49 = vadd.f32 %v5477_v2, %v3215_v10  ;;  %v2353_v56 = vmax.f32 %v2111_v6, 0.0  ;;  %v2122_v54 = vadd.f32 %v5431_v41, %v5787_v48 }
 0x16c   :  { %v3406_v24 = vmax.f32 %v7261_v23, %v3342_v53  ;;  %v2483_v12 = vadd.f32 %v5477_v2, %v2419_v37  ;;  %v7262_v20 = vmax.f32 %v4901_v34, %v4904_v35  ;;  %v3220_v63 = vmul.f32 %v5455_v45, %v3156_v58 }
 0x16d   :  { %v5829_v44 = vpop.f32.mrb[72].mxu0  ;;  %v5831_v57 = vpop.f32.mrb[72].mxu1  ;;  %3473 = vst.msk [vmem:[%s7046_s8 + $0x10] sm:$0xff] %vm3470_vm3, %v3408_v3  ;;  %v2417_v27 = vmul.f32 %v5455_v45, %v2353_v56  ;;  %v2356_v28 = vmax.f32 %v2122_v54, 0.0  ;;  %v2923_v10 = vadd.f32 %v5431_v41, %v5789_v1  ;;  %v2114_v48 = vadd.f32 %v5431_v41, %v5796_v7 }
 0x16e   :  { %v5841_v39 = vpop.f32.mrb[73].mxu0  ;;  %v5843_v11 = vpop.f32.mrb[73].mxu1  ;;  %v3409_v52 = vmax.f32 %v7262_v20, %v3345_v4  ;;  %3471 = vst.msk [vmem:[%s7046_s8] sm:$0xff] %vm3470_vm3, %v3406_v24  ;;  %v7263_v34 = vmax.f32 %v4916_v42, %v4919_v43  ;;  %v3284_v58 = vadd.f32 %v5477_v2, %v3220_v63  ;;  %v2135_v6 = vadd.f32 %v5431_v41, %v5829_v44 }
 0x16f   :  { %v5850_v62 = vpop.f32.mrb[74].mxu0  ;;  %v5852_v14 = vpop.f32.mrb[74].mxu1  ;;  %v2481_v7 = vadd.f32 %v5477_v2, %v2417_v27  ;;  %v3157_v60 = vmax.f32 %v2923_v10, 0.0  ;;  %v2354_v3 = vmax.f32 %v2114_v48, 0.0  ;;  %v2936_v20 = vadd.f32 %v5431_v41, %v5831_v57 }
 0x170   :  { %v5861_v51 = vpop.f32.mrb[75].mxu0  ;;  %v5863_v15 = vpop.f32.mrb[75].mxu1  ;;  %3474 = vst.msk [vmem:[%s7046_s8 + $0x18] sm:$0xff] %vm3470_vm3, %v3409_v52  ;;  %v3348_v43 = vmax.f32 %v2483_v12, %v3284_v58  ;;  %v7264_v44 = vmax.f32 %v4945_v5, %v4950_v9  ;;  %v2359_v27 = vmax.f32 %v2135_v6, 0.0  ;;  %v2127_v57 = vadd.f32 %v5431_v41, %v5841_v39 }
 0x171   :  { %v3221_v56 = vmul.f32 %v5455_v45, %v3157_v60  ;;  %v2418_v54 = vmul.f32 %v5455_v45, %v2354_v3  ;;  %v3160_v48 = vmax.f32 %v2936_v20, 0.0  ;;  %v7265_v5 = vmax.f32 %v4955_v16, %v4958_v17 }
 0x172   :  { %v2928_v58 = vadd.f32 %v5431_v41, %v5843_v11  ;;  %v2357_v39 = vmax.f32 %v2127_v57, 0.0  ;;  %v2939_v60 = vadd.f32 %v5431_v41, %v5852_v14  ;;  %v7267_v14 = vmax.f32 %v4986_v40, %v4992_v50 }
 0x173   :  { %v2482_v10 = vadd.f32 %v5477_v2, %v2418_v54  ;;  %v2931_v50 = vadd.f32 %v5431_v41, %v5863_v15  ;;  %v7268_v15 = vmax.f32 %v5007_v0, %v5014_v13 }
 0x175   :  { %v5884_v33 = vpop.f32.mrb[76].mxu0  ;;  %v5886_v59 = vpop.f32.mrb[76].mxu1 }
 0x176   :  { %v5890_v55 = vpop.f32.mrb[77].mxu0  ;;  %v5892_v26 = vpop.f32.mrb[77].mxu1  ;;  %v2151_v57 = vadd.f32 %v5431_v41, %v5884_v33 }
 0x177   :  { %v5899_v36 = vpop.f32.mrb[78].mxu0  ;;  %v5901_v38 = vpop.f32.mrb[78].mxu1  ;;  %v2143_v33 = vadd.f32 %v5431_v41, %v5890_v55 }
 0x178   :  { %7259 = vst [vmem:[#allocation108_spill] sm:$0xff] %v5901_v38  ;;  %v5909_v32 = vpop.f32.mrb[79].mxu0  ;;  %v5911_v19 = vpop.f32.mrb[79].mxu1  ;;  %v2912_v38 = vadd.f32 %v5431_v41, %v5778_v31  ;;  %v3343_v31 = vmax.f32 %v2478_v61, %v3279_v49  ;;  %v2915_v61 = vadd.f32 %v5431_v41, %v5798_v21 }
 0x17a   :  { %v3154_v18 = vmax.f32 %v2912_v38, 0.0  ;;  %v3407_v35 = vmax.f32 %v7263_v34, %v3343_v31  ;;  %v2420_v38 = vmul.f32 %v5455_v45, %v2356_v28  ;;  %v3155_v37 = vmax.f32 %v2915_v61, 0.0 }
 0x17b   :  { %v3412_v31 = vmax.f32 %v7264_v44, %v3348_v43  ;;  %v3285_v28 = vadd.f32 %v5477_v2, %v3221_v56  ;;  %v3224_v61 = vmul.f32 %v5455_v45, %v3160_v48  ;;  %v7266_v43 = vmax.f32 %v4971_v29, %v4974_v30 }
 0x17c   :  { %v3218_v4 = vmul.f32 %v5455_v45, %v3154_v18  ;;  %3472 = vst.msk [vmem:[%s7046_s8 + $0x8] sm:$0xff] %vm3470_vm3, %v3407_v35  ;;  %v2484_v24 = vadd.f32 %v5477_v2, %v2420_v38  ;;  %v3219_v18 = vmul.f32 %v5455_v45, %v3155_v37  ;;  %v2423_v35 = vmul.f32 %v5455_v45, %v2359_v27 }
 0x17d   :  { %v5950_v1 = vpop.f32.mrb[80].mxu0  ;;  %v5952_v8 = vpop.f32.mrb[80].mxu1  ;;  %3477 = vst.msk [vmem:[%s7046_s8 + $0x30] sm:$0xff] %vm3470_vm3, %v3412_v31  ;;  %v3158_v38 = vmax.f32 %v2928_v58, 0.0  ;;  %v2421_v37 = vmul.f32 %v5455_v45, %v2357_v39  ;;  %v3161_v44 = vmax.f32 %v2939_v60, 0.0  ;;  %v2130_v29 = vadd.f32 %v5431_v41, %v5861_v51 }
 0x17e   :  { %v5956_v53 = vpop.f32.mrb[81].mxu0  ;;  %v5958_v42 = vpop.f32.mrb[81].mxu1  ;;  %v3282_v21 = vadd.f32 %v5477_v2, %v3218_v4  ;;  %v3283_v34 = vadd.f32 %v5477_v2, %v3219_v18  ;;  %v3349_v4 = vmax.f32 %v2484_v24, %v3285_v28  ;;  %v2487_v17 = vadd.f32 %v5477_v2, %v2423_v35 }
 0x17f   :  { %v5967_v49 = vpop.f32.mrb[82].mxu0  ;;  %v5969_v23 = vpop.f32.mrb[82].mxu1  ;;  %v3222_v20 = vmul.f32 %v5455_v45, %v3158_v38  ;;  %v2485_v18 = vadd.f32 %v5477_v2, %v2421_v37  ;;  %v2358_v48 = vmax.f32 %v2130_v29, 0.0  ;;  %v2952_v35 = vadd.f32 %v5431_v41, %v5886_v59 }
 0x180   :  { %v5976_v12 = vpop.f32.mrb[83].mxu0  ;;  %v5978_v52 = vpop.f32.mrb[83].mxu1  ;;  %v3346_v63 = vmax.f32 %v2481_v7, %v3282_v21  ;;  %v2138_v7 = vadd.f32 %v5431_v41, %v5850_v62  ;;  %v3347_v16 = vmax.f32 %v2482_v10, %v3283_v34  ;;  %v3413_v62 = vmax.f32 %v7266_v43, %v3349_v4 }
 0x181   :  { %v3288_v21 = vadd.f32 %v5477_v2, %v3224_v61  ;;  %v3286_v28 = vadd.f32 %v5477_v2, %v3222_v20  ;;  %v3225_v10 = vmul.f32 %v5455_v45, %v3161_v44  ;;  %v3159_v34 = vmax.f32 %v2931_v50, 0.0  ;;  %v7271_v44 = vld [vmem:[#allocation108_spill] sm:$0xff] }
 0x182   :  { %v3410_v9 = vmax.f32 %v7265_v5, %v3346_v63  ;;  %v2360_v6 = vmax.f32 %v2138_v7, 0.0  ;;  %v3411_v54 = vmax.f32 %v7267_v14, %v3347_v16  ;;  %3478 = vst.msk [vmem:[%s7046_s8 + $0x38] sm:$0xff] %vm3470_vm3, %v3413_v62  ;;  %v2422_v61 = vmul.f32 %v5455_v45, %v2358_v48 }
 0x183   :  { %v3352_v63 = vmax.f32 %v2487_v17, %v3288_v21  ;;  %v3350_v58 = vmax.f32 %v2485_v18, %v3286_v28  ;;  %v3289_v4 = vadd.f32 %v5477_v2, %v3225_v10  ;;  %v2363_v39 = vmax.f32 %v2151_v57, 0.0 }
 0x184   :  { %3475 = vst.msk [vmem:[%s7046_s8 + $0x20] sm:$0xff] %vm3470_vm3, %v3410_v9  ;;  %v2424_v40 = vmul.f32 %v5455_v45, %v2360_v6  ;;  %3476 = vst.msk [vmem:[%s7046_s8 + $0x28] sm:$0xff] %vm3470_vm3, %v3411_v54  ;;  %v3223_v0 = vmul.f32 %v5455_v45, %v3159_v34  ;;  %v3164_v13 = vmax.f32 %v2952_v35, 0.0  ;;  %v2944_v59 = vadd.f32 %v5431_v41, %v5892_v26 }
 0x185   :  { %v6009_v11 = vpop.f32.mrb[84].mxu0  ;;  %v6011_v3 = vpop.f32.mrb[84].mxu1  ;;  %v3416_v5 = vmax.f32 %v7268_v15, %v3352_v63  ;;  %v7269_v7 = vmax.f32 %v5023_v22, %v5026_v25  ;;  %v2486_v38 = vadd.f32 %v5477_v2, %v2422_v61  ;;  %v2427_v60 = vmul.f32 %v5455_v45, %v2363_v39 }
 0x186   :  { %v6018_v24 = vpop.f32.mrb[85].mxu0  ;;  %v6020_v56 = vpop.f32.mrb[85].mxu1  ;;  %v2488_v9 = vadd.f32 %v5477_v2, %v2424_v40  ;;  %v3287_v21 = vadd.f32 %v5477_v2, %v3223_v0  ;;  %v3228_v55 = vmul.f32 %v5455_v45, %v3164_v13  ;;  %v2361_v37 = vmax.f32 %v2143_v33, 0.0 }
 0x187   :  { %v6028_v30 = vpop.f32.mrb[86].mxu0  ;;  %v6030_v31 = vpop.f32.mrb[86].mxu1  ;;  %3481 = vst.msk [vmem:[%s7046_s8 + $0x50] sm:$0xff] %vm3470_vm3, %v3416_v5  ;;  %v3414_v16 = vmax.f32 %v7269_v7, %v3350_v58  ;;  %v3162_v6 = vmax.f32 %v2944_v59, 0.0  ;;  %v7270_v22 = vmax.f32 %v5038_v46, %v5041_v47  ;;  %v2491_v54 = vadd.f32 %v5477_v2, %v2427_v60  ;;  %v7272_v5 = vld [vmem:[#allocation2_spill] sm:$0xff] }
 0x188   :  { %v6040_v27 = vpop.f32.mrb[87].mxu0  ;;  %v6042_v51 = vpop.f32.mrb[87].mxu1  ;;  %v3353_v17 = vmax.f32 %v2488_v9, %v3289_v4  ;;  %v2154_v20 = vadd.f32 %v5431_v41, %v5899_v36  ;;  %v2955_v29 = vadd.f32 %v5431_v41, %v7271_v44  ;;  %v3351_v40 = vmax.f32 %v2486_v38, %v3287_v21  ;;  %v7273_v9 = vld [vmem:[#allocation3_spill] sm:$0xff] }
 0x189   :  { %3479 = vst.msk [vmem:[%s7046_s8 + $0x40] sm:$0xff] %vm3470_vm3, %v3414_v16  ;;  %v3292_v50 = vadd.f32 %v5477_v2, %v3228_v55  ;;  %v2425_v28 = vmul.f32 %v5455_v45, %v2361_v37  ;;  %v3226_v46 = vmul.f32 %v5455_v45, %v3162_v6  ;;  %v2146_v57 = vadd.f32 %v5431_v41, %v5909_v32  ;;  %v7275_v32 = vld [vmem:[#allocation4_spill] sm:$0xff] }
 0x18a   :  { %v3417_v25 = vmax.f32 %v7270_v22, %v3353_v17  ;;  %v2364_v36 = vmax.f32 %v2154_v20, 0.0  ;;  %v3165_v48 = vmax.f32 %v2955_v29, 0.0  ;;  %v2947_v15 = vadd.f32 %v5431_v41, %v5911_v19  ;;  %v7276_v19 = vld [vmem:[#allocation5_spill] sm:$0xff] }
 0x18b   :  { %v7274_v34 = vmax.f32 %v7272_v5, %v7273_v9  ;;  %v3356_v58 = vmax.f32 %v2491_v54, %v3292_v50  ;;  %v2489_v4 = vadd.f32 %v5477_v2, %v2425_v28  ;;  %v3290_v61 = vadd.f32 %v5477_v2, %v3226_v46 }
 0x18c   :  { %3482 = vst.msk [vmem:[%s7046_s8 + $0x58] sm:$0xff] %vm3470_vm3, %v3417_v25  ;;  %v2428_v39 = vmul.f32 %v5455_v45, %v2364_v36  ;;  %v3229_v0 = vmul.f32 %v5455_v45, %v3165_v48  ;;  %v2362_v13 = vmax.f32 %v2146_v57, 0.0  ;;  %v3163_v33 = vmax.f32 %v2947_v15, 0.0  ;;  %v7279_v25 = vld [vmem:[#allocation7_spill] sm:$0xff] }
 0x18d   :  { %v6074_v43 = vpop.f32.mrb[88].mxu0  ;;  %v6076_v62 = vpop.f32.mrb[88].mxu1  ;;  %v3415_v35 = vmax.f32 %v7274_v34, %v3351_v40  ;;  %v7277_v59 = vmax.f32 %v7275_v32, %v7276_v19  ;;  %v3354_v16 = vmax.f32 %v2489_v4, %v3290_v61  ;;  %v2167_v17 = vadd.f32 %v5431_v41, %v5950_v1  ;;  %v7278_v1 = vld [vmem:[#allocation6_spill] sm:$0xff]  ;;  %v7282_v4 = vld [vmem:[#allocation9_spill] sm:$0xff] }
 0x18e   :  { %v6080_v26 = vpop.f32.mrb[89].mxu0  ;;  %v6082_v14 = vpop.f32.mrb[89].mxu1  ;;  %v2968_v38 = vadd.f32 %v5431_v41, %v5952_v8  ;;  %v2492_v60 = vadd.f32 %v5477_v2, %v2428_v39  ;;  %v3293_v21 = vadd.f32 %v5477_v2, %v3229_v0  ;;  %v2426_v55 = vmul.f32 %v5455_v45, %v2362_v13 }
 0x18f   :  { %v6096_v63 = vpop.f32.mrb[90].mxu0  ;;  %v6098_v18 = vpop.f32.mrb[90].mxu1  ;;  %3480 = vst.msk [vmem:[%s7046_s8 + $0x48] sm:$0xff] %vm3470_vm3, %v3415_v35  ;;  %v3420_v7 = vmax.f32 %v7277_v59, %v3356_v58  ;;  %v3227_v37 = vmul.f32 %v5455_v45, %v3163_v33  ;;  %v7280_v8 = vmax.f32 %v7278_v1, %v7279_v25  ;;  %v2367_v20 = vmax.f32 %v2167_v17, 0.0  ;;  %v7281_v58 = vld [vmem:[#allocation8_spill] sm:$0xff] }
 0x190   :  { %v6103_v47 = vpop.f32.mrb[91].mxu0  ;;  %v6105_v10 = vpop.f32.mrb[91].mxu1  ;;  %v3168_v44 = vmax.f32 %v2968_v38, 0.0  ;;  %v2159_v29 = vadd.f32 %v5431_v41, %v5956_v53  ;;  %v3357_v28 = vmax.f32 %v2492_v60, %v3293_v21  ;;  %v2490_v46 = vadd.f32 %v5477_v2, %v2426_v55 }
 0x191   :  { %3485 = vst.msk [vmem:[%s7046_s8 + $0x70] sm:$0xff] %vm3470_vm3, %v3420_v7  ;;  %v3418_v54 = vmax.f32 %v7280_v8, %v3354_v16  ;;  %v3291_v36 = vadd.f32 %v5477_v2, %v3227_v37  ;;  %v2960_v48 = vadd.f32 %v5431_v41, %v5958_v42  ;;  %v2431_v53 = vmul.f32 %v5455_v45, %v2367_v20  ;;  %v7284_v7 = vld [vmem:[#allocation10_spill] sm:$0xff]  ;;  %v7285_v16 = vld [vmem:[#allocation11_spill] sm:$0xff] }
 0x192   :  { %v3232_v5 = vmul.f32 %v5455_v45, %v3168_v44  ;;  %v2365_v9 = vmax.f32 %v2159_v29, 0.0  ;;  %v2170_v34 = vadd.f32 %v5431_v41, %v5967_v49  ;;  %v7283_v61 = vmax.f32 %v7281_v58, %v7282_v4 }
 0x193   :  { %3483 = vst.msk [vmem:[%s7046_s8 + $0x60] sm:$0xff] %vm3470_vm3, %v3418_v54  ;;  %v3355_v0 = vmax.f32 %v2490_v46, %v3291_v36  ;;  %v3166_v13 = vmax.f32 %v2960_v48, 0.0  ;;  %v2971_v33 = vadd.f32 %v5431_v41, %v5969_v23  ;;  %v2495_v32 = vadd.f32 %v5477_v2, %v2431_v53  ;;  %v7288_v46 = vld [vmem:[#allocation13_spill] sm:$0xff] }
 0x194   :  { %v3421_v39 = vmax.f32 %v7283_v61, %v3357_v28  ;;  %v3296_v19 = vadd.f32 %v5477_v2, %v3232_v5  ;;  %v2429_v59 = vmul.f32 %v5455_v45, %v2365_v9  ;;  %v2368_v49 = vmax.f32 %v2170_v34, 0.0  ;;  %v7287_v28 = vld [vmem:[#allocation12_spill] sm:$0xff] }
 0x195   :  { %v6137_v6 = vpop.f32.mrb[92].mxu0  ;;  %v6139_v22 = vpop.f32.mrb[92].mxu1  ;;  %v7286_v17 = vmax.f32 %v7284_v7, %v7285_v16  ;;  %v3230_v60 = vmul.f32 %v5455_v45, %v3166_v13  ;;  %v3169_v21 = vmax.f32 %v2971_v33, 0.0  ;;  %v2162_v23 = vadd.f32 %v5431_v41, %v5976_v12  ;;  %v6232_v13 = vld [vmem:[%s7043_s5] ss:$0 sm:$0xff]  ;;  %v7291_v7 = vld [vmem:[#allocation15_spill] sm:$0xff] }
 0x196   :  { %v6150_v40 = vpop.f32.mrb[93].mxu0  ;;  %v6152_v50 = vpop.f32.mrb[93].mxu1  ;;  %3486 = vst.msk [vmem:[%s7046_s8 + $0x78] sm:$0xff] %vm3470_vm3, %v3421_v39  ;;  %v3360_v55 = vmax.f32 %v2495_v32, %v3296_v19  ;;  %v2493_v37 = vadd.f32 %v5477_v2, %v2429_v59  ;;  %v2432_v1 = vmul.f32 %v5455_v45, %v2368_v49  ;;  %v2963_v25 = vadd.f32 %v5431_v41, %v5978_v52  ;;  %v7290_v49 = vld [vmem:[#allocation14_spill] sm:$0xff] }
 0x197   :  { %v6158_v57 = vpop.f32.mrb[94].mxu0  ;;  %v6160_v15 = vpop.f32.mrb[94].mxu1  ;;  %v3419_v38 = vmax.f32 %v7286_v17, %v3355_v0  ;;  %v3294_v8 = vadd.f32 %v5477_v2, %v3230_v60  ;;  %v3233_v54 = vmul.f32 %v5455_v45, %v3169_v21  ;;  %v2366_v20 = vmax.f32 %v2162_v23, 0.0 }
 0x198   :  { %v6170_v35 = vpop.f32.mrb[95].mxu0  ;;  %v6172_v42 = vpop.f32.mrb[95].mxu1  ;;  %v2183_v12 = vadd.f32 %v5431_v41, %v6009_v11  ;;  %v7289_v52 = vmax.f32 %v7287_v28, %v7288_v46  ;;  %v2496_v48 = vadd.f32 %v5477_v2, %v2432_v1  ;;  %v3167_v53 = vmax.f32 %v2963_v25, 0.0  ;;  %v7293_v1 = vld [vmem:[#allocation16_spill] sm:$0xff]  ;;  %v7294_v25 = vld [vmem:[#allocation17_spill] sm:$0xff] }
 0x199   :  { %3484 = vst.msk [vmem:[%s7046_s8 + $0x68] sm:$0xff] %vm3470_vm3, %v3419_v38  ;;  %v2984_v5 = vadd.f32 %v5431_v41, %v6011_v3  ;;  %v3358_v58 = vmax.f32 %v2493_v37, %v3294_v8  ;;  %v3297_v11 = vadd.f32 %v5477_v2, %v3233_v54  ;;  %v2430_v4 = vmul.f32 %v5455_v45, %v2366_v20 }
 0x19a   :  { %v3424_v36 = vmax.f32 %v7289_v52, %v3360_v55  ;;  %v2371_v61 = vmax.f32 %v2183_v12, 0.0  ;;  %v3231_v41 = vmul.f32 %v5455_v45, %v3167_v53  ;;  %v2175_v33 = vadd.f32 %v6232_v13, %v6018_v24  ;;  %v6251_v24 = vld [vmem:[%s7044_s6] ss:$0 sm:$0xff] }
 0x19b   :  { %v3172_v3 = vmax.f32 %v2984_v5, 0.0  ;;  %v2976_v32 = vadd.f32 %v6232_v13, %v6020_v56  ;;  %v7292_v16 = vmax.f32 %v7290_v49, %v7291_v7  ;;  %v3361_v38 = vmax.f32 %v2496_v48, %v3297_v11  ;;  %v7297_v11 = vld [vmem:[#allocation19_spill] sm:$0xff] }
 0x19c   :  { %3489 = vst.msk [vmem:[%s7046_s8 + $0x90] sm:$0xff] %vm3470_vm3, %v3424_v36  ;;  %v2494_v60 = vadd.f32 %v5477_v2, %v2430_v4  ;;  %v2435_v21 = vmul.f32 %v5455_v45, %v2371_v61  ;;  %v3295_v23 = vadd.f32 %v5477_v2, %v3231_v41  ;;  %v2369_v55 = vmax.f32 %v2175_v33, 0.0 }
 0x19d   :  { %v6204_v44 = vpop.f32.mrb[96].mxu0  ;;  %v6206_v29 = vpop.f32.mrb[96].mxu1  ;;  %v3422_v17 = vmax.f32 %v7292_v16, %v3358_v58  ;;  %v3236_v56 = vmul.f32 %v6251_v24, %v3172_v3  ;;  %v3170_v37 = vmax.f32 %v2976_v32, 0.0  ;;  %v7295_v8 = vmax.f32 %v7293_v1, %v7294_v25  ;;  %v7296_v58 = vld [vmem:[#allocation18_spill] sm:$0xff] }
 0x19e   :  { %v6214_v9 = vpop.f32.mrb[97].mxu0  ;;  %v6216_v34 = vpop.f32.mrb[97].mxu1  ;;  %v2499_v54 = vadd.f32 %v5477_v2, %v2435_v21  ;;  %v2186_v20 = vadd.f32 %v6232_v13, %v6028_v30  ;;  %v2987_v12 = vadd.f32 %v6232_v13, %v6030_v31  ;;  %v3359_v28 = vmax.f32 %v2494_v60, %v3295_v23  ;;  %v6287_v3 = vld [vmem:[%s7045_s7] ss:$0 sm:$0xff]  ;;  %v7299_v21 = vld [vmem:[#allocation20_spill] sm:$0xff]  ;;  %v7300_v23 = vld [vmem:[#allocation21_spill] sm:$0xff] }
 0x19f   :  { %v6220_v39 = vpop.f32.mrb[98].mxu0  ;;  %v6222_v0 = vpop.f32.mrb[98].mxu1  ;;  %3487 = vst.msk [vmem:[%s7046_s8 + $0x80] sm:$0xff] %vm3470_vm3, %v3422_v17  ;;  %v3425_v45 = vmax.f32 %v7295_v8, %v3361_v38  ;;  %v3300_v46 = vadd.f32 %v5477_v2, %v3236_v56  ;;  %v2433_v52 = vmul.f32 %v6251_v24, %v2369_v55  ;;  %v3234_v36 = vmul.f32 %v6251_v24, %v3170_v37 }
 0x1a0   :  { %v6238_v19 = vpop.f32.mrb[99].mxu0  ;;  %v6240_v59 = vpop.f32.mrb[99].mxu1  ;;  %v2372_v48 = vmax.f32 %v2186_v20, 0.0  ;;  %v3173_v53 = vmax.f32 %v2987_v12, 0.0  ;;  %v2178_v30 = vadd.f32 %v6232_v13, %v6040_v27  ;;  %v2979_v31 = vadd.f32 %v6232_v13, %v6042_v51 }
 0x1a1   :  { %3490 = vst.msk [vmem:[%s7046_s8 + $0x98] sm:$0xff] %vm3470_vm3, %v3425_v45  ;;  %v7298_v4 = vmax.f32 %v7296_v58, %v7297_v11  ;;  %v3364_v41 = vmax.f32 %v2499_v54, %v3300_v46  ;;  %v2497_v33 = vadd.f32 %v6287_v3, %v2433_v52  ;;  %v3298_v27 = vadd.f32 %v6287_v3, %v3234_v36  ;;  %v7303_v46 = vld [vmem:[#allocation23_spill] sm:$0xff] }
 0x1a2   :  { %v2436_v49 = vmul.f32 %v6251_v24, %v2372_v48  ;;  %v3237_v7 = vmul.f32 %v6251_v24, %v3173_v53  ;;  %v2370_v16 = vmax.f32 %v2178_v30, 0.0  ;;  %v3171_v17 = vmax.f32 %v2979_v31, 0.0 }
 0x1a3   :  { %v3423_v61 = vmax.f32 %v7298_v4, %v3359_v28  ;;  %v7301_v56 = vmax.f32 %v7299_v21, %v7300_v23  ;;  %v3362_v37 = vmax.f32 %v2497_v33, %v3298_v27  ;;  %v2199_v1 = vadd.f32 %v6232_v13, %v6074_v43  ;;  %v7302_v43 = vld [vmem:[#allocation22_spill] sm:$0xff]  ;;  %v7305_v33 = vld [vmem:[#allocation24_spill] sm:$0xff]  ;;  %v7306_v27 = vld [vmem:[#allocation25_spill] sm:$0xff] }
 0x1a4   :  { %v3000_v25 = vadd.f32 %v6232_v13, %v6076_v62  ;;  %v2500_v54 = vadd.f32 %v6287_v3, %v2436_v49  ;;  %v3301_v20 = vadd.f32 %v6287_v3, %v3237_v7  ;;  %v2434_v12 = vmul.f32 %v6251_v24, %v2370_v16 }
 0x1a5   :  { %v6277_v5 = vpop.f32.mrb[100].mxu0  ;;  %v6279_v2 = vpop.f32.mrb[100].mxu1  ;;  %3488 = vst.msk [vmem:[%s7046_s8 + $0x88] sm:$0xff] %vm3470_vm3, %v3423_v61  ;;  %v3428_v55 = vmax.f32 %v7301_v56, %v3364_v41  ;;  %v3235_v28 = vmul.f32 %v6251_v24, %v3171_v17  ;;  %v7304_v62 = vmax.f32 %v7302_v43, %v7303_v46  ;;  %v2375_v36 = vmax.f32 %v2199_v1, 0.0 }
 0x1a6   :  { %v6291_v32 = vpop.f32.mrb[101].mxu0  ;;  %v6293_v51 = vpop.f32.mrb[101].mxu1  ;;  %v3176_v48 = vmax.f32 %v3000_v25, 0.0  ;;  %v2191_v53 = vadd.f32 %v6232_v13, %v6080_v26  ;;  %v3365_v30 = vmax.f32 %v2500_v54, %v3301_v20  ;;  %v2498_v31 = vadd.f32 %v6287_v3, %v2434_v12  ;;  %v7309_v54 = vld [vmem:[#allocation27_spill] sm:$0xff] }
 0x1a7   :  { %v6297_v38 = vpop.f32.mrb[102].mxu0  ;;  %v6299_v60 = vpop.f32.mrb[102].mxu1  ;;  %3493 = vst.msk [vmem:[%s7046_s8 + $0xb0] sm:$0xff] %vm3470_vm3, %v3428_v55  ;;  %v3426_v52 = vmax.f32 %v7304_v62, %v3362_v37  ;;  %v3299_v58 = vadd.f32 %v6287_v3, %v3235_v28  ;;  %v2992_v11 = vadd.f32 %v6232_v13, %v6082_v14  ;;  %v2439_v4 = vmul.f32 %v6251_v24, %v2375_v36 }
 0x1a8   :  { %v6312_v8 = vpop.f32.mrb[103].mxu0  ;;  %v6314_v45 = vpop.f32.mrb[103].mxu1  ;;  %v3240_v61 = vmul.f32 %v6251_v24, %v3176_v48  ;;  %v2373_v41 = vmax.f32 %v2191_v53, 0.0  ;;  %v2202_v26 = vadd.f32 %v6232_v13, %v6096_v63  ;;  %v7307_v49 = vmax.f32 %v7305_v33, %v7306_v27 }
 0x1a9   :  { %3491 = vst.msk [vmem:[%s7046_s8 + $0xa0] sm:$0xff] %vm3470_vm3, %v3426_v52  ;;  %v3363_v16 = vmax.f32 %v2498_v31, %v3299_v58  ;;  %v3174_v17 = vmax.f32 %v2992_v11, 0.0  ;;  %v3003_v14 = vadd.f32 %v6232_v13, %v6098_v18  ;;  %v2503_v56 = vadd.f32 %v6287_v3, %v2439_v4  ;;  %v7308_v18 = vld [vmem:[#allocation26_spill] sm:$0xff] }
 0x1aa   :  { %v3429_v7 = vmax.f32 %v7307_v49, %v3365_v30  ;;  %v3304_v55 = vadd.f32 %v6287_v3, %v3240_v61  ;;  %v2437_v37 = vmul.f32 %v6251_v24, %v2373_v41  ;;  %v2376_v63 = vmax.f32 %v2202_v26, 0.0  ;;  %v7311_v41 = vld [vmem:[#allocation28_spill] sm:$0xff]  ;;  %v7312_v26 = vld [vmem:[#allocation29_spill] sm:$0xff] }
 0x1ab   :  { %v7310_v20 = vmax.f32 %v7308_v18, %v7309_v54  ;;  %v3238_v28 = vmul.f32 %v6251_v24, %v3174_v17  ;;  %v3177_v43 = vmax.f32 %v3003_v14, 0.0  ;;  %v2194_v46 = vadd.f32 %v6232_v13, %v6103_v47  ;;  %v7315_v18 = vld [vmem:[#allocation31_spill] sm:$0xff] }
 0x1ac   :  { %3494 = vst.msk [vmem:[%s7046_s8 + $0xb8] sm:$0xff] %vm3470_vm3, %v3429_v7  ;;  %v3368_v36 = vmax.f32 %v2503_v56, %v3304_v55  ;;  %v2501_v48 = vadd.f32 %v6287_v3, %v2437_v37  ;;  %v2440_v53 = vmul.f32 %v6251_v24, %v2376_v63  ;;  %v2995_v30 = vadd.f32 %v6232_v13, %v6105_v10  ;;  %v7314_v63 = vld [vmem:[#allocation30_spill] sm:$0xff] }
 0x1ad   :  { %v6346_v21 = vpop.f32.mrb[104].mxu0  ;;  %v6348_v23 = vpop.f32.mrb[104].mxu1  ;;  %v3427_v12 = vmax.f32 %v7310_v20, %v3363_v16  ;;  %v3302_v47 = vadd.f32 %v6287_v3, %v3238_v28  ;;  %v3241_v11 = vmul.f32 %v6251_v24, %v3177_v43  ;;  %v2374_v4 = vmax.f32 %v2194_v46, 0.0 }
 0x1ae   :  { %v6353_v1 = vpop.f32.mrb[105].mxu0  ;;  %v6355_v25 = vpop.f32.mrb[105].mxu1  ;;  %v2215_v61 = vadd.f32 %v6232_v13, %v6137_v6  ;;  %v7313_v10 = vmax.f32 %v7311_v41, %v7312_v26  ;;  %v2504_v27 = vadd.f32 %v6287_v3, %v2440_v53  ;;  %v3175_v49 = vmax.f32 %v2995_v30, 0.0 }
 0x1af   :  { %v6367_v62 = vpop.f32.mrb[106].mxu0  ;;  %v6369_v52 = vpop.f32.mrb[106].mxu1  ;;  %3492 = vst.msk [vmem:[%s7046_s8 + $0xa8] sm:$0xff] %vm3470_vm3, %v3427_v12  ;;  %v3016_v7 = vadd.f32 %v6232_v13, %v6139_v22  ;;  %v3366_v16 = vmax.f32 %v2501_v48, %v3302_v47  ;;  %v3305_v17 = vadd.f32 %v6287_v3, %v3241_v11  ;;  %v2438_v14 = vmul.f32 %v6251_v24, %v2374_v4  ;;  %v7317_v11 = vld [vmem:[#allocation32_spill] sm:$0xff]  ;;  %v7318_v4 = vld [vmem:[#allocation33_spill] sm:$0xff] }
 0x1b0   :  { %v6375_v31 = vpop.f32.mrb[107].mxu0  ;;  %v6377_v58 = vpop.f32.mrb[107].mxu1  ;;  %v3432_v33 = vmax.f32 %v7313_v10, %v3368_v36  ;;  %v2379_v56 = vmax.f32 %v2215_v61, 0.0  ;;  %v3239_v6 = vmul.f32 %v6251_v24, %v3175_v49  ;;  %v2207_v37 = vadd.f32 %v6232_v13, %v6150_v40 }
 0x1b1   :  { %v3180_v55 = vmax.f32 %v3016_v7, 0.0  ;;  %v3008_v22 = vadd.f32 %v6232_v13, %v6152_v50  ;;  %v7316_v54 = vmax.f32 %v7314_v63, %v7315_v18  ;;  %v3369_v12 = vmax.f32 %v2504_v27, %v3305_v17  ;;  %v7321_v63 = vld [vmem:[#allocation35_spill] sm:$0xff] }
 0x1b2   :  { %3497 = vst.msk [vmem:[%s7046_s8 + $0xd0] sm:$0xff] %vm3470_vm3, %v3432_v33  ;;  %v2502_v28 = vadd.f32 %v6287_v3, %v2438_v14  ;;  %v2443_v43 = vmul.f32 %v6251_v24, %v2379_v56  ;;  %v3303_v48 = vadd.f32 %v6287_v3, %v3239_v6  ;;  %v2377_v53 = vmax.f32 %v2207_v37, 0.0 }
 0x1b3   :  { %v3430_v20 = vmax.f32 %v7316_v54, %v3366_v16  ;;  %v3244_v40 = vmul.f32 %v6251_v24, %v3180_v55  ;;  %v3178_v30 = vmax.f32 %v3008_v22, 0.0  ;;  %v7319_v61 = vmax.f32 %v7317_v11, %v7318_v4  ;;  %v7320_v22 = vld [vmem:[#allocation34_spill] sm:$0xff] }
 0x1b4   :  { %v2507_v26 = vadd.f32 %v6287_v3, %v2443_v43  ;;  %v2218_v10 = vadd.f32 %v6232_v13, %v6158_v57  ;;  %v3019_v33 = vadd.f32 %v6232_v13, %v6160_v15  ;;  %v3367_v7 = vmax.f32 %v2502_v28, %v3303_v48 }
 0x1b5   :  { %v6409_v46 = vpop.f32.mrb[108].mxu0  ;;  %v6411_v36 = vpop.f32.mrb[108].mxu1  ;;  %3495 = vst.msk [vmem:[%s7046_s8 + $0xc0] sm:$0xff] %vm3470_vm3, %v3430_v20  ;;  %v3433_v41 = vmax.f32 %v7319_v61, %v3369_v12  ;;  %v3308_v16 = vadd.f32 %v6287_v3, %v3244_v40  ;;  %v2441_v17 = vmul.f32 %v6251_v24, %v2377_v53  ;;  %v3242_v14 = vmul.f32 %v6251_v24, %v3178_v30 }
 0x1b6   :  { %v6415_v50 = vpop.f32.mrb[109].mxu0  ;;  %v6417_v47 = vpop.f32.mrb[109].mxu1  ;;  %v2380_v57 = vmax.f32 %v2218_v10, 0.0  ;;  %v3181_v15 = vmax.f32 %v3019_v33, 0.0  ;;  %v2210_v55 = vadd.f32 %v6232_v13, %v6170_v35  ;;  %v3011_v37 = vadd.f32 %v6232_v13, %v6172_v42  ;;  %v7323_v35 = vld [vmem:[#allocation36_spill] sm:$0xff]  ;;  %v7324_v42 = vld [vmem:[#allocation37_spill] sm:$0xff] }
 0x1b7   :  { %v6431_v27 = vpop.f32.mrb[110].mxu0  ;;  %v6433_v49 = vpop.f32.mrb[110].mxu1  ;;  %3498 = vst.msk [vmem:[%s7046_s8 + $0xd8] sm:$0xff] %vm3470_vm3, %v3433_v41  ;;  %v7322_v18 = vmax.f32 %v7320_v22, %v7321_v63  ;;  %v3372_v20 = vmax.f32 %v2507_v26, %v3308_v16  ;;  %v2505_v12 = vadd.f32 %v6287_v3, %v2441_v17  ;;  %v3306_v28 = vadd.f32 %v6287_v3, %v3242_v14  ;;  %v7327_v14 = vld [vmem:[#allocation39_spill] sm:$0xff] }
 0x1b8   :  { %v6438_v56 = vpop.f32.mrb[111].mxu0  ;;  %v6440_v6 = vpop.f32.mrb[111].mxu1  ;;  %v2444_v43 = vmul.f32 %v6251_v24, %v2380_v57  ;;  %v3245_v48 = vmul.f32 %v6251_v24, %v3181_v15  ;;  %v2378_v40 = vmax.f32 %v2210_v55, 0.0  ;;  %v3179_v53 = vmax.f32 %v3011_v37, 0.0 }
 0x1b9   :  { %v3431_v54 = vmax.f32 %v7322_v18, %v3367_v7  ;;  %v7325_v30 = vmax.f32 %v7323_v35, %v7324_v42  ;;  %v3370_v4 = vmax.f32 %v2505_v12, %v3306_v28  ;;  %v2231_v61 = vadd.f32 %v6232_v13, %v6204_v44  ;;  %v7326_v44 = vld [vmem:[#allocation38_spill] sm:$0xff]  ;;  %v7329_v42 = vld [vmem:[#allocation40_spill] sm:$0xff] }
 0x1ba   :  { %v3032_v41 = vadd.f32 %v6232_v13, %v6206_v29  ;;  %v2508_v26 = vadd.f32 %v6287_v3, %v2444_v43  ;;  %v3309_v10 = vadd.f32 %v6287_v3, %v3245_v48  ;;  %v2442_v33 = vmul.f32 %v6251_v24, %v2378_v40 }
 0x1bb   :  { %3496 = vst.msk [vmem:[%s7046_s8 + $0xc8] sm:$0xff] %vm3470_vm3, %v3431_v54  ;;  %v3436_v11 = vmax.f32 %v7325_v30, %v3372_v20  ;;  %v3243_v7 = vmul.f32 %v6251_v24, %v3179_v53  ;;  %v7328_v29 = vmax.f32 %v7326_v44, %v7327_v14  ;;  %v2383_v15 = vmax.f32 %v2231_v61, 0.0  ;;  %v7330_v30 = vld [vmem:[#allocation41_spill] sm:$0xff]  ;;  %v7332_v44 = vld [vmem:[#allocation42_spill] sm:$0xff]  ;;  %v7333_v14 = vld [vmem:[#allocation43_spill] sm:$0xff] }
 0x1bc   :  { %v3184_v55 = vmax.f32 %v3032_v41, 0.0  ;;  %v2223_v37 = vadd.f32 %v6232_v13, %v6214_v9  ;;  %v3373_v18 = vmax.f32 %v2508_v26, %v3309_v10  ;;  %v2506_v54 = vadd.f32 %v6287_v3, %v2442_v33 }
 0x1bd   :  { %v6472_v16 = vpop.f32.mrb[112].mxu0  ;;  %v6474_v17 = vpop.f32.mrb[112].mxu1  ;;  %3501 = vst.msk [vmem:[%s7046_s8 + $0xf0] sm:$0xff] %vm3470_vm3, %v3436_v11  ;;  %v3434_v57 = vmax.f32 %v7328_v29, %v3370_v4  ;;  %v3307_v20 = vadd.f32 %v6287_v3, %v3243_v7  ;;  %v3024_v12 = vadd.f32 %v6232_v13, %v6216_v34  ;;  %v2447_v9 = vmul.f32 %v6251_v24, %v2383_v15 }
 0x1be   :  { %v6485_v22 = vpop.f32.mrb[113].mxu0  ;;  %v6487_v63 = vpop.f32.mrb[113].mxu1  ;;  %v3248_v48 = vmul.f32 %v6251_v24, %v3184_v55  ;;  %v2381_v40 = vmax.f32 %v2223_v37, 0.0  ;;  %v2234_v53 = vadd.f32 %v6232_v13, %v6220_v39  ;;  %v7331_v11 = vmax.f32 %v7329_v42, %v7330_v30  ;;  %v7335_v42 = vld [vmem:[#allocation44_spill] sm:$0xff]  ;;  %v7336_v30 = vld [vmem:[#allocation45_spill] sm:$0xff] }
 0x1bf   :  { %v6493_v28 = vpop.f32.mrb[114].mxu0  ;;  %v6495_v43 = vpop.f32.mrb[114].mxu1  ;;  %3499 = vst.msk [vmem:[%s7046_s8 + $0xe0] sm:$0xff] %vm3470_vm3, %v3434_v57  ;;  %v3371_v61 = vmax.f32 %v2506_v54, %v3307_v20  ;;  %v3182_v41 = vmax.f32 %v3024_v12, 0.0  ;;  %v3035_v26 = vadd.f32 %v6232_v13, %v6222_v0  ;;  %v2511_v10 = vadd.f32 %v6287_v3, %v2447_v9 }
 0x1c0   :  { %v6505_v35 = vpop.f32.mrb[115].mxu0  ;;  %v6507_v34 = vpop.f32.mrb[115].mxu1  ;;  %v3437_v4 = vmax.f32 %v7331_v11, %v3373_v18  ;;  %v3312_v33 = vadd.f32 %v6287_v3, %v3248_v48  ;;  %v2445_v7 = vmul.f32 %v6251_v24, %v2381_v40  ;;  %v2384_v39 = vmax.f32 %v2234_v53, 0.0 }
 0x1c1   :  { %v7334_v29 = vmax.f32 %v7332_v44, %v7333_v14  ;;  %v3246_v15 = vmul.f32 %v6251_v24, %v3182_v41  ;;  %v3185_v55 = vmax.f32 %v3035_v26, 0.0  ;;  %v2226_v0 = vadd.f32 %v6232_v13, %v6238_v19 }
 0x1c2   :  { %3502 = vst.msk [vmem:[%s7046_s8 + $0xf8] sm:$0xff] %vm3470_vm3, %v3437_v4  ;;  %v3376_v37 = vmax.f32 %v2511_v10, %v3312_v33  ;;  %v2509_v18 = vadd.f32 %v6287_v3, %v2445_v7  ;;  %v2448_v54 = vmul.f32 %v6251_v24, %v2384_v39  ;;  %v3027_v20 = vadd.f32 %v6232_v13, %v6240_v59 }
 0x1c3   :  { %v3435_v57 = vmax.f32 %v7334_v29, %v3371_v61  ;;  %v3310_v12 = vadd.f32 %v6287_v3, %v3246_v15  ;;  %v3249_v9 = vmul.f32 %v6251_v24, %v3185_v55  ;;  %v2382_v48 = vmax.f32 %v2226_v0, 0.0 }
 0x1c4   :  { %v2247_v19 = vadd.f32 %v6232_v13, %v6277_v5  ;;  %v7337_v59 = vmax.f32 %v7335_v42, %v7336_v30  ;;  %v2512_v4 = vadd.f32 %v6287_v3, %v2448_v54  ;;  %v3183_v61 = vmax.f32 %v3027_v20, 0.0 }
 0x1c5   :  { %3500 = vst.msk [vmem:[%s7046_s8 + $0xe8] sm:$0xff] %vm3470_vm3, %v3435_v57  ;;  %v6539_v40 = vpop.f32.mrb[116].mxu0  ;;  %v6541_v53 = vpop.f32.mrb[116].mxu1  ;;  %v3048_v41 = vadd.f32 %v6232_v13, %v6279_v2  ;;  %v3374_v33 = vmax.f32 %v2509_v18, %v3310_v12  ;;  %v3313_v5 = vadd.f32 %v6287_v3, %v3249_v9  ;;  %v2446_v7 = vmul.f32 %v6251_v24, %v2382_v48  ;;  %v7339_v18 = vld [vmem:[#allocation47_spill] sm:$0xff] }
 0x1c6   :  { %v3440_v11 = vmax.f32 %v7337_v59, %v3376_v37  ;;  %v6549_v26 = vpop.f32.mrb[117].mxu0  ;;  %v6551_v10 = vpop.f32.mrb[117].mxu1  ;;  %v2387_v39 = vmax.f32 %v2247_v19, 0.0  ;;  %v3247_v2 = vmul.f32 %v6251_v24, %v3183_v61  ;;  %v2239_v57 = vadd.f32 %v6232_v13, %v6291_v32  ;;  %v7338_v37 = vld [vmem:[#allocation46_spill] sm:$0xff]  ;;  %v7342_v59 = vld [vmem:[#allocation49_spill] sm:$0xff] }
 0x1c7   :  { %v6555_v44 = vpop.f32.mrb[118].mxu0  ;;  %v6557_v14 = vpop.f32.mrb[118].mxu1  ;;  %v3188_v29 = vmax.f32 %v3048_v41, 0.0  ;;  %v3040_v15 = vadd.f32 %v6232_v13, %v6293_v51  ;;  %v7340_v54 = vmax.f32 %v7338_v37, %v7339_v18  ;;  %v3377_v12 = vmax.f32 %v2512_v4, %v3313_v5  ;;  %v7341_v51 = vld [vmem:[#allocation48_spill] sm:$0xff]  ;;  %v7344_v37 = vld [vmem:[#allocation50_spill] sm:$0xff]  ;;  %v7345_v18 = vld [vmem:[#allocation51_spill] sm:$0xff] }
 0x1c8   :  { %3505 = vst.msk [vmem:[%s7046_s8 + $0x110] sm:$0xff] %vm3470_vm3, %v3440_v11  ;;  %v6568_v55 = vpop.f32.mrb[119].mxu0  ;;  %v6570_v0 = vpop.f32.mrb[119].mxu1  ;;  %v2510_v9 = vadd.f32 %v6287_v3, %v2446_v7  ;;  %v2451_v48 = vmul.f32 %v6251_v24, %v2387_v39  ;;  %v3311_v19 = vadd.f32 %v6287_v3, %v3247_v2  ;;  %v2385_v42 = vmax.f32 %v2239_v57, 0.0 }
 0x1c9   :  { %v3438_v20 = vmax.f32 %v7340_v54, %v3374_v33  ;;  %v3252_v32 = vmul.f32 %v6251_v24, %v3188_v29  ;;  %v3186_v30 = vmax.f32 %v3040_v15, 0.0  ;;  %v7343_v11 = vmax.f32 %v7341_v51, %v7342_v59 }
 0x1ca   :  { %v2515_v4 = vadd.f32 %v6287_v3, %v2451_v48  ;;  %v2250_v41 = vadd.f32 %v6232_v13, %v6297_v38  ;;  %v3051_v33 = vadd.f32 %v6232_v13, %v6299_v60  ;;  %v3375_v5 = vmax.f32 %v2510_v9, %v3311_v19 }
 0x1cb   :  { %3503 = vst.msk [vmem:[%s7046_s8 + $0x100] sm:$0xff] %vm3470_vm3, %v3438_v20  ;;  %v3441_v61 = vmax.f32 %v7343_v11, %v3377_v12  ;;  %v3316_v7 = vadd.f32 %v6287_v3, %v3252_v32  ;;  %v2449_v39 = vmul.f32 %v6251_v24, %v2385_v42  ;;  %v3250_v2 = vmul.f32 %v6251_v24, %v3186_v30  ;;  %v7347_v11 = vld [vmem:[#allocation52_spill] sm:$0xff] }
 0x1cc   :  { %v2388_v29 = vmax.f32 %v2250_v41, 0.0  ;;  %v3189_v57 = vmax.f32 %v3051_v33, 0.0  ;;  %v2242_v38 = vadd.f32 %v6232_v13, %v6312_v8  ;;  %v3043_v60 = vadd.f32 %v6232_v13, %v6314_v45 }
 0x1cd   :  { %3506 = vst.msk [vmem:[%s7046_s8 + $0x118] sm:$0xff] %vm3470_vm3, %v3441_v61  ;;  %v6602_v15 = vpop.f32.mrb[120].mxu0  ;;  %v7346_v54 = vmax.f32 %v7344_v37, %v7345_v18  ;;  %v3380_v12 = vmax.f32 %v2515_v4, %v3316_v7  ;;  %v2513_v9 = vadd.f32 %v6287_v3, %v2449_v39  ;;  %v3314_v48 = vadd.f32 %v6287_v3, %v3250_v2  ;;  %v6609_v19 = vpop.f32.mrb[120].mxu1  ;;  %v7348_v61 = vld [vmem:[#allocation53_spill] sm:$0xff] }
 0x1ce   :  { %v6611_v32 = vpop.f32.mrb[121].mxu0  ;;  %v2452_v8 = vmul.f32 %v6251_v24, %v2388_v29  ;;  %v3253_v42 = vmul.f32 %v6251_v24, %v3189_v57  ;;  %v2386_v45 = vmax.f32 %v2242_v38, 0.0  ;;  %v3187_v30 = vmax.f32 %v3043_v60, 0.0  ;;  %v6615_v51 = vpop.f32.mrb[121].mxu1 }
 0x1cf   :  { %v3439_v20 = vmax.f32 %v7346_v54, %v3375_v5  ;;  %v6617_v59 = vpop.f32.mrb[122].mxu0  ;;  %v7349_v4 = vmax.f32 %v7347_v11, %v7348_v61  ;;  %v3378_v33 = vmax.f32 %v2513_v9, %v3314_v48  ;;  %v2263_v5 = vadd.f32 %v6232_v13, %v6346_v21  ;;  %v6630_v39 = vpop.f32.mrb[122].mxu1  ;;  %v7350_v21 = vld [vmem:[#allocation54_spill] sm:$0xff] }
 0x1d0   :  { %v3064_v7 = vadd.f32 %v6232_v13, %v6348_v23  ;;  %v6632_v2 = vpop.f32.mrb[123].mxu0  ;;  %v2516_v29 = vadd.f32 %v6287_v3, %v2452_v8  ;;  %v3317_v57 = vadd.f32 %v6287_v3, %v3253_v42  ;;  %v2450_v38 = vmul.f32 %v6251_v24, %v2386_v45  ;;  %v6638_v37 = vpop.f32.mrb[123].mxu1  ;;  %v7351_v23 = vld [vmem:[#allocation55_spill] sm:$0xff] }
 0x1d1   :  { %3504 = vst.msk [vmem:[%s7046_s8 + $0x108] sm:$0xff] %vm3470_vm3, %v3439_v20  ;;  %v3444_v41 = vmax.f32 %v7349_v4, %v3380_v12  ;;  %v3251_v60 = vmul.f32 %v6251_v24, %v3187_v30  ;;  %v7352_v18 = vmax.f32 %v7350_v21, %v7351_v23  ;;  %v2391_v20 = vmax.f32 %v2263_v5, 0.0  ;;  %v7353_v4 = vld [vmem:[#allocation56_spill] sm:$0xff] }
 0x1d2   :  { %v3192_v12 = vmax.f32 %v3064_v7, 0.0  ;;  %v2255_v9 = vadd.f32 %v6232_v13, %v6353_v1  ;;  %v3381_v48 = vmax.f32 %v2516_v29, %v3317_v57  ;;  %v2514_v8 = vadd.f32 %v6287_v3, %v2450_v38 }
 0x1d3   :  { %3509 = vst.msk [vmem:[%s7046_s8 + $0x130] sm:$0xff] %vm3470_vm3, %v3444_v41  ;;  %v3442_v54 = vmax.f32 %v7352_v18, %v3378_v33  ;;  %v3315_v42 = vadd.f32 %v6287_v3, %v3251_v60  ;;  %v3056_v45 = vadd.f32 %v6232_v13, %v6355_v25  ;;  %v2455_v30 = vmul.f32 %v6251_v24, %v2391_v20  ;;  %v7354_v41 = vld [vmem:[#allocation57_spill] sm:$0xff] }
 0x1d4   :  { %v3256_v11 = vmul.f32 %v6251_v24, %v3192_v12  ;;  %v2389_v61 = vmax.f32 %v2255_v9, 0.0  ;;  %v2266_v1 = vadd.f32 %v6232_v13, %v6367_v62  ;;  %v7355_v33 = vmax.f32 %v7353_v4, %v7354_v41 }
 0x1d5   :  { %3507 = vst.msk [vmem:[%s7046_s8 + $0x120] sm:$0xff] %vm3470_vm3, %v3442_v54  ;;  %v3379_v7 = vmax.f32 %v2514_v8, %v3315_v42  ;;  %v3190_v29 = vmax.f32 %v3056_v45, 0.0  ;;  %v3067_v25 = vadd.f32 %v6232_v13, %v6369_v52  ;;  %v6666_v57 = vpop.f32.mrb[124].mxu0  ;;  %v2519_v38 = vadd.f32 %v6287_v3, %v2455_v30  ;;  %v6671_v18 = vpop.f32.mrb[124].mxu1  ;;  %v7356_v54 = vld [vmem:[#allocation58_spill] sm:$0xff]  ;;  %v7357_v52 = vld [vmem:[#allocation59_spill] sm:$0xff] }
 0x1d6   :  { %v3445_v5 = vmax.f32 %v7355_v33, %v3381_v48  ;;  %v3320_v60 = vadd.f32 %v6287_v3, %v3256_v11  ;;  %v2453_v21 = vmul.f32 %v6251_v24, %v2389_v61  ;;  %v2392_v23 = vmax.f32 %v2266_v1, 0.0  ;;  %v6673_v62 = vpop.f32.mrb[125].mxu0  ;;  %v6685_v42 = vpop.f32.mrb[125].mxu1 }
 0x1d7   :  { %v7358_v20 = vmax.f32 %v7356_v54, %v7357_v52  ;;  %v3254_v9 = vmul.f32 %v6251_v24, %v3190_v29  ;;  %v3193_v48 = vmax.f32 %v3067_v25, 0.0  ;;  %v2258_v8 = vadd.f32 %v6232_v13, %v6375_v31  ;;  %v6687_v45 = vpop.f32.mrb[126].mxu0  ;;  %v6693_v4 = vpop.f32.mrb[126].mxu1  ;;  %v7360_v25 = vld [vmem:[#allocation61_spill] sm:$0xff] }
 0x1d8   :  { %3510 = vst.msk [vmem:[%s7046_s8 + $0x138] sm:$0xff] %vm3470_vm3, %v3445_v5  ;;  %v3384_v30 = vmax.f32 %v2519_v38, %v3320_v60  ;;  %v2517_v11 = vadd.f32 %v6287_v3, %v2453_v21  ;;  %v2456_v61 = vmul.f32 %v6251_v24, %v2392_v23  ;;  %v3059_v1 = vadd.f32 %v6232_v13, %v6377_v58  ;;  %v6695_v41 = vpop.f32.mrb[127].mxu0  ;;  %v6705_v29 = vpop.f32.mrb[127].mxu1  ;;  %v7359_v58 = vld [vmem:[#allocation60_spill] sm:$0xff] }
 0x1d9   :  { %v3443_v12 = vmax.f32 %v7358_v20, %v3379_v7  ;;  %v3318_v31 = vadd.f32 %v6287_v3, %v3254_v9  ;;  %v3257_v33 = vmul.f32 %v6251_v24, %v3193_v48  ;;  %v2390_v5 = vmax.f32 %v2258_v8, 0.0 }
 0x1da   :  { %v2279_v7 = vadd.f32 %v6232_v13, %v6409_v46  ;;  %v7361_v38 = vmax.f32 %v7359_v58, %v7360_v25  ;;  %v2520_v21 = vadd.f32 %v6287_v3, %v2456_v61  ;;  %v3191_v23 = vmax.f32 %v3059_v1, 0.0 }
 0x1db   :  { %3508 = vst.msk [vmem:[%s7046_s8 + $0x128] sm:$0xff] %vm3470_vm3, %v3443_v12  ;;  %v3080_v54 = vadd.f32 %v6232_v13, %v6411_v36  ;;  %v3382_v52 = vmax.f32 %v2517_v11, %v3318_v31  ;;  %v3321_v20 = vadd.f32 %v6287_v3, %v3257_v33  ;;  %v2454_v12 = vmul.f32 %v6251_v24, %v2390_v5  ;;  %v7363_v11 = vld [vmem:[#allocation63_spill] sm:$0xff] }
 0x1dc   :  { %v3448_v60 = vmax.f32 %v7361_v38, %v3384_v30  ;;  %v2395_v9 = vmax.f32 %v2279_v7, 0.0  ;;  %v3255_v46 = vmul.f32 %v6251_v24, %v3191_v23  ;;  %v2271_v8 = vadd.f32 %v6232_v13, %v6415_v50  ;;  %v7362_v30 = vld [vmem:[#allocation62_spill] sm:$0xff]  ;;  %v7365_v50 = vld [vmem:[#allocation64_spill] sm:$0xff] }
 0x1dd   :  { %v3196_v48 = vmax.f32 %v3080_v54, 0.0  ;;  %v3072_v36 = vadd.f32 %v6232_v13, %v6417_v47  ;;  %v7364_v61 = vmax.f32 %v7362_v30, %v7363_v11  ;;  %v3385_v31 = vmax.f32 %v2520_v21, %v3321_v20  ;;  %v7366_v47 = vld [vmem:[#allocation65_spill] sm:$0xff]  ;;  %v7369_v30 = vld [vmem:[#allocation67_spill] sm:$0xff] }
 0x1de   :  { %3513 = vst.msk [vmem:[%s7046_s8 + $0x150] sm:$0xff] %vm3470_vm3, %v3448_v60  ;;  %v2518_v33 = vadd.f32 %v6287_v3, %v2454_v12  ;;  %v2459_v5 = vmul.f32 %v6251_v24, %v2395_v9  ;;  %v3319_v7 = vadd.f32 %v6287_v3, %v3255_v46  ;;  %v2393_v25 = vmax.f32 %v2271_v8, 0.0 }
 0x1df   :  { %v3446_v1 = vmax.f32 %v7364_v61, %v3382_v52  ;;  %v3260_v58 = vmul.f32 %v6251_v24, %v3196_v48  ;;  %v3194_v38 = vmax.f32 %v3072_v36, 0.0  ;;  %v7367_v60 = vmax.f32 %v7365_v50, %v7366_v47  ;;  %v7368_v36 = vld [vmem:[#allocation66_spill] sm:$0xff] }
 0x1e0   :  { %v2523_v21 = vadd.f32 %v6287_v3, %v2459_v5  ;;  %v2282_v54 = vadd.f32 %v6232_v13, %v6431_v27  ;;  %v3083_v52 = vadd.f32 %v6232_v13, %v6433_v49  ;;  %v3383_v20 = vmax.f32 %v2518_v33, %v3319_v7 }
 0x1e1   :  { %3511 = vst.msk [vmem:[%s7046_s8 + $0x140] sm:$0xff] %vm3470_vm3, %v3446_v1  ;;  %v3449_v23 = vmax.f32 %v7367_v60, %v3385_v31  ;;  %v3324_v12 = vadd.f32 %v6287_v3, %v3260_v58  ;;  %v2457_v9 = vmul.f32 %v6251_v24, %v2393_v25  ;;  %v3258_v46 = vmul.f32 %v6251_v24, %v3194_v38 }
 0x1e2   :  { %v2396_v48 = vmax.f32 %v2282_v54, 0.0  ;;  %v3197_v8 = vmax.f32 %v3083_v52, 0.0  ;;  %v2274_v27 = vadd.f32 %v6232_v13, %v6438_v56  ;;  %v3075_v49 = vadd.f32 %v6232_v13, %v6440_v6  ;;  %v7371_v56 = vld [vmem:[#allocation68_spill] sm:$0xff]  ;;  %v7372_v6 = vld [vmem:[#allocation69_spill] sm:$0xff] }
 0x1e3   :  { %3514 = vst.msk [vmem:[%s7046_s8 + $0x158] sm:$0xff] %vm3470_vm3, %v3449_v23  ;;  %v7370_v11 = vmax.f32 %v7368_v36, %v7369_v30  ;;  %v3388_v1 = vmax.f32 %v2523_v21, %v3324_v12  ;;  %v2521_v31 = vadd.f32 %v6287_v3, %v2457_v9  ;;  %v3322_v33 = vadd.f32 %v6287_v3, %v3258_v46  ;;  %v7374_v12 = vld [vmem:[#allocation70_spill] sm:$0xff]  ;;  %v7375_v9 = vld [vmem:[#allocation71_spill] sm:$0xff] }
 0x1e4   :  { %v2460_v5 = vmul.f32 %v6251_v24, %v2396_v48  ;;  %v3261_v7 = vmul.f32 %v6251_v24, %v3197_v8  ;;  %v2394_v58 = vmax.f32 %v2274_v27, 0.0  ;;  %v3195_v25 = vmax.f32 %v3075_v49, 0.0 }
 0x1e5   :  { %v3447_v61 = vmax.f32 %v7370_v11, %v3383_v20  ;;  %v7373_v38 = vmax.f32 %v7371_v56, %v7372_v6  ;;  %v3386_v47 = vmax.f32 %v2521_v31, %v3322_v33  ;;  %v2295_v60 = vadd.f32 %v6232_v13, %v6472_v16  ;;  %v7377_v31 = vld [vmem:[#allocation72_spill] sm:$0xff]  ;;  %v7378_v33 = vld [vmem:[#allocation73_spill] sm:$0xff] }
 0x1e6   :  { %v3096_v23 = vadd.f32 %v6232_v13, %v6474_v17  ;;  %v2524_v21 = vadd.f32 %v6287_v3, %v2460_v5  ;;  %v3325_v54 = vadd.f32 %v6287_v3, %v3261_v7  ;;  %v2458_v52 = vmul.f32 %v6251_v24, %v2394_v58 }
 0x1e7   :  { %3512 = vst.msk [vmem:[%s7046_s8 + $0x148] sm:$0xff] %vm3470_vm3, %v3447_v61  ;;  %v3452_v50 = vmax.f32 %v7373_v38, %v3388_v1  ;;  %v3259_v20 = vmul.f32 %v6251_v24, %v3195_v25  ;;  %v7376_v46 = vmax.f32 %v7374_v12, %v7375_v9  ;;  %v2399_v48 = vmax.f32 %v2295_v60, 0.0 }
 0x1e8   :  { %v3200_v8 = vmax.f32 %v3096_v23, 0.0  ;;  %v2287_v17 = vadd.f32 %v6232_v13, %v6485_v22  ;;  %v3389_v27 = vmax.f32 %v2524_v21, %v3325_v54  ;;  %v2522_v49 = vadd.f32 %v6287_v3, %v2458_v52 }
 0x1e9   :  { %3517 = vst.msk [vmem:[%s7046_s8 + $0x170] sm:$0xff] %vm3470_vm3, %v3452_v50  ;;  %v3450_v16 = vmax.f32 %v7376_v46, %v3386_v47  ;;  %v3323_v36 = vadd.f32 %v6287_v3, %v3259_v20  ;;  %v3088_v30 = vadd.f32 %v6232_v13, %v6487_v63  ;;  %v2463_v11 = vmul.f32 %v6251_v24, %v2399_v48  ;;  %v7381_v47 = vld [vmem:[#allocation75_spill] sm:$0xff] }
 0x1ea   :  { %v3264_v61 = vmul.f32 %v6251_v24, %v3200_v8  ;;  %v2397_v1 = vmax.f32 %v2287_v17, 0.0  ;;  %v2298_v22 = vadd.f32 %v6232_v13, %v6493_v28  ;;  %v7379_v5 = vmax.f32 %v7377_v31, %v7378_v33  ;;  %v7380_v28 = vld [vmem:[#allocation74_spill] sm:$0xff]  ;;  %v7383_v8 = vld [vmem:[#allocation76_spill] sm:$0xff]  ;;  %v7384_v17 = vld [vmem:[#allocation77_spill] sm:$0xff] }
 0x1eb   :  { %3515 = vst.msk [vmem:[%s7046_s8 + $0x160] sm:$0xff] %vm3470_vm3, %v3450_v16  ;;  %v3387_v58 = vmax.f32 %v2522_v49, %v3323_v36  ;;  %v3198_v25 = vmax.f32 %v3088_v30, 0.0  ;;  %v3099_v63 = vadd.f32 %v6232_v13, %v6495_v43  ;;  %v2527_v56 = vadd.f32 %v6287_v3, %v2463_v11 }
 0x1ec   :  { %v3453_v7 = vmax.f32 %v7379_v5, %v3389_v27  ;;  %v3328_v6 = vadd.f32 %v6287_v3, %v3264_v61  ;;  %v2461_v38 = vmul.f32 %v6251_v24, %v2397_v1  ;;  %v2400_v50 = vmax.f32 %v2298_v22, 0.0  ;;  %v7386_v5 = vld [vmem:[#allocation78_spill] sm:$0xff] }
 0x1ed   :  { %v7382_v60 = vmax.f32 %v7380_v28, %v7381_v47  ;;  %v3262_v21 = vmul.f32 %v6251_v24, %v3198_v25  ;;  %v3201_v54 = vmax.f32 %v3099_v63, 0.0  ;;  %v2290_v43 = vadd.f32 %v6232_v13, %v6505_v35 }
 0x1ee   :  { %3518 = vst.msk [vmem:[%s7046_s8 + $0x178] sm:$0xff] %vm3470_vm3, %v3453_v7  ;;  %v3392_v52 = vmax.f32 %v2527_v56, %v3328_v6  ;;  %v2525_v20 = vadd.f32 %v6287_v3, %v2461_v38  ;;  %v2464_v12 = vmul.f32 %v6251_v24, %v2400_v50  ;;  %v3091_v9 = vadd.f32 %v6232_v13, %v6507_v34  ;;  %v7387_v7 = vld [vmem:[#allocation79_spill] sm:$0xff] }
 0x1ef   :  { %v3451_v23 = vmax.f32 %v7382_v60, %v3387_v58  ;;  %v3326_v46 = vadd.f32 %v6287_v3, %v3262_v21  ;;  %v3265_v16 = vmul.f32 %v6251_v24, %v3201_v54  ;;  %v2398_v48 = vmax.f32 %v2290_v43, 0.0 }
 0x1f0   :  { %v2311_v35 = vadd.f32 %v6232_v13, %v6539_v40  ;;  %v7385_v27 = vmax.f32 %v7383_v8, %v7384_v17  ;;  %v2528_v36 = vadd.f32 %v6287_v3, %v2464_v12  ;;  %v3199_v34 = vmax.f32 %v3091_v9, 0.0 }
 0x1f1   :  { %3516 = vst.msk [vmem:[%s7046_s8 + $0x168] sm:$0xff] %vm3470_vm3, %v3451_v23  ;;  %v3112_v30 = vadd.f32 %v6232_v13, %v6541_v53  ;;  %v3390_v11 = vmax.f32 %v2525_v20, %v3326_v46  ;;  %v3329_v61 = vadd.f32 %v6287_v3, %v3265_v16  ;;  %v2462_v1 = vmul.f32 %v6251_v24, %v2398_v48  ;;  %v7392_v48 = vld [vmem:[#allocation82_spill] sm:$0xff] }
 0x1f2   :  { %v3456_v49 = vmax.f32 %v7385_v27, %v3392_v52  ;;  %v2403_v22 = vmax.f32 %v2311_v35, 0.0  ;;  %v3263_v40 = vmul.f32 %v6251_v24, %v3199_v34  ;;  %v2303_v33 = vadd.f32 %v6232_v13, %v6549_v26  ;;  %v7389_v26 = vld [vmem:[#allocation80_spill] sm:$0xff]  ;;  %v7393_v35 = vld [vmem:[#allocation83_spill] sm:$0xff] }
 0x1f3   :  { %v3204_v31 = vmax.f32 %v3112_v30, 0.0  ;;  %v3104_v53 = vadd.f32 %v6232_v13, %v6551_v10  ;;  %v7388_v58 = vmax.f32 %v7386_v5, %v7387_v7  ;;  %v3393_v63 = vmax.f32 %v2528_v36, %v3329_v61  ;;  %v7390_v10 = vld [vmem:[#allocation81_spill] sm:$0xff] }
 0x1f4   :  { %3521 = vst.msk [vmem:[%s7046_s8 + $0x190] sm:$0xff] %vm3470_vm3, %v3456_v49  ;;  %v2526_v56 = vadd.f32 %v6287_v3, %v2462_v1  ;;  %v2467_v6 = vmul.f32 %v6251_v24, %v2403_v22  ;;  %v3327_v38 = vadd.f32 %v6287_v3, %v3263_v40  ;;  %v2401_v28 = vmax.f32 %v2303_v33, 0.0 }
 0x1f5   :  { %v3454_v25 = vmax.f32 %v7388_v58, %v3390_v11  ;;  %v3268_v50 = vmul.f32 %v6251_v24, %v3204_v31  ;;  %v3202_v47 = vmax.f32 %v3104_v53, 0.0  ;;  %v7391_v60 = vmax.f32 %v7389_v26, %v7390_v10 }
 0x1f6   :  { %v2531_v21 = vadd.f32 %v6287_v3, %v2467_v6  ;;  %v2314_v54 = vadd.f32 %v6232_v13, %v6555_v44  ;;  %v3115_v43 = vadd.f32 %v6232_v13, %v6557_v14  ;;  %v3391_v52 = vmax.f32 %v2526_v56, %v3327_v38 }
 0x1f7   :  { %3519 = vst.msk [vmem:[%s7046_s8 + $0x180] sm:$0xff] %vm3470_vm3, %v3454_v25  ;;  %v3457_v23 = vmax.f32 %v7391_v60, %v3393_v63  ;;  %v3332_v20 = vadd.f32 %v6287_v3, %v3268_v50  ;;  %v2465_v12 = vmul.f32 %v6251_v24, %v2401_v28  ;;  %v3266_v9 = vmul.f32 %v6251_v24, %v3202_v47  ;;  %v7398_v25 = vld [vmem:[#allocation86_spill] sm:$0xff]  ;;  %v7399_v63 = vld [vmem:[#allocation87_spill] sm:$0xff] }
 0x1f8   :  { %v2404_v46 = vmax.f32 %v2314_v54, 0.0  ;;  %v3205_v16 = vmax.f32 %v3115_v43, 0.0  ;;  %v2306_v44 = vadd.f32 %v6232_v13, %v6568_v55  ;;  %v3107_v14 = vadd.f32 %v6232_v13, %v6570_v0  ;;  %v7395_v55 = vld [vmem:[#allocation84_spill] sm:$0xff]  ;;  %v7396_v0 = vld [vmem:[#allocation85_spill] sm:$0xff] }
 0x1f9   :  { %3522 = vst.msk [vmem:[%s7046_s8 + $0x198] sm:$0xff] %vm3470_vm3, %v3457_v23  ;;  %v7394_v8 = vmax.f32 %v7392_v48, %v7393_v35  ;;  %v3396_v27 = vmax.f32 %v2531_v21, %v3332_v20  ;;  %v2529_v49 = vadd.f32 %v6287_v3, %v2465_v12  ;;  %v3330_v36 = vadd.f32 %v6287_v3, %v3266_v9  ;;  %v7401_v21 = vld [vmem:[#allocation88_spill] sm:$0xff]  ;;  %v7402_v54 = vld [vmem:[#allocation89_spill] sm:$0xff] }
 0x1fa   :  { %v2468_v34 = vmul.f32 %v6251_v24, %v2404_v46  ;;  %v3269_v30 = vmul.f32 %v6251_v24, %v3205_v16  ;;  %v2402_v11 = vmax.f32 %v2306_v44, 0.0  ;;  %v3203_v61 = vmax.f32 %v3107_v14, 0.0  ;;  %v7405_v14 = vld [vmem:[#allocation91_spill] sm:$0xff] }
 0x1fb   :  { %v3455_v17 = vmax.f32 %v7394_v8, %v3391_v52  ;;  %v7397_v1 = vmax.f32 %v7395_v55, %v7396_v0  ;;  %v3394_v40 = vmax.f32 %v2529_v49, %v3330_v36  ;;  %v2327_v31 = vadd.f32 %v6232_v13, %v6602_v15  ;;  %v7407_v55 = vld [vmem:[#allocation92_spill] sm:$0xff]  ;;  %v7408_v0 = vld [vmem:[#allocation93_spill] sm:$0xff] }
 0x1fc   :  { %v3128_v33 = vadd.f32 %v6232_v13, %v6609_v19  ;;  %v2532_v53 = vadd.f32 %v6287_v3, %v2468_v34  ;;  %v3333_v5 = vadd.f32 %v6287_v3, %v3269_v30  ;;  %v2466_v7 = vmul.f32 %v6251_v24, %v2402_v11 }
 0x1fd   :  { %3520 = vst.msk [vmem:[%s7046_s8 + $0x188] sm:$0xff] %vm3470_vm3, %v3455_v17  ;;  %v3460_v22 = vmax.f32 %v7397_v1, %v3396_v27  ;;  %v3267_v58 = vmul.f32 %v6251_v24, %v3203_v61  ;;  %v7400_v56 = vmax.f32 %v7398_v25, %v7399_v63  ;;  %v2407_v6 = vmax.f32 %v2327_v31, 0.0  ;;  %v7410_v63 = vld [vmem:[#allocation94_spill] sm:$0xff] }
 0x1fe   :  { %v3208_v38 = vmax.f32 %v3128_v33, 0.0  ;;  %v2319_v19 = vadd.f32 %v6232_v13, %v6611_v32  ;;  %v3397_v50 = vmax.f32 %v2532_v53, %v3333_v5  ;;  %v2530_v28 = vadd.f32 %v6287_v3, %v2466_v7 }
 0x1ff   :  { %3525 = vst.msk [vmem:[%s7046_s8 + $0x1b0] sm:$0xff] %vm3470_vm3, %v3460_v22  ;;  %v3458_v15 = vmax.f32 %v7400_v56, %v3394_v40  ;;  %v3331_v47 = vadd.f32 %v6287_v3, %v3267_v58  ;;  %v3120_v26 = vadd.f32 %v6232_v13, %v6615_v51  ;;  %v2471_v10 = vmul.f32 %v6251_v24, %v2407_v6  ;;  %v7411_v56 = vld [vmem:[#allocation95_spill] sm:$0xff] }
 0x200   :  { %v3272_v60 = vmul.f32 %v6251_v24, %v3208_v38  ;;  %v2405_v23 = vmax.f32 %v2319_v19, 0.0  ;;  %v2330_v32 = vadd.f32 %v6232_v13, %v6617_v59  ;;  %v7403_v43 = vmax.f32 %v7401_v21, %v7402_v54  ;;  %v7404_v59 = vld [vmem:[#allocation90_spill] sm:$0xff] }
 0x201   :  { %3523 = vst.msk [vmem:[%s7046_s8 + $0x1a0] sm:$0xff] %vm3470_vm3, %v3458_v15  ;;  %v3395_v20 = vmax.f32 %v2530_v28, %v3331_v47  ;;  %v3206_v12 = vmax.f32 %v3120_v26, 0.0  ;;  %v3131_v51 = vadd.f32 %v6232_v13, %v6630_v39  ;;  %v2535_v9 = vadd.f32 %v6287_v3, %v2471_v10  ;;  %v4345_v54 = vld [vmem:[%s7043_s5] ss:$0 sm:$0xff] }
 0x202   :  { %v3461_v52 = vmax.f32 %v7403_v43, %v3397_v50  ;;  %v3336_v46 = vadd.f32 %v6287_v3, %v3272_v60  ;;  %v2469_v16 = vmul.f32 %v6251_v24, %v2405_v23  ;;  %v2408_v44 = vmax.f32 %v2330_v32, 0.0 }
 0x203   :  { %v7406_v48 = vmax.f32 %v7404_v59, %v7405_v14  ;;  %v3270_v8 = vmul.f32 %v6251_v24, %v3206_v12  ;;  %v3209_v17 = vmax.f32 %v3131_v51, 0.0  ;;  %v2322_v39 = vadd.f32 %v6232_v13, %v6632_v2 }
 0x204   :  { %3526 = vst.msk [vmem:[%s7046_s8 + $0x1b8] sm:$0xff] %vm3470_vm3, %v3461_v52  ;;  %v3400_v27 = vmax.f32 %v2535_v9, %v3336_v46  ;;  %v2533_v49 = vadd.f32 %v6287_v3, %v2469_v16  ;;  %v2472_v36 = vmul.f32 %v6251_v24, %v2408_v44  ;;  %v3123_v34 = vadd.f32 %v6232_v13, %v6638_v37  ;;  %v7416_v16 = vld [vmem:[#allocation98_spill] sm:$0xff] }
 0x205   :  { %v3459_v35 = vmax.f32 %v7406_v48, %v3395_v20  ;;  %v3334_v30 = vadd.f32 %v6287_v3, %v3270_v8  ;;  %v3273_v11 = vmul.f32 %v6251_v24, %v3209_v17  ;;  %v2406_v61 = vmax.f32 %v2322_v39, 0.0 }
 0x206   :  { %v2343_v2 = vadd.f32 %v6232_v13, %v6666_v57  ;;  %v7409_v1 = vmax.f32 %v7407_v55, %v7408_v0  ;;  %v2536_v40 = vadd.f32 %v6287_v3, %v2472_v36  ;;  %v3207_v37 = vmax.f32 %v3123_v34, 0.0  ;;  %v7422_v55 = vld [vmem:[#allocation102_spill] sm:$0xff]  ;;  %v7423_v0 = vld [vmem:[#allocation103_spill] sm:$0xff] }
 0x207   :  { %3524 = vst.msk [vmem:[%s7046_s8 + $0x1a8] sm:$0xff] %vm3470_vm3, %v3459_v35  ;;  %v3144_v31 = vadd.f32 %v6232_v13, %v6671_v18  ;;  %v3398_v33 = vmax.f32 %v2533_v49, %v3334_v30  ;;  %v3337_v53 = vadd.f32 %v6287_v3, %v3273_v11  ;;  %v2470_v5 = vmul.f32 %v6251_v24, %v2406_v61  ;;  %v4346_v35 = vld [vmem:[%s7044_s6] ss:$0 sm:$0xff] }
 0x208   :  { %v3464_v22 = vmax.f32 %v7409_v1, %v3400_v27  ;;  %v2411_v7 = vmax.f32 %v2343_v2, 0.0  ;;  %v3271_v57 = vmul.f32 %v6251_v24, %v3207_v37  ;;  %v2335_v25 = vadd.f32 %v6232_v13, %v6673_v62  ;;  %v7413_v62 = vld [vmem:[#allocation96_spill] sm:$0xff] }
 0x209   :  { %v3212_v58 = vmax.f32 %v3144_v31, 0.0  ;;  %v3136_v18 = vadd.f32 %v6232_v13, %v6685_v42  ;;  %v7412_v15 = vmax.f32 %v7410_v63, %v7411_v56  ;;  %v3401_v38 = vmax.f32 %v2536_v40, %v3337_v53  ;;  %v7414_v42 = vld [vmem:[#allocation97_spill] sm:$0xff] }
 0x20a   :  { %3529 = vst.msk [vmem:[%s7046_s8 + $0x1d0] sm:$0xff] %vm3470_vm3, %v3464_v22  ;;  %v2534_v19 = vadd.f32 %v6287_v3, %v2470_v5  ;;  %v2475_v50 = vmul.f32 %v6251_v24, %v2411_v7  ;;  %v3335_v28 = vadd.f32 %v6287_v3, %v3271_v57  ;;  %v2409_v26 = vmax.f32 %v2335_v25, 0.0  ;;  %v7426_v53 = vld [vmem:[#allocation105_spill] sm:$0xff]  ;;  %v7429_v25 = vld [vmem:[#allocation107_spill] sm:$0xff] }
 0x20b   :  { %v3462_v6 = vmax.f32 %v7412_v15, %v3398_v33  ;;  %v3276_v47 = vmul.f32 %v6251_v24, %v3212_v58  ;;  %v3210_v10 = vmax.f32 %v3136_v18, 0.0  ;;  %v7415_v60 = vmax.f32 %v7413_v62, %v7414_v42  ;;  %v7425_v33 = vld [vmem:[#allocation104_spill] sm:$0xff]  ;;  %v7428_v58 = vld [vmem:[#allocation106_spill] sm:$0xff] }
 0x20c   :  { %v2539_v32 = vadd.f32 %v6287_v3, %v2475_v50  ;;  %v2346_v21 = vadd.f32 %v6232_v13, %v6687_v45  ;;  %v3147_v43 = vadd.f32 %v4345_v54, %v6693_v4  ;;  %v3399_v52 = vmax.f32 %v2534_v19, %v3335_v28  ;;  %v7417_v4 = vld [vmem:[#allocation99_spill] sm:$0xff] }
 0x20d   :  { %3527 = vst.msk [vmem:[%s7046_s8 + $0x1c0] sm:$0xff] %vm3470_vm3, %v3462_v6  ;;  %v3465_v23 = vmax.f32 %v7415_v60, %v3401_v38  ;;  %v3340_v20 = vadd.f32 %v6287_v3, %v3276_v47  ;;  %v2473_v12 = vmul.f32 %v6251_v24, %v2409_v26  ;;  %v3274_v51 = vmul.f32 %v6251_v24, %v3210_v10 }
 0x20e   :  { %v2412_v9 = vmax.f32 %v2346_v21, 0.0  ;;  %v3213_v13 = vmax.f32 %v3147_v43, 0.0  ;;  %v2338_v45 = vadd.f32 %v4345_v54, %v6695_v41  ;;  %v3139_v46 = vadd.f32 %v4345_v54, %v6705_v29  ;;  %v7419_v41 = vld [vmem:[#allocation100_spill] sm:$0xff]  ;;  %v7420_v29 = vld [vmem:[#allocation101_spill] sm:$0xff] }
 0x20f   :  { %3530 = vst.msk [vmem:[%s7046_s8 + $0x1d8] sm:$0xff] %vm3470_vm3, %v3465_v23  ;;  %v7418_v44 = vmax.f32 %v7416_v16, %v7417_v4  ;;  %v3404_v14 = vmax.f32 %v2539_v32, %v3340_v20  ;;  %v2537_v48 = vadd.f32 %v6287_v3, %v2473_v12  ;;  %v3338_v24 = vadd.f32 %v6287_v3, %v3274_v51 }
 0x210   :  { %v2476_v8 = vmul.f32 %v4346_v35, %v2412_v9  ;;  %v3277_v17 = vmul.f32 %v4346_v35, %v3213_v13  ;;  %v2410_v39 = vmax.f32 %v2338_v45, 0.0  ;;  %v3211_v27 = vmax.f32 %v3139_v46, 0.0 }
 0x211   :  { %v3463_v59 = vmax.f32 %v7418_v44, %v3399_v52  ;;  %v7421_v49 = vmax.f32 %v7419_v41, %v7420_v29  ;;  %v3402_v34 = vmax.f32 %v2537_v48, %v3338_v24  ;;  %v7424_v1 = vmax.f32 %v7422_v55, %v7423_v0 }
 0x212   :  { %v2540_v30 = vadd.f32 %v6287_v3, %v2476_v8  ;;  %v3341_v11 = vadd.f32 %v6287_v3, %v3277_v17  ;;  %v2474_v61 = vmul.f32 %v4346_v35, %v2410_v39  ;;  %v3275_v2 = vmul.f32 %v4346_v35, %v3211_v27 }
 0x213   :  { %3528 = vst.msk [vmem:[%s7046_s8 + $0x1c8] sm:$0xff] %vm3470_vm3, %v3463_v59  ;;  %v3468_v36 = vmax.f32 %v7421_v49, %v3404_v14  ;;  %v3466_v22 = vmax.f32 %v7424_v1, %v3402_v34  ;;  %v7427_v5 = vmax.f32 %v7425_v33, %v7426_v53  ;;  %v7430_v18 = vmax.f32 %v7428_v58, %v7429_v25 }
 0x214   :  { %v3405_v40 = vmax.f32 %v2540_v30, %v3341_v11  ;;  %v2538_v37 = vadd.f32 %v6287_v3, %v2474_v61  ;;  %v3339_v31 = vadd.f32 %v6287_v3, %v3275_v2 }
 0x215   :  { %3533 = vst.msk [vmem:[%s7046_s8 + $0x1f0] sm:$0xff] %vm3470_vm3, %v3468_v36  ;;  %3531 = vst.msk [vmem:[%s7046_s8 + $0x1e0] sm:$0xff] %vm3470_vm3, %v3466_v22 }
 0x216   :  { %v3469_v7 = vmax.f32 %v7427_v5, %v3405_v40  ;;  %v3403_v57 = vmax.f32 %v2538_v37, %v3339_v31 }
 0x218   :  { %3534 = vst.msk [vmem:[%s7046_s8 + $0x1f8] sm:$0xff] %vm3470_vm3, %v3469_v7  ;;  %v3467_v63 = vmax.f32 %v7430_v18, %v3403_v57 }
 0x21a   :  { %3532 = vst.msk [vmem:[%s7046_s8 + $0x1e8] sm:$0xff] %vm3470_vm3, %v3467_v63 }

// kernel: cnn_forward.4
= control target key start
LH: loop header
LB: loop body
LE: loop exit
PB: predicated region body
PF: predicated region fallthrough
CT: control target
= control target key end

     0   :  { %vm335_vm0 = vcmask 261120   ;;  %vm1916_vm1 = vcmask 523264   ;;  %s3794_s4 = inlined_call_operand.vmem [shape: bf16[288,64], index: 4, kind: input, shape index: {}]   ;;  %s3795_s0 = inlined_call_operand.vmem [shape: bf16[128,288], index: 0, kind: input, shape index: {}]   ;;  %s3796_s1 = inlined_call_operand.vmem [shape: bf16[128,288], index: 1, kind: input, shape index: {}]   ;;  %s3797_s2 = inlined_call_operand.vmem [shape: bf16[128,288], index: 2, kind: input, shape index: {}]   ;;  %s3798_s3 = inlined_call_operand.vmem [shape: bf16[128,288], index: 3, kind: input, shape index: {}]   ;;  %s3799_s5 = inlined_call_operand.vmem [shape: f32[1,64], index: 5, kind: input, shape index: {}]   ;;  %s3800_s6 = inlined_call_operand.vmem [shape: f32[1,64], index: 6, kind: input, shape index: {}]   ;;  %s3801_s7 = inlined_call_operand.vmem [shape: f32[1,64], index: 7, kind: input, shape index: {}]   ;;  %s3802_s8 = inlined_call_operand.vmem [shape: f32[128,64], index: 8, kind: output, shape index: {}]  }
   0x1   :  { %v2674_v0 = vld [vmem:[%s3794_s4 + $0x40] sm:$0xff]   ;;  %v2691_v3 = vld [vmem:[%s3794_s4 + $0x48] sm:$0xff]   ;;  %v2713_v7 = vld [vmem:[%s3794_s4 + $0x50] sm:$0xff]  }
   0x2   :  { %v2679_v1 = vld [vmem:[%s3794_s4 + $0x80] sm:$0xff]   ;;  %2086 = vmatprep.subr.bf16.mxu0 %v2674_v0  ;;  %v2698_v4 = vld [vmem:[%s3794_s4 + $0x88] sm:$0xff]   ;;  %v2725_v9 = vld [vmem:[%s3794_s4 + $0x10] sm:$0xff]  }
   0x3   :  { %v2685_v2 = vld [vmem:[%s3794_s4] sm:$0xff]   ;;  %2382 = vmatprep.subr.bf16.mxu1 %v2679_v1  ;;  %v2704_v5 = vld [vmem:[%s3794_s4 + $0x8] sm:$0xff]   ;;  %v2731_v10 = vld [vmem:[%s3794_s4 + $0x58] sm:$0xff]  }
   0x4   :  { %2087 = vmatpush3.bf16.msra.mxu0 %v2685_v2  ;;  %2383 = vmatpush3.bf16.msra.mxu1 %v2679_v1  ;;  %v2484_v6 = vld [vmem:[%s3795_s0 + $0x8] ss:$12 sps:$4 sm:$0xff]   ;;  %v2486_v8 = vld [vmem:[%s3795_s0 + $0x20] ss:$12 sps:$4 sm:$0xff]   ;;  %v2737_v11 = vld [vmem:[%s3794_s4 + $0x18] sm:$0xff]  }
   0x5   :  { %2088 = vmatprep.subr.bf16.mxu0 %v2691_v3  ;;  %2384 = vmatprep.subr.bf16.mxu1 %v2698_v4  ;;  %v2490_v12 = vld [vmem:[%s3795_s0 + $0x38] ss:$12 sps:$4 sm:$0xff]   ;;  %v2492_v14 = vld [vmem:[%s3795_s0 + $0x50] ss:$12 sps:$4 sm:$0xff]   ;;  %v2767_v16 = vld [vmem:[%s3794_s4 + $0x68] sm:$0xff]  }
   0x6   :  { %2386 = vmatprep.mubr.msk.bf16.mxu1 %vm335_vm0, %v2484_v6  ;;  %v2749_v13 = vld [vmem:[%s3794_s4 + $0x60] sm:$0xff]   ;;  %v2496_v17 = vld [vmem:[%s3795_s0 + $0x68] ss:$12 sps:$4 sm:$0xff]   ;;  %v2801_v22 = vld [vmem:[%s3794_s4 + $0x78] sm:$0xff]  }
   0x7   :  { %v2760_v15 = vld [vmem:[%s3794_s4 + $0x20] sm:$0xff]   ;;  %v2778_v18 = vld [vmem:[%s3794_s4 + $0x28] sm:$0xff]   ;;  %v2785_v19 = vld [vmem:[%s3794_s4 + $0x70] sm:$0xff]  }
   0x8   :  { %2089 = vmatpush3.bf16.msra.mxu0 %v2704_v5  ;;  %2385 = vmatpush3.bf16.msra.mxu1 %v2698_v4  ;;  %v2498_v20 = vld [vmem:[%s3795_s0 + $0x80] ss:$12 sps:$4 sm:$0xff]   ;;  %v2794_v21 = vld [vmem:[%s3794_s4 + $0x30] sm:$0xff]   ;;  %v2505_v24 = vld [vmem:[%s3795_s0 + $0x98] ss:$12 sps:$4 sm:$0xff]  }
   0x9   :  { %2090 = vmatprep.subr.bf16.mxu0 %v2713_v7  ;;  %2160 = vmatprep.subr.bf16.mxu1 %v2674_v0  ;;  %v2504_v23 = vld [vmem:[%s3795_s0 + $0x4] ss:$12 sps:$4 sm:$0xff]   ;;  %v2817_v25 = vld [vmem:[%s3794_s4 + $0x38] sm:$0xff]   ;;  %v2502_v26 = vld [vmem:[%s3795_s0] ss:$12 sps:$4 sm:$0xff]  }
   0xa   :  { %392 = vmatprep.mubr.bf16.mxu0 %v2504_v23  ;;  %v2506_v27 = vld [vmem:[%s3795_s0 + $0xb0] ss:$12 sps:$4 sm:$0xff]   ;;  %v2509_v30 = vld [vmem:[%s3796_s1] ss:$12 sps:$4 sm:$0xff]   ;;  %v2512_v31 = vld [vmem:[%s3795_s0 + $0x18] ss:$12 sps:$4 sm:$0xff]  }
   0xb   :  { %2387 = vmatmul.mubr.msk.bf16.vlgmr.msra.gmra.mrb[0].mxu1 %vm335_vm0, %v2486_v8  ;;  %v2507_v28 = vld [vmem:[%s3795_s0 + $0x1c] ss:$12 sps:$4 sm:$0xff]   ;;  %v2511_v29 = vld [vmem:[%s3796_s1 + $0x4] ss:$12 sps:$4 sm:$0xff]   ;;  %v2513_v32 = vld [vmem:[%s3795_s0 + $0x34] ss:$12 sps:$4 sm:$0xff]  }
   0xc   :  { %2091 = vmatpush3.bf16.msra.mxu0 %v2725_v9  ;;  %2161 = vmatpush3.bf16.msra.mxu1 %v2685_v2  ;;  %v2515_v33 = vld [vmem:[%s3796_s1 + $0x1c] ss:$12 sps:$4 sm:$0xff]   ;;  %v2518_v35 = vld [vmem:[%s3796_s1 + $0x18] ss:$12 sps:$4 sm:$0xff]   ;;  %v2521_v37 = vld [vmem:[%s3796_s1 + $0x34] ss:$12 sps:$4 sm:$0xff]  }
   0xd   :  { %2092 = vmatprep.subr.bf16.mxu0 %v2731_v10  ;;  %2162 = vmatprep.subr.bf16.mxu1 %v2691_v3  ;;  %v2517_v34 = vld [vmem:[%s3795_s0 + $0x30] ss:$12 sps:$4 sm:$0xff]   ;;  %v2519_v36 = vld [vmem:[%s3795_s0 + $0x4c] ss:$12 sps:$4 sm:$0xff]   ;;  %v2523_v38 = vld [vmem:[%s3795_s0 + $0x48] ss:$12 sps:$4 sm:$0xff]  }
   0xe   :  { %2390 = vmatprep.mubr.msk.bf16.mxu1 %vm335_vm0, %v2490_v12  ;;  %v2524_v39 = vld [vmem:[%s3796_s1 + $0x30] ss:$12 sps:$4 sm:$0xff]   ;;  %v2527_v41 = vld [vmem:[%s3796_s1 + $0x4c] ss:$12 sps:$4 sm:$0xff]   ;;  %v2530_v43 = vld [vmem:[%s3796_s1 + $0x48] ss:$12 sps:$4 sm:$0xff]  }
   0xf   :  { %v2525_v40 = vld [vmem:[%s3795_s0 + $0x64] ss:$12 sps:$4 sm:$0xff]   ;;  %v2529_v42 = vld [vmem:[%s3795_s0 + $0x60] ss:$12 sps:$4 sm:$0xff]   ;;  %v2531_v44 = vld [vmem:[%s3795_s0 + $0x7c] ss:$12 sps:$4 sm:$0xff]  }
  0x10   :  { %2093 = vmatpush3.bf16.msra.mxu0 %v2737_v11  ;;  %2163 = vmatpush3.bf16.msra.mxu1 %v2704_v5  ;;  %v2533_v45 = vld [vmem:[%s3796_s1 + $0x64] ss:$12 sps:$4 sm:$0xff]   ;;  %v2536_v47 = vld [vmem:[%s3796_s1 + $0x60] ss:$12 sps:$4 sm:$0xff]   ;;  %v2539_v49 = vld [vmem:[%s3796_s1 + $0x7c] ss:$12 sps:$4 sm:$0xff]  }
  0x11   :  { %2094 = vmatprep.subr.bf16.mxu0 %v2749_v13  ;;  %2164 = vmatprep.subr.bf16.mxu1 %v2713_v7  ;;  %v2535_v46 = vld [vmem:[%s3795_s0 + $0x78] ss:$12 sps:$4 sm:$0xff]   ;;  %v2537_v48 = vld [vmem:[%s3795_s0 + $0x94] ss:$12 sps:$4 sm:$0xff]   ;;  %v2541_v50 = vld [vmem:[%s3795_s0 + $0x90] ss:$12 sps:$4 sm:$0xff]  }
  0x12   :  { %v2542_v51 = vld [vmem:[%s3796_s1 + $0x78] ss:$12 sps:$4 sm:$0xff]   ;;  %v2545_v53 = vld [vmem:[%s3796_s1 + $0x94] ss:$12 sps:$4 sm:$0xff]   ;;  %v2548_v55 = vld [vmem:[%s3796_s1 + $0x90] ss:$12 sps:$4 sm:$0xff]  }
  0x13   :  { %2391 = vmatmul.mubr.msk.bf16.gmra.mrb[4].mxu1 %vm335_vm0, %v2492_v14  ;;  %v2543_v52 = vld [vmem:[%s3795_s0 + $0xac] ss:$12 sps:$4 sm:$0xff]   ;;  %v2547_v54 = vld [vmem:[%s3795_s0 + $0xa8] ss:$12 sps:$4 sm:$0xff]   ;;  %v2557_v61 = vld [vmem:[%s3797_s2 + $0x4] ss:$12 sps:$4 sm:$0xff]  }
  0x14   :  { %2095 = vmatpush3.bf16.msra.mxu0 %v2760_v15  ;;  %2165 = vmatpush3.bf16.msra.mxu1 %v2725_v9  ;;  %v2549_v56 = vld [vmem:[%s3796_s1 + $0xac] ss:$12 sps:$4 sm:$0xff]   ;;  %v2551_v57 = vld [vmem:[%s3796_s1 + $0x8] ss:$12 sps:$4 sm:$0xff]   ;;  %v2558_v63 = vld [vmem:[%s3796_s1 + $0x50] ss:$12 sps:$4 sm:$0xff]  }
  0x15   :  { %2096 = vmatprep.subr.bf16.mxu0 %v2767_v16  ;;  %2166 = vmatprep.subr.bf16.mxu1 %v2731_v10  ;;  %v2552_v58 = vld [vmem:[%s3796_s1 + $0xa8] ss:$12 sps:$4 sm:$0xff]   ;;  %v2553_v59 = vld [vmem:[%s3796_s1 + $0x20] ss:$12 sps:$4 sm:$0xff]   ;;  %v2554_v60 = vld [vmem:[%s3796_s1 + $0x38] ss:$12 sps:$4 sm:$0xff]  }
  0x16   :  { %2394 = vmatprep.mubr.msk.bf16.mxu1 %vm335_vm0, %v2496_v17  ;;  %v2555_v62 = vld [vmem:[%s3797_s2] ss:$12 sps:$4 sm:$0xff]   ;;  %v2559_v6 = vld [vmem:[%s3796_s1 + $0x68] ss:$12 sps:$4 sm:$0xff]   ;;  %v2563_v14 = vld [vmem:[%s3797_s2 + $0x18] ss:$12 sps:$4 sm:$0xff]  }
  0x17   :  { %v2560_v8 = vld [vmem:[%s3797_s2 + $0x1c] ss:$12 sps:$4 sm:$0xff]   ;;  %v2562_v12 = vld [vmem:[%s3796_s1 + $0x80] ss:$12 sps:$4 sm:$0xff]  }
  0x18   :  { %2097 = vmatpush3.bf16.msra.mxu0 %v2778_v18  ;;  %2167 = vmatpush3.bf16.msra.mxu1 %v2737_v11  ;;  %v2565_v17 = vld [vmem:[%s3797_s2 + $0x34] ss:$12 sps:$4 sm:$0xff]   ;;  %v2568_v23 = vld [vmem:[%s3797_s2 + $0x30] ss:$12 sps:$4 sm:$0xff]  }
  0x19   :  { %2098 = vmatprep.subr.bf16.mxu0 %v2785_v19  ;;  %2168 = vmatprep.subr.bf16.mxu1 %v2749_v13 }
  0x1b   :  { %2395 = vmatmul.mubr.msk.bf16.gmra.mrb[8].mxu1 %vm335_vm0, %v2498_v20  ;;  %v2567_v20 = vld [vmem:[%s3796_s1 + $0xb0] ss:$12 sps:$4 sm:$0xff]  }
  0x1c   :  { %2099 = vmatpush3.bf16.msra.mxu0 %v2794_v21  ;;  %2169 = vmatpush3.bf16.msra.mxu1 %v2760_v15 }
  0x1d   :  { %2100 = vmatprep.subr.bf16.mxu0 %v2801_v22  ;;  %2170 = vmatprep.subr.bf16.mxu1 %v2767_v16 }
  0x1e   :  { %2398 = vmatprep.mubr.msk.bf16.mxu1 %vm335_vm0, %v2505_v24  ;;  %v2569_v24 = vld [vmem:[%s3797_s2 + $0x4c] ss:$12 sps:$4 sm:$0xff]  }
  0x20   :  { %2101 = vmatpush3.bf16.msra.mxu0 %v2817_v25  ;;  %2171 = vmatpush3.bf16.msra.mxu1 %v2778_v18 }
  0x21   :  { %2172 = vmatprep.subr.bf16.mxu1 %v2785_v19  ;;  %2402 = vmatprep.subr.bf16.mxu0 %v2679_v1 }
  0x23   :  { %393 = vmatmul.mubr.bf16.vlgmr.msra.gmra.mrb[0].mxu0 %v2502_v26  ;;  %2399 = vmatmul.mubr.msk.bf16.gmra.mrb[12].mxu1 %vm335_vm0, %v2506_v27  ;;  %v2571_v26 = vld [vmem:[%s3797_s2 + $0x8] ss:$12 sps:$4 sm:$0xff]  }
  0x24   :  { %2173 = vmatpush3.bf16.msra.mxu1 %v2794_v21  ;;  %2403 = vmatpush3.bf16.msra.mxu0 %v2679_v1  ;;  %v2572_v27 = vld [vmem:[%s3797_s2 + $0x48] ss:$12 sps:$4 sm:$0xff]  }
  0x25   :  { %2174 = vmatprep.subr.bf16.mxu1 %v2801_v22  ;;  %400 = vmatprep.mubr.bf16.mxu0 %v2507_v28  ;;  %v2573_v28 = vld [vmem:[%s3797_s2 + $0x20] ss:$12 sps:$4 sm:$0xff]  }
  0x26   :  { %822 = vmatprep.mubr.bf16.mxu1 %v2511_v29  ;;  %2404 = vmatprep.subr.bf16.mxu0 %v2698_v4  ;;  %v2574_v29 = vld [vmem:[%s3797_s2 + $0x64] ss:$12 sps:$4 sm:$0xff]  }
  0x28   :  { %2175 = vmatpush3.bf16.msra.mxu1 %v2817_v25  ;;  %2405 = vmatpush3.bf16.msra.mxu0 %v2698_v4 }
  0x29   :  { %2234 = vmatprep.subr.bf16.mxu1 %v2674_v0  ;;  %2422 = vmatprep.subr.bf16.mxu0 %v2679_v1 }
  0x2b   :  { %401 = vmatmul.mubr.bf16.gmra.mrb[4].mxu0 %v2512_v31  ;;  %823 = vmatmul.mubr.bf16.vlgmr.msra.gmra.mrb[16].mxu1 %v2509_v30  ;;  %v2576_v30 = vld [vmem:[%s3797_s2 + $0x38] ss:$12 sps:$4 sm:$0xff]   ;;  %v2577_v31 = vld [vmem:[%s3797_s2 + $0x60] ss:$12 sps:$4 sm:$0xff]  }
  0x2c   :  { %408 = vmatprep.mubr.bf16.mxu0 %v2513_v32  ;;  %830 = vmatprep.mubr.bf16.mxu1 %v2515_v33  ;;  %v2578_v32 = vld [vmem:[%s3797_s2 + $0x50] ss:$12 sps:$4 sm:$0xff]   ;;  %v2589_v33 = vld [vmem:[%s3797_s2 + $0xac] ss:$12 sps:$4 sm:$0xff]  }
  0x2d   :  { %2235 = vmatpush3.bf16.msra.mxu1 %v2685_v2 }
  0x2e   :  { %2236 = vmatprep.subr.bf16.mxu1 %v2691_v3 }
  0x31   :  { %2237 = vmatpush3.bf16.msra.mxu1 %v2704_v5 }
  0x32   :  { %2238 = vmatprep.subr.bf16.mxu1 %v2713_v7 }
  0x33   :  { %409 = vmatmul.mubr.bf16.gmra.mrb[8].mxu0 %v2517_v34  ;;  %831 = vmatmul.mubr.bf16.gmra.mrb[20].mxu1 %v2518_v35  ;;  %v2601_v34 = vld [vmem:[%s3798_s3 + $0x34] ss:$12 sps:$4 sm:$0xff]  }
  0x34   :  { %416 = vmatprep.mubr.bf16.mxu0 %v2519_v36  ;;  %838 = vmatprep.mubr.bf16.mxu1 %v2521_v37  ;;  %v2603_v35 = vld [vmem:[%s3798_s3 + $0x8] ss:$12 sps:$4 sm:$0xff]   ;;  %v2604_v36 = vld [vmem:[%s3798_s3 + $0x30] ss:$12 sps:$4 sm:$0xff]   ;;  %v2605_v37 = vld [vmem:[%s3798_s3 + $0x20] ss:$12 sps:$4 sm:$0xff]  }
  0x35   :  { %2239 = vmatpush3.bf16.msra.mxu1 %v2725_v9 }
  0x36   :  { %2240 = vmatprep.subr.bf16.mxu1 %v2731_v10 }
  0x39   :  { %2241 = vmatpush3.bf16.msra.mxu1 %v2737_v11 }
  0x3a   :  { %2242 = vmatprep.subr.bf16.mxu1 %v2749_v13 }
  0x3b   :  { %417 = vmatmul.mubr.bf16.gmra.mrb[12].mxu0 %v2523_v38  ;;  %839 = vmatmul.mubr.bf16.gmra.mrb[24].mxu1 %v2524_v39  ;;  %v2606_v38 = vld [vmem:[%s3798_s3 + $0x4c] ss:$12 sps:$4 sm:$0xff]   ;;  %v2609_v39 = vld [vmem:[%s3798_s3 + $0x48] ss:$12 sps:$4 sm:$0xff]  }
  0x3c   :  { %424 = vmatprep.mubr.bf16.mxu0 %v2525_v40  ;;  %846 = vmatprep.mubr.bf16.mxu1 %v2527_v41  ;;  %v2611_v40 = vld [vmem:[%s3798_s3 + $0x64] ss:$12 sps:$4 sm:$0xff]   ;;  %v2613_v41 = vld [vmem:[%s3798_s3 + $0x68] ss:$12 sps:$4 sm:$0xff]  }
  0x3d   :  { %2243 = vmatpush3.bf16.msra.mxu1 %v2760_v15 }
  0x3e   :  { %2244 = vmatprep.subr.bf16.mxu1 %v2767_v16 }
  0x41   :  { %2245 = vmatpush3.bf16.msra.mxu1 %v2778_v18 }
  0x42   :  { %2246 = vmatprep.subr.bf16.mxu1 %v2785_v19 }
  0x43   :  { %425 = vmatmul.mubr.bf16.gmra.mrb[16].mxu0 %v2529_v42  ;;  %847 = vmatmul.mubr.bf16.gmra.mrb[28].mxu1 %v2530_v43  ;;  %v2614_v42 = vld [vmem:[%s3798_s3 + $0x60] ss:$12 sps:$4 sm:$0xff]  }
  0x44   :  { %432 = vmatprep.mubr.bf16.mxu0 %v2531_v44  ;;  %854 = vmatprep.mubr.bf16.mxu1 %v2533_v45  ;;  %v2615_v43 = vld [vmem:[%s3798_s3 + $0x80] ss:$12 sps:$4 sm:$0xff]   ;;  %v2616_v44 = vld [vmem:[%s3798_s3 + $0x7c] ss:$12 sps:$4 sm:$0xff]   ;;  %v2618_v45 = vld [vmem:[%s3798_s3 + $0x98] ss:$12 sps:$4 sm:$0xff]  }
  0x45   :  { %2247 = vmatpush3.bf16.msra.mxu1 %v2794_v21 }
  0x46   :  { %2248 = vmatprep.subr.bf16.mxu1 %v2801_v22 }
  0x49   :  { %2249 = vmatpush3.bf16.msra.mxu1 %v2817_v25 }
  0x4a   :  { %2462 = vmatprep.subr.bf16.mxu1 %v2674_v0 }
  0x4b   :  { %433 = vmatmul.mubr.bf16.gmra.mrb[20].mxu0 %v2535_v46  ;;  %855 = vmatmul.mubr.bf16.gmra.mrb[32].mxu1 %v2536_v47  ;;  %v2619_v46 = vld [vmem:[%s3798_s3 + $0x78] ss:$12 sps:$4 sm:$0xff]   ;;  %v2620_v47 = vld [vmem:[%s3798_s3 + $0xb0] ss:$12 sps:$4 sm:$0xff]  }
  0x4c   :  { %440 = vmatprep.mubr.bf16.mxu0 %v2537_v48  ;;  %862 = vmatprep.mubr.bf16.mxu1 %v2539_v49  ;;  %v2621_v48 = vld [vmem:[%s3798_s3 + $0x94] ss:$12 sps:$4 sm:$0xff]   ;;  %v2623_v49 = vld [vmem:[%s3798_s3 + $0x90] ss:$12 sps:$4 sm:$0xff]  }
  0x53   :  { %441 = vmatmul.mubr.bf16.gmra.mrb[24].mxu0 %v2541_v50  ;;  %863 = vmatmul.mubr.bf16.gmra.mrb[36].mxu1 %v2542_v51 }
  0x54   :  { %448 = vmatprep.mubr.bf16.mxu0 %v2543_v52  ;;  %870 = vmatprep.mubr.bf16.mxu1 %v2545_v53 }
  0x5b   :  { %449 = vmatmul.mubr.bf16.gmra.mrb[28].mxu0 %v2547_v54  ;;  %871 = vmatmul.mubr.bf16.gmra.mrb[40].mxu1 %v2548_v55 }
  0x5c   :  { %878 = vmatprep.mubr.bf16.mxu1 %v2549_v56  ;;  %2406 = vmatprep.mubr.msk.bf16.mxu0 %vm335_vm0, %v2551_v57 }
  0x63   :  { %879 = vmatmul.mubr.bf16.gmra.mrb[44].mxu1 %v2552_v58  ;;  %2407 = vmatmul.mubr.msk.bf16.vlgmr.msra.gmra.mrb[32].mxu0 %vm335_vm0, %v2553_v59 }
  0x64   :  { %2423 = vmatpush3.bf16.msra.mxu0 %v2679_v1  ;;  %2410 = vmatprep.mubr.msk.bf16.mxu0 %vm335_vm0, %v2554_v60 }
  0x65   :  { %1256 = vmatprep.mubr.bf16.mxu1 %v2557_v61  ;;  %2424 = vmatprep.subr.bf16.mxu0 %v2698_v4 }
  0x68   :  { %2425 = vmatpush3.bf16.msra.mxu0 %v2698_v4 }
  0x69   :  { %2308 = vmatprep.subr.bf16.mxu0 %v2674_v0  ;;  %v2564_v0 = vld [vmem:[%s3796_s1 + $0x98] ss:$12 sps:$4 sm:$0xff]  }
  0x6b   :  { %2411 = vmatmul.mubr.msk.bf16.gmra.mrb[36].mxu0 %vm335_vm0, %v2558_v63  ;;  %1257 = vmatmul.mubr.bf16.vlgmr.msra.gmra.mrb[48].mxu1 %v2555_v62 }
  0x6c   :  { %2414 = vmatprep.mubr.msk.bf16.mxu0 %vm335_vm0, %v2559_v6  ;;  %1264 = vmatprep.mubr.bf16.mxu1 %v2560_v8  ;;  %v3194_v6 = vld [vmem:[%s3799_s5] ss:$0 sm:$0xff] }
  0x6d   :  { %2470 = vmatpush3.bf16.msra.mxu1 %v2685_v2 }
  0x6e   :  { %2463 = vmatprep.subr.bf16.mxu1 %v2691_v3 }
  0x71   :  { %2471 = vmatpush3.bf16.msra.mxu1 %v2704_v5 }
  0x72   :  { %2464 = vmatprep.subr.bf16.mxu1 %v2713_v7 }
  0x73   :  { %2415 = vmatmul.mubr.msk.bf16.gmra.mrb[40].mxu0 %vm335_vm0, %v2562_v12  ;;  %1265 = vmatmul.mubr.bf16.gmra.mrb[52].mxu1 %v2563_v14 }
  0x74   :  { %2418 = vmatprep.mubr.msk.bf16.mxu0 %vm335_vm0, %v2564_v0  ;;  %1272 = vmatprep.mubr.bf16.mxu1 %v2565_v17 }
  0x75   :  { %2472 = vmatpush3.bf16.msra.mxu1 %v2725_v9 }
  0x76   :  { %2465 = vmatprep.subr.bf16.mxu1 %v2731_v10 }
  0x79   :  { %2473 = vmatpush3.bf16.msra.mxu1 %v2737_v11 }
  0x7a   :  { %2466 = vmatprep.subr.bf16.mxu1 %v2749_v13 }
  0x7b   :  { %2419 = vmatmul.mubr.msk.bf16.gmra.mrb[44].mxu0 %vm335_vm0, %v2567_v20  ;;  %1273 = vmatmul.mubr.bf16.gmra.mrb[56].mxu1 %v2568_v23 }
  0x7c   :  { %1280 = vmatprep.mubr.bf16.mxu1 %v2569_v24  ;;  %2426 = vmatprep.mubr.msk.bf16.mxu0 %vm335_vm0, %v2571_v26 }
  0x7d   :  { %2474 = vmatpush3.bf16.msra.mxu1 %v2760_v15 }
  0x7e   :  { %2467 = vmatprep.subr.bf16.mxu1 %v2767_v16 }
  0x81   :  { %2475 = vmatpush3.bf16.msra.mxu1 %v2778_v18 }
  0x82   :  { %2468 = vmatprep.subr.bf16.mxu1 %v2785_v19 }
  0x83   :  { %1281 = vmatmul.mubr.bf16.gmra.mrb[60].mxu1 %v2572_v27  ;;  %2427 = vmatmul.mubr.msk.bf16.vlgmr.msra.gmra.mrb[48].mxu0 %vm335_vm0, %v2573_v28 }
  0x84   :  { %2309 = vmatpush3.bf16.msra.mxu0 %v2685_v2  ;;  %1288 = vmatprep.mubr.bf16.mxu1 %v2574_v29  ;;  %v2579_v2 = vld [vmem:[%s3797_s2 + $0x7c] ss:$12 sps:$4 sm:$0xff]  }
  0x85   :  { %2310 = vmatprep.subr.bf16.mxu0 %v2691_v3  ;;  %2430 = vmatprep.mubr.msk.bf16.mxu0 %vm335_vm0, %v2576_v30  ;;  %v2581_v3 = vld [vmem:[%s3797_s2 + $0x68] ss:$12 sps:$4 sm:$0xff]  }
  0x86   :  { %2476 = vmatpush3.bf16.msra.mxu1 %v2794_v21 }
  0x87   :  { %2469 = vmatprep.subr.bf16.mxu1 %v2801_v22 }
  0x88   :  { %2311 = vmatpush3.bf16.msra.mxu0 %v2704_v5  ;;  %v2582_v5 = vld [vmem:[%s3797_s2 + $0x78] ss:$12 sps:$4 sm:$0xff]  }
  0x89   :  { %2312 = vmatprep.subr.bf16.mxu0 %v2713_v7  ;;  %v2583_v7 = vld [vmem:[%s3797_s2 + $0x80] ss:$12 sps:$4 sm:$0xff]  }
  0x8a   :  { %2477 = vmatpush3.bf16.msra.mxu1 %v2817_v25 }
  0x8b   :  { %1289 = vmatmul.mubr.bf16.gmra.mrb[64].mxu1 %v2577_v31  ;;  %2431 = vmatmul.mubr.msk.bf16.gmra.mrb[52].mxu0 %vm335_vm0, %v2578_v32 }
  0x8c   :  { %2313 = vmatpush3.bf16.msra.mxu0 %v2725_v9  ;;  %1296 = vmatprep.mubr.bf16.mxu1 %v2579_v2  ;;  %v2584_v9 = vld [vmem:[%s3797_s2 + $0x94] ss:$12 sps:$4 sm:$0xff]  }
  0x8d   :  { %2314 = vmatprep.subr.bf16.mxu0 %v2731_v10  ;;  %2434 = vmatprep.mubr.msk.bf16.mxu0 %vm335_vm0, %v2581_v3  ;;  %v2586_v10 = vld [vmem:[%s3797_s2 + $0x98] ss:$12 sps:$4 sm:$0xff]  }
  0x8e   :  { %2442 = vmatprep.subr.bf16.mxu1 %v2679_v1 }
  0x90   :  { %2315 = vmatpush3.bf16.msra.mxu0 %v2737_v11  ;;  %v2587_v11 = vld [vmem:[%s3797_s2 + $0x90] ss:$12 sps:$4 sm:$0xff]  }
  0x91   :  { %2316 = vmatprep.subr.bf16.mxu0 %v2749_v13  ;;  %v2588_v13 = vld [vmem:[%s3797_s2 + $0xb0] ss:$12 sps:$4 sm:$0xff]  }
  0x93   :  { %1297 = vmatmul.mubr.bf16.gmra.mrb[68].mxu1 %v2582_v5  ;;  %2435 = vmatmul.mubr.msk.bf16.gmra.mrb[56].mxu0 %vm335_vm0, %v2583_v7 }
  0x94   :  { %2317 = vmatpush3.bf16.msra.mxu0 %v2760_v15  ;;  %1304 = vmatprep.mubr.bf16.mxu1 %v2584_v9  ;;  %v2593_v15 = vld [vmem:[%s3798_s3 + $0x4] ss:$12 sps:$4 sm:$0xff]  }
  0x95   :  { %2318 = vmatprep.subr.bf16.mxu0 %v2767_v16  ;;  %2438 = vmatprep.mubr.msk.bf16.mxu0 %vm335_vm0, %v2586_v10  ;;  %v2591_v16 = vld [vmem:[%s3798_s3] ss:$12 sps:$4 sm:$0xff]  }
  0x98   :  { %2319 = vmatpush3.bf16.msra.mxu0 %v2778_v18  ;;  %v2594_v18 = vld [vmem:[%s3797_s2 + $0xa8] ss:$12 sps:$4 sm:$0xff]  }
  0x99   :  { %2320 = vmatprep.subr.bf16.mxu0 %v2785_v19  ;;  %v2595_v19 = vld [vmem:[%s3798_s3 + $0x1c] ss:$12 sps:$4 sm:$0xff]  }
  0x9b   :  { %1305 = vmatmul.mubr.bf16.gmra.mrb[72].mxu1 %v2587_v11  ;;  %2439 = vmatmul.mubr.msk.bf16.gmra.mrb[60].mxu0 %vm335_vm0, %v2588_v13 }
  0x9c   :  { %2321 = vmatpush3.bf16.msra.mxu0 %v2794_v21  ;;  %1312 = vmatprep.mubr.bf16.mxu1 %v2589_v33  ;;  %v2599_v21 = vld [vmem:[%s3798_s3 + $0xac] ss:$12 sps:$4 sm:$0xff]  }
  0x9d   :  { %2322 = vmatprep.subr.bf16.mxu0 %v2801_v22  ;;  %1674 = vmatprep.mubr.bf16.mxu0 %v2593_v15  ;;  %v2597_v22 = vld [vmem:[%s3798_s3 + $0xa8] ss:$12 sps:$4 sm:$0xff]  }
  0xa0   :  { %2323 = vmatpush3.bf16.msra.mxu0 %v2817_v25  ;;  %v2600_v25 = vld [vmem:[%s3798_s3 + $0x18] ss:$12 sps:$4 sm:$0xff]  }
  0xa3   :  { %1313 = vmatmul.mubr.bf16.gmra.mrb[76].mxu1 %v2594_v18  ;;  %1675 = vmatmul.mubr.bf16.vlgmr.msra.gmra.mrb[64].mxu0 %v2591_v16 }
  0xa4   :  { %1682 = vmatprep.mubr.bf16.mxu0 %v2595_v19  ;;  %1730 = vmatprep.mubr.bf16.mxu1 %v2599_v21 }
  0xab   :  { %1683 = vmatmul.mubr.bf16.gmra.mrb[68].mxu0 %v2600_v25  ;;  %1731 = vmatmul.mubr.bf16.vlgmr.msra.gmra.mrb[80].mxu1 %v2597_v22 }
  0xac   :  { %2443 = vmatpush3.bf16.msra.mxu1 %v2679_v1  ;;  %1690 = vmatprep.mubr.bf16.mxu0 %v2601_v34  ;;  %v2608_v1 = vld [vmem:[%s3798_s3 + $0x38] ss:$12 sps:$4 sm:$0xff]  }
  0xad   :  { %2444 = vmatprep.subr.bf16.mxu1 %v2698_v4  ;;  %2446 = vmatprep.mubr.msk.bf16.mxu1 %vm335_vm0, %v2603_v35 }
  0xb0   :  { %2445 = vmatpush3.bf16.msra.mxu1 %v2698_v4  ;;  %v2610_v4 = vld [vmem:[%s3798_s3 + $0x50] ss:$12 sps:$4 sm:$0xff]  }
  0xb3   :  { %1691 = vmatmul.mubr.bf16.gmra.mrb[72].mxu0 %v2604_v36  ;;  %2447 = vmatmul.mubr.msk.bf16.vlgmr.msra.gmra.mrb[84].mxu1 %vm335_vm0, %v2605_v37 }
  0xb4   :  { %1698 = vmatprep.mubr.bf16.mxu0 %v2606_v38  ;;  %2450 = vmatprep.mubr.msk.bf16.mxu1 %vm335_vm0, %v2608_v1 }
  0xbb   :  { %1699 = vmatmul.mubr.bf16.gmra.mrb[76].mxu0 %v2609_v39  ;;  %2451 = vmatmul.mubr.msk.bf16.gmra.mrb[88].mxu1 %vm335_vm0, %v2610_v4 }
  0xbc   :  { %1706 = vmatprep.mubr.bf16.mxu0 %v2611_v40  ;;  %2454 = vmatprep.mubr.msk.bf16.mxu1 %vm335_vm0, %v2613_v41 }
  0xc3   :  { %1707 = vmatmul.mubr.bf16.gmra.mrb[80].mxu0 %v2614_v42  ;;  %2455 = vmatmul.mubr.msk.bf16.gmra.mrb[92].mxu1 %vm335_vm0, %v2615_v43 }
  0xc4   :  { %1714 = vmatprep.mubr.bf16.mxu0 %v2616_v44  ;;  %2458 = vmatprep.mubr.msk.bf16.mxu1 %vm335_vm0, %v2618_v45 }
  0xcb   :  { %1715 = vmatmul.mubr.bf16.gmra.mrb[84].mxu0 %v2619_v46  ;;  %2459 = vmatmul.mubr.msk.bf16.gmra.mrb[96].mxu1 %vm335_vm0, %v2620_v47 }
  0xcc   :  { %1722 = vmatprep.mubr.bf16.mxu0 %v2621_v48 }
  0xd3   :  { %1723 = vmatmul.mubr.bf16.gmra.mrb[88].mxu0 %v2623_v49 }
  0xde   :  { %v2388_v50 = vpop.f32.mrb[0].mxu1 }
  0xdf   :  { %v491_v51 = vpop.f32.mrb[1].mxu1 }
  0xe0   :  { %v2389_v52 = vpop.f32.mrb[2].mxu1 }
  0xe1   :  { %v494_v53 = vpop.f32.mrb[3].mxu1 }
  0xe6   :  { %v3177_v54 = vpop.f32.mrb[4].mxu1 }
  0xe7   :  { %v507_v55 = vpop.f32.mrb[5].mxu1 }
  0xe8   :  { %v3179_v56 = vpop.f32.mrb[6].mxu1 }
  0xe9   :  { %v510_v57 = vpop.f32.mrb[7].mxu1 }
  0xee   :  { %v3181_v58 = vpop.f32.mrb[8].mxu1 }
  0xef   :  { %v3183_v59 = vpop.f32.mrb[9].mxu1 }
  0xf0   :  { %v3185_v60 = vpop.f32.mrb[10].mxu1 }
  0xf1   :  { %v3187_v61 = vpop.f32.mrb[11].mxu1 }
  0xf6   :  { %v2102_v62 = vpop.f32.mrb[0].mxu0  ;;  %v3189_v63 = vpop.f32.mrb[12].mxu1 }
  0xf7   :  { %v2103_v8 = vpop.f32.mrb[1].mxu0  ;;  %v3196_v12 = vpop.f32.mrb[13].mxu1 }
  0xf8   :  { %v2104_v14 = vadd.f32 %v2103_v8, %v2102_v62  ;;  %v2105_v0 = vpop.f32.mrb[2].mxu0  ;;  %v3198_v17 = vpop.f32.mrb[14].mxu1 }
  0xf9   :  { %v2106_v20 = vpop.f32.mrb[3].mxu0  ;;  %v3200_v23 = vpop.f32.mrb[15].mxu1 }
  0xfa   :  { %v395_v24 = vadd.f32 %v2104_v14, %v3194_v6  ;;  %v2107_v26 = vadd.f32 %v2106_v20, %v2105_v0 }
  0xfc   :  { %v3203_v27 = vadd.f32 %v491_v51, %v395_v24  ;;  %v398_v28 = vadd.f32 %v2107_v26, %v3194_v6 }
  0xfe   :  { %v3206_v29 = vadd.f32 %v494_v53, %v398_v28  ;;  %v2108_v30 = vpop.f32.mrb[4].mxu0  ;;  %v2176_v31 = vpop.f32.mrb[16].mxu1 }
  0xff   :  { %v2109_v32 = vpop.f32.mrb[5].mxu0  ;;  %v2177_v2 = vpop.f32.mrb[17].mxu1 }
 0x100   :  { %v2110_v3 = vadd.f32 %v2109_v32, %v2108_v30  ;;  %v2111_v5 = vpop.f32.mrb[6].mxu0  ;;  %v3208_v7 = vadd.f32 %v2177_v2, %v2176_v31  ;;  %v2179_v9 = vpop.f32.mrb[18].mxu1 }
 0x101   :  { %v2112_v10 = vpop.f32.mrb[7].mxu0  ;;  %v2180_v11 = vpop.f32.mrb[19].mxu1 }
 0x102   :  { %v403_v13 = vadd.f32 %v2110_v3, %v3194_v6  ;;  %v2113_v33 = vadd.f32 %v2112_v10, %v2111_v5  ;;  %v3211_v15 = vadd.f32 %v2180_v11, %v2179_v9 }
 0x104   :  { %v3213_v16 = vadd.f32 %v2388_v50, %v403_v13  ;;  %v406_v18 = vadd.f32 %v2113_v33, %v3194_v6 }
 0x106   :  { %v3216_v19 = vadd.f32 %v2389_v52, %v406_v18  ;;  %v2114_v21 = vpop.f32.mrb[8].mxu0  ;;  %v2182_v22 = vpop.f32.mrb[20].mxu1 }
 0x107   :  { %v2115_v25 = vpop.f32.mrb[9].mxu0  ;;  %v2183_v34 = vpop.f32.mrb[21].mxu1 }
 0x108   :  { %v2116_v35 = vadd.f32 %v2115_v25, %v2114_v21  ;;  %v2117_v36 = vpop.f32.mrb[10].mxu0  ;;  %v3218_v37 = vadd.f32 %v2183_v34, %v2182_v22  ;;  %v2185_v38 = vpop.f32.mrb[22].mxu1 }
 0x109   :  { %v2118_v1 = vpop.f32.mrb[11].mxu0  ;;  %v2186_v39 = vpop.f32.mrb[23].mxu1 }
 0x10a   :  { %v411_v4 = vadd.f32 %v2116_v35, %v3194_v6  ;;  %v2119_v40 = vadd.f32 %v2118_v1, %v2117_v36  ;;  %v3221_v41 = vadd.f32 %v2186_v39, %v2185_v38 }
 0x10c   :  { %v3223_v42 = vadd.f32 %v507_v55, %v411_v4  ;;  %v414_v43 = vadd.f32 %v2119_v40, %v3194_v6 }
 0x10e   :  { %v3226_v44 = vadd.f32 %v510_v57, %v414_v43  ;;  %v2120_v45 = vpop.f32.mrb[12].mxu0  ;;  %v2188_v46 = vpop.f32.mrb[24].mxu1 }
 0x10f   :  { %v2121_v47 = vpop.f32.mrb[13].mxu0  ;;  %v2189_v48 = vpop.f32.mrb[25].mxu1 }
 0x110   :  { %v2122_v49 = vadd.f32 %v2121_v47, %v2120_v45  ;;  %v2123_v50 = vpop.f32.mrb[14].mxu0  ;;  %v3228_v51 = vadd.f32 %v2189_v48, %v2188_v46  ;;  %v2191_v52 = vpop.f32.mrb[26].mxu1 }
 0x111   :  { %v2124_v53 = vpop.f32.mrb[15].mxu0  ;;  %v2192_v62 = vpop.f32.mrb[27].mxu1 }
 0x112   :  { %v419_v8 = vadd.f32 %v2122_v49, %v3194_v6  ;;  %v2125_v14 = vadd.f32 %v2124_v53, %v2123_v50  ;;  %v3231_v55 = vadd.f32 %v2192_v62, %v2191_v52 }
 0x114   :  { %v3234_v0 = vadd.f32 %v3177_v54, %v419_v8  ;;  %v422_v57 = vadd.f32 %v2125_v14, %v3194_v6 }
 0x116   :  { %v3238_v20 = vadd.f32 %v3179_v56, %v422_v57  ;;  %v2126_v24 = vpop.f32.mrb[16].mxu0  ;;  %v2194_v26 = vpop.f32.mrb[28].mxu1 }
 0x117   :  { %v2127_v28 = vpop.f32.mrb[17].mxu0  ;;  %v2195_v30 = vpop.f32.mrb[29].mxu1 }
 0x118   :  { %v2128_v31 = vadd.f32 %v2127_v28, %v2126_v24  ;;  %v2129_v32 = vpop.f32.mrb[18].mxu0  ;;  %v3240_v2 = vadd.f32 %v2195_v30, %v2194_v26  ;;  %v2197_v3 = vpop.f32.mrb[30].mxu1  ;;  %v554_v26 = vmax.f32 %v3203_v27, 0.0 }
 0x119   :  { %v2130_v5 = vpop.f32.mrb[19].mxu0  ;;  %v2198_v9 = vpop.f32.mrb[31].mxu1 }
 0x11a   :  { %v427_v10 = vadd.f32 %v2128_v31, %v3194_v6  ;;  %v2131_v54 = vadd.f32 %v2130_v5, %v2129_v32  ;;  %v3243_v11 = vadd.f32 %v2198_v9, %v2197_v3  ;;  %v555_v31 = vmax.f32 %v3206_v29, 0.0  ;;  %v3290_v29 = vld [vmem:[%s3801_s7] ss:$0 sm:$0xff] }
 0x11b   :  { %v556_v32 = vmax.f32 %v3213_v16, 0.0  ;;  %v557_v3 = vmax.f32 %v3216_v19, 0.0 }
 0x11c   :  { %v3246_v13 = vadd.f32 %v3183_v59, %v427_v10  ;;  %v430_v56 = vadd.f32 %v2131_v54, %v3194_v6  ;;  %v558_v54 = vmax.f32 %v3223_v42, 0.0 }
 0x11e   :  { %v3250_v33 = vadd.f32 %v3187_v61, %v430_v56  ;;  %v2132_v18 = vpop.f32.mrb[20].mxu0  ;;  %v2200_v21 = vpop.f32.mrb[32].mxu1 }
 0x11f   :  { %v2133_v22 = vpop.f32.mrb[21].mxu0  ;;  %v2201_v25 = vpop.f32.mrb[33].mxu1 }
 0x120   :  { %v2134_v34 = vadd.f32 %v2133_v22, %v2132_v18  ;;  %v2135_v35 = vpop.f32.mrb[22].mxu0  ;;  %v3252_v36 = vadd.f32 %v2201_v25, %v2200_v21  ;;  %v2203_v38 = vpop.f32.mrb[34].mxu1  ;;  %v559_v25 = vmax.f32 %v3226_v44, 0.0 }
 0x121   :  { %v2136_v1 = vpop.f32.mrb[23].mxu0  ;;  %v2204_v39 = vpop.f32.mrb[35].mxu1 }
 0x122   :  { %v435_v4 = vadd.f32 %v2134_v34, %v3194_v6  ;;  %v2137_v59 = vadd.f32 %v2136_v1, %v2135_v35  ;;  %v3255_v40 = vadd.f32 %v2204_v39, %v2203_v38 }
 0x124   :  { %v3258_v43 = vadd.f32 %v3181_v58, %v435_v4  ;;  %v438_v61 = vadd.f32 %v2137_v59, %v3194_v6  ;;  %v560_v59 = vmax.f32 %v3234_v0, 0.0  ;;  %v833_v0 = vadd.f32 %v3218_v37, %v3194_v6 }
 0x126   :  { %v3262_v45 = vadd.f32 %v3185_v60, %v438_v61  ;;  %v2138_v46 = vpop.f32.mrb[24].mxu0  ;;  %v2206_v47 = vpop.f32.mrb[36].mxu1  ;;  %v3273_v60 = vld [vmem:[%s3800_s6] ss:$0 sm:$0xff] }
 0x127   :  { %v2139_v48 = vpop.f32.mrb[25].mxu0  ;;  %v2207_v49 = vpop.f32.mrb[37].mxu1  ;;  %v576_v10 = vmul.f32 %v3273_v60, %v554_v26  ;;  %v578_v22 = vmul.f32 %v3273_v60, %v556_v32  ;;  %v579_v35 = vmul.f32 %v3273_v60, %v557_v3  ;;  %v580_v4 = vmul.f32 %v3273_v60, %v558_v54 }
 0x128   :  { %v2140_v50 = vadd.f32 %v2139_v48, %v2138_v46  ;;  %v2141_v52 = vpop.f32.mrb[26].mxu0  ;;  %v3264_v53 = vadd.f32 %v2207_v49, %v2206_v47  ;;  %v2209_v62 = vpop.f32.mrb[38].mxu1  ;;  %v561_v46 = vmax.f32 %v3238_v20, 0.0  ;;  %v825_v48 = vadd.f32 %v3208_v7, %v3194_v6 }
 0x129   :  { %v2142_v8 = vpop.f32.mrb[27].mxu0  ;;  %v2210_v14 = vpop.f32.mrb[39].mxu1  ;;  %v3304_v61 = vadd.f32 %v3290_v29, %v576_v10  ;;  %v581_v49 = vmul.f32 %v3273_v60, %v559_v25  ;;  %v828_v7 = vadd.f32 %v3211_v15, %v3194_v6  ;;  %v841_v3 = vadd.f32 %v3228_v51, %v3194_v6 }
 0x12a   :  { %v443_v57 = vadd.f32 %v2140_v50, %v3194_v6  ;;  %v2143_v58 = vadd.f32 %v2142_v8, %v2141_v52  ;;  %v3267_v24 = vadd.f32 %v2210_v14, %v2209_v62  ;;  %v562_v50 = vmax.f32 %v3246_v13, 0.0 }
 0x12b   :  { %v3327_v8 = vadd.f32 %v3290_v29, %v579_v35  ;;  %v582_v14 = vmul.f32 %v3273_v60, %v560_v59 }
 0x12c   :  { %v3276_v28 = vadd.f32 %v3196_v12, %v443_v57  ;;  %v446_v30 = vadd.f32 %v2143_v58, %v3194_v6  ;;  %v836_v58 = vadd.f32 %v3221_v41, %v3194_v6  ;;  %v3344_v41 = vadd.f32 %v3290_v29, %v581_v49 }
 0x12d   :  { %v3351_v25 = vadd.f32 %v3290_v29, %v582_v14 }
 0x12e   :  { %v3283_v5 = vadd.f32 %v3200_v23, %v446_v30  ;;  %v2144_v27 = vpop.f32.mrb[28].mxu0  ;;  %v2212_v9 = vpop.f32.mrb[40].mxu1  ;;  %v577_v23 = vmul.f32 %v3273_v60, %v555_v31  ;;  %v583_v30 = vmul.f32 %v3273_v60, %v561_v46  ;;  %v852_v46 = vadd.f32 %v3243_v11, %v3194_v6 }
 0x12f   :  { %v2145_v56 = vpop.f32.mrb[29].mxu0  ;;  %v2213_v12 = vpop.f32.mrb[41].mxu1 }
 0x130   :  { %v2146_v18 = vadd.f32 %v2145_v56, %v2144_v27  ;;  %v2147_v21 = vpop.f32.mrb[30].mxu0  ;;  %v3292_v16 = vadd.f32 %v2213_v12, %v2212_v9  ;;  %v2215_v19 = vpop.f32.mrb[42].mxu1  ;;  %v3318_v52 = vadd.f32 %v3290_v29, %v577_v23  ;;  %v584_v9 = vmul.f32 %v3273_v60, %v562_v50 }
 0x131   :  { %v2148_v34 = vpop.f32.mrb[31].mxu0  ;;  %v2216_v42 = vpop.f32.mrb[43].mxu1  ;;  %v565_v50 = vmax.f32 %v3262_v45, 0.0 }
 0x132   :  { %v451_v38 = vadd.f32 %v2146_v18, %v3194_v6  ;;  %v2149_v1 = vadd.f32 %v2148_v34, %v2147_v21  ;;  %v3299_v39 = vadd.f32 %v2216_v42, %v2215_v19  ;;  %v563_v18 = vmax.f32 %v3250_v33, 0.0 }
 0x133   :  { %v844_v34 = vadd.f32 %v3231_v55, %v3194_v6  ;;  %v3359_v33 = vadd.f32 %v3290_v29, %v583_v30  ;;  %v3374_v49 = vadd.f32 %v3290_v29, %v584_v9 }
 0x134   :  { %v3308_v44 = vadd.f32 %v3189_v63, %v451_v38  ;;  %v454_v47 = vadd.f32 %v2149_v1, %v3194_v6  ;;  %v3324_v63 = vadd.f32 %v3290_v29, %v578_v22  ;;  %v849_v38 = vadd.f32 %v3240_v2, %v3194_v6 }
 0x135   :  { %v564_v1 = vmax.f32 %v3258_v43, 0.0  ;;  %v585_v55 = vmul.f32 %v3273_v60, %v563_v18 }
 0x136   :  { %v3321_v20 = vadd.f32 %v3198_v17, %v454_v47  ;;  %v2408_v62 = vpop.f32.mrb[32].mxu0  ;;  %v2218_v13 = vpop.f32.mrb[44].mxu1  ;;  %v3335_v17 = vadd.f32 %v3290_v29, %v580_v4 }
 0x137   :  { %v930_v37 = vadd.f32 %v2408_v62, %v833_v0  ;;  %v921_v57 = vpop.f32.mrb[33].mxu0  ;;  %v2219_v26 = vpop.f32.mrb[45].mxu1  ;;  %v586_v30 = vmul.f32 %v3273_v60, %v564_v1 }
 0x138   :  { %v922_v31 = vadd.f32 %v921_v57, %v825_v48  ;;  %v2409_v32 = vpop.f32.mrb[34].mxu0  ;;  %v3340_v15 = vadd.f32 %v2219_v26, %v2218_v13  ;;  %v2221_v27 = vpop.f32.mrb[46].mxu1 }
 0x139   :  { %v986_v10 = vmax.f32 %v930_v37, 0.0  ;;  %v933_v54 = vadd.f32 %v2409_v32, %v836_v58  ;;  %v924_v56 = vpop.f32.mrb[35].mxu0  ;;  %v2222_v12 = vpop.f32.mrb[47].mxu1 }
 0x13a   :  { %v984_v21 = vmax.f32 %v922_v31, 0.0  ;;  %v925_v19 = vadd.f32 %v924_v56, %v828_v7  ;;  %v3347_v23 = vadd.f32 %v2222_v12, %v2221_v27 }
 0x13b   :  { %v1002_v51 = vmul.f32 %v3273_v60, %v986_v10  ;;  %v987_v22 = vmax.f32 %v933_v54, 0.0 }
 0x13c   :  { %v1000_v42 = vmul.f32 %v3273_v60, %v984_v21  ;;  %v985_v35 = vmax.f32 %v925_v19, 0.0  ;;  %v857_v19 = vadd.f32 %v3252_v36, %v3194_v6  ;;  %v865_v36 = vadd.f32 %v3264_v53, %v3194_v6 }
 0x13d   :  { %v3363_v4 = vadd.f32 %v3290_v29, %v1002_v51  ;;  %v1003_v59 = vmul.f32 %v3273_v60, %v987_v22  ;;  %v3400_v51 = vadd.f32 %v3290_v29, %v585_v55  ;;  %v587_v22 = vmul.f32 %v3273_v60, %v565_v50 }
 0x13e   :  { %v3370_v47 = vadd.f32 %v3290_v29, %v1000_v42  ;;  %v1001_v2 = vmul.f32 %v3273_v60, %v985_v35  ;;  %v2412_v48 = vpop.f32.mrb[36].mxu0  ;;  %v2250_v43 = vpop.f32.mrb[48].mxu1  ;;  %v567_v50 = vmax.f32 %v3283_v5, 0.0  ;;  %v568_v5 = vmax.f32 %v3308_v44, 0.0 }
 0x13f   :  { %v3380_v62 = vadd.f32 %v3290_v29, %v1003_v59  ;;  %v946_v11 = vadd.f32 %v2412_v48, %v849_v38  ;;  %v937_v7 = vpop.f32.mrb[37].mxu0  ;;  %v2251_v13 = vpop.f32.mrb[49].mxu1  ;;  %v860_v38 = vadd.f32 %v3255_v40, %v3194_v6  ;;  %v3411_v59 = vadd.f32 %v3290_v29, %v586_v30 }
 0x140   :  { %v3385_v37 = vadd.f32 %v3290_v29, %v1001_v2  ;;  %v938_v57 = vadd.f32 %v937_v7, %v841_v3  ;;  %v2413_v58 = vpop.f32.mrb[38].mxu0  ;;  %v3387_v26 = vadd.f32 %v2251_v13, %v2250_v43  ;;  %v2253_v45 = vpop.f32.mrb[50].mxu1  ;;  %v868_v40 = vadd.f32 %v3267_v24, %v3194_v6 }
 0x141   :  { %v990_v32 = vmax.f32 %v946_v11, 0.0  ;;  %v949_v27 = vadd.f32 %v2413_v58, %v852_v46  ;;  %v940_v9 = vpop.f32.mrb[39].mxu0  ;;  %v2254_v10 = vpop.f32.mrb[51].mxu1  ;;  %3814 = vst [vmem:[#allocation2_spill] sm:$0xff] %v3411_v59  ;;  %v566_v46 = vmax.f32 %v3276_v28, 0.0 }
 0x142   :  { %v988_v56 = vmax.f32 %v938_v57, 0.0  ;;  %v941_v12 = vadd.f32 %v940_v9, %v844_v34  ;;  %v3394_v18 = vadd.f32 %v2254_v10, %v2253_v45 }
 0x143   :  { %v1006_v3 = vmul.f32 %v3273_v60, %v990_v32  ;;  %v991_v21 = vmax.f32 %v949_v27, 0.0 }
 0x144   :  { %v1004_v42 = vmul.f32 %v3273_v60, %v988_v56  ;;  %v989_v35 = vmax.f32 %v941_v12, 0.0 }
 0x145   :  { %v3407_v34 = vadd.f32 %v3290_v29, %v1006_v3  ;;  %v1007_v1 = vmul.f32 %v3273_v60, %v991_v21 }
 0x146   :  { %v3417_v55 = vadd.f32 %v3290_v29, %v1004_v42  ;;  %v1005_v2 = vmul.f32 %v3273_v60, %v989_v35  ;;  %v2416_v48 = vpop.f32.mrb[40].mxu0  ;;  %v2256_v43 = vpop.f32.mrb[52].mxu1 }
 0x147   :  { %v3426_v7 = vadd.f32 %v3290_v29, %v1007_v1  ;;  %v962_v53 = vadd.f32 %v2416_v48, %v865_v36  ;;  %v953_v28 = vpop.f32.mrb[41].mxu0  ;;  %v2257_v13 = vpop.f32.mrb[53].mxu1  ;;  %v3441_v36 = vadd.f32 %v3290_v29, %v587_v22  ;;  %v881_v22 = vadd.f32 %v3340_v15, %v3194_v6 }
 0x148   :  { %v3431_v58 = vadd.f32 %v3290_v29, %v1005_v2  ;;  %v954_v45 = vadd.f32 %v953_v28, %v857_v19  ;;  %v2417_v24 = vpop.f32.mrb[42].mxu0  ;;  %v2258_v30 = vadd.f32 %v2257_v13, %v2256_v43  ;;  %v2259_v32 = vpop.f32.mrb[54].mxu1  ;;  %v588_v19 = vmul.f32 %v3273_v60, %v566_v46 }
 0x149   :  { %v994_v9 = vmax.f32 %v962_v53, 0.0  ;;  %v965_v10 = vadd.f32 %v2417_v24, %v868_v40  ;;  %v956_v56 = vpop.f32.mrb[43].mxu0  ;;  %v2260_v12 = vpop.f32.mrb[55].mxu1  ;;  %3815 = vst [vmem:[#allocation3_spill] sm:$0xff] %v3441_v36  ;;  %v589_v2 = vmul.f32 %v3273_v60, %v567_v50  ;;  %v873_v43 = vadd.f32 %v3292_v16, %v3194_v6 }
 0x14a   :  { %v992_v21 = vmax.f32 %v954_v45, 0.0  ;;  %v957_v42 = vadd.f32 %v956_v56, %v860_v38  ;;  %v2261_v35 = vadd.f32 %v2260_v12, %v2259_v32  ;;  %v569_v53 = vmax.f32 %v3321_v20, 0.0 }
 0x14b   :  { %v1010_v1 = vmul.f32 %v3273_v60, %v994_v9  ;;  %v995_v44 = vmax.f32 %v965_v10, 0.0  ;;  %v590_v28 = vmul.f32 %v3273_v60, %v568_v5  ;;  %v876_v16 = vadd.f32 %v3299_v39, %v3194_v6 }
 0x14c   :  { %v1008_v48 = vmul.f32 %v3273_v60, %v992_v21  ;;  %v993_v40 = vmax.f32 %v957_v42, 0.0  ;;  %v884_v5 = vadd.f32 %v3347_v23, %v3194_v6 }
 0x14d   :  { %v3449_v38 = vadd.f32 %v3290_v29, %v1010_v1  ;;  %v1011_v46 = vmul.f32 %v3273_v60, %v995_v44  ;;  %v591_v44 = vmul.f32 %v3273_v60, %v569_v53  ;;  %v3481_v53 = vadd.f32 %v3290_v29, %v588_v19 }
 0x14e   :  { %v3456_v50 = vadd.f32 %v3290_v29, %v1008_v48  ;;  %v1009_v13 = vmul.f32 %v3273_v60, %v993_v40  ;;  %v2420_v45 = vpop.f32.mrb[44].mxu0  ;;  %v2262_v20 = vpop.f32.mrb[56].mxu1 }
 0x14f   :  { %3816 = vst [vmem:[#allocation4_spill] sm:$0xff] %v3449_v38  ;;  %v3464_v32 = vadd.f32 %v3290_v29, %v1011_v46  ;;  %v978_v9 = vadd.f32 %v2420_v45, %v881_v22  ;;  %v969_v15 = vpop.f32.mrb[45].mxu0  ;;  %v2263_v10 = vpop.f32.mrb[57].mxu1  ;;  %3818 = vst [vmem:[#allocation6_spill] sm:$0xff] %v3481_v53 }
 0x150   :  { %v3471_v12 = vadd.f32 %v3290_v29, %v1009_v13  ;;  %v970_v39 = vadd.f32 %v969_v15, %v873_v43  ;;  %v2421_v21 = vpop.f32.mrb[46].mxu0  ;;  %v2264_v42 = vadd.f32 %v2263_v10, %v2262_v20  ;;  %v2265_v1 = vpop.f32.mrb[58].mxu1  ;;  %v1267_v20 = vadd.f32 %v2258_v30, %v3194_v6 }
 0x151   :  { %3817 = vst [vmem:[#allocation5_spill] sm:$0xff] %v3464_v32  ;;  %v998_v40 = vmax.f32 %v978_v9, 0.0  ;;  %v981_v46 = vadd.f32 %v2421_v21, %v884_v5  ;;  %v972_v22 = vpop.f32.mrb[47].mxu0  ;;  %v2266_v23 = vpop.f32.mrb[59].mxu1  ;;  %v3485_v9 = vadd.f32 %v3290_v29, %v589_v2  ;;  %v3488_v21 = vadd.f32 %v3290_v29, %v590_v28 }
 0x152   :  { %v996_v24 = vmax.f32 %v970_v39, 0.0  ;;  %v973_v56 = vadd.f32 %v972_v22, %v876_v16  ;;  %v2267_v13 = vadd.f32 %v2266_v23, %v2265_v1  ;;  %v3494_v39 = vadd.f32 %v3290_v29, %v591_v44 }
 0x153   :  { %v1014_v43 = vmul.f32 %v3273_v60, %v998_v40  ;;  %v999_v15 = vmax.f32 %v981_v46, 0.0  ;;  %3819 = vst [vmem:[#allocation7_spill] sm:$0xff] %v3485_v9  ;;  %v1259_v2 = vadd.f32 %v3387_v26, %v3194_v6  ;;  %v1262_v28 = vadd.f32 %v3394_v18, %v3194_v6 }
 0x154   :  { %v1012_v10 = vmul.f32 %v3273_v60, %v996_v24  ;;  %v997_v5 = vmax.f32 %v973_v56, 0.0  ;;  %3821 = vst [vmem:[#allocation9_spill] sm:$0xff] %v3494_v39  ;;  %v1270_v23 = vadd.f32 %v2261_v35, %v3194_v6  ;;  %v1278_v35 = vadd.f32 %v2267_v13, %v3194_v6 }
 0x155   :  { %v3491_v16 = vadd.f32 %v3290_v29, %v1014_v43  ;;  %v1015_v30 = vmul.f32 %v3273_v60, %v999_v15 }
 0x156   :  { %v3498_v19 = vadd.f32 %v3290_v29, %v1012_v10  ;;  %v1013_v24 = vmul.f32 %v3273_v60, %v997_v5  ;;  %v2428_v1 = vpop.f32.mrb[48].mxu0  ;;  %v2268_v56 = vpop.f32.mrb[60].mxu1 }
 0x157   :  { %3820 = vst [vmem:[#allocation8_spill] sm:$0xff] %v3491_v16  ;;  %v3508_v44 = vadd.f32 %v3290_v29, %v1015_v30  ;;  %v3510_v46 = vadd.f32 %v2428_v1, %v1267_v20  ;;  %v1355_v22 = vpop.f32.mrb[49].mxu0  ;;  %v2269_v43 = vpop.f32.mrb[61].mxu1 }
 0x158   :  { %3822 = vst [vmem:[#allocation10_spill] sm:$0xff] %v3498_v19  ;;  %v3516_v26 = vadd.f32 %v3290_v29, %v1013_v24  ;;  %v3518_v10 = vadd.f32 %v1355_v22, %v1259_v2  ;;  %v2429_v18 = vpop.f32.mrb[50].mxu0  ;;  %v2270_v5 = vadd.f32 %v2269_v43, %v2268_v56  ;;  %v2271_v48 = vpop.f32.mrb[62].mxu1  ;;  %v1275_v2 = vadd.f32 %v2264_v42, %v3194_v6 }
 0x159   :  { %3823 = vst [vmem:[#allocation11_spill] sm:$0xff] %v3508_v44  ;;  %v3522_v20 = vadd.f32 %v2429_v18, %v1270_v23  ;;  %v1358_v1 = vpop.f32.mrb[51].mxu0  ;;  %v2272_v40 = vpop.f32.mrb[63].mxu1 }
 0x15a   :  { %3824 = vst [vmem:[#allocation12_spill] sm:$0xff] %v3516_v26  ;;  %v3526_v45 = vadd.f32 %v1358_v1, %v1262_v28  ;;  %v2273_v15 = vadd.f32 %v2272_v40, %v2271_v48  ;;  %v1283_v24 = vadd.f32 %v2270_v5, %v3194_v6 }
 0x15c   :  { %v1286_v56 = vadd.f32 %v2273_v15, %v3194_v6 }
 0x15e   :  { %v2432_v22 = vpop.f32.mrb[52].mxu0  ;;  %v2274_v43 = vpop.f32.mrb[64].mxu1 }
 0x15f   :  { %v3531_v27 = vadd.f32 %v2432_v22, %v1283_v24  ;;  %v1371_v23 = vpop.f32.mrb[53].mxu0  ;;  %v2275_v18 = vpop.f32.mrb[65].mxu1 }
 0x160   :  { %v3533_v30 = vadd.f32 %v1371_v23, %v1275_v2  ;;  %v2433_v11 = vpop.f32.mrb[54].mxu0  ;;  %v2276_v28 = vadd.f32 %v2275_v18, %v2274_v43  ;;  %v2277_v1 = vpop.f32.mrb[66].mxu1 }
 0x161   :  { %v3536_v48 = vadd.f32 %v2433_v11, %v1286_v56  ;;  %v1374_v40 = vpop.f32.mrb[55].mxu0  ;;  %v2278_v5 = vpop.f32.mrb[67].mxu1 }
 0x162   :  { %v3538_v42 = vadd.f32 %v1374_v40, %v1278_v35  ;;  %v2279_v15 = vadd.f32 %v2278_v5, %v2277_v1  ;;  %v1291_v3 = vadd.f32 %v2276_v28, %v3194_v6 }
 0x164   :  { %v1294_v57 = vadd.f32 %v2279_v15, %v3194_v6 }
 0x166   :  { %v2280_v24 = vpop.f32.mrb[68].mxu1  ;;  %v2436_v22 = vpop.f32.mrb[56].mxu0 }
 0x167   :  { %v2281_v2 = vpop.f32.mrb[69].mxu1  ;;  %v1387_v23 = vpop.f32.mrb[57].mxu0 }
 0x168   :  { %v2282_v54 = vadd.f32 %v2281_v2, %v2280_v24  ;;  %v3542_v31 = vadd.f32 %v1387_v23, %v1291_v3  ;;  %v2283_v13 = vpop.f32.mrb[70].mxu1  ;;  %v2437_v43 = vpop.f32.mrb[58].mxu0 }
 0x169   :  { %v2284_v11 = vpop.f32.mrb[71].mxu1  ;;  %v1390_v56 = vpop.f32.mrb[59].mxu0 }
 0x16a   :  { %v1299_v18 = vadd.f32 %v2282_v54, %v3194_v6  ;;  %v2285_v35 = vadd.f32 %v2284_v11, %v2283_v13  ;;  %v3545_v40 = vadd.f32 %v1390_v56, %v1294_v57 }
 0x16c   :  { %v3547_v1 = vadd.f32 %v2436_v22, %v1299_v18  ;;  %v1302_v28 = vadd.f32 %v2285_v35, %v3194_v6 }
 0x16e   :  { %v3550_v5 = vadd.f32 %v2437_v43, %v1302_v28  ;;  %v2286_v15 = vpop.f32.mrb[72].mxu1  ;;  %v2440_v14 = vpop.f32.mrb[60].mxu0 }
 0x16f   :  { %v2287_v24 = vpop.f32.mrb[73].mxu1  ;;  %v1403_v3 = vpop.f32.mrb[61].mxu0 }
 0x170   :  { %v2288_v2 = vadd.f32 %v2287_v24, %v2286_v15  ;;  %v2289_v23 = vpop.f32.mrb[74].mxu1  ;;  %v2441_v0 = vpop.f32.mrb[62].mxu0 }
 0x171   :  { %v2290_v26 = vpop.f32.mrb[75].mxu1  ;;  %v1406_v9 = vpop.f32.mrb[63].mxu0 }
 0x172   :  { %v1307_v54 = vadd.f32 %v2288_v2, %v3194_v6  ;;  %v2291_v13 = vadd.f32 %v2290_v26, %v2289_v23 }
 0x174   :  { %v3553_v57 = vadd.f32 %v1403_v3, %v1307_v54  ;;  %v1310_v22 = vadd.f32 %v2291_v13, %v3194_v6 }
 0x176   :  { %v3556_v11 = vadd.f32 %v1406_v9, %v1310_v22  ;;  %v2292_v43 = vpop.f32.mrb[76].mxu1  ;;  %v2324_v56 = vpop.f32.mrb[64].mxu0 }
 0x177   :  { %v2293_v18 = vpop.f32.mrb[77].mxu1  ;;  %v2325_v35 = vpop.f32.mrb[65].mxu0 }
 0x178   :  { %3825 = vst [vmem:[#allocation13_spill] sm:$0xff] %v3556_v11  ;;  %v2294_v28 = vadd.f32 %v2293_v18, %v2292_v43  ;;  %v2326_v19 = vadd.f32 %v2325_v35, %v2324_v56  ;;  %v2295_v15 = vpop.f32.mrb[78].mxu1  ;;  %v2327_v24 = vpop.f32.mrb[66].mxu0 }
 0x179   :  { %v2296_v53 = vpop.f32.mrb[79].mxu1  ;;  %v2328_v32 = vpop.f32.mrb[67].mxu0 }
 0x17a   :  { %v1315_v36 = vadd.f32 %v2294_v28, %v3194_v6  ;;  %v2297_v2 = vadd.f32 %v2296_v53, %v2295_v15  ;;  %v2329_v26 = vadd.f32 %v2328_v32, %v2327_v24  ;;  %v1419_v15 = vmax.f32 %v3526_v45, 0.0 }
 0x17c   :  { %v3559_v3 = vadd.f32 %v2440_v14, %v1315_v36  ;;  %v1318_v23 = vadd.f32 %v2297_v2, %v3194_v6  ;;  %v1420_v14 = vmax.f32 %v3510_v46, 0.0  ;;  %v1418_v36 = vmax.f32 %v3518_v10, 0.0 }
 0x17e   :  { %v3562_v9 = vadd.f32 %v2441_v0, %v1318_v23  ;;  %v2330_v54 = vpop.f32.mrb[68].mxu0  ;;  %v2366_v13 = vpop.f32.mrb[80].mxu1  ;;  %v1421_v0 = vmax.f32 %v3522_v20, 0.0  ;;  %v1680_v20 = vadd.f32 %v2329_v26, %v3194_v6 }
 0x17f   :  { %v2331_v22 = vpop.f32.mrb[69].mxu0  ;;  %v2367_v38 = vpop.f32.mrb[81].mxu1 }
 0x180   :  { %v2332_v43 = vadd.f32 %v2331_v22, %v2330_v54  ;;  %v2333_v56 = vpop.f32.mrb[70].mxu0  ;;  %v3564_v18 = vadd.f32 %v2367_v38, %v2366_v13  ;;  %v2369_v35 = vpop.f32.mrb[82].mxu1  ;;  %v1677_v38 = vadd.f32 %v2326_v19, %v3194_v6  ;;  %v1437_v45 = vmul.f32 %v3273_v60, %v1421_v0 }
 0x181   :  { %v2334_v59 = vpop.f32.mrb[71].mxu0  ;;  %v2370_v44 = vpop.f32.mrb[83].mxu1 }
 0x182   :  { %v2335_v28 = vadd.f32 %v2334_v59, %v2333_v56  ;;  %v3566_v53 = vadd.f32 %v2370_v44, %v2369_v35  ;;  %v1685_v32 = vadd.f32 %v2332_v43, %v3194_v6  ;;  %v1436_v44 = vmul.f32 %v3273_v60, %v1420_v14 }
 0x183   :  { %v1434_v43 = vmul.f32 %v3273_v60, %v1418_v36  ;;  %v1424_v14 = vmax.f32 %v3531_v27, 0.0 }
 0x184   :  { %v1688_v59 = vadd.f32 %v2335_v28, %v3194_v6  ;;  %v1452_v36 = vadd.f32 %v3290_v29, %v1436_v44 }
 0x186   :  { %v2336_v24 = vpop.f32.mrb[72].mxu0  ;;  %v2448_v2 = vpop.f32.mrb[84].mxu1 }
 0x187   :  { %v1782_v23 = vadd.f32 %v2448_v2, %v1685_v32  ;;  %v2337_v54 = vpop.f32.mrb[73].mxu0  ;;  %v1773_v13 = vpop.f32.mrb[85].mxu1  ;;  %v1435_v2 = vmul.f32 %v3273_v60, %v1419_v15  ;;  %v1453_v15 = vadd.f32 %v3290_v29, %v1437_v45 }
 0x188   :  { %v2338_v46 = vadd.f32 %v2337_v54, %v2336_v24  ;;  %v1774_v22 = vadd.f32 %v1773_v13, %v1677_v38  ;;  %v2339_v10 = vpop.f32.mrb[74].mxu0  ;;  %v2449_v56 = vpop.f32.mrb[86].mxu1  ;;  %v1422_v24 = vmax.f32 %v3533_v30, 0.0  ;;  %v1450_v54 = vadd.f32 %v3290_v29, %v1434_v43 }
 0x189   :  { %v1838_v35 = vmax.f32 %v1782_v23, 0.0  ;;  %v1785_v39 = vadd.f32 %v2449_v56, %v1688_v59  ;;  %v2340_v19 = vpop.f32.mrb[75].mxu0  ;;  %v1776_v32 = vpop.f32.mrb[87].mxu1  ;;  %v1451_v27 = vadd.f32 %v3290_v29, %v1435_v2 }
 0x18a   :  { %v1836_v11 = vmax.f32 %v1774_v22, 0.0  ;;  %v2341_v28 = vadd.f32 %v2340_v19, %v2339_v10  ;;  %v1777_v16 = vadd.f32 %v1776_v32, %v1680_v20  ;;  %v1693_v10 = vadd.f32 %v2338_v46, %v3194_v6 }
 0x18b   :  { %v1854_v38 = vmul.f32 %v3273_v60, %v1838_v35  ;;  %v1839_v26 = vmax.f32 %v1785_v39, 0.0  ;;  %v3826_v46 = vmax.f32 %v3324_v63, %v3363_v4  ;;  %v3828_v63 = vmax.f32 %v3327_v8, %v3380_v62 }
 0x18c   :  { %v1852_v0 = vmul.f32 %v3273_v60, %v1836_v11  ;;  %v1837_v23 = vmax.f32 %v1777_v16, 0.0  ;;  %v1440_v16 = vmul.f32 %v3273_v60, %v1424_v14  ;;  %v1438_v11 = vmul.f32 %v3273_v60, %v1422_v24 }
 0x18d   :  { %v1870_v13 = vadd.f32 %v3290_v29, %v1854_v38  ;;  %v1855_v59 = vmul.f32 %v3273_v60, %v1839_v26 }
 0x18e   :  { %v1868_v30 = vadd.f32 %v3290_v29, %v1852_v0  ;;  %v1853_v39 = vmul.f32 %v3273_v60, %v1837_v23  ;;  %v2342_v22 = vpop.f32.mrb[76].mxu0  ;;  %v2452_v44 = vpop.f32.mrb[88].mxu1  ;;  %v1423_v0 = vmax.f32 %v3538_v42, 0.0 }
 0x18f   :  { %v1886_v56 = vmax.f32 %v1452_v36, %v1870_v13  ;;  %v1871_v20 = vadd.f32 %v3290_v29, %v1855_v59  ;;  %v2343_v43 = vpop.f32.mrb[77].mxu0  ;;  %v1789_v45 = vpop.f32.mrb[89].mxu1  ;;  %v1696_v36 = vadd.f32 %v2341_v28, %v3194_v6 }
 0x190   :  { %v1884_v35 = vmax.f32 %v1450_v54, %v1868_v30  ;;  %v1869_v19 = vadd.f32 %v3290_v29, %v1853_v39  ;;  %v2344_v32 = vadd.f32 %v2343_v43, %v2342_v22  ;;  %v1790_v2 = vadd.f32 %v1789_v45, %v1693_v10  ;;  %v2345_v38 = vpop.f32.mrb[78].mxu0  ;;  %v2453_v26 = vpop.f32.mrb[90].mxu1 }
 0x191   :  { %v1902_v14 = vmax.f32 %v3826_v46, %v1886_v56  ;;  %v1887_v23 = vmax.f32 %v1453_v15, %v1871_v20  ;;  %v2346_v24 = vpop.f32.mrb[79].mxu0  ;;  %v1792_v13 = vpop.f32.mrb[91].mxu1  ;;  %v3827_v54 = vmax.f32 %v3304_v61, %v3370_v47  ;;  %v1425_v10 = vmax.f32 %v3536_v48, 0.0 }
 0x192   :  { %v1885_v30 = vmax.f32 %v1451_v27, %v1869_v19  ;;  %v1701_v39 = vadd.f32 %v2344_v32, %v3194_v6  ;;  %v1840_v22 = vmax.f32 %v1790_v2, 0.0  ;;  %v2347_v42 = vadd.f32 %v2346_v24, %v2345_v38 }
 0x193   :  { %v1900_v59 = vmax.f32 %v3827_v54, %v1884_v35  ;;  %1919 = vst.msk [vmem:[%s3802_s8 + $0x10] sm:$0xff] %vm1916_vm1, %v1902_v14  ;;  %v1903_v4 = vmax.f32 %v3828_v63, %v1887_v23  ;;  %v1793_v28 = vadd.f32 %v1792_v13, %v1696_v36  ;;  %v1426_v61 = vmax.f32 %v3542_v31, 0.0 }
 0x194   :  { %v3829_v47 = vmax.f32 %v3318_v52, %v3385_v37  ;;  %v1798_v15 = vadd.f32 %v2452_v44, %v1701_v39  ;;  %v1856_v27 = vmul.f32 %v3273_v60, %v1840_v22  ;;  %v1439_v56 = vmul.f32 %v3273_v60, %v1423_v0  ;;  %v3654_v22 = vld [vmem:[%s3799_s5] ss:$0 sm:$0xff] }
 0x195   :  { %1917 = vst.msk [vmem:[%s3802_s8] sm:$0xff] %vm1916_vm1, %v1900_v59  ;;  %1920 = vst.msk [vmem:[%s3802_s8 + $0x18] sm:$0xff] %vm1916_vm1, %v1903_v4  ;;  %v1704_v8 = vadd.f32 %v2347_v42, %v3194_v6  ;;  %v1841_v62 = vmax.f32 %v1793_v28, 0.0  ;;  %v1454_v31 = vadd.f32 %v3290_v29, %v1438_v11  ;;  %v1456_v43 = vadd.f32 %v3290_v29, %v1440_v16 }
 0x196   :  { %v1901_v48 = vmax.f32 %v3829_v47, %v1885_v30  ;;  %v1842_v52 = vmax.f32 %v1798_v15, 0.0  ;;  %v1872_v37 = vadd.f32 %v3290_v29, %v1856_v27  ;;  %v2348_v44 = vpop.f32.mrb[80].mxu0  ;;  %v3635_v20 = vpop.f32.mrb[92].mxu1  ;;  %v1441_v45 = vmul.f32 %v3273_v60, %v1425_v10 }
 0x197   :  { %v1801_v35 = vadd.f32 %v2453_v26, %v1704_v8  ;;  %v1857_v6 = vmul.f32 %v3273_v60, %v1841_v62  ;;  %v2349_v19 = vpop.f32.mrb[81].mxu0  ;;  %v1805_v11 = vpop.f32.mrb[93].mxu1  ;;  %v1442_v32 = vmul.f32 %v3273_v60, %v1426_v61  ;;  %v1455_v23 = vadd.f32 %v3290_v29, %v1439_v56 }
 0x198   :  { %1918 = vst.msk [vmem:[%s3802_s8 + $0x8] sm:$0xff] %vm1916_vm1, %v1901_v48  ;;  %v1858_v2 = vmul.f32 %v3273_v60, %v1842_v52  ;;  %v1888_v38 = vmax.f32 %v1454_v31, %v1872_v37  ;;  %v2350_v0 = vadd.f32 %v2349_v19, %v2348_v44  ;;  %v2351_v46 = vpop.f32.mrb[82].mxu0  ;;  %v3642_v14 = vpop.f32.mrb[94].mxu1  ;;  %v1427_v16 = vmax.f32 %v3545_v40, 0.0 }
 0x199   :  { %v1843_v24 = vmax.f32 %v1801_v35, 0.0  ;;  %v1873_v26 = vadd.f32 %v3290_v29, %v1857_v6  ;;  %v2352_v36 = vpop.f32.mrb[83].mxu0  ;;  %v1808_v13 = vpop.f32.mrb[95].mxu1  ;;  %v3830_v59 = vmax.f32 %v3335_v17, %v3417_v55  ;;  %v1457_v40 = vadd.f32 %v3290_v29, %v1441_v45 }
 0x19a   :  { %v1874_v54 = vadd.f32 %v3290_v29, %v1858_v2  ;;  %v2353_v39 = vadd.f32 %v2352_v36, %v2351_v46  ;;  %v1709_v10 = vadd.f32 %v3654_v22, %v2350_v0  ;;  %v1428_v63 = vmax.f32 %v3547_v1, 0.0 }
 0x19b   :  { %v1904_v30 = vmax.f32 %v3830_v59, %v1888_v38  ;;  %v1859_v4 = vmul.f32 %v3273_v60, %v1843_v24  ;;  %v1889_v42 = vmax.f32 %v1455_v23, %v1873_v26  ;;  %v1458_v28 = vadd.f32 %v3290_v29, %v1442_v32 }
 0x19c   :  { %v1890_v61 = vmax.f32 %v1456_v43, %v1874_v54  ;;  %v1806_v17 = vadd.f32 %v1805_v11, %v1709_v10  ;;  %v1712_v55 = vadd.f32 %v3654_v22, %v2353_v39  ;;  %v1432_v47 = vmax.f32 %v3559_v3, 0.0 }
 0x19d   :  { %1921 = vst.msk [vmem:[%s3802_s8 + $0x20] sm:$0xff] %vm1916_vm1, %v1904_v30  ;;  %v1875_v48 = vadd.f32 %v3290_v29, %v1859_v4  ;;  %v3831_v1 = vmax.f32 %v3344_v41, %v3431_v58  ;;  %v1733_v27 = vadd.f32 %v3654_v22, %v3564_v18  ;;  %v1443_v56 = vmul.f32 %v3273_v60, %v1427_v16 }
 0x19e   :  { %v3832_v8 = vmax.f32 %v3351_v25, %v3407_v34  ;;  %v1844_v31 = vmax.f32 %v1806_v17, 0.0  ;;  %v1809_v52 = vadd.f32 %v1808_v13, %v1712_v55  ;;  %v2354_v37 = vpop.f32.mrb[84].mxu0  ;;  %v2460_v44 = vpop.f32.mrb[96].mxu1  ;;  %v1433_v3 = vmax.f32 %v3562_v9, 0.0 }
 0x19f   :  { %v1905_v15 = vmax.f32 %v3831_v1, %v1889_v42  ;;  %v1891_v43 = vmax.f32 %v1457_v40, %v1875_v48  ;;  %v1830_v41 = vadd.f32 %v2460_v44, %v1733_v27  ;;  %v2355_v58 = vpop.f32.mrb[85].mxu0  ;;  %v3682_v18 = vpop.f32.mrb[97].mxu1  ;;  %v1736_v25 = vadd.f32 %v3654_v22, %v3566_v53 }
 0x1a0   :  { %v1906_v62 = vmax.f32 %v3832_v8, %v1890_v61  ;;  %v1429_v34 = vmax.f32 %v3550_v5, 0.0  ;;  %v1860_v9 = vmul.f32 %v3273_v60, %v1844_v31  ;;  %v1845_v45 = vmax.f32 %v1809_v52, 0.0  ;;  %v2357_v6 = vpop.f32.mrb[86].mxu0  ;;  %v2461_v19 = vpop.f32.mrb[98].mxu1  ;;  %v3836_v52 = vld [vmem:[#allocation8_spill] sm:$0xff] }
 0x1a1   :  { %1922 = vst.msk [vmem:[%s3802_s8 + $0x28] sm:$0xff] %vm1916_vm1, %v1905_v15  ;;  %v2356_v35 = vadd.f32 %v2355_v58, %v2354_v37  ;;  %v1448_v11 = vmul.f32 %v3273_v60, %v1432_v47  ;;  %v3833_v32 = vmax.f32 %v3359_v33, %v3426_v7  ;;  %v1850_v53 = vmax.f32 %v1830_v41, 0.0  ;;  %v2358_v5 = vpop.f32.mrb[87].mxu0  ;;  %v1824_v0 = vpop.f32.mrb[99].mxu1 }
 0x1a2   :  { %1923 = vst.msk [vmem:[%s3802_s8 + $0x30] sm:$0xff] %vm1916_vm1, %v1906_v62  ;;  %v1833_v38 = vadd.f32 %v2461_v19, %v1736_v25  ;;  %v1876_v46 = vadd.f32 %v3290_v29, %v1860_v9  ;;  %v1861_v23 = vmul.f32 %v3273_v60, %v1845_v45  ;;  %v2359_v24 = vadd.f32 %v2358_v5, %v2357_v6  ;;  %v3838_v25 = vld [vmem:[#allocation13_spill] sm:$0xff]  ;;  %v3840_v9 = vld [vmem:[#allocation11_spill] sm:$0xff] }
 0x1a3   :  { %v1907_v2 = vmax.f32 %v3833_v32, %v1891_v43  ;;  %v1717_v16 = vadd.f32 %v3654_v22, %v2356_v35  ;;  %v1459_v26 = vadd.f32 %v3290_v29, %v1443_v56  ;;  %v1449_v36 = vmul.f32 %v3273_v60, %v1433_v3 }
 0x1a4   :  { %v1866_v33 = vmul.f32 %v3273_v60, %v1850_v53  ;;  %v1851_v7 = vmax.f32 %v1833_v38, 0.0  ;;  %v1892_v13 = vmax.f32 %v1458_v28, %v1876_v46  ;;  %v1877_v54 = vadd.f32 %v3290_v29, %v1861_v23  ;;  %v3842_v53 = vld [vmem:[#allocation2_spill] sm:$0xff]  ;;  %v3843_v38 = vld [vmem:[#allocation4_spill] sm:$0xff] }
 0x1a5   :  { %1924 = vst.msk [vmem:[%s3802_s8 + $0x38] sm:$0xff] %vm1916_vm1, %v1907_v2  ;;  %v1814_v59 = vadd.f32 %v3635_v20, %v1717_v16  ;;  %v1720_v30 = vadd.f32 %v3654_v22, %v2359_v24  ;;  %v1444_v39 = vmul.f32 %v3273_v60, %v1428_v63  ;;  %v1464_v10 = vadd.f32 %v3290_v29, %v1448_v11 }
 0x1a6   :  { %v1882_v40 = vadd.f32 %v3290_v29, %v1866_v33  ;;  %v1867_v4 = vmul.f32 %v3273_v60, %v1851_v7  ;;  %v3834_v42 = vmax.f32 %v3374_v49, %v3456_v50  ;;  %v1893_v17 = vmax.f32 %v1459_v26, %v1877_v54  ;;  %v2360_v47 = vpop.f32.mrb[88].mxu0 }
 0x1a7   :  { %v1846_v28 = vmax.f32 %v1814_v59, 0.0  ;;  %v1817_v55 = vadd.f32 %v3642_v14, %v1720_v30  ;;  %v1445_v20 = vmul.f32 %v3273_v60, %v1429_v34  ;;  %v1465_v63 = vadd.f32 %v3290_v29, %v1449_v36  ;;  %v2361_v15 = vpop.f32.mrb[89].mxu0  ;;  %v2625_v59 = vld [vmem:[%s3800_s6] ss:$0 sm:$0xff] }
 0x1a8   :  { %v1908_v61 = vmax.f32 %v3834_v42, %v1892_v13  ;;  %v1898_v48 = vmax.f32 %v1464_v10, %v1882_v40  ;;  %v1883_v1 = vadd.f32 %v3290_v29, %v1867_v4  ;;  %v3835_v49 = vmax.f32 %v3400_v51, %v3471_v12  ;;  %v2363_v8 = vpop.f32.mrb[90].mxu0  ;;  %v3848_v40 = vld [vmem:[#allocation6_spill] sm:$0xff] }
 0x1a9   :  { %v1862_v14 = vmul.f32 %v3273_v60, %v1846_v28  ;;  %v1847_v27 = vmax.f32 %v1817_v55, 0.0  ;;  %v2362_v56 = vadd.f32 %v2361_v15, %v2360_v47  ;;  %v1460_v62 = vadd.f32 %v3290_v29, %v1444_v39  ;;  %v2364_v43 = vpop.f32.mrb[91].mxu0  ;;  %v3849_v4 = vld [vmem:[#allocation10_spill] sm:$0xff]  ;;  %v3851_v28 = vld [vmem:[#allocation7_spill] sm:$0xff]  ;;  %v3852_v55 = vld [vmem:[#allocation12_spill] sm:$0xff] }
 0x1aa   :  { %1925 = vst.msk [vmem:[%s3802_s8 + $0x40] sm:$0xff] %vm1916_vm1, %v1908_v61  ;;  %v1909_v50 = vmax.f32 %v3835_v49, %v1893_v17  ;;  %v1430_v31 = vmax.f32 %v3553_v57, 0.0  ;;  %v3837_v37 = vmax.f32 %v3488_v21, %v3836_v52  ;;  %v1899_v3 = vmax.f32 %v1465_v63, %v1883_v1  ;;  %v3839_v21 = vld [vmem:[#allocation9_spill] sm:$0xff] }
 0x1ab   :  { %v1878_v51 = vadd.f32 %v3290_v29, %v1862_v14  ;;  %v1863_v12 = vmul.f32 %v3273_v60, %v1847_v27  ;;  %v1725_v41 = vadd.f32 %v3654_v22, %v2362_v56  ;;  %v2365_v58 = vadd.f32 %v2364_v43, %v2363_v8 }
 0x1ac   :  { %v1914_v44 = vmax.f32 %v3837_v37, %v1898_v48  ;;  %1926 = vst.msk [vmem:[%s3802_s8 + $0x48] sm:$0xff] %vm1916_vm1, %v1909_v50  ;;  %v1461_v57 = vadd.f32 %v3290_v29, %v1445_v20  ;;  %v1431_v34 = vmax.f32 %v3838_v25, 0.0  ;;  %v3841_v45 = vmax.f32 %v3839_v21, %v3840_v9 }
 0x1ad   :  { %v1894_v6 = vmax.f32 %v1460_v62, %v1878_v51  ;;  %v1879_v19 = vadd.f32 %v3290_v29, %v1863_v12  ;;  %v1822_v11 = vadd.f32 %v3682_v18, %v1725_v41  ;;  %v1728_v32 = vadd.f32 %v3654_v22, %v2365_v58  ;;  %v3845_v22 = vld [vmem:[#allocation3_spill] sm:$0xff]  ;;  %v3846_v18 = vld [vmem:[#allocation5_spill] sm:$0xff] }
 0x1ae   :  { %1931 = vst.msk [vmem:[%s3802_s8 + $0x70] sm:$0xff] %vm1916_vm1, %v1914_v44  ;;  %v1915_v35 = vmax.f32 %v3841_v45, %v1899_v3  ;;  %v1446_v2 = vmul.f32 %v3273_v60, %v1430_v31  ;;  %v3844_v5 = vmax.f32 %v3842_v53, %v3843_v38  ;;  %v1447_v26 = vmul.f32 %v3273_v60, %v1431_v34 }
 0x1af   :  { %v1895_v23 = vmax.f32 %v1461_v57, %v1879_v19  ;;  %v1848_v16 = vmax.f32 %v1822_v11, 0.0  ;;  %v1825_v24 = vadd.f32 %v1824_v0, %v1728_v32  ;;  %v3847_v36 = vmax.f32 %v3845_v22, %v3846_v18 }
 0x1b0   :  { %1932 = vst.msk [vmem:[%s3802_s8 + $0x78] sm:$0xff] %vm1916_vm1, %v1915_v35  ;;  %v1910_v46 = vmax.f32 %v3844_v5, %v1894_v6  ;;  %v1462_v54 = vadd.f32 %v3290_v29, %v1446_v2  ;;  %v1463_v39 = vadd.f32 %v3290_v29, %v1447_v26  ;;  %v3850_v42 = vmax.f32 %v3848_v40, %v3849_v4 }
 0x1b1   :  { %v1911_v33 = vmax.f32 %v3847_v36, %v1895_v23  ;;  %v1864_v7 = vmul.f32 %v3273_v60, %v1848_v16  ;;  %v1849_v13 = vmax.f32 %v1825_v24, 0.0  ;;  %v3853_v47 = vmax.f32 %v3851_v28, %v3852_v55 }
 0x1b2   :  { %1927 = vst.msk [vmem:[%s3802_s8 + $0x50] sm:$0xff] %vm1916_vm1, %v1910_v46 }
 0x1b3   :  { %1928 = vst.msk [vmem:[%s3802_s8 + $0x58] sm:$0xff] %vm1916_vm1, %v1911_v33  ;;  %v1880_v0 = vadd.f32 %v3290_v29, %v1864_v7  ;;  %v1865_v30 = vmul.f32 %v2625_v59, %v1849_v13 }
 0x1b5   :  { %v1896_v10 = vmax.f32 %v1462_v54, %v1880_v0  ;;  %v1881_v60 = vadd.f32 %v3290_v29, %v1865_v30 }
 0x1b7   :  { %v1912_v61 = vmax.f32 %v3850_v42, %v1896_v10  ;;  %v1897_v17 = vmax.f32 %v1463_v39, %v1881_v60 }
 0x1b9   :  { %1929 = vst.msk [vmem:[%s3802_s8 + $0x60] sm:$0xff] %vm1916_vm1, %v1912_v61  ;;  %v1913_v20 = vmax.f32 %v3853_v47, %v1897_v17 }
 0x1bb   :  { %1930 = vst.msk [vmem:[%s3802_s8 + $0x68] sm:$0xff] %vm1916_vm1, %v1913_v20 }

// kernel: cnn_forward.5
= control target key start
LH: loop header
LB: loop body
LE: loop exit
PB: predicated region body
PF: predicated region fallthrough
CT: control target
= control target key end

     0   :  { %v545_v38 = vlaneseq  ;;  %v5779_v39 = vmov 1966171168   ;;  %s7642_s0 = inlined_call_operand.vmem [shape: bf16[2,4096], index: 0, kind: input, shape index: {}]   ;;  %s7643_s1 = inlined_call_operand.vmem [shape: bf16[4096,256], index: 1, kind: input, shape index: {}]   ;;  %s7644_s2 = inlined_call_operand.vmem [shape: f32[1,256], index: 2, kind: input, shape index: {}]   ;;  %s7645_s3 = inlined_call_operand.vmem [shape: f32[1,256], index: 3, kind: input, shape index: {}]   ;;  %s7646_s4 = inlined_call_operand.vmem [shape: f32[1,256], index: 4, kind: input, shape index: {}]   ;;  %s7647_s5 = inlined_call_operand.vmem [shape: bf16[256,256], index: 5, kind: input, shape index: {}]   ;;  %s7648_s6 = inlined_call_operand.vmem [shape: f32[1,256], index: 6, kind: input, shape index: {}]   ;;  %s7649_s7 = inlined_call_operand.hbm [shape: f32[2,256], index: 7, kind: output, shape index: {}]  }
   0x1   :  { %v4925_v0 = vld [vmem:[%s7643_s1 + $0x4] ss:$8 sps:$4 sm:$0xff]   ;;  %v4929_v2 = vld [vmem:[%s7643_s1] ss:$8 sps:$4 sm:$0xff]   ;;  %v4931_v4 = vld [vmem:[%s7643_s1 + $0x14] ss:$8 sps:$4 sm:$0xff]   ;;  %v561_v40 = vunpack.c.l.s4 %v5779_v39 }
   0x2   :  { %v4927_v1 = vld [vmem:[%s7643_s1 + $0x704] ss:$8 sps:$4 sm:$0xff]   ;;  %3347 = vmatprep.subr.bf16.mxu1 %v4925_v0  ;;  %v4930_v3 = vld [vmem:[%s7643_s1 + $0x700] ss:$8 sps:$4 sm:$0xff]   ;;  %v4933_v5 = vld [vmem:[%s7643_s1 + $0x714] ss:$8 sps:$4 sm:$0xff]  }
   0x3   :  { %3634 = vmatprep.subr.bf16.mxu0 %v4927_v1  ;;  %3348 = vmatpush1.bf16.msra.mxu1 %v4929_v2  ;;  %v4935_v6 = vld [vmem:[%s7643_s1 + $0x10] ss:$8 sps:$4 sm:$0xff]   ;;  %v4937_v8 = vld [vmem:[%s7643_s1 + $0x24] ss:$8 sps:$4 sm:$0xff]   ;;  %v4941_v10 = vld [vmem:[%s7643_s1 + $0x20] ss:$8 sps:$4 sm:$0xff]   ;;  %v562_v46 = vunpack.c.0.s8 %v561_v40 }
   0x4   :  { %3635 = vmatpush1.bf16.msra.mxu0 %v4930_v3  ;;  %3349 = vmatprep.subr.bf16.mxu1 %v4931_v4  ;;  %v4936_v7 = vld [vmem:[%s7643_s1 + $0x710] ss:$8 sps:$4 sm:$0xff]   ;;  %v4939_v9 = vld [vmem:[%s7643_s1 + $0x724] ss:$8 sps:$4 sm:$0xff]   ;;  %v4942_v11 = vld [vmem:[%s7643_s1 + $0x720] ss:$8 sps:$4 sm:$0xff]  }
   0x5   :  { %3636 = vmatprep.subr.bf16.mxu0 %v4933_v5  ;;  %v4943_v12 = vld [vmem:[%s7643_s1 + $0x34] ss:$8 sps:$4 sm:$0xff]   ;;  %v4947_v14 = vld [vmem:[%s7643_s1 + $0x30] ss:$8 sps:$4 sm:$0xff]   ;;  %v4949_v16 = vld [vmem:[%s7643_s1 + $0x44] ss:$8 sps:$4 sm:$0xff]  }
   0x6   :  { %v4945_v13 = vld [vmem:[%s7643_s1 + $0x734] ss:$8 sps:$4 sm:$0xff]   ;;  %v4948_v15 = vld [vmem:[%s7643_s1 + $0x730] ss:$8 sps:$4 sm:$0xff]   ;;  %v4951_v17 = vld [vmem:[%s7643_s1 + $0x744] ss:$8 sps:$4 sm:$0xff]  }
   0x7   :  { %3350 = vmatpush1.bf16.msra.mxu1 %v4935_v6  ;;  %v4953_v18 = vld [vmem:[%s7643_s1 + $0x40] ss:$8 sps:$4 sm:$0xff]   ;;  %v4955_v20 = vld [vmem:[%s7643_s1 + $0x54] ss:$8 sps:$4 sm:$0xff]   ;;  %v4959_v22 = vld [vmem:[%s7643_s1 + $0x50] ss:$8 sps:$4 sm:$0xff]  }
   0x8   :  { %3637 = vmatpush1.bf16.msra.mxu0 %v4936_v7  ;;  %3351 = vmatprep.subr.bf16.mxu1 %v4937_v8  ;;  %v4954_v19 = vld [vmem:[%s7643_s1 + $0x740] ss:$8 sps:$4 sm:$0xff]   ;;  %v4957_v21 = vld [vmem:[%s7643_s1 + $0x754] ss:$8 sps:$4 sm:$0xff]   ;;  %v4960_v23 = vld [vmem:[%s7643_s1 + $0x750] ss:$8 sps:$4 sm:$0xff]  }
   0x9   :  { %3638 = vmatprep.subr.bf16.mxu0 %v4939_v9  ;;  %v4961_v24 = vld [vmem:[%s7643_s1 + $0x64] ss:$8 sps:$4 sm:$0xff]   ;;  %v4965_v26 = vld [vmem:[%s7643_s1 + $0x60] ss:$8 sps:$4 sm:$0xff]   ;;  %v4967_v28 = vld [vmem:[%s7643_s1 + $0x74] ss:$8 sps:$4 sm:$0xff]  }
   0xa   :  { %v4963_v25 = vld [vmem:[%s7643_s1 + $0x764] ss:$8 sps:$4 sm:$0xff]   ;;  %v4966_v27 = vld [vmem:[%s7643_s1 + $0x760] ss:$8 sps:$4 sm:$0xff]   ;;  %v4969_v29 = vld [vmem:[%s7643_s1 + $0x774] ss:$8 sps:$4 sm:$0xff]  }
   0xb   :  { %3352 = vmatpush1.bf16.msra.mxu1 %v4941_v10  ;;  %v4971_v30 = vld [vmem:[%s7643_s1 + $0x70] ss:$8 sps:$4 sm:$0xff]   ;;  %v4973_v32 = vld [vmem:[%s7643_s1 + $0x84] ss:$8 sps:$4 sm:$0xff]   ;;  %v4977_v34 = vld [vmem:[%s7643_s1 + $0x80] ss:$8 sps:$4 sm:$0xff]  }
   0xc   :  { %3639 = vmatpush1.bf16.msra.mxu0 %v4942_v11  ;;  %3353 = vmatprep.subr.bf16.mxu1 %v4943_v12  ;;  %v4972_v31 = vld [vmem:[%s7643_s1 + $0x770] ss:$8 sps:$4 sm:$0xff]   ;;  %v4975_v33 = vld [vmem:[%s7643_s1 + $0x784] ss:$8 sps:$4 sm:$0xff]   ;;  %v4978_v35 = vld [vmem:[%s7643_s1 + $0x780] ss:$8 sps:$4 sm:$0xff]  }
   0xd   :  { %3640 = vmatprep.subr.bf16.mxu0 %v4945_v13  ;;  %v4979_v36 = vld [vmem:[%s7643_s1 + $0x94] ss:$8 sps:$4 sm:$0xff]   ;;  %v4983_v41 = vld [vmem:[%s7643_s1 + $0x90] ss:$8 sps:$4 sm:$0xff]   ;;  %v4985_v43 = vld [vmem:[%s7643_s1 + $0xa4] ss:$8 sps:$4 sm:$0xff]  }
   0xe   :  { %v4981_v37 = vld [vmem:[%s7643_s1 + $0x794] ss:$8 sps:$4 sm:$0xff]   ;;  %v4984_v42 = vld [vmem:[%s7643_s1 + $0x790] ss:$8 sps:$4 sm:$0xff]   ;;  %v4987_v44 = vld [vmem:[%s7643_s1 + $0x7a4] ss:$8 sps:$4 sm:$0xff]  }
   0xf   :  { %3354 = vmatpush1.bf16.msra.mxu1 %v4947_v14  ;;  %v5947_v45 = vshrl.u32 %v545_v38, 7  ;;  %v4989_v47 = vld [vmem:[%s7643_s1 + $0xa0] ss:$8 sps:$4 sm:$0xff]   ;;  %v4991_v49 = vld [vmem:[%s7643_s1 + $0xb4] ss:$8 sps:$4 sm:$0xff]  }
  0x10   :  { %3641 = vmatpush1.bf16.msra.mxu0 %v4948_v15  ;;  %3355 = vmatprep.subr.bf16.mxu1 %v4949_v16  ;;  %v4990_v48 = vld [vmem:[%s7643_s1 + $0x7a0] ss:$8 sps:$4 sm:$0xff]   ;;  %v4993_v50 = vld [vmem:[%s7643_s1 + $0x7b4] ss:$8 sps:$4 sm:$0xff]   ;;  %v4995_v53 = vld [vmem:[%s7643_s1 + $0xb0] ss:$8 sps:$4 sm:$0xff]  }
  0x11   :  { %3642 = vmatprep.subr.bf16.mxu0 %v4951_v17  ;;  %v5962_v51 = vsub.s32 %v562_v46, %v5947_v45  ;;  %v5967_v52 = vld [vmem:[%s7642_s0] sm:$0xff]  ;;  %v4996_v55 = vld [vmem:[%s7643_s1 + $0x7b0] ss:$8 sps:$4 sm:$0xff]   ;;  %v28_v56 = vld [vmem:[%s7642_s0 + $0x8] sm:$0xff] }
  0x12   :  { %v4997_v57 = vld [vmem:[%s7643_s1 + $0xc4] ss:$8 sps:$4 sm:$0xff]   ;;  %v608_v60 = vcombine.high %v28_v56, %v28_v56  ;;  %v5001_v63 = vld [vmem:[%s7643_s1 + $0xc0] ss:$8 sps:$4 sm:$0xff]   ;;  %v5003_v1 = vld [vmem:[%s7643_s1 + $0xd4] ss:$8 sps:$4 sm:$0xff]  }
  0x13   :  { %3356 = vmatpush1.bf16.msra.mxu1 %v4953_v18  ;;  %v566_v54 = vrot.slane %v5967_v52, %v5962_v51  ;;  %v4999_v58 = vld [vmem:[%s7643_s1 + $0x7c4] ss:$8 sps:$4 sm:$0xff]   ;;  %v5002_v0 = vld [vmem:[%s7643_s1 + $0x7c0] ss:$8 sps:$4 sm:$0xff]   ;;  %v5005_v2 = vld [vmem:[%s7643_s1 + $0x7d4] ss:$8 sps:$4 sm:$0xff]  }
  0x14   :  { %3643 = vmatpush1.bf16.msra.mxu0 %v4954_v19  ;;  %3357 = vmatprep.subr.bf16.mxu1 %v4955_v20  ;;  %v622_v62 = vrot.slane %v608_v60, %v5962_v51  ;;  %v5007_v5 = vld [vmem:[%s7643_s1 + $0xd0] ss:$8 sps:$4 sm:$0xff]   ;;  %v5009_v7 = vld [vmem:[%s7643_s1 + $0xe4] ss:$8 sps:$4 sm:$0xff]   ;;  %v5013_v10 = vld [vmem:[%s7643_s1 + $0xe0] ss:$8 sps:$4 sm:$0xff]  }
  0x15   :  { %3644 = vmatprep.subr.bf16.mxu0 %v4957_v21  ;;  %v574_v59 = vcombine.high %v566_v54, %v566_v54  ;;  %v5008_v6 = vld [vmem:[%s7643_s1 + $0x7d0] ss:$8 sps:$4 sm:$0xff]   ;;  %v5011_v8 = vld [vmem:[%s7643_s1 + $0x7e4] ss:$8 sps:$4 sm:$0xff]   ;;  %v5014_v11 = vld [vmem:[%s7643_s1 + $0x7e0] ss:$8 sps:$4 sm:$0xff]   ;;  %v6045_v19 = vrot.slane %v566_v54, %v5962_v51 }
  0x16   :  { %v624_v3 = vcombine.high %v622_v62, %v622_v62  ;;  %v5015_v12 = vld [vmem:[%s7643_s1 + $0xf4] ss:$8 sps:$4 sm:$0xff]   ;;  %v6030_v14 = vrot.slane %v622_v62, %v5962_v51  ;;  %v5019_v15 = vld [vmem:[%s7643_s1 + $0xf0] ss:$8 sps:$4 sm:$0xff]   ;;  %v5024_v17 = vld [vmem:[%s7643_s1 + $0x104] ss:$8 sps:$4 sm:$0xff]  }
  0x17   :  { %3358 = vmatpush1.bf16.msra.mxu1 %v4959_v22  ;;  %v596_v61 = vrot.slane %v574_v59, %v5962_v51  ;;  %v5017_v13 = vld [vmem:[%s7643_s1 + $0x7f4] ss:$8 sps:$4 sm:$0xff]   ;;  %v5020_v16 = vld [vmem:[%s7643_s1 + $0x7f0] ss:$8 sps:$4 sm:$0xff]   ;;  %v5028_v18 = vld [vmem:[%s7643_s1 + $0x804] ss:$8 sps:$4 sm:$0xff]  }
  0x18   :  { %3645 = vmatpush1.bf16.msra.mxu0 %v4960_v23  ;;  %3359 = vmatprep.subr.bf16.mxu1 %v4961_v24  ;;  %v6001_v4 = vrot.slane %v624_v3, %v5962_v51  ;;  %v654_v20 = vcombine.high %v6030_v14, %v6030_v14  ;;  %v5022_v21 = vld [vmem:[%s7643_s1 + $0x100] ss:$8 sps:$4 sm:$0xff]   ;;  %v5031_v23 = vld [vmem:[%s7643_s1 + $0x114] ss:$8 sps:$4 sm:$0xff]   ;;  %v5064_v46 = vld [vmem:[%s7643_s1 + $0x864] ss:$8 sps:$4 sm:$0xff]  }
  0x19   :  { %3646 = vmatprep.subr.bf16.mxu0 %v4963_v25  ;;  %3379 = vmatprep.mubr.bf16.mxu1 %v596_v61  ;;  %v5026_v22 = vld [vmem:[%s7643_s1 + $0x800] ss:$8 sps:$4 sm:$0xff]   ;;  %v5034_v24 = vld [vmem:[%s7643_s1 + $0x814] ss:$8 sps:$4 sm:$0xff]   ;;  %v606_v25 = vcombine.high %v596_v61, %v596_v61  ;;  %v5065_v56 = vld [vmem:[%s7643_s1 + $0x170] ss:$8 sps:$4 sm:$0xff]  }
  0x1a   :  { %v656_v9 = vcombine.high %v6001_v4, %v6001_v4  ;;  %v5047_v38 = vld [vmem:[%s7643_s1 + $0x140] ss:$8 sps:$4 sm:$0xff]   ;;  %v5055_v40 = vld [vmem:[%s7643_s1 + $0x154] ss:$8 sps:$4 sm:$0xff]   ;;  %v5076_v60 = vld [vmem:[%s7643_s1 + $0x884] ss:$8 sps:$4 sm:$0xff]  }
  0x1b   :  { %3360 = vmatpush1.bf16.msra.mxu1 %v4965_v26  ;;  %v5029_v26 = vld [vmem:[%s7643_s1 + $0x110] ss:$8 sps:$4 sm:$0xff]   ;;  %v5050_v39 = vld [vmem:[%s7643_s1 + $0x840] ss:$8 sps:$4 sm:$0xff]   ;;  %v5070_v54 = vld [vmem:[%s7643_s1 + $0x874] ss:$8 sps:$4 sm:$0xff]  }
  0x1c   :  { %3647 = vmatpush1.bf16.msra.mxu0 %v4966_v27  ;;  %3361 = vmatprep.subr.bf16.mxu1 %v4967_v28  ;;  %v5032_v27 = vld [vmem:[%s7643_s1 + $0x810] ss:$8 sps:$4 sm:$0xff]   ;;  %v5037_v28 = vld [vmem:[%s7643_s1 + $0x124] ss:$8 sps:$4 sm:$0xff]   ;;  %v5071_v61 = vld [vmem:[%s7643_s1 + $0x180] ss:$8 sps:$4 sm:$0xff]  }
  0x1d   :  { %3648 = vmatprep.subr.bf16.mxu0 %v4969_v29  ;;  %3666 = vmatprep.mubr.bf16.mxu0 %v656_v9  ;;  %v5040_v29 = vld [vmem:[%s7643_s1 + $0x824] ss:$8 sps:$4 sm:$0xff]   ;;  %v5074_v62 = vld [vmem:[%s7643_s1 + $0x880] ss:$8 sps:$4 sm:$0xff]   ;;  %v5094_v9 = vld [vmem:[%s7643_s1 + $0x8b4] ss:$8 sps:$4 sm:$0xff]  }
  0x1e   :  { %v5085_v3 = vld [vmem:[%s7643_s1 + $0x1a4] ss:$8 sps:$4 sm:$0xff]  }
  0x1f   :  { %3362 = vmatpush1.bf16.msra.mxu1 %v4971_v30  ;;  %v5035_v30 = vld [vmem:[%s7643_s1 + $0x120] ss:$8 sps:$4 sm:$0xff]  }
  0x20   :  { %3649 = vmatpush1.bf16.msra.mxu0 %v4972_v31  ;;  %3363 = vmatprep.subr.bf16.mxu1 %v4973_v32  ;;  %v5038_v31 = vld [vmem:[%s7643_s1 + $0x820] ss:$8 sps:$4 sm:$0xff]   ;;  %v5043_v32 = vld [vmem:[%s7643_s1 + $0x134] ss:$8 sps:$4 sm:$0xff]  }
  0x21   :  { %3650 = vmatprep.subr.bf16.mxu0 %v4975_v33  ;;  %v5046_v33 = vld [vmem:[%s7643_s1 + $0x834] ss:$8 sps:$4 sm:$0xff]  }
  0x23   :  { %3364 = vmatpush1.bf16.msra.mxu1 %v4977_v34  ;;  %v5041_v34 = vld [vmem:[%s7643_s1 + $0x130] ss:$8 sps:$4 sm:$0xff]  }
  0x24   :  { %3651 = vmatpush1.bf16.msra.mxu0 %v4978_v35  ;;  %3365 = vmatprep.subr.bf16.mxu1 %v4979_v36  ;;  %v5044_v35 = vld [vmem:[%s7643_s1 + $0x830] ss:$8 sps:$4 sm:$0xff]   ;;  %v5049_v36 = vld [vmem:[%s7643_s1 + $0x144] ss:$8 sps:$4 sm:$0xff]  }
  0x25   :  { %3652 = vmatprep.subr.bf16.mxu0 %v4981_v37  ;;  %v5052_v37 = vld [vmem:[%s7643_s1 + $0x844] ss:$8 sps:$4 sm:$0xff]  }
  0x27   :  { %3366 = vmatpush1.bf16.msra.mxu1 %v4983_v41  ;;  %v5058_v41 = vld [vmem:[%s7643_s1 + $0x854] ss:$8 sps:$4 sm:$0xff]  }
  0x28   :  { %3653 = vmatpush1.bf16.msra.mxu0 %v4984_v42  ;;  %3367 = vmatprep.subr.bf16.mxu1 %v4985_v43  ;;  %v5053_v42 = vld [vmem:[%s7643_s1 + $0x150] ss:$8 sps:$4 sm:$0xff]  }
  0x29   :  { %3654 = vmatprep.subr.bf16.mxu0 %v4987_v44  ;;  %v5056_v43 = vld [vmem:[%s7643_s1 + $0x850] ss:$8 sps:$4 sm:$0xff]   ;;  %v5061_v44 = vld [vmem:[%s7643_s1 + $0x164] ss:$8 sps:$4 sm:$0xff]  }
  0x2b   :  { %3368 = vmatpush1.bf16.msra.mxu1 %v4989_v47  ;;  %v5059_v47 = vld [vmem:[%s7643_s1 + $0x160] ss:$8 sps:$4 sm:$0xff]  }
  0x2c   :  { %3655 = vmatpush1.bf16.msra.mxu0 %v4990_v48  ;;  %3369 = vmatprep.subr.bf16.mxu1 %v4991_v49  ;;  %v6128_v48 = vld [vmem:[%s7642_s0 + $0x10] sm:$0xff]  ;;  %v5062_v49 = vld [vmem:[%s7643_s1 + $0x860] ss:$8 sps:$4 sm:$0xff]  }
  0x2d   :  { %3656 = vmatprep.subr.bf16.mxu0 %v4993_v50  ;;  %v5067_v50 = vld [vmem:[%s7643_s1 + $0x174] ss:$8 sps:$4 sm:$0xff]  }
  0x2f   :  { %3370 = vmatpush1.bf16.msra.mxu1 %v4995_v53  ;;  %v6138_v53 = vrot.slane %v6128_v48, %v5962_v51 }
  0x30   :  { %3657 = vmatpush1.bf16.msra.mxu0 %v4996_v55  ;;  %3371 = vmatprep.subr.bf16.mxu1 %v4997_v57  ;;  %v5068_v57 = vld [vmem:[%s7643_s1 + $0x870] ss:$8 sps:$4 sm:$0xff]  }
  0x31   :  { %3658 = vmatprep.subr.bf16.mxu0 %v4999_v58  ;;  %v672_v55 = vcombine.high %v6138_v53, %v6138_v53  ;;  %v5073_v58 = vld [vmem:[%s7643_s1 + $0x184] ss:$8 sps:$4 sm:$0xff]  }
  0x33   :  { %3372 = vmatpush1.bf16.msra.mxu1 %v5001_v63  ;;  %v6155_v59 = vrot.slane %v672_v55, %v5962_v51  ;;  %v5079_v63 = vld [vmem:[%s7643_s1 + $0x194] ss:$8 sps:$4 sm:$0xff]   ;;  %v5145_v55 = vld [vmem:[%s7643_s1 + $0x244] ss:$8 sps:$4 sm:$0xff]  }
  0x34   :  { %3659 = vmatpush1.bf16.msra.mxu0 %v5002_v0  ;;  %3373 = vmatprep.subr.bf16.mxu1 %v5003_v1  ;;  %v5082_v0 = vld [vmem:[%s7643_s1 + $0x894] ss:$8 sps:$4 sm:$0xff]   ;;  %v5077_v1 = vld [vmem:[%s7643_s1 + $0x190] ss:$8 sps:$4 sm:$0xff]  }
  0x35   :  { %3660 = vmatprep.subr.bf16.mxu0 %v5005_v2  ;;  %v5080_v2 = vld [vmem:[%s7643_s1 + $0x890] ss:$8 sps:$4 sm:$0xff]  }
  0x37   :  { %3374 = vmatpush1.bf16.msra.mxu1 %v5007_v5  ;;  %v5088_v5 = vld [vmem:[%s7643_s1 + $0x8a4] ss:$8 sps:$4 sm:$0xff]  }
  0x38   :  { %3661 = vmatpush1.bf16.msra.mxu0 %v5008_v6  ;;  %3375 = vmatprep.subr.bf16.mxu1 %v5009_v7  ;;  %v5083_v6 = vld [vmem:[%s7643_s1 + $0x1a0] ss:$8 sps:$4 sm:$0xff]  }
  0x39   :  { %3662 = vmatprep.subr.bf16.mxu0 %v5011_v8  ;;  %v5086_v7 = vld [vmem:[%s7643_s1 + $0x8a0] ss:$8 sps:$4 sm:$0xff]   ;;  %v5091_v8 = vld [vmem:[%s7643_s1 + $0x1b4] ss:$8 sps:$4 sm:$0xff]  }
  0x3b   :  { %3376 = vmatpush1.bf16.msra.mxu1 %v5013_v10  ;;  %v5089_v10 = vld [vmem:[%s7643_s1 + $0x1b0] ss:$8 sps:$4 sm:$0xff]  }
  0x3c   :  { %3663 = vmatpush1.bf16.msra.mxu0 %v5014_v11  ;;  %3377 = vmatprep.subr.bf16.mxu1 %v5015_v12  ;;  %v5092_v11 = vld [vmem:[%s7643_s1 + $0x8b0] ss:$8 sps:$4 sm:$0xff]   ;;  %v5097_v12 = vld [vmem:[%s7643_s1 + $0x1c4] ss:$8 sps:$4 sm:$0xff]  }
  0x3d   :  { %3664 = vmatprep.subr.bf16.mxu0 %v5017_v13  ;;  %v5100_v13 = vld [vmem:[%s7643_s1 + $0x8c4] ss:$8 sps:$4 sm:$0xff]  }
  0x3f   :  { %3378 = vmatpush1.bf16.msra.mxu1 %v5019_v15  ;;  %v5095_v15 = vld [vmem:[%s7643_s1 + $0x1c0] ss:$8 sps:$4 sm:$0xff]  }
  0x40   :  { %3665 = vmatpush1.bf16.msra.mxu0 %v5020_v16  ;;  %3388 = vmatprep.subr.bf16.mxu1 %v5024_v17  ;;  %v5098_v16 = vld [vmem:[%s7643_s1 + $0x8c0] ss:$8 sps:$4 sm:$0xff]   ;;  %v5103_v17 = vld [vmem:[%s7643_s1 + $0x1d4] ss:$8 sps:$4 sm:$0xff]  }
  0x41   :  { %3675 = vmatprep.subr.bf16.mxu0 %v5028_v18  ;;  %v5106_v18 = vld [vmem:[%s7643_s1 + $0x8d4] ss:$8 sps:$4 sm:$0xff]  }
  0x42   :  { %3380 = vmatmul.mubr.bf16.vlgmr.msra.gmra.mrb[0].mxu1 %v6045_v19 }
  0x43   :  { %3667 = vmatmul.mubr.bf16.vlgmr.msra.gmra.mrb[0].mxu0 %v654_v20  ;;  %3389 = vmatpush1.bf16.msra.mxu1 %v5022_v21  ;;  %v5101_v20 = vld [vmem:[%s7643_s1 + $0x1d0] ss:$8 sps:$4 sm:$0xff]  }
  0x44   :  { %3676 = vmatpush1.bf16.msra.mxu0 %v5026_v22  ;;  %3390 = vmatprep.subr.bf16.mxu1 %v5031_v23  ;;  %v5104_v21 = vld [vmem:[%s7643_s1 + $0x8d0] ss:$8 sps:$4 sm:$0xff]   ;;  %v5109_v22 = vld [vmem:[%s7643_s1 + $0x1e4] ss:$8 sps:$4 sm:$0xff]  }
  0x45   :  { %3677 = vmatprep.subr.bf16.mxu0 %v5034_v24  ;;  %3420 = vmatprep.mubr.bf16.mxu1 %v606_v25  ;;  %v5112_v23 = vld [vmem:[%s7643_s1 + $0x8e4] ss:$8 sps:$4 sm:$0xff]   ;;  %v559_v24 = vcombine.high %v5967_v52, %v5967_v52  ;;  %v5107_v25 = vld [vmem:[%s7643_s1 + $0x1e0] ss:$8 sps:$4 sm:$0xff]   ;;  %v5118_v52 = vld [vmem:[%s7643_s1 + $0x8f4] ss:$8 sps:$4 sm:$0xff]  }
  0x46   :  { %3707 = vmatprep.mubr.bf16.mxu0 %v6155_v59 }
  0x47   :  { %3391 = vmatpush1.bf16.msra.mxu1 %v5029_v26  ;;  %v5110_v26 = vld [vmem:[%s7643_s1 + $0x8e0] ss:$8 sps:$4 sm:$0xff]  }
  0x48   :  { %3678 = vmatpush1.bf16.msra.mxu0 %v5032_v27  ;;  %3392 = vmatprep.subr.bf16.mxu1 %v5037_v28  ;;  %v5115_v27 = vld [vmem:[%s7643_s1 + $0x1f4] ss:$8 sps:$4 sm:$0xff]   ;;  %v6248_v28 = vrot.slane %v559_v24, %v5962_v51  ;;  %v5185_v24 = vld [vmem:[%s7643_s1 + $0x2b0] ss:$8 sps:$4 sm:$0xff]  }
  0x49   :  { %3679 = vmatprep.subr.bf16.mxu0 %v5040_v29  ;;  %v5113_v29 = vld [vmem:[%s7643_s1 + $0x1f0] ss:$8 sps:$4 sm:$0xff]  }
  0x4b   :  { %3393 = vmatpush1.bf16.msra.mxu1 %v5035_v30  ;;  %v5116_v30 = vld [vmem:[%s7643_s1 + $0x8f0] ss:$8 sps:$4 sm:$0xff]  }
  0x4c   :  { %3680 = vmatpush1.bf16.msra.mxu0 %v5038_v31  ;;  %3394 = vmatprep.subr.bf16.mxu1 %v5043_v32  ;;  %v5121_v31 = vld [vmem:[%s7643_s1 + $0x204] ss:$8 sps:$4 sm:$0xff]  }
  0x4d   :  { %3681 = vmatprep.subr.bf16.mxu0 %v5046_v33  ;;  %v5124_v32 = vld [vmem:[%s7643_s1 + $0x904] ss:$8 sps:$4 sm:$0xff]   ;;  %v575_v33 = vcombine.high %v6248_v28, %v6248_v28 }
  0x4f   :  { %3395 = vmatpush1.bf16.msra.mxu1 %v5041_v34  ;;  %v604_v34 = vcombine.high %v6045_v19, %v6045_v19  ;;  %v5130_v19 = vld [vmem:[%s7643_s1 + $0x914] ss:$8 sps:$4 sm:$0xff]  }
  0x50   :  { %3682 = vmatpush1.bf16.msra.mxu0 %v5044_v35  ;;  %3396 = vmatprep.subr.bf16.mxu1 %v5049_v36  ;;  %v5119_v35 = vld [vmem:[%s7643_s1 + $0x200] ss:$8 sps:$4 sm:$0xff]   ;;  %v6271_v36 = vrot.slane %v6138_v53, %v5962_v51  ;;  %v5137_v53 = vld [vmem:[%s7643_s1 + $0x230] ss:$8 sps:$4 sm:$0xff]  }
  0x51   :  { %3683 = vmatprep.subr.bf16.mxu0 %v5052_v37  ;;  %v5122_v37 = vld [vmem:[%s7643_s1 + $0x900] ss:$8 sps:$4 sm:$0xff]  }
  0x53   :  { %3397 = vmatpush1.bf16.msra.mxu1 %v5047_v38  ;;  %v5127_v38 = vld [vmem:[%s7643_s1 + $0x214] ss:$8 sps:$4 sm:$0xff]  }
  0x54   :  { %3684 = vmatpush1.bf16.msra.mxu0 %v5050_v39  ;;  %3398 = vmatprep.subr.bf16.mxu1 %v5055_v40  ;;  %v6283_v39 = vrot.slane %v575_v33, %v5962_v51  ;;  %v704_v40 = vcombine.high %v6155_v59, %v6155_v59  ;;  %v5151_v59 = vld [vmem:[%s7643_s1 + $0x254] ss:$8 sps:$4 sm:$0xff]   ;;  %v5200_v33 = vld [vmem:[%s7643_s1 + $0x9d0] ss:$8 sps:$4 sm:$0xff]  }
  0x55   :  { %3685 = vmatprep.subr.bf16.mxu0 %v5058_v41  ;;  %v5125_v41 = vld [vmem:[%s7643_s1 + $0x210] ss:$8 sps:$4 sm:$0xff]  }
  0x57   :  { %3399 = vmatpush1.bf16.msra.mxu1 %v5053_v42  ;;  %v5128_v42 = vld [vmem:[%s7643_s1 + $0x910] ss:$8 sps:$4 sm:$0xff]  }
  0x58   :  { %3686 = vmatpush1.bf16.msra.mxu0 %v5056_v43  ;;  %3400 = vmatprep.subr.bf16.mxu1 %v5061_v44  ;;  %v5133_v43 = vld [vmem:[%s7643_s1 + $0x224] ss:$8 sps:$4 sm:$0xff]  }
  0x59   :  { %3687 = vmatprep.subr.bf16.mxu0 %v5064_v46  ;;  %v5136_v44 = vld [vmem:[%s7643_s1 + $0x924] ss:$8 sps:$4 sm:$0xff]   ;;  %v5131_v46 = vld [vmem:[%s7643_s1 + $0x220] ss:$8 sps:$4 sm:$0xff]  }
  0x5b   :  { %3401 = vmatpush1.bf16.msra.mxu1 %v5059_v47  ;;  %v5134_v47 = vld [vmem:[%s7643_s1 + $0x920] ss:$8 sps:$4 sm:$0xff]  }
  0x5c   :  { %3688 = vmatpush1.bf16.msra.mxu0 %v5062_v49  ;;  %3402 = vmatprep.subr.bf16.mxu1 %v5067_v50  ;;  %v5139_v49 = vld [vmem:[%s7643_s1 + $0x234] ss:$8 sps:$4 sm:$0xff]  }
  0x5d   :  { %3689 = vmatprep.subr.bf16.mxu0 %v5070_v54  ;;  %v5142_v50 = vld [vmem:[%s7643_s1 + $0x934] ss:$8 sps:$4 sm:$0xff]   ;;  %v5140_v54 = vld [vmem:[%s7643_s1 + $0x930] ss:$8 sps:$4 sm:$0xff]  }
  0x5f   :  { %3403 = vmatpush1.bf16.msra.mxu1 %v5065_v56  ;;  %v5148_v56 = vld [vmem:[%s7643_s1 + $0x944] ss:$8 sps:$4 sm:$0xff]  }
  0x60   :  { %3690 = vmatpush1.bf16.msra.mxu0 %v5068_v57  ;;  %3404 = vmatprep.subr.bf16.mxu1 %v5073_v58  ;;  %v5143_v57 = vld [vmem:[%s7643_s1 + $0x240] ss:$8 sps:$4 sm:$0xff]  }
  0x61   :  { %3691 = vmatprep.subr.bf16.mxu0 %v5076_v60  ;;  %v5146_v58 = vld [vmem:[%s7643_s1 + $0x940] ss:$8 sps:$4 sm:$0xff]   ;;  %v5154_v60 = vld [vmem:[%s7643_s1 + $0x954] ss:$8 sps:$4 sm:$0xff]  }
  0x63   :  { %3405 = vmatpush1.bf16.msra.mxu1 %v5071_v61  ;;  %v5149_v61 = vld [vmem:[%s7643_s1 + $0x250] ss:$8 sps:$4 sm:$0xff]  }
  0x64   :  { %3692 = vmatpush1.bf16.msra.mxu0 %v5074_v62  ;;  %3406 = vmatprep.subr.bf16.mxu1 %v5079_v63  ;;  %v5152_v62 = vld [vmem:[%s7643_s1 + $0x950] ss:$8 sps:$4 sm:$0xff]   ;;  %v5157_v63 = vld [vmem:[%s7643_s1 + $0x264] ss:$8 sps:$4 sm:$0xff]  }
  0x65   :  { %3693 = vmatprep.subr.bf16.mxu0 %v5082_v0  ;;  %v5160_v0 = vld [vmem:[%s7643_s1 + $0x964] ss:$8 sps:$4 sm:$0xff]  }
  0x67   :  { %3407 = vmatpush1.bf16.msra.mxu1 %v5077_v1  ;;  %v5155_v1 = vld [vmem:[%s7643_s1 + $0x260] ss:$8 sps:$4 sm:$0xff]  }
  0x68   :  { %3694 = vmatpush1.bf16.msra.mxu0 %v5080_v2  ;;  %3408 = vmatprep.subr.bf16.mxu1 %v5085_v3  ;;  %v5158_v2 = vld [vmem:[%s7643_s1 + $0x960] ss:$8 sps:$4 sm:$0xff]   ;;  %v5163_v3 = vld [vmem:[%s7643_s1 + $0x274] ss:$8 sps:$4 sm:$0xff]  }
  0x69   :  { %3695 = vmatprep.subr.bf16.mxu0 %v5088_v5  ;;  %v5166_v5 = vld [vmem:[%s7643_s1 + $0x974] ss:$8 sps:$4 sm:$0xff]  }
  0x6b   :  { %3409 = vmatpush1.bf16.msra.mxu1 %v5083_v6  ;;  %v5161_v6 = vld [vmem:[%s7643_s1 + $0x270] ss:$8 sps:$4 sm:$0xff]  }
  0x6c   :  { %3696 = vmatpush1.bf16.msra.mxu0 %v5086_v7  ;;  %3410 = vmatprep.subr.bf16.mxu1 %v5091_v8  ;;  %v5164_v7 = vld [vmem:[%s7643_s1 + $0x970] ss:$8 sps:$4 sm:$0xff]   ;;  %v5169_v8 = vld [vmem:[%s7643_s1 + $0x284] ss:$8 sps:$4 sm:$0xff]  }
  0x6d   :  { %3697 = vmatprep.subr.bf16.mxu0 %v5094_v9  ;;  %v5172_v9 = vld [vmem:[%s7643_s1 + $0x984] ss:$8 sps:$4 sm:$0xff]  }
  0x6f   :  { %3411 = vmatpush1.bf16.msra.mxu1 %v5089_v10  ;;  %v5167_v10 = vld [vmem:[%s7643_s1 + $0x280] ss:$8 sps:$4 sm:$0xff]  }
  0x70   :  { %3698 = vmatpush1.bf16.msra.mxu0 %v5092_v11  ;;  %3412 = vmatprep.subr.bf16.mxu1 %v5097_v12  ;;  %v5170_v11 = vld [vmem:[%s7643_s1 + $0x980] ss:$8 sps:$4 sm:$0xff]   ;;  %v5175_v12 = vld [vmem:[%s7643_s1 + $0x294] ss:$8 sps:$4 sm:$0xff]  }
  0x71   :  { %3699 = vmatprep.subr.bf16.mxu0 %v5100_v13  ;;  %v5178_v13 = vld [vmem:[%s7643_s1 + $0x994] ss:$8 sps:$4 sm:$0xff]  }
  0x73   :  { %3413 = vmatpush1.bf16.msra.mxu1 %v5095_v15  ;;  %v5173_v15 = vld [vmem:[%s7643_s1 + $0x290] ss:$8 sps:$4 sm:$0xff]  }
  0x74   :  { %3700 = vmatpush1.bf16.msra.mxu0 %v5098_v16  ;;  %3414 = vmatprep.subr.bf16.mxu1 %v5103_v17  ;;  %v5176_v16 = vld [vmem:[%s7643_s1 + $0x990] ss:$8 sps:$4 sm:$0xff]   ;;  %v5181_v17 = vld [vmem:[%s7643_s1 + $0x2a4] ss:$8 sps:$4 sm:$0xff]  }
  0x75   :  { %3701 = vmatprep.subr.bf16.mxu0 %v5106_v18  ;;  %v5184_v18 = vld [vmem:[%s7643_s1 + $0x9a4] ss:$8 sps:$4 sm:$0xff]  }
  0x77   :  { %3415 = vmatpush1.bf16.msra.mxu1 %v5101_v20  ;;  %v5179_v20 = vld [vmem:[%s7643_s1 + $0x2a0] ss:$8 sps:$4 sm:$0xff]  }
  0x78   :  { %3702 = vmatpush1.bf16.msra.mxu0 %v5104_v21  ;;  %3416 = vmatprep.subr.bf16.mxu1 %v5109_v22  ;;  %v5182_v21 = vld [vmem:[%s7643_s1 + $0x9a0] ss:$8 sps:$4 sm:$0xff]   ;;  %v5187_v22 = vld [vmem:[%s7643_s1 + $0x2b4] ss:$8 sps:$4 sm:$0xff]  }
  0x79   :  { %3703 = vmatprep.subr.bf16.mxu0 %v5112_v23  ;;  %v5190_v23 = vld [vmem:[%s7643_s1 + $0x9b4] ss:$8 sps:$4 sm:$0xff]  }
  0x7b   :  { %3417 = vmatpush1.bf16.msra.mxu1 %v5107_v25  ;;  %v5188_v25 = vld [vmem:[%s7643_s1 + $0x9b0] ss:$8 sps:$4 sm:$0xff]  }
  0x7c   :  { %3704 = vmatpush1.bf16.msra.mxu0 %v5110_v26  ;;  %3418 = vmatprep.subr.bf16.mxu1 %v5115_v27  ;;  %v5193_v26 = vld [vmem:[%s7643_s1 + $0x2c4] ss:$8 sps:$4 sm:$0xff]  }
  0x7d   :  { %3705 = vmatprep.subr.bf16.mxu0 %v5118_v52  ;;  %v5196_v27 = vld [vmem:[%s7643_s1 + $0x9c4] ss:$8 sps:$4 sm:$0xff]   ;;  %v5191_v52 = vld [vmem:[%s7643_s1 + $0x2c0] ss:$8 sps:$4 sm:$0xff]  }
  0x7f   :  { %3419 = vmatpush1.bf16.msra.mxu1 %v5113_v29  ;;  %v5194_v29 = vld [vmem:[%s7643_s1 + $0x9c0] ss:$8 sps:$4 sm:$0xff]  }
  0x80   :  { %3706 = vmatpush1.bf16.msra.mxu0 %v5116_v30  ;;  %3429 = vmatprep.subr.bf16.mxu1 %v5121_v31  ;;  %v5199_v30 = vld [vmem:[%s7643_s1 + $0x2d4] ss:$8 sps:$4 sm:$0xff]  }
  0x81   :  { %3716 = vmatprep.subr.bf16.mxu0 %v5124_v32  ;;  %v5202_v31 = vld [vmem:[%s7643_s1 + $0x9d4] ss:$8 sps:$4 sm:$0xff]   ;;  %v5197_v32 = vld [vmem:[%s7643_s1 + $0x2d0] ss:$8 sps:$4 sm:$0xff]  }
  0x82   :  { %3421 = vmatmul.mubr.bf16.vlgmr.msra.gmra.mrb[0].mxu1 %v604_v34  ;;  %v5205_v34 = vld [vmem:[%s7643_s1 + $0x2e4] ss:$8 sps:$4 sm:$0xff]  }
  0x83   :  { %3708 = vmatmul.mubr.bf16.vlgmr.msra.gmra.mrb[0].mxu0 %v6271_v36  ;;  %3430 = vmatpush1.bf16.msra.mxu1 %v5119_v35  ;;  %v5208_v35 = vld [vmem:[%s7643_s1 + $0x9e4] ss:$8 sps:$4 sm:$0xff]  }
  0x84   :  { %3717 = vmatpush1.bf16.msra.mxu0 %v5122_v37  ;;  %3431 = vmatprep.subr.bf16.mxu1 %v5127_v38  ;;  %v657_v37 = vcombine.high %v6128_v48, %v6128_v48  ;;  %v5203_v38 = vld [vmem:[%s7643_s1 + $0x2e0] ss:$8 sps:$4 sm:$0xff]   ;;  %v5214_v48 = vld [vmem:[%s7643_s1 + $0x9f4] ss:$8 sps:$4 sm:$0xff]  }
  0x85   :  { %3718 = vmatprep.subr.bf16.mxu0 %v5130_v19  ;;  %3461 = vmatprep.mubr.bf16.mxu1 %v6283_v39  ;;  %v5206_v19 = vld [vmem:[%s7643_s1 + $0x9e0] ss:$8 sps:$4 sm:$0xff]  }
  0x86   :  { %3748 = vmatprep.mubr.bf16.mxu0 %v704_v40  ;;  %v5211_v40 = vld [vmem:[%s7643_s1 + $0x2f4] ss:$8 sps:$4 sm:$0xff]  }
  0x87   :  { %3432 = vmatpush1.bf16.msra.mxu1 %v5125_v41  ;;  %v6460_v41 = vrot.slane %v657_v37, %v5962_v51  ;;  %v5284_v37 = vld [vmem:[%s7643_s1 + $0xab0] ss:$8 sps:$4 sm:$0xff]  }
  0x88   :  { %3719 = vmatpush1.bf16.msra.mxu0 %v5128_v42  ;;  %3433 = vmatprep.subr.bf16.mxu1 %v5133_v43  ;;  %v5209_v42 = vld [vmem:[%s7643_s1 + $0x2f0] ss:$8 sps:$4 sm:$0xff]  }
  0x89   :  { %3720 = vmatprep.subr.bf16.mxu0 %v5136_v44  ;;  %v5212_v43 = vld [vmem:[%s7643_s1 + $0x9f0] ss:$8 sps:$4 sm:$0xff]   ;;  %v5217_v44 = vld [vmem:[%s7643_s1 + $0x304] ss:$8 sps:$4 sm:$0xff]  }
  0x8b   :  { %3434 = vmatpush1.bf16.msra.mxu1 %v5131_v46  ;;  %v5220_v46 = vld [vmem:[%s7643_s1 + $0xa04] ss:$8 sps:$4 sm:$0xff]  }
  0x8c   :  { %3721 = vmatpush1.bf16.msra.mxu0 %v5134_v47  ;;  %3435 = vmatprep.subr.bf16.mxu1 %v5139_v49  ;;  %v673_v47 = vcombine.high %v6460_v41, %v6460_v41  ;;  %v5215_v49 = vld [vmem:[%s7643_s1 + $0x300] ss:$8 sps:$4 sm:$0xff]  }
  0x8d   :  { %3722 = vmatprep.subr.bf16.mxu0 %v5142_v50  ;;  %v6481_v50 = vrot.slane %v6248_v28, %v5962_v51  ;;  %v5226_v28 = vld [vmem:[%s7643_s1 + $0xa14] ss:$8 sps:$4 sm:$0xff]  }
  0x8f   :  { %3436 = vmatpush1.bf16.msra.mxu1 %v5137_v53  ;;  %v702_v53 = vcombine.high %v6271_v36, %v6271_v36  ;;  %v6497_v36 = vrot.slane %v673_v47, %v5962_v51  ;;  %v5301_v47 = vld [vmem:[%s7643_s1 + $0x3e4] ss:$8 sps:$4 sm:$0xff]  }
  0x90   :  { %3723 = vmatpush1.bf16.msra.mxu0 %v5140_v54  ;;  %3437 = vmatprep.subr.bf16.mxu1 %v5145_v55  ;;  %v5218_v54 = vld [vmem:[%s7643_s1 + $0xa00] ss:$8 sps:$4 sm:$0xff]   ;;  %v5223_v55 = vld [vmem:[%s7643_s1 + $0x314] ss:$8 sps:$4 sm:$0xff]  }
  0x91   :  { %3724 = vmatprep.subr.bf16.mxu0 %v5148_v56  ;;  %v607_v56 = vcombine.high %v6283_v39, %v6283_v39  ;;  %v5229_v39 = vld [vmem:[%s7643_s1 + $0x324] ss:$8 sps:$4 sm:$0xff]  }
  0x93   :  { %3438 = vmatpush1.bf16.msra.mxu1 %v5143_v57  ;;  %v5221_v57 = vld [vmem:[%s7643_s1 + $0x310] ss:$8 sps:$4 sm:$0xff]  }
  0x94   :  { %3725 = vmatpush1.bf16.msra.mxu0 %v5146_v58  ;;  %3439 = vmatprep.subr.bf16.mxu1 %v5151_v59  ;;  %v5224_v58 = vld [vmem:[%s7643_s1 + $0xa10] ss:$8 sps:$4 sm:$0xff]   ;;  %v5232_v59 = vld [vmem:[%s7643_s1 + $0xa24] ss:$8 sps:$4 sm:$0xff]  }
  0x95   :  { %3726 = vmatprep.subr.bf16.mxu0 %v5154_v60  ;;  %v5227_v60 = vld [vmem:[%s7643_s1 + $0x320] ss:$8 sps:$4 sm:$0xff]  }
  0x97   :  { %3440 = vmatpush1.bf16.msra.mxu1 %v5149_v61  ;;  %v5230_v61 = vld [vmem:[%s7643_s1 + $0xa20] ss:$8 sps:$4 sm:$0xff]  }
  0x98   :  { %3727 = vmatpush1.bf16.msra.mxu0 %v5152_v62  ;;  %3441 = vmatprep.subr.bf16.mxu1 %v5157_v63  ;;  %v5235_v62 = vld [vmem:[%s7643_s1 + $0x334] ss:$8 sps:$4 sm:$0xff]  }
  0x99   :  { %3728 = vmatprep.subr.bf16.mxu0 %v5160_v0  ;;  %v5238_v63 = vld [vmem:[%s7643_s1 + $0xa34] ss:$8 sps:$4 sm:$0xff]   ;;  %v5233_v0 = vld [vmem:[%s7643_s1 + $0x330] ss:$8 sps:$4 sm:$0xff]  }
  0x9b   :  { %3442 = vmatpush1.bf16.msra.mxu1 %v5155_v1  ;;  %v5236_v1 = vld [vmem:[%s7643_s1 + $0xa30] ss:$8 sps:$4 sm:$0xff]  }
  0x9c   :  { %3729 = vmatpush1.bf16.msra.mxu0 %v5158_v2  ;;  %3443 = vmatprep.subr.bf16.mxu1 %v5163_v3  ;;  %v5241_v2 = vld [vmem:[%s7643_s1 + $0x344] ss:$8 sps:$4 sm:$0xff]  }
  0x9d   :  { %3730 = vmatprep.subr.bf16.mxu0 %v5166_v5  ;;  %v5244_v3 = vld [vmem:[%s7643_s1 + $0xa44] ss:$8 sps:$4 sm:$0xff]   ;;  %v5239_v5 = vld [vmem:[%s7643_s1 + $0x340] ss:$8 sps:$4 sm:$0xff]  }
  0x9f   :  { %3444 = vmatpush1.bf16.msra.mxu1 %v5161_v6  ;;  %v5242_v6 = vld [vmem:[%s7643_s1 + $0xa40] ss:$8 sps:$4 sm:$0xff]  }
  0xa0   :  { %3731 = vmatpush1.bf16.msra.mxu0 %v5164_v7  ;;  %3445 = vmatprep.subr.bf16.mxu1 %v5169_v8  ;;  %v5247_v7 = vld [vmem:[%s7643_s1 + $0x354] ss:$8 sps:$4 sm:$0xff]  }
  0xa1   :  { %3732 = vmatprep.subr.bf16.mxu0 %v5172_v9  ;;  %v5250_v8 = vld [vmem:[%s7643_s1 + $0xa54] ss:$8 sps:$4 sm:$0xff]   ;;  %v5245_v9 = vld [vmem:[%s7643_s1 + $0x350] ss:$8 sps:$4 sm:$0xff]  }
  0xa3   :  { %3446 = vmatpush1.bf16.msra.mxu1 %v5167_v10  ;;  %v5248_v10 = vld [vmem:[%s7643_s1 + $0xa50] ss:$8 sps:$4 sm:$0xff]  }
  0xa4   :  { %3733 = vmatpush1.bf16.msra.mxu0 %v5170_v11  ;;  %3447 = vmatprep.subr.bf16.mxu1 %v5175_v12  ;;  %v5253_v11 = vld [vmem:[%s7643_s1 + $0x364] ss:$8 sps:$4 sm:$0xff]  }
  0xa5   :  { %3734 = vmatprep.subr.bf16.mxu0 %v5178_v13  ;;  %v5256_v12 = vld [vmem:[%s7643_s1 + $0xa64] ss:$8 sps:$4 sm:$0xff]   ;;  %v5251_v13 = vld [vmem:[%s7643_s1 + $0x360] ss:$8 sps:$4 sm:$0xff]  }
  0xa7   :  { %3448 = vmatpush1.bf16.msra.mxu1 %v5173_v15  ;;  %v5254_v15 = vld [vmem:[%s7643_s1 + $0xa60] ss:$8 sps:$4 sm:$0xff]  }
  0xa8   :  { %3735 = vmatpush1.bf16.msra.mxu0 %v5176_v16  ;;  %3449 = vmatprep.subr.bf16.mxu1 %v5181_v17  ;;  %v5259_v16 = vld [vmem:[%s7643_s1 + $0x374] ss:$8 sps:$4 sm:$0xff]  }
  0xa9   :  { %3736 = vmatprep.subr.bf16.mxu0 %v5184_v18  ;;  %v5262_v17 = vld [vmem:[%s7643_s1 + $0xa74] ss:$8 sps:$4 sm:$0xff]   ;;  %v5257_v18 = vld [vmem:[%s7643_s1 + $0x370] ss:$8 sps:$4 sm:$0xff]  }
  0xab   :  { %3450 = vmatpush1.bf16.msra.mxu1 %v5179_v20  ;;  %v5260_v20 = vld [vmem:[%s7643_s1 + $0xa70] ss:$8 sps:$4 sm:$0xff]  }
  0xac   :  { %3737 = vmatpush1.bf16.msra.mxu0 %v5182_v21  ;;  %3451 = vmatprep.subr.bf16.mxu1 %v5187_v22  ;;  %v5265_v21 = vld [vmem:[%s7643_s1 + $0x384] ss:$8 sps:$4 sm:$0xff]  }
  0xad   :  { %3738 = vmatprep.subr.bf16.mxu0 %v5190_v23  ;;  %v5268_v22 = vld [vmem:[%s7643_s1 + $0xa84] ss:$8 sps:$4 sm:$0xff]   ;;  %v5263_v23 = vld [vmem:[%s7643_s1 + $0x380] ss:$8 sps:$4 sm:$0xff]  }
  0xaf   :  { %3452 = vmatpush1.bf16.msra.mxu1 %v5185_v24  ;;  %v5266_v24 = vld [vmem:[%s7643_s1 + $0xa80] ss:$8 sps:$4 sm:$0xff]  }
  0xb0   :  { %3739 = vmatpush1.bf16.msra.mxu0 %v5188_v25  ;;  %3453 = vmatprep.subr.bf16.mxu1 %v5193_v26  ;;  %v5271_v25 = vld [vmem:[%s7643_s1 + $0x394] ss:$8 sps:$4 sm:$0xff]  }
  0xb1   :  { %3740 = vmatprep.subr.bf16.mxu0 %v5196_v27  ;;  %v5274_v26 = vld [vmem:[%s7643_s1 + $0xa94] ss:$8 sps:$4 sm:$0xff]   ;;  %v5269_v27 = vld [vmem:[%s7643_s1 + $0x390] ss:$8 sps:$4 sm:$0xff]  }
  0xb3   :  { %3454 = vmatpush1.bf16.msra.mxu1 %v5191_v52  ;;  %v5272_v52 = vld [vmem:[%s7643_s1 + $0xa90] ss:$8 sps:$4 sm:$0xff]  }
  0xb4   :  { %3741 = vmatpush1.bf16.msra.mxu0 %v5194_v29  ;;  %3455 = vmatprep.subr.bf16.mxu1 %v5199_v30  ;;  %v5277_v29 = vld [vmem:[%s7643_s1 + $0x3a4] ss:$8 sps:$4 sm:$0xff]  }
  0xb5   :  { %3742 = vmatprep.subr.bf16.mxu0 %v5202_v31  ;;  %v5280_v30 = vld [vmem:[%s7643_s1 + $0xaa4] ss:$8 sps:$4 sm:$0xff]   ;;  %v5275_v31 = vld [vmem:[%s7643_s1 + $0x3a0] ss:$8 sps:$4 sm:$0xff]  }
  0xb7   :  { %3456 = vmatpush1.bf16.msra.mxu1 %v5197_v32  ;;  %v5278_v32 = vld [vmem:[%s7643_s1 + $0xaa0] ss:$8 sps:$4 sm:$0xff]  }
  0xb8   :  { %3743 = vmatpush1.bf16.msra.mxu0 %v5200_v33  ;;  %3457 = vmatprep.subr.bf16.mxu1 %v5205_v34  ;;  %v5283_v33 = vld [vmem:[%s7643_s1 + $0x3b4] ss:$8 sps:$4 sm:$0xff]  }
  0xb9   :  { %3744 = vmatprep.subr.bf16.mxu0 %v5208_v35  ;;  %v5286_v34 = vld [vmem:[%s7643_s1 + $0xab4] ss:$8 sps:$4 sm:$0xff]   ;;  %v5281_v35 = vld [vmem:[%s7643_s1 + $0x3b0] ss:$8 sps:$4 sm:$0xff]  }
  0xbb   :  { %3458 = vmatpush1.bf16.msra.mxu1 %v5203_v38  ;;  %v5289_v38 = vld [vmem:[%s7643_s1 + $0x3c4] ss:$8 sps:$4 sm:$0xff]  }
  0xbc   :  { %3745 = vmatpush1.bf16.msra.mxu0 %v5206_v19  ;;  %3459 = vmatprep.subr.bf16.mxu1 %v5211_v40  ;;  %v5292_v19 = vld [vmem:[%s7643_s1 + $0xac4] ss:$8 sps:$4 sm:$0xff]   ;;  %v5287_v40 = vld [vmem:[%s7643_s1 + $0x3c0] ss:$8 sps:$4 sm:$0xff]  }
  0xbd   :  { %3746 = vmatprep.subr.bf16.mxu0 %v5214_v48  ;;  %v5290_v48 = vld [vmem:[%s7643_s1 + $0xac0] ss:$8 sps:$4 sm:$0xff]  }
  0xbf   :  { %3460 = vmatpush1.bf16.msra.mxu1 %v5209_v42  ;;  %v5295_v42 = vld [vmem:[%s7643_s1 + $0x3d4] ss:$8 sps:$4 sm:$0xff]  }
  0xc0   :  { %3747 = vmatpush1.bf16.msra.mxu0 %v5212_v43  ;;  %3470 = vmatprep.subr.bf16.mxu1 %v5217_v44  ;;  %v5298_v43 = vld [vmem:[%s7643_s1 + $0xad4] ss:$8 sps:$4 sm:$0xff]   ;;  %v5293_v44 = vld [vmem:[%s7643_s1 + $0x3d0] ss:$8 sps:$4 sm:$0xff]  }
  0xc1   :  { %3757 = vmatprep.subr.bf16.mxu0 %v5220_v46  ;;  %v5296_v46 = vld [vmem:[%s7643_s1 + $0xad0] ss:$8 sps:$4 sm:$0xff]  }
  0xc2   :  { %3462 = vmatmul.mubr.bf16.vlgmr.msra.gmra.mrb[0].mxu1 %v6481_v50 }
  0xc3   :  { %3749 = vmatmul.mubr.bf16.vlgmr.msra.gmra.mrb[0].mxu0 %v702_v53  ;;  %3471 = vmatpush1.bf16.msra.mxu1 %v5215_v49  ;;  %v5304_v49 = vld [vmem:[%s7643_s1 + $0xae4] ss:$8 sps:$4 sm:$0xff]   ;;  %v5299_v53 = vld [vmem:[%s7643_s1 + $0x3e0] ss:$8 sps:$4 sm:$0xff]  }
  0xc4   :  { %3758 = vmatpush1.bf16.msra.mxu0 %v5218_v54  ;;  %3472 = vmatprep.subr.bf16.mxu1 %v5223_v55  ;;  %v5302_v54 = vld [vmem:[%s7643_s1 + $0xae0] ss:$8 sps:$4 sm:$0xff]   ;;  %v5307_v55 = vld [vmem:[%s7643_s1 + $0x3f4] ss:$8 sps:$4 sm:$0xff]  }
  0xc5   :  { %3759 = vmatprep.subr.bf16.mxu0 %v5226_v28  ;;  %3502 = vmatprep.mubr.bf16.mxu1 %v607_v56  ;;  %v5310_v28 = vld [vmem:[%s7643_s1 + $0xaf4] ss:$8 sps:$4 sm:$0xff]   ;;  %v6672_v56 = vld.sshfl [vmem:[%s7642_s0 + $0x8] sm:$0xff pattern:$0x75316420] }
  0xc6   :  { %3789 = vmatprep.mubr.bf16.mxu0 %v6497_v36 }
  0xc7   :  { %3473 = vmatpush1.bf16.msra.mxu1 %v5221_v57  ;;  %v5305_v57 = vld [vmem:[%s7643_s1 + $0x3f0] ss:$8 sps:$4 sm:$0xff]  }
  0xc8   :  { %3760 = vmatpush1.bf16.msra.mxu0 %v5224_v58  ;;  %3474 = vmatprep.subr.bf16.mxu1 %v5229_v39  ;;  %v5308_v58 = vld [vmem:[%s7643_s1 + $0xaf0] ss:$8 sps:$4 sm:$0xff]   ;;  %v5313_v39 = vld [vmem:[%s7643_s1 + $0x404] ss:$8 sps:$4 sm:$0xff]  }
  0xc9   :  { %3761 = vmatprep.subr.bf16.mxu0 %v5232_v59  ;;  %v5317_v59 = vld [vmem:[%s7643_s1 + $0xb04] ss:$8 sps:$4 sm:$0xff]  }
  0xcb   :  { %3475 = vmatpush1.bf16.msra.mxu1 %v5227_v60  ;;  %v623_v60 = vcombine.high %v6672_v56, %v6672_v56 }
  0xcc   :  { %3762 = vmatpush1.bf16.msra.mxu0 %v5230_v61  ;;  %3476 = vmatprep.subr.bf16.mxu1 %v5235_v62  ;;  %v5311_v61 = vld [vmem:[%s7643_s1 + $0x400] ss:$8 sps:$4 sm:$0xff]   ;;  %v605_v62 = vcombine.high %v6481_v50, %v6481_v50  ;;  %v5323_v50 = vld [vmem:[%s7643_s1 + $0xb14] ss:$8 sps:$4 sm:$0xff]  }
  0xcd   :  { %3763 = vmatprep.subr.bf16.mxu0 %v5238_v63  ;;  %v6695_v63 = vrot.slane %v6460_v41, %v5962_v51  ;;  %v705_v41 = vcombine.high %v6497_v36, %v6497_v36  ;;  %v5329_v36 = vld [vmem:[%s7643_s1 + $0xb24] ss:$8 sps:$4 sm:$0xff]  }
  0xcf   :  { %3477 = vmatpush1.bf16.msra.mxu1 %v5233_v0  ;;  %v5315_v0 = vld [vmem:[%s7643_s1 + $0xb00] ss:$8 sps:$4 sm:$0xff]  }
  0xd0   :  { %3764 = vmatpush1.bf16.msra.mxu0 %v5236_v1  ;;  %3478 = vmatprep.subr.bf16.mxu1 %v5241_v2  ;;  %v5320_v1 = vld [vmem:[%s7643_s1 + $0x414] ss:$8 sps:$4 sm:$0xff]   ;;  %v6707_v2 = vrot.slane %v623_v60, %v5962_v51  ;;  %v5398_v60 = vld [vmem:[%s7643_s1 + $0x4e4] ss:$8 sps:$4 sm:$0xff]  }
  0xd1   :  { %3765 = vmatprep.subr.bf16.mxu0 %v5244_v3  ;;  %v5318_v3 = vld [vmem:[%s7643_s1 + $0x410] ss:$8 sps:$4 sm:$0xff]  }
  0xd3   :  { %3479 = vmatpush1.bf16.msra.mxu1 %v5239_v5  ;;  %v5321_v5 = vld [vmem:[%s7643_s1 + $0xb10] ss:$8 sps:$4 sm:$0xff]  }
  0xd4   :  { %3766 = vmatpush1.bf16.msra.mxu0 %v5242_v6  ;;  %3480 = vmatprep.subr.bf16.mxu1 %v5247_v7  ;;  %v5326_v6 = vld [vmem:[%s7643_s1 + $0x424] ss:$8 sps:$4 sm:$0xff]   ;;  %v5324_v7 = vld [vmem:[%s7643_s1 + $0x420] ss:$8 sps:$4 sm:$0xff]  }
  0xd5   :  { %3767 = vmatprep.subr.bf16.mxu0 %v5250_v8  ;;  %v5327_v8 = vld [vmem:[%s7643_s1 + $0xb20] ss:$8 sps:$4 sm:$0xff]  }
  0xd7   :  { %3481 = vmatpush1.bf16.msra.mxu1 %v5245_v9  ;;  %v5332_v9 = vld [vmem:[%s7643_s1 + $0x434] ss:$8 sps:$4 sm:$0xff]  }
  0xd8   :  { %3768 = vmatpush1.bf16.msra.mxu0 %v5248_v10  ;;  %3482 = vmatprep.subr.bf16.mxu1 %v5253_v11  ;;  %v5335_v10 = vld [vmem:[%s7643_s1 + $0xb34] ss:$8 sps:$4 sm:$0xff]   ;;  %v5330_v11 = vld [vmem:[%s7643_s1 + $0x430] ss:$8 sps:$4 sm:$0xff]  }
  0xd9   :  { %3769 = vmatprep.subr.bf16.mxu0 %v5256_v12  ;;  %v5333_v12 = vld [vmem:[%s7643_s1 + $0xb30] ss:$8 sps:$4 sm:$0xff]  }
  0xdb   :  { %3483 = vmatpush1.bf16.msra.mxu1 %v5251_v13  ;;  %v5338_v13 = vld [vmem:[%s7643_s1 + $0x444] ss:$8 sps:$4 sm:$0xff]  }
  0xdc   :  { %3770 = vmatpush1.bf16.msra.mxu0 %v5254_v15  ;;  %3484 = vmatprep.subr.bf16.mxu1 %v5259_v16  ;;  %v5341_v15 = vld [vmem:[%s7643_s1 + $0xb44] ss:$8 sps:$4 sm:$0xff]   ;;  %v5336_v16 = vld [vmem:[%s7643_s1 + $0x440] ss:$8 sps:$4 sm:$0xff]  }
  0xdd   :  { %3771 = vmatprep.subr.bf16.mxu0 %v5262_v17  ;;  %v5339_v17 = vld [vmem:[%s7643_s1 + $0xb40] ss:$8 sps:$4 sm:$0xff]  }
  0xdf   :  { %3485 = vmatpush1.bf16.msra.mxu1 %v5257_v18  ;;  %v5344_v18 = vld [vmem:[%s7643_s1 + $0x454] ss:$8 sps:$4 sm:$0xff]  }
  0xe0   :  { %3772 = vmatpush1.bf16.msra.mxu0 %v5260_v20  ;;  %3486 = vmatprep.subr.bf16.mxu1 %v5265_v21  ;;  %v5347_v20 = vld [vmem:[%s7643_s1 + $0xb54] ss:$8 sps:$4 sm:$0xff]   ;;  %v5342_v21 = vld [vmem:[%s7643_s1 + $0x450] ss:$8 sps:$4 sm:$0xff]  }
  0xe1   :  { %3773 = vmatprep.subr.bf16.mxu0 %v5268_v22  ;;  %v5345_v22 = vld [vmem:[%s7643_s1 + $0xb50] ss:$8 sps:$4 sm:$0xff]  }
  0xe3   :  { %3487 = vmatpush1.bf16.msra.mxu1 %v5263_v23  ;;  %v5350_v23 = vld [vmem:[%s7643_s1 + $0x464] ss:$8 sps:$4 sm:$0xff]  }
  0xe4   :  { %3774 = vmatpush1.bf16.msra.mxu0 %v5266_v24  ;;  %3488 = vmatprep.subr.bf16.mxu1 %v5271_v25  ;;  %v5353_v24 = vld [vmem:[%s7643_s1 + $0xb64] ss:$8 sps:$4 sm:$0xff]   ;;  %v5348_v25 = vld [vmem:[%s7643_s1 + $0x460] ss:$8 sps:$4 sm:$0xff]  }
  0xe5   :  { %3775 = vmatprep.subr.bf16.mxu0 %v5274_v26  ;;  %v5351_v26 = vld [vmem:[%s7643_s1 + $0xb60] ss:$8 sps:$4 sm:$0xff]  }
  0xe7   :  { %3489 = vmatpush1.bf16.msra.mxu1 %v5269_v27  ;;  %v5356_v27 = vld [vmem:[%s7643_s1 + $0x474] ss:$8 sps:$4 sm:$0xff]  }
  0xe8   :  { %3776 = vmatpush1.bf16.msra.mxu0 %v5272_v52  ;;  %3490 = vmatprep.subr.bf16.mxu1 %v5277_v29  ;;  %v5359_v52 = vld [vmem:[%s7643_s1 + $0xb74] ss:$8 sps:$4 sm:$0xff]   ;;  %v5354_v29 = vld [vmem:[%s7643_s1 + $0x470] ss:$8 sps:$4 sm:$0xff]  }
  0xe9   :  { %3777 = vmatprep.subr.bf16.mxu0 %v5280_v30  ;;  %v5357_v30 = vld [vmem:[%s7643_s1 + $0xb70] ss:$8 sps:$4 sm:$0xff]  }
  0xeb   :  { %3491 = vmatpush1.bf16.msra.mxu1 %v5275_v31  ;;  %v5362_v31 = vld [vmem:[%s7643_s1 + $0x484] ss:$8 sps:$4 sm:$0xff]  }
  0xec   :  { %3778 = vmatpush1.bf16.msra.mxu0 %v5278_v32  ;;  %3492 = vmatprep.subr.bf16.mxu1 %v5283_v33  ;;  %v5365_v32 = vld [vmem:[%s7643_s1 + $0xb84] ss:$8 sps:$4 sm:$0xff]   ;;  %v5360_v33 = vld [vmem:[%s7643_s1 + $0x480] ss:$8 sps:$4 sm:$0xff]  }
  0xed   :  { %3779 = vmatprep.subr.bf16.mxu0 %v5286_v34  ;;  %v5363_v34 = vld [vmem:[%s7643_s1 + $0xb80] ss:$8 sps:$4 sm:$0xff]  }
  0xef   :  { %3493 = vmatpush1.bf16.msra.mxu1 %v5281_v35  ;;  %v5368_v35 = vld [vmem:[%s7643_s1 + $0x494] ss:$8 sps:$4 sm:$0xff]  }
  0xf0   :  { %3780 = vmatpush1.bf16.msra.mxu0 %v5284_v37  ;;  %3494 = vmatprep.subr.bf16.mxu1 %v5289_v38  ;;  %v5371_v37 = vld [vmem:[%s7643_s1 + $0xb94] ss:$8 sps:$4 sm:$0xff]   ;;  %v5366_v38 = vld [vmem:[%s7643_s1 + $0x490] ss:$8 sps:$4 sm:$0xff]  }
  0xf1   :  { %3781 = vmatprep.subr.bf16.mxu0 %v5292_v19  ;;  %v5369_v19 = vld [vmem:[%s7643_s1 + $0xb90] ss:$8 sps:$4 sm:$0xff]  }
  0xf3   :  { %3495 = vmatpush1.bf16.msra.mxu1 %v5287_v40  ;;  %v5374_v40 = vld [vmem:[%s7643_s1 + $0x4a4] ss:$8 sps:$4 sm:$0xff]  }
  0xf4   :  { %3782 = vmatpush1.bf16.msra.mxu0 %v5290_v48  ;;  %3496 = vmatprep.subr.bf16.mxu1 %v5295_v42  ;;  %v5377_v48 = vld [vmem:[%s7643_s1 + $0xba4] ss:$8 sps:$4 sm:$0xff]   ;;  %v5372_v42 = vld [vmem:[%s7643_s1 + $0x4a0] ss:$8 sps:$4 sm:$0xff]  }
  0xf5   :  { %3783 = vmatprep.subr.bf16.mxu0 %v5298_v43  ;;  %v5375_v43 = vld [vmem:[%s7643_s1 + $0xba0] ss:$8 sps:$4 sm:$0xff]  }
  0xf7   :  { %3497 = vmatpush1.bf16.msra.mxu1 %v5293_v44  ;;  %v5380_v44 = vld [vmem:[%s7643_s1 + $0x4b4] ss:$8 sps:$4 sm:$0xff]  }
  0xf8   :  { %3784 = vmatpush1.bf16.msra.mxu0 %v5296_v46  ;;  %3498 = vmatprep.subr.bf16.mxu1 %v5301_v47  ;;  %v5383_v46 = vld [vmem:[%s7643_s1 + $0xbb4] ss:$8 sps:$4 sm:$0xff]   ;;  %v5378_v47 = vld [vmem:[%s7643_s1 + $0x4b0] ss:$8 sps:$4 sm:$0xff]  }
  0xf9   :  { %3785 = vmatprep.subr.bf16.mxu0 %v5304_v49  ;;  %v5381_v49 = vld [vmem:[%s7643_s1 + $0xbb0] ss:$8 sps:$4 sm:$0xff]  }
  0xfb   :  { %3499 = vmatpush1.bf16.msra.mxu1 %v5299_v53  ;;  %v5386_v53 = vld [vmem:[%s7643_s1 + $0x4c4] ss:$8 sps:$4 sm:$0xff]  }
  0xfc   :  { %3786 = vmatpush1.bf16.msra.mxu0 %v5302_v54  ;;  %3500 = vmatprep.subr.bf16.mxu1 %v5307_v55  ;;  %v5389_v54 = vld [vmem:[%s7643_s1 + $0xbc4] ss:$8 sps:$4 sm:$0xff]   ;;  %v5384_v55 = vld [vmem:[%s7643_s1 + $0x4c0] ss:$8 sps:$4 sm:$0xff]  }
  0xfd   :  { %3787 = vmatprep.subr.bf16.mxu0 %v5310_v28  ;;  %v5387_v28 = vld [vmem:[%s7643_s1 + $0xbc0] ss:$8 sps:$4 sm:$0xff]  }
  0xff   :  { %3501 = vmatpush1.bf16.msra.mxu1 %v5305_v57  ;;  %v5392_v57 = vld [vmem:[%s7643_s1 + $0x4d4] ss:$8 sps:$4 sm:$0xff]  }
 0x100   :  { %3788 = vmatpush1.bf16.msra.mxu0 %v5308_v58  ;;  %3511 = vmatprep.subr.bf16.mxu1 %v5313_v39  ;;  %v5395_v58 = vld [vmem:[%s7643_s1 + $0xbd4] ss:$8 sps:$4 sm:$0xff]   ;;  %v5390_v39 = vld [vmem:[%s7643_s1 + $0x4d0] ss:$8 sps:$4 sm:$0xff]  }
 0x101   :  { %3798 = vmatprep.subr.bf16.mxu0 %v5317_v59  ;;  %v5393_v59 = vld [vmem:[%s7643_s1 + $0xbd0] ss:$8 sps:$4 sm:$0xff]  }
 0x102   :  { %3503 = vmatmul.mubr.bf16.vlgmr.msra.gmra.mrb[0].mxu1 %v605_v62  ;;  %v6872_v62 = vld [vmem:[%s7642_s0 + $0x18] sm:$0xff] }
 0x103   :  { %3790 = vmatmul.mubr.bf16.vlgmr.msra.gmra.mrb[0].mxu0 %v6695_v63  ;;  %3512 = vmatpush1.bf16.msra.mxu1 %v5311_v61  ;;  %v5401_v61 = vld [vmem:[%s7643_s1 + $0xbe4] ss:$8 sps:$4 sm:$0xff]  }
 0x104   :  { %3799 = vmatpush1.bf16.msra.mxu0 %v5315_v0  ;;  %3513 = vmatprep.subr.bf16.mxu1 %v5320_v1  ;;  %v5396_v0 = vld [vmem:[%s7643_s1 + $0x4e0] ss:$8 sps:$4 sm:$0xff]  }
 0x105   :  { %3800 = vmatprep.subr.bf16.mxu0 %v5323_v50  ;;  %3543 = vmatprep.mubr.bf16.mxu1 %v6707_v2  ;;  %v5399_v1 = vld [vmem:[%s7643_s1 + $0xbe0] ss:$8 sps:$4 sm:$0xff]   ;;  %v5404_v50 = vld [vmem:[%s7643_s1 + $0x4f4] ss:$8 sps:$4 sm:$0xff]  }
 0x106   :  { %3830 = vmatprep.mubr.bf16.mxu0 %v705_v41  ;;  %v5407_v41 = vld [vmem:[%s7643_s1 + $0xbf4] ss:$8 sps:$4 sm:$0xff]  }
 0x107   :  { %3514 = vmatpush1.bf16.msra.mxu1 %v5318_v3  ;;  %v6888_v3 = vrot.slane %v6872_v62, %v5962_v51 }
 0x108   :  { %3801 = vmatpush1.bf16.msra.mxu0 %v5321_v5  ;;  %3515 = vmatprep.subr.bf16.mxu1 %v5326_v6  ;;  %v5402_v5 = vld [vmem:[%s7643_s1 + $0x4f0] ss:$8 sps:$4 sm:$0xff]  }
 0x109   :  { %3802 = vmatprep.subr.bf16.mxu0 %v5329_v36  ;;  %v5405_v6 = vld [vmem:[%s7643_s1 + $0xbf0] ss:$8 sps:$4 sm:$0xff]   ;;  %v5410_v36 = vld [vmem:[%s7643_s1 + $0x504] ss:$8 sps:$4 sm:$0xff]  }
 0x10b   :  { %3516 = vmatpush1.bf16.msra.mxu1 %v5324_v7  ;;  %v5413_v7 = vld [vmem:[%s7643_s1 + $0xc04] ss:$8 sps:$4 sm:$0xff]  }
 0x10c   :  { %3803 = vmatpush1.bf16.msra.mxu0 %v5327_v8  ;;  %3517 = vmatprep.subr.bf16.mxu1 %v5332_v9  ;;  %v5408_v8 = vld [vmem:[%s7643_s1 + $0x500] ss:$8 sps:$4 sm:$0xff]  }
 0x10d   :  { %3804 = vmatprep.subr.bf16.mxu0 %v5335_v10  ;;  %v5411_v9 = vld [vmem:[%s7643_s1 + $0xc00] ss:$8 sps:$4 sm:$0xff]   ;;  %v721_v10 = vcombine.high %v6888_v3, %v6888_v3 }
 0x10f   :  { %3518 = vmatpush1.bf16.msra.mxu1 %v5330_v11  ;;  %v6912_v11 = vrot.slane %v6672_v56, %v5962_v51  ;;  %v5414_v56 = vld [vmem:[%s7643_s1 + $0x510] ss:$8 sps:$4 sm:$0xff]  }
 0x110   :  { %3805 = vmatpush1.bf16.msra.mxu0 %v5333_v12  ;;  %3519 = vmatprep.subr.bf16.mxu1 %v5338_v13  ;;  %v703_v12 = vcombine.high %v6695_v63, %v6695_v63  ;;  %v5416_v13 = vld [vmem:[%s7643_s1 + $0x514] ss:$8 sps:$4 sm:$0xff]   ;;  %v5417_v63 = vld [vmem:[%s7643_s1 + $0xc10] ss:$8 sps:$4 sm:$0xff]  }
 0x111   :  { %3806 = vmatprep.subr.bf16.mxu0 %v5341_v15  ;;  %v5419_v15 = vld [vmem:[%s7643_s1 + $0xc14] ss:$8 sps:$4 sm:$0xff]  }
 0x113   :  { %3520 = vmatpush1.bf16.msra.mxu1 %v5336_v16  ;;  %v655_v16 = vcombine.high %v6707_v2, %v6707_v2  ;;  %v5420_v2 = vld [vmem:[%s7643_s1 + $0x520] ss:$8 sps:$4 sm:$0xff]  }
 0x114   :  { %3807 = vmatpush1.bf16.msra.mxu0 %v5339_v17  ;;  %3521 = vmatprep.subr.bf16.mxu1 %v5344_v18  ;;  %v6931_v17 = vrot.slane %v721_v10, %v5962_v51  ;;  %v5422_v18 = vld [vmem:[%s7643_s1 + $0x524] ss:$8 sps:$4 sm:$0xff]  }
 0x115   :  { %3808 = vmatprep.subr.bf16.mxu0 %v5347_v20  ;;  %v5425_v20 = vld [vmem:[%s7643_s1 + $0xc24] ss:$8 sps:$4 sm:$0xff]  }
 0x117   :  { %3522 = vmatpush1.bf16.msra.mxu1 %v5342_v21  ;;  %v5423_v21 = vld [vmem:[%s7643_s1 + $0xc20] ss:$8 sps:$4 sm:$0xff]  }
 0x118   :  { %3809 = vmatpush1.bf16.msra.mxu0 %v5345_v22  ;;  %3523 = vmatprep.subr.bf16.mxu1 %v5350_v23  ;;  %v5428_v22 = vld [vmem:[%s7643_s1 + $0x534] ss:$8 sps:$4 sm:$0xff]  }
 0x119   :  { %3810 = vmatprep.subr.bf16.mxu0 %v5353_v24  ;;  %v5431_v23 = vld [vmem:[%s7643_s1 + $0xc34] ss:$8 sps:$4 sm:$0xff]   ;;  %v5426_v24 = vld [vmem:[%s7643_s1 + $0x530] ss:$8 sps:$4 sm:$0xff]  }
 0x11b   :  { %3524 = vmatpush1.bf16.msra.mxu1 %v5348_v25  ;;  %v5429_v25 = vld [vmem:[%s7643_s1 + $0xc30] ss:$8 sps:$4 sm:$0xff]  }
 0x11c   :  { %3811 = vmatpush1.bf16.msra.mxu0 %v5351_v26  ;;  %3525 = vmatprep.subr.bf16.mxu1 %v5356_v27  ;;  %v5434_v26 = vld [vmem:[%s7643_s1 + $0x544] ss:$8 sps:$4 sm:$0xff]  }
 0x11d   :  { %3812 = vmatprep.subr.bf16.mxu0 %v5359_v52  ;;  %v5437_v27 = vld [vmem:[%s7643_s1 + $0xc44] ss:$8 sps:$4 sm:$0xff]  }
 0x11f   :  { %3526 = vmatpush1.bf16.msra.mxu1 %v5354_v29 }
 0x120   :  { %3813 = vmatpush1.bf16.msra.mxu0 %v5357_v30  ;;  %3527 = vmatprep.subr.bf16.mxu1 %v5362_v31 }
 0x121   :  { %3814 = vmatprep.subr.bf16.mxu0 %v5365_v32 }
 0x123   :  { %3528 = vmatpush1.bf16.msra.mxu1 %v5360_v33 }
 0x124   :  { %3815 = vmatpush1.bf16.msra.mxu0 %v5363_v34  ;;  %3529 = vmatprep.subr.bf16.mxu1 %v5368_v35 }
 0x125   :  { %3816 = vmatprep.subr.bf16.mxu0 %v5371_v37 }
 0x127   :  { %3530 = vmatpush1.bf16.msra.mxu1 %v5366_v38 }
 0x128   :  { %3817 = vmatpush1.bf16.msra.mxu0 %v5369_v19  ;;  %3531 = vmatprep.subr.bf16.mxu1 %v5374_v40 }
 0x129   :  { %3818 = vmatprep.subr.bf16.mxu0 %v5377_v48 }
 0x12b   :  { %3532 = vmatpush1.bf16.msra.mxu1 %v5372_v42 }
 0x12c   :  { %3819 = vmatpush1.bf16.msra.mxu0 %v5375_v43  ;;  %3533 = vmatprep.subr.bf16.mxu1 %v5380_v44 }
 0x12d   :  { %3820 = vmatprep.subr.bf16.mxu0 %v5383_v46 }
 0x12f   :  { %3534 = vmatpush1.bf16.msra.mxu1 %v5378_v47 }
 0x130   :  { %3821 = vmatpush1.bf16.msra.mxu0 %v5381_v49  ;;  %3535 = vmatprep.subr.bf16.mxu1 %v5386_v53 }
 0x131   :  { %3822 = vmatprep.subr.bf16.mxu0 %v5389_v54 }
 0x133   :  { %3536 = vmatpush1.bf16.msra.mxu1 %v5384_v55 }
 0x134   :  { %3823 = vmatpush1.bf16.msra.mxu0 %v5387_v28  ;;  %3537 = vmatprep.subr.bf16.mxu1 %v5392_v57 }
 0x135   :  { %3824 = vmatprep.subr.bf16.mxu0 %v5395_v58 }
 0x137   :  { %3538 = vmatpush1.bf16.msra.mxu1 %v5390_v39 }
 0x138   :  { %3825 = vmatpush1.bf16.msra.mxu0 %v5393_v59  ;;  %3539 = vmatprep.subr.bf16.mxu1 %v5398_v60 }
 0x139   :  { %3826 = vmatprep.subr.bf16.mxu0 %v5401_v61 }
 0x13b   :  { %3540 = vmatpush1.bf16.msra.mxu1 %v5396_v0 }
 0x13c   :  { %3827 = vmatpush1.bf16.msra.mxu0 %v5399_v1  ;;  %3541 = vmatprep.subr.bf16.mxu1 %v5404_v50 }
 0x13d   :  { %3828 = vmatprep.subr.bf16.mxu0 %v5407_v41 }
 0x13f   :  { %3542 = vmatpush1.bf16.msra.mxu1 %v5402_v5 }
 0x140   :  { %3829 = vmatpush1.bf16.msra.mxu0 %v5405_v6  ;;  %3552 = vmatprep.subr.bf16.mxu1 %v5410_v36 }
 0x141   :  { %3839 = vmatprep.subr.bf16.mxu0 %v5413_v7 }
 0x142   :  { %3544 = vmatmul.mubr.bf16.vlgmr.msra.gmra.mrb[0].mxu1 %v6912_v11 }
 0x143   :  { %3831 = vmatmul.mubr.bf16.vlgmr.msra.gmra.mrb[0].mxu0 %v703_v12  ;;  %3553 = vmatpush1.bf16.msra.mxu1 %v5408_v8 }
 0x144   :  { %3840 = vmatpush1.bf16.msra.mxu0 %v5411_v9  ;;  %3554 = vmatprep.subr.bf16.mxu1 %v5416_v13 }
 0x145   :  { %3841 = vmatprep.subr.bf16.mxu0 %v5419_v15  ;;  %3584 = vmatprep.mubr.bf16.mxu1 %v655_v16 }
 0x146   :  { %3871 = vmatprep.mubr.bf16.mxu0 %v6931_v17 }
 0x147   :  { %3555 = vmatpush1.bf16.msra.mxu1 %v5414_v56 }
 0x148   :  { %3842 = vmatpush1.bf16.msra.mxu0 %v5417_v63  ;;  %3556 = vmatprep.subr.bf16.mxu1 %v5422_v18 }
 0x149   :  { %3843 = vmatprep.subr.bf16.mxu0 %v5425_v20 }
 0x14b   :  { %3557 = vmatpush1.bf16.msra.mxu1 %v5420_v2 }
 0x14c   :  { %3844 = vmatpush1.bf16.msra.mxu0 %v5423_v21  ;;  %3558 = vmatprep.subr.bf16.mxu1 %v5428_v22 }
 0x14d   :  { %3845 = vmatprep.subr.bf16.mxu0 %v5431_v23 }
 0x14e   :  { %12 = vsyncpa [#allocation3], 0  ;;  %v5432_v52 = vld [vmem:[%s7643_s1 + $0x540] ss:$8 sps:$4 sm:$0xff]   ;;  %v5440_v30 = vld [vmem:[%s7643_s1 + $0x554] ss:$8 sps:$4 sm:$0xff]   ;;  %v653_v2 = vcombine.high %v6912_v11, %v6912_v11  ;;  %v7113_v21 = vrot.slane %v6888_v3, %v5962_v51 }
 0x14f   :  { %3559 = vmatpush1.bf16.msra.mxu1 %v5426_v24  ;;  %v5435_v29 = vld [vmem:[%s7643_s1 + $0xc40] ss:$8 sps:$4 sm:$0xff]   ;;  %v5443_v31 = vld [vmem:[%s7643_s1 + $0xc54] ss:$8 sps:$4 sm:$0xff]   ;;  %v5438_v32 = vld [vmem:[%s7643_s1 + $0x550] ss:$8 sps:$4 sm:$0xff]   ;;  %v753_v24 = vcombine.high %v6931_v17, %v6931_v17 }
 0x150   :  { %3846 = vmatpush1.bf16.msra.mxu0 %v5429_v25  ;;  %3560 = vmatprep.subr.bf16.mxu1 %v5434_v26  ;;  %v5441_v33 = vld [vmem:[%s7643_s1 + $0xc50] ss:$8 sps:$4 sm:$0xff]   ;;  %v5446_v34 = vld [vmem:[%s7643_s1 + $0x564] ss:$8 sps:$4 sm:$0xff]   ;;  %v5444_v37 = vld [vmem:[%s7643_s1 + $0x560] ss:$8 sps:$4 sm:$0xff]  }
 0x151   :  { %3847 = vmatprep.subr.bf16.mxu0 %v5437_v27  ;;  %v5449_v35 = vld [vmem:[%s7643_s1 + $0xc64] ss:$8 sps:$4 sm:$0xff]   ;;  %v5447_v38 = vld [vmem:[%s7643_s1 + $0xc60] ss:$8 sps:$4 sm:$0xff]   ;;  %v5452_v19 = vld [vmem:[%s7643_s1 + $0x574] ss:$8 sps:$4 sm:$0xff]  }
 0x152   :  { %v5455_v40 = vld [vmem:[%s7643_s1 + $0xc74] ss:$8 sps:$4 sm:$0xff]   ;;  %v5450_v48 = vld [vmem:[%s7643_s1 + $0x570] ss:$8 sps:$4 sm:$0xff]   ;;  %v5458_v43 = vld [vmem:[%s7643_s1 + $0x584] ss:$8 sps:$4 sm:$0xff]  }
 0x153   :  { %3561 = vmatpush1.bf16.msra.mxu1 %v5432_v52  ;;  %v5453_v42 = vld [vmem:[%s7643_s1 + $0xc70] ss:$8 sps:$4 sm:$0xff]   ;;  %v5461_v44 = vld [vmem:[%s7643_s1 + $0xc84] ss:$8 sps:$4 sm:$0xff]   ;;  %v5456_v46 = vld [vmem:[%s7643_s1 + $0x580] ss:$8 sps:$4 sm:$0xff]  }
 0x154   :  { %3848 = vmatpush1.bf16.msra.mxu0 %v5435_v29  ;;  %3562 = vmatprep.subr.bf16.mxu1 %v5440_v30  ;;  %v5459_v47 = vld [vmem:[%s7643_s1 + $0xc80] ss:$8 sps:$4 sm:$0xff]   ;;  %v5464_v49 = vld [vmem:[%s7643_s1 + $0x594] ss:$8 sps:$4 sm:$0xff]   ;;  %v5462_v54 = vld [vmem:[%s7643_s1 + $0x590] ss:$8 sps:$4 sm:$0xff]  }
 0x155   :  { %3849 = vmatprep.subr.bf16.mxu0 %v5443_v31  ;;  %v5467_v53 = vld [vmem:[%s7643_s1 + $0xc94] ss:$8 sps:$4 sm:$0xff]   ;;  %v5465_v55 = vld [vmem:[%s7643_s1 + $0xc90] ss:$8 sps:$4 sm:$0xff]   ;;  %v5470_v28 = vld [vmem:[%s7643_s1 + $0x5a4] ss:$8 sps:$4 sm:$0xff]  }
 0x156   :  { %v5473_v57 = vld [vmem:[%s7643_s1 + $0xca4] ss:$8 sps:$4 sm:$0xff]   ;;  %v5468_v58 = vld [vmem:[%s7643_s1 + $0x5a0] ss:$8 sps:$4 sm:$0xff]   ;;  %v5476_v59 = vld [vmem:[%s7643_s1 + $0x5b4] ss:$8 sps:$4 sm:$0xff]  }
 0x157   :  { %3563 = vmatpush1.bf16.msra.mxu1 %v5438_v32  ;;  %v5471_v39 = vld [vmem:[%s7643_s1 + $0xca0] ss:$8 sps:$4 sm:$0xff]   ;;  %v5479_v60 = vld [vmem:[%s7643_s1 + $0xcb4] ss:$8 sps:$4 sm:$0xff]   ;;  %v5474_v61 = vld [vmem:[%s7643_s1 + $0x5b0] ss:$8 sps:$4 sm:$0xff]  }
 0x158   :  { %3850 = vmatpush1.bf16.msra.mxu0 %v5441_v33  ;;  %3564 = vmatprep.subr.bf16.mxu1 %v5446_v34  ;;  %v5477_v0 = vld [vmem:[%s7643_s1 + $0xcb0] ss:$8 sps:$4 sm:$0xff]   ;;  %v5482_v1 = vld [vmem:[%s7643_s1 + $0x5c4] ss:$8 sps:$4 sm:$0xff]   ;;  %v5480_v41 = vld [vmem:[%s7643_s1 + $0x5c0] ss:$8 sps:$4 sm:$0xff]  }
 0x159   :  { %3851 = vmatprep.subr.bf16.mxu0 %v5449_v35  ;;  %v5485_v50 = vld [vmem:[%s7643_s1 + $0xcc4] ss:$8 sps:$4 sm:$0xff]   ;;  %v5483_v5 = vld [vmem:[%s7643_s1 + $0xcc0] ss:$8 sps:$4 sm:$0xff]   ;;  %v5488_v6 = vld [vmem:[%s7643_s1 + $0x5d4] ss:$8 sps:$4 sm:$0xff]  }
 0x15a   :  { %v5491_v36 = vld [vmem:[%s7643_s1 + $0xcd4] ss:$8 sps:$4 sm:$0xff]   ;;  %v5486_v7 = vld [vmem:[%s7643_s1 + $0x5d0] ss:$8 sps:$4 sm:$0xff]   ;;  %v5494_v9 = vld [vmem:[%s7643_s1 + $0x5e4] ss:$8 sps:$4 sm:$0xff]  }
 0x15b   :  { %3565 = vmatpush1.bf16.msra.mxu1 %v5444_v37  ;;  %v5489_v8 = vld [vmem:[%s7643_s1 + $0xcd0] ss:$8 sps:$4 sm:$0xff]   ;;  %v5497_v10 = vld [vmem:[%s7643_s1 + $0xce4] ss:$8 sps:$4 sm:$0xff]   ;;  %v5492_v12 = vld [vmem:[%s7643_s1 + $0x5e0] ss:$8 sps:$4 sm:$0xff]  }
 0x15c   :  { %3852 = vmatpush1.bf16.msra.mxu0 %v5447_v38  ;;  %3566 = vmatprep.subr.bf16.mxu1 %v5452_v19  ;;  %v5495_v13 = vld [vmem:[%s7643_s1 + $0xce0] ss:$8 sps:$4 sm:$0xff]   ;;  %v5500_v15 = vld [vmem:[%s7643_s1 + $0x5f4] ss:$8 sps:$4 sm:$0xff]   ;;  %v5498_v63 = vld [vmem:[%s7643_s1 + $0x5f0] ss:$8 sps:$4 sm:$0xff]  }
 0x15d   :  { %3853 = vmatprep.subr.bf16.mxu0 %v5455_v40  ;;  %v5503_v56 = vld [vmem:[%s7643_s1 + $0xcf4] ss:$8 sps:$4 sm:$0xff]   ;;  %v5501_v16 = vld [vmem:[%s7643_s1 + $0xcf0] ss:$8 sps:$4 sm:$0xff]   ;;  %v5506_v18 = vld [vmem:[%s7643_s1 + $0x604] ss:$8 sps:$4 sm:$0xff]  }
 0x15e   :  { %v5509_v20 = vld [vmem:[%s7643_s1 + $0xd04] ss:$8 sps:$4 sm:$0xff]   ;;  %v5504_v22 = vld [vmem:[%s7643_s1 + $0x600] ss:$8 sps:$4 sm:$0xff]   ;;  %v5512_v11 = vld [vmem:[%s7643_s1 + $0x614] ss:$8 sps:$4 sm:$0xff]  }
 0x15f   :  { %3567 = vmatpush1.bf16.msra.mxu1 %v5450_v48  ;;  %v5507_v23 = vld [vmem:[%s7643_s1 + $0xd00] ss:$8 sps:$4 sm:$0xff]   ;;  %v5515_v3 = vld [vmem:[%s7643_s1 + $0xd14] ss:$8 sps:$4 sm:$0xff]   ;;  %v5510_v25 = vld [vmem:[%s7643_s1 + $0x610] ss:$8 sps:$4 sm:$0xff]  }
 0x160   :  { %3854 = vmatpush1.bf16.msra.mxu0 %v5453_v42  ;;  %3568 = vmatprep.subr.bf16.mxu1 %v5458_v43  ;;  %v5513_v26 = vld [vmem:[%s7643_s1 + $0xd10] ss:$8 sps:$4 sm:$0xff]   ;;  %v5518_v27 = vld [vmem:[%s7643_s1 + $0x624] ss:$8 sps:$4 sm:$0xff]   ;;  %v5516_v52 = vld [vmem:[%s7643_s1 + $0x620] ss:$8 sps:$4 sm:$0xff]  }
 0x161   :  { %3855 = vmatprep.subr.bf16.mxu0 %v5461_v44  ;;  %v5521_v17 = vld [vmem:[%s7643_s1 + $0xd24] ss:$8 sps:$4 sm:$0xff]   ;;  %v5519_v29 = vld [vmem:[%s7643_s1 + $0xd20] ss:$8 sps:$4 sm:$0xff]   ;;  %v5524_v30 = vld [vmem:[%s7643_s1 + $0x634] ss:$8 sps:$4 sm:$0xff]  }
 0x162   :  { %v5522_v31 = vld [vmem:[%s7643_s1 + $0x630] ss:$8 sps:$4 sm:$0xff]   ;;  %v5530_v33 = vld [vmem:[%s7643_s1 + $0x644] ss:$8 sps:$4 sm:$0xff]   ;;  %v5528_v35 = vld [vmem:[%s7643_s1 + $0x640] ss:$8 sps:$4 sm:$0xff]  }
 0x163   :  { %3569 = vmatpush1.bf16.msra.mxu1 %v5456_v46  ;;  %v5525_v32 = vld [vmem:[%s7643_s1 + $0xd30] ss:$8 sps:$4 sm:$0xff]   ;;  %v5533_v34 = vld [vmem:[%s7643_s1 + $0xd44] ss:$8 sps:$4 sm:$0xff]   ;;  %v5531_v37 = vld [vmem:[%s7643_s1 + $0xd40] ss:$8 sps:$4 sm:$0xff]  }
 0x164   :  { %3856 = vmatpush1.bf16.msra.mxu0 %v5459_v47  ;;  %3570 = vmatprep.subr.bf16.mxu1 %v5464_v49  ;;  %v5536_v38 = vld [vmem:[%s7643_s1 + $0x654] ss:$8 sps:$4 sm:$0xff]   ;;  %v5534_v40 = vld [vmem:[%s7643_s1 + $0x650] ss:$8 sps:$4 sm:$0xff]   ;;  %v5542_v42 = vld [vmem:[%s7643_s1 + $0x664] ss:$8 sps:$4 sm:$0xff]  }
 0x165   :  { %3857 = vmatprep.subr.bf16.mxu0 %v5467_v53  ;;  %v5539_v19 = vld [vmem:[%s7643_s1 + $0xd54] ss:$8 sps:$4 sm:$0xff]   ;;  %v5537_v48 = vld [vmem:[%s7643_s1 + $0xd50] ss:$8 sps:$4 sm:$0xff]   ;;  %v5545_v43 = vld [vmem:[%s7643_s1 + $0xd64] ss:$8 sps:$4 sm:$0xff]  }
 0x166   :  { %v5540_v44 = vld [vmem:[%s7643_s1 + $0x660] ss:$8 sps:$4 sm:$0xff]   ;;  %v5548_v47 = vld [vmem:[%s7643_s1 + $0x674] ss:$8 sps:$4 sm:$0xff]   ;;  %v5546_v53 = vld [vmem:[%s7643_s1 + $0x670] ss:$8 sps:$4 sm:$0xff]  }
 0x167   :  { %3571 = vmatpush1.bf16.msra.mxu1 %v5462_v54  ;;  %v5543_v46 = vld [vmem:[%s7643_s1 + $0xd60] ss:$8 sps:$4 sm:$0xff]   ;;  %v5551_v49 = vld [vmem:[%s7643_s1 + $0xd74] ss:$8 sps:$4 sm:$0xff]   ;;  %v5549_v54 = vld [vmem:[%s7643_s1 + $0xd70] ss:$8 sps:$4 sm:$0xff]  }
 0x168   :  { %3858 = vmatpush1.bf16.msra.mxu0 %v5465_v55  ;;  %3572 = vmatprep.subr.bf16.mxu1 %v5470_v28  ;;  %v5554_v55 = vld [vmem:[%s7643_s1 + $0x684] ss:$8 sps:$4 sm:$0xff]  }
 0x169   :  { %3859 = vmatprep.subr.bf16.mxu0 %v5473_v57  ;;  %v5557_v28 = vld [vmem:[%s7643_s1 + $0xd84] ss:$8 sps:$4 sm:$0xff]   ;;  %v5552_v57 = vld [vmem:[%s7643_s1 + $0x680] ss:$8 sps:$4 sm:$0xff]  }
 0x16b   :  { %3573 = vmatpush1.bf16.msra.mxu1 %v5468_v58  ;;  %v5555_v58 = vld [vmem:[%s7643_s1 + $0xd80] ss:$8 sps:$4 sm:$0xff]  }
 0x16c   :  { %3860 = vmatpush1.bf16.msra.mxu0 %v5471_v39  ;;  %3574 = vmatprep.subr.bf16.mxu1 %v5476_v59  ;;  %v5560_v39 = vld [vmem:[%s7643_s1 + $0x694] ss:$8 sps:$4 sm:$0xff]  }
 0x16d   :  { %3861 = vmatprep.subr.bf16.mxu0 %v5479_v60  ;;  %v5563_v59 = vld [vmem:[%s7643_s1 + $0xd94] ss:$8 sps:$4 sm:$0xff]   ;;  %v5558_v60 = vld [vmem:[%s7643_s1 + $0x690] ss:$8 sps:$4 sm:$0xff]  }
 0x16f   :  { %3575 = vmatpush1.bf16.msra.mxu1 %v5474_v61  ;;  %v5561_v61 = vld [vmem:[%s7643_s1 + $0xd90] ss:$8 sps:$4 sm:$0xff]  }
 0x170   :  { %3862 = vmatpush1.bf16.msra.mxu0 %v5477_v0  ;;  %3576 = vmatprep.subr.bf16.mxu1 %v5482_v1  ;;  %v5566_v0 = vld [vmem:[%s7643_s1 + $0x6a4] ss:$8 sps:$4 sm:$0xff]  }
 0x171   :  { %3863 = vmatprep.subr.bf16.mxu0 %v5485_v50  ;;  %v5569_v1 = vld [vmem:[%s7643_s1 + $0xda4] ss:$8 sps:$4 sm:$0xff]   ;;  %v5564_v50 = vld [vmem:[%s7643_s1 + $0x6a0] ss:$8 sps:$4 sm:$0xff]  }
 0x173   :  { %3577 = vmatpush1.bf16.msra.mxu1 %v5480_v41  ;;  %v5567_v41 = vld [vmem:[%s7643_s1 + $0xda0] ss:$8 sps:$4 sm:$0xff]  }
 0x174   :  { %3864 = vmatpush1.bf16.msra.mxu0 %v5483_v5  ;;  %3578 = vmatprep.subr.bf16.mxu1 %v5488_v6  ;;  %v5572_v5 = vld [vmem:[%s7643_s1 + $0x6b4] ss:$8 sps:$4 sm:$0xff]  }
 0x175   :  { %3865 = vmatprep.subr.bf16.mxu0 %v5491_v36  ;;  %v5575_v6 = vld [vmem:[%s7643_s1 + $0xdb4] ss:$8 sps:$4 sm:$0xff]   ;;  %v5570_v36 = vld [vmem:[%s7643_s1 + $0x6b0] ss:$8 sps:$4 sm:$0xff]  }
 0x177   :  { %3579 = vmatpush1.bf16.msra.mxu1 %v5486_v7  ;;  %v5573_v7 = vld [vmem:[%s7643_s1 + $0xdb0] ss:$8 sps:$4 sm:$0xff]  }
 0x178   :  { %3866 = vmatpush1.bf16.msra.mxu0 %v5489_v8  ;;  %3580 = vmatprep.subr.bf16.mxu1 %v5494_v9  ;;  %v5578_v8 = vld [vmem:[%s7643_s1 + $0x6c4] ss:$8 sps:$4 sm:$0xff]  }
 0x179   :  { %3867 = vmatprep.subr.bf16.mxu0 %v5497_v10  ;;  %v5581_v9 = vld [vmem:[%s7643_s1 + $0xdc4] ss:$8 sps:$4 sm:$0xff]   ;;  %v5576_v10 = vld [vmem:[%s7643_s1 + $0x6c0] ss:$8 sps:$4 sm:$0xff]  }
 0x17b   :  { %3581 = vmatpush1.bf16.msra.mxu1 %v5492_v12  ;;  %v5579_v12 = vld [vmem:[%s7643_s1 + $0xdc0] ss:$8 sps:$4 sm:$0xff]  }
 0x17c   :  { %3868 = vmatpush1.bf16.msra.mxu0 %v5495_v13  ;;  %3582 = vmatprep.subr.bf16.mxu1 %v5500_v15  ;;  %v5584_v13 = vld [vmem:[%s7643_s1 + $0x6d4] ss:$8 sps:$4 sm:$0xff]  }
 0x17d   :  { %3869 = vmatprep.subr.bf16.mxu0 %v5503_v56  ;;  %v5587_v15 = vld [vmem:[%s7643_s1 + $0xdd4] ss:$8 sps:$4 sm:$0xff]   ;;  %v5582_v56 = vld [vmem:[%s7643_s1 + $0x6d0] ss:$8 sps:$4 sm:$0xff]  }
 0x17f   :  { %3583 = vmatpush1.bf16.msra.mxu1 %v5498_v63  ;;  %v5585_v63 = vld [vmem:[%s7643_s1 + $0xdd0] ss:$8 sps:$4 sm:$0xff]  }
 0x180   :  { %3870 = vmatpush1.bf16.msra.mxu0 %v5501_v16  ;;  %3593 = vmatprep.subr.bf16.mxu1 %v5506_v18  ;;  %v706_v16 = vcombine.high %v6872_v62, %v6872_v62  ;;  %v5590_v18 = vld [vmem:[%s7643_s1 + $0x6e4] ss:$8 sps:$4 sm:$0xff]   ;;  %v5591_v62 = vld [vmem:[%s7643_s1 + $0xde0] ss:$8 sps:$4 sm:$0xff]  }
 0x181   :  { %3880 = vmatprep.subr.bf16.mxu0 %v5509_v20  ;;  %v5593_v20 = vld [vmem:[%s7643_s1 + $0xde4] ss:$8 sps:$4 sm:$0xff]  }
 0x182   :  { %3585 = vmatmul.mubr.bf16.vlgmr.msra.gmra.mrb[0].mxu1 %v653_v2  ;;  %v5588_v2 = vld [vmem:[%s7643_s1 + $0x6e0] ss:$8 sps:$4 sm:$0xff]  }
 0x183   :  { %3872 = vmatmul.mubr.bf16.vlgmr.msra.gmra.mrb[0].mxu0 %v7113_v21  ;;  %3594 = vmatpush1.bf16.msra.mxu1 %v5504_v22  ;;  %v7296_v22 = vrot.slane %v706_v16, %v5962_v51  ;;  %v5699_v16 = vld [vmem:[%s7647_s5 + $0x4] ss:$8 sps:$4 sm:$0xff]  }
 0x184   :  { %3881 = vmatpush1.bf16.msra.mxu0 %v5507_v23  ;;  %3595 = vmatprep.subr.bf16.mxu1 %v5512_v11  ;;  %v5596_v23 = vld [vmem:[%s7643_s1 + $0x6f4] ss:$8 sps:$4 sm:$0xff]  }
 0x185   :  { %3882 = vmatprep.subr.bf16.mxu0 %v5515_v3  ;;  %3625 = vmatprep.mubr.bf16.mxu1 %v6001_v4  ;;  %v5527_v4 = vld [vmem:[%s7643_s1 + $0xd34] ss:$8 sps:$4 sm:$0xff]   ;;  %v5594_v3 = vld [vmem:[%s7643_s1 + $0x6f0] ss:$8 sps:$4 sm:$0xff]  }
 0x186   :  { %3912 = vmatprep.mubr.bf16.mxu0 %v753_v24  ;;  %v5599_v11 = vld [vmem:[%s7643_s1 + $0xdf4] ss:$8 sps:$4 sm:$0xff]   ;;  %v5597_v24 = vld [vmem:[%s7643_s1 + $0xdf0] ss:$8 sps:$4 sm:$0xff]  }
 0x187   :  { %3596 = vmatpush1.bf16.msra.mxu1 %v5510_v25  ;;  %v722_v25 = vcombine.high %v7296_v22, %v7296_v22 }
 0x188   :  { %3883 = vmatpush1.bf16.msra.mxu0 %v5513_v26  ;;  %3597 = vmatprep.subr.bf16.mxu1 %v5518_v27  ;;  %v5602_v26 = vld [vmem:[%s7643_s1 + $0xe04] ss:$8 sps:$4 sm:$0xff]   ;;  %v751_v27 = vcombine.high %v7113_v21, %v7113_v21  ;;  %v5603_v21 = vld [vmem:[%s7643_s1 + $0xe10] ss:$8 sps:$4 sm:$0xff]  }
 0x189   :  { %3884 = vmatprep.subr.bf16.mxu0 %v5521_v17  ;;  %v5600_v17 = vld [vmem:[%s7643_s1 + $0xe00] ss:$8 sps:$4 sm:$0xff]  }
 0x18b   :  { %3598 = vmatpush1.bf16.msra.mxu1 %v5516_v52  ;;  %v7321_v52 = vrot.slane %v722_v25, %v5962_v51  ;;  %v5676_v25 = vld [vmem:[%s7643_s1 + $0xf90] ss:$8 sps:$4 sm:$0xff]  }
 0x18c   :  { %3885 = vmatpush1.bf16.msra.mxu0 %v5519_v29  ;;  %3599 = vmatprep.subr.bf16.mxu1 %v5524_v30  ;;  %v5605_v29 = vld [vmem:[%s7643_s1 + $0xe14] ss:$8 sps:$4 sm:$0xff]   ;;  %v5608_v30 = vld [vmem:[%s7643_s1 + $0xe24] ss:$8 sps:$4 sm:$0xff]  }
 0x18d   :  { %3886 = vmatprep.subr.bf16.mxu0 %v5527_v4  ;;  %v5606_v4 = vld [vmem:[%s7643_s1 + $0xe20] ss:$8 sps:$4 sm:$0xff]  }
 0x18f   :  { %3600 = vmatpush1.bf16.msra.mxu1 %v5522_v31  ;;  %v5609_v31 = vld [vmem:[%s7643_s1 + $0xe30] ss:$8 sps:$4 sm:$0xff]  }
 0x190   :  { %3887 = vmatpush1.bf16.msra.mxu0 %v5525_v32  ;;  %3601 = vmatprep.subr.bf16.mxu1 %v5530_v33  ;;  %v5614_v32 = vld [vmem:[%s7643_s1 + $0xe44] ss:$8 sps:$4 sm:$0xff]   ;;  %v5612_v33 = vld [vmem:[%s7643_s1 + $0xe40] ss:$8 sps:$4 sm:$0xff]  }
 0x191   :  { %3888 = vmatprep.subr.bf16.mxu0 %v5533_v34  ;;  %v5617_v34 = vld [vmem:[%s7643_s1 + $0xe54] ss:$8 sps:$4 sm:$0xff]  }
 0x193   :  { %3602 = vmatpush1.bf16.msra.mxu1 %v5528_v35  ;;  %v5615_v35 = vld [vmem:[%s7643_s1 + $0xe50] ss:$8 sps:$4 sm:$0xff]  }
 0x194   :  { %3889 = vmatpush1.bf16.msra.mxu0 %v5531_v37  ;;  %3603 = vmatprep.subr.bf16.mxu1 %v5536_v38  ;;  %v5620_v37 = vld [vmem:[%s7643_s1 + $0xe64] ss:$8 sps:$4 sm:$0xff]   ;;  %v5618_v38 = vld [vmem:[%s7643_s1 + $0xe60] ss:$8 sps:$4 sm:$0xff]  }
 0x195   :  { %3890 = vmatprep.subr.bf16.mxu0 %v5539_v19  ;;  %v5623_v19 = vld [vmem:[%s7643_s1 + $0xe74] ss:$8 sps:$4 sm:$0xff]  }
 0x197   :  { %3604 = vmatpush1.bf16.msra.mxu1 %v5534_v40  ;;  %v5621_v40 = vld [vmem:[%s7643_s1 + $0xe70] ss:$8 sps:$4 sm:$0xff]  }
 0x198   :  { %3891 = vmatpush1.bf16.msra.mxu0 %v5537_v48  ;;  %3605 = vmatprep.subr.bf16.mxu1 %v5542_v42  ;;  %v5626_v48 = vld [vmem:[%s7643_s1 + $0xe84] ss:$8 sps:$4 sm:$0xff]   ;;  %v5624_v42 = vld [vmem:[%s7643_s1 + $0xe80] ss:$8 sps:$4 sm:$0xff]  }
 0x199   :  { %3892 = vmatprep.subr.bf16.mxu0 %v5545_v43  ;;  %v5629_v43 = vld [vmem:[%s7643_s1 + $0xe94] ss:$8 sps:$4 sm:$0xff]  }
 0x19b   :  { %3606 = vmatpush1.bf16.msra.mxu1 %v5540_v44  ;;  %v5627_v44 = vld [vmem:[%s7643_s1 + $0xe90] ss:$8 sps:$4 sm:$0xff]  }
 0x19c   :  { %3893 = vmatpush1.bf16.msra.mxu0 %v5543_v46  ;;  %3607 = vmatprep.subr.bf16.mxu1 %v5548_v47  ;;  %v5632_v46 = vld [vmem:[%s7643_s1 + $0xea4] ss:$8 sps:$4 sm:$0xff]   ;;  %v5630_v47 = vld [vmem:[%s7643_s1 + $0xea0] ss:$8 sps:$4 sm:$0xff]  }
 0x19d   :  { %3894 = vmatprep.subr.bf16.mxu0 %v5551_v49  ;;  %v5635_v49 = vld [vmem:[%s7643_s1 + $0xeb4] ss:$8 sps:$4 sm:$0xff]  }
 0x19f   :  { %3608 = vmatpush1.bf16.msra.mxu1 %v5546_v53  ;;  %v5633_v53 = vld [vmem:[%s7643_s1 + $0xeb0] ss:$8 sps:$4 sm:$0xff]  }
 0x1a0   :  { %3895 = vmatpush1.bf16.msra.mxu0 %v5549_v54  ;;  %3609 = vmatprep.subr.bf16.mxu1 %v5554_v55  ;;  %v5638_v54 = vld [vmem:[%s7643_s1 + $0xec4] ss:$8 sps:$4 sm:$0xff]   ;;  %v5636_v55 = vld [vmem:[%s7643_s1 + $0xec0] ss:$8 sps:$4 sm:$0xff]  }
 0x1a1   :  { %3896 = vmatprep.subr.bf16.mxu0 %v5557_v28  ;;  %v5641_v28 = vld [vmem:[%s7643_s1 + $0xed4] ss:$8 sps:$4 sm:$0xff]  }
 0x1a3   :  { %3610 = vmatpush1.bf16.msra.mxu1 %v5552_v57  ;;  %v5639_v57 = vld [vmem:[%s7643_s1 + $0xed0] ss:$8 sps:$4 sm:$0xff]  }
 0x1a4   :  { %3897 = vmatpush1.bf16.msra.mxu0 %v5555_v58  ;;  %3611 = vmatprep.subr.bf16.mxu1 %v5560_v39  ;;  %v5644_v58 = vld [vmem:[%s7643_s1 + $0xee4] ss:$8 sps:$4 sm:$0xff]   ;;  %v5642_v39 = vld [vmem:[%s7643_s1 + $0xee0] ss:$8 sps:$4 sm:$0xff]  }
 0x1a5   :  { %3898 = vmatprep.subr.bf16.mxu0 %v5563_v59  ;;  %v5647_v59 = vld [vmem:[%s7643_s1 + $0xef4] ss:$8 sps:$4 sm:$0xff]  }
 0x1a7   :  { %3612 = vmatpush1.bf16.msra.mxu1 %v5558_v60  ;;  %v5645_v60 = vld [vmem:[%s7643_s1 + $0xef0] ss:$8 sps:$4 sm:$0xff]  }
 0x1a8   :  { %3899 = vmatpush1.bf16.msra.mxu0 %v5561_v61  ;;  %3613 = vmatprep.subr.bf16.mxu1 %v5566_v0  ;;  %v5651_v61 = vld [vmem:[%s7643_s1 + $0xf04] ss:$8 sps:$4 sm:$0xff]   ;;  %v7420_v0 = vrot.slane %v7296_v22, %v5962_v51  ;;  %v5652_v51 = vld [vmem:[%s7643_s1 + $0xf10] ss:$8 sps:$4 sm:$0xff]  }
 0x1a9   :  { %3900 = vmatprep.subr.bf16.mxu0 %v5569_v1  ;;  %v5649_v1 = vld [vmem:[%s7643_s1 + $0xf00] ss:$8 sps:$4 sm:$0xff]   ;;  %v5705_v22 = vld [vmem:[%s7647_s5 + $0x24] ss:$8 sps:$4 sm:$0xff]  }
 0x1ab   :  { %3614 = vmatpush1.bf16.msra.mxu1 %v5564_v50  ;;  %v754_v50 = vcombine.high %v7321_v52, %v7321_v52 }
 0x1ac   :  { %3901 = vmatpush1.bf16.msra.mxu0 %v5567_v41  ;;  %3615 = vmatprep.subr.bf16.mxu1 %v5572_v5  ;;  %v5654_v41 = vld [vmem:[%s7643_s1 + $0xf14] ss:$8 sps:$4 sm:$0xff]   ;;  %v5657_v5 = vld [vmem:[%s7643_s1 + $0xf24] ss:$8 sps:$4 sm:$0xff]  }
 0x1ad   :  { %3902 = vmatprep.subr.bf16.mxu0 %v5575_v6  ;;  %v5655_v6 = vld [vmem:[%s7643_s1 + $0xf20] ss:$8 sps:$4 sm:$0xff]  }
 0x1af   :  { %3616 = vmatpush1.bf16.msra.mxu1 %v5570_v36  ;;  %v5660_v36 = vld [vmem:[%s7643_s1 + $0xf34] ss:$8 sps:$4 sm:$0xff]  }
 0x1b0   :  { %3903 = vmatpush1.bf16.msra.mxu0 %v5573_v7  ;;  %3617 = vmatprep.subr.bf16.mxu1 %v5578_v8  ;;  %v5658_v7 = vld [vmem:[%s7643_s1 + $0xf30] ss:$8 sps:$4 sm:$0xff]   ;;  %v5663_v8 = vld [vmem:[%s7643_s1 + $0xf44] ss:$8 sps:$4 sm:$0xff]  }
 0x1b1   :  { %3904 = vmatprep.subr.bf16.mxu0 %v5581_v9  ;;  %v5661_v9 = vld [vmem:[%s7643_s1 + $0xf40] ss:$8 sps:$4 sm:$0xff]  }
 0x1b3   :  { %3618 = vmatpush1.bf16.msra.mxu1 %v5576_v10  ;;  %v5666_v10 = vld [vmem:[%s7643_s1 + $0xf54] ss:$8 sps:$4 sm:$0xff]  }
 0x1b4   :  { %3905 = vmatpush1.bf16.msra.mxu0 %v5579_v12  ;;  %3619 = vmatprep.subr.bf16.mxu1 %v5584_v13  ;;  %v5664_v12 = vld [vmem:[%s7643_s1 + $0xf50] ss:$8 sps:$4 sm:$0xff]   ;;  %v5669_v13 = vld [vmem:[%s7643_s1 + $0xf64] ss:$8 sps:$4 sm:$0xff]  }
 0x1b5   :  { %3906 = vmatprep.subr.bf16.mxu0 %v5587_v15  ;;  %v5667_v15 = vld [vmem:[%s7643_s1 + $0xf60] ss:$8 sps:$4 sm:$0xff]  }
 0x1b7   :  { %3620 = vmatpush1.bf16.msra.mxu1 %v5582_v56  ;;  %v5672_v56 = vld [vmem:[%s7643_s1 + $0xf74] ss:$8 sps:$4 sm:$0xff]  }
 0x1b8   :  { %3907 = vmatpush1.bf16.msra.mxu0 %v5585_v63  ;;  %3621 = vmatprep.subr.bf16.mxu1 %v5590_v18  ;;  %v5697_v63 = vld [vmem:[%s7647_s5] ss:$8 sps:$4 sm:$0xff]   ;;  %v5702_v18 = vld [vmem:[%s7647_s5 + $0x14] ss:$8 sps:$4 sm:$0xff]  }
 0x1b9   :  { %3908 = vmatprep.subr.bf16.mxu0 %v5593_v20  ;;  %v5670_v20 = vld [vmem:[%s7643_s1 + $0xf70] ss:$8 sps:$4 sm:$0xff]  }
 0x1bb   :  { %3622 = vmatpush1.bf16.msra.mxu1 %v5588_v2  ;;  %v5700_v2 = vld [vmem:[%s7647_s5 + $0x10] ss:$8 sps:$4 sm:$0xff]  }
 0x1bc   :  { %3909 = vmatpush1.bf16.msra.mxu0 %v5591_v62  ;;  %3623 = vmatprep.subr.bf16.mxu1 %v5596_v23  ;;  %v5675_v62 = vld [vmem:[%s7643_s1 + $0xf84] ss:$8 sps:$4 sm:$0xff]   ;;  %v5673_v23 = vld [vmem:[%s7643_s1 + $0xf80] ss:$8 sps:$4 sm:$0xff]  }
 0x1bd   :  { %3910 = vmatprep.subr.bf16.mxu0 %v5599_v11  ;;  %v5703_v11 = vld [vmem:[%s7647_s5 + $0x20] ss:$8 sps:$4 sm:$0xff]  }
 0x1bf   :  { %3624 = vmatpush1.bf16.msra.mxu1 %v5594_v3  ;;  %v5678_v3 = vld [vmem:[%s7643_s1 + $0xf94] ss:$8 sps:$4 sm:$0xff]  }
 0x1c0   :  { %3911 = vmatpush1.bf16.msra.mxu0 %v5597_v24  ;;  %4239 = vmatprep.subr.bf16.mxu1 %v5699_v16  ;;  %v5708_v24 = vld [vmem:[%s7647_s5 + $0x34] ss:$8 sps:$4 sm:$0xff]  }
 0x1c1   :  { %3921 = vmatprep.subr.bf16.mxu0 %v5602_v26  ;;  %v5706_v26 = vld [vmem:[%s7647_s5 + $0x30] ss:$8 sps:$4 sm:$0xff]  }
 0x1c2   :  { %3626 = vmatmul.mubr.bf16.vlgmr.msra.gmra.mrb[0].mxu1 %v6030_v14  ;;  %v5611_v14 = vld [vmem:[%s7643_s1 + $0xe34] ss:$8 sps:$4 sm:$0xff]  }
 0x1c3   :  { %3913 = vmatmul.mubr.bf16.vlgmr.msra.gmra.mrb[0].mxu0 %v751_v27  ;;  %4240 = vmatpush1.bf16.msra.mxu1 %v5697_v63  ;;  %v5681_v27 = vld [vmem:[%s7643_s1 + $0xfa4] ss:$8 sps:$4 sm:$0xff]   ;;  %v4019_v63 = vld [vmem:[%s7646_s4] sm:$0x3]  ;;  %s5780_s4 = smov [#allocation2]  }
 0x1c4   :  { %3922 = vmatpush1.bf16.msra.mxu0 %v5600_v17  ;;  %3953 = vmatprep.mubr.bf16.mxu0 %v7321_v52  ;;  %v5711_v17 = vld [vmem:[%s7647_s5 + $0x44] ss:$8 sps:$4 sm:$0xff]   ;;  %v5679_v52 = vld [vmem:[%s7643_s1 + $0xfa0] ss:$8 sps:$4 sm:$0xff]  }
 0x1c5   :  { %3923 = vmatprep.subr.bf16.mxu0 %v5605_v29  ;;  %4241 = vmatprep.subr.bf16.mxu1 %v5702_v18  ;;  %v5709_v29 = vld [vmem:[%s7647_s5 + $0x40] ss:$8 sps:$4 sm:$0xff]  }
 0x1c7   :  { %4242 = vmatpush1.bf16.msra.mxu1 %v5700_v2 }
 0x1c8   :  { %3924 = vmatpush1.bf16.msra.mxu0 %v5603_v21  ;;  %4243 = vmatprep.subr.bf16.mxu1 %v5705_v22  ;;  %v5684_v21 = vld [vmem:[%s7643_s1 + $0xfb4] ss:$8 sps:$4 sm:$0xff]  }
 0x1c9   :  { %3925 = vmatprep.subr.bf16.mxu0 %v5608_v30  ;;  %v5714_v30 = vld [vmem:[%s7647_s5 + $0x54] ss:$8 sps:$4 sm:$0xff]  }
 0x1cb   :  { %4244 = vmatpush1.bf16.msra.mxu1 %v5703_v11 }
 0x1cc   :  { %3926 = vmatpush1.bf16.msra.mxu0 %v5606_v4  ;;  %4245 = vmatprep.subr.bf16.mxu1 %v5708_v24  ;;  %v5682_v4 = vld [vmem:[%s7643_s1 + $0xfb0] ss:$8 sps:$4 sm:$0xff]  }
 0x1cd   :  { %3927 = vmatprep.subr.bf16.mxu0 %v5611_v14  ;;  %v5712_v14 = vld [vmem:[%s7647_s5 + $0x50] ss:$8 sps:$4 sm:$0xff]  }
 0x1cf   :  { %4246 = vmatpush1.bf16.msra.mxu1 %v5706_v26 }
 0x1d0   :  { %3928 = vmatpush1.bf16.msra.mxu0 %v5609_v31  ;;  %4247 = vmatprep.subr.bf16.mxu1 %v5711_v17  ;;  %v5687_v31 = vld [vmem:[%s7643_s1 + $0xfc4] ss:$8 sps:$4 sm:$0xff]  }
 0x1d1   :  { %3929 = vmatprep.subr.bf16.mxu0 %v5614_v32  ;;  %v5717_v32 = vld [vmem:[%s7647_s5 + $0x64] ss:$8 sps:$4 sm:$0xff]  }
 0x1d3   :  { %4248 = vmatpush1.bf16.msra.mxu1 %v5709_v29 }
 0x1d4   :  { %3930 = vmatpush1.bf16.msra.mxu0 %v5612_v33  ;;  %4249 = vmatprep.subr.bf16.mxu1 %v5714_v30  ;;  %v5685_v33 = vld [vmem:[%s7643_s1 + $0xfc0] ss:$8 sps:$4 sm:$0xff]  }
 0x1d5   :  { %3931 = vmatprep.subr.bf16.mxu0 %v5617_v34  ;;  %v5715_v34 = vld [vmem:[%s7647_s5 + $0x60] ss:$8 sps:$4 sm:$0xff]  }
 0x1d7   :  { %4250 = vmatpush1.bf16.msra.mxu1 %v5712_v14 }
 0x1d8   :  { %3932 = vmatpush1.bf16.msra.mxu0 %v5615_v35  ;;  %v5690_v35 = vld [vmem:[%s7643_s1 + $0xfd4] ss:$8 sps:$4 sm:$0xff]   ;;  %4251 = vmatprep.subr.bf16.mxu1 %v5717_v32 }
 0x1d9   :  { %3933 = vmatprep.subr.bf16.mxu0 %v5620_v37  ;;  %v5720_v37 = vld [vmem:[%s7647_s5 + $0x74] ss:$8 sps:$4 sm:$0xff]  }
 0x1db   :  { %4252 = vmatpush1.bf16.msra.mxu1 %v5715_v34 }
 0x1dc   :  { %3934 = vmatpush1.bf16.msra.mxu0 %v5618_v38  ;;  %v5688_v38 = vld [vmem:[%s7643_s1 + $0xfd0] ss:$8 sps:$4 sm:$0xff]   ;;  %4253 = vmatprep.subr.bf16.mxu1 %v5720_v37 }
 0x1dd   :  { %3935 = vmatprep.subr.bf16.mxu0 %v5623_v19  ;;  %v5718_v19 = vld [vmem:[%s7647_s5 + $0x70] ss:$8 sps:$4 sm:$0xff]  }
 0x1df   :  { %4254 = vmatpush1.bf16.msra.mxu1 %v5718_v19 }
 0x1e0   :  { %3936 = vmatpush1.bf16.msra.mxu0 %v5621_v40  ;;  %v5693_v40 = vld [vmem:[%s7643_s1 + $0xfe4] ss:$8 sps:$4 sm:$0xff]  }
 0x1e1   :  { %3937 = vmatprep.subr.bf16.mxu0 %v5626_v48  ;;  %v5723_v48 = vld [vmem:[%s7647_s5 + $0x84] ss:$8 sps:$4 sm:$0xff]  }
 0x1e2   :  { %4255 = vmatprep.subr.bf16.mxu1 %v5723_v48 }
 0x1e4   :  { %3938 = vmatpush1.bf16.msra.mxu0 %v5624_v42  ;;  %v5691_v42 = vld [vmem:[%s7643_s1 + $0xfe0] ss:$8 sps:$4 sm:$0xff]  }
 0x1e5   :  { %3939 = vmatprep.subr.bf16.mxu0 %v5629_v43  ;;  %v5721_v43 = vld [vmem:[%s7647_s5 + $0x80] ss:$8 sps:$4 sm:$0xff]  }
 0x1e6   :  { %4256 = vmatpush1.bf16.msra.mxu1 %v5721_v43 }
 0x1e8   :  { %3940 = vmatpush1.bf16.msra.mxu0 %v5627_v44  ;;  %v5696_v44 = vld [vmem:[%s7643_s1 + $0xff4] ss:$8 sps:$4 sm:$0xff]  }
 0x1e9   :  { %3941 = vmatprep.subr.bf16.mxu0 %v5632_v46  ;;  %v5726_v46 = vld [vmem:[%s7647_s5 + $0x94] ss:$8 sps:$4 sm:$0xff]  }
 0x1ea   :  { %4257 = vmatprep.subr.bf16.mxu1 %v5726_v46 }
 0x1ec   :  { %3942 = vmatpush1.bf16.msra.mxu0 %v5630_v47  ;;  %v5694_v47 = vld [vmem:[%s7643_s1 + $0xff0] ss:$8 sps:$4 sm:$0xff]  }
 0x1ed   :  { %3943 = vmatprep.subr.bf16.mxu0 %v5635_v49  ;;  %v5724_v49 = vld [vmem:[%s7647_s5 + $0x90] ss:$8 sps:$4 sm:$0xff]  }
 0x1ee   :  { %4258 = vmatpush1.bf16.msra.mxu1 %v5724_v49 }
 0x1f0   :  { %3944 = vmatpush1.bf16.msra.mxu0 %v5633_v53  ;;  %v5729_v53 = vld [vmem:[%s7647_s5 + $0xa4] ss:$8 sps:$4 sm:$0xff]  }
 0x1f1   :  { %3945 = vmatprep.subr.bf16.mxu0 %v5638_v54  ;;  %v752_v54 = vcombine.high %v7420_v0, %v7420_v0  ;;  %4259 = vmatprep.subr.bf16.mxu1 %v5729_v53 }
 0x1f4   :  { %3946 = vmatpush1.bf16.msra.mxu0 %v5636_v55  ;;  %v5727_v55 = vld [vmem:[%s7647_s5 + $0xa0] ss:$8 sps:$4 sm:$0xff]  }
 0x1f5   :  { %3947 = vmatprep.subr.bf16.mxu0 %v5641_v28  ;;  %v5732_v28 = vld [vmem:[%s7647_s5 + $0xb4] ss:$8 sps:$4 sm:$0xff]   ;;  %4260 = vmatpush1.bf16.msra.mxu1 %v5727_v55 }
 0x1f6   :  { %4261 = vmatprep.subr.bf16.mxu1 %v5732_v28 }
 0x1f8   :  { %3948 = vmatpush1.bf16.msra.mxu0 %v5639_v57  ;;  %v5730_v57 = vld [vmem:[%s7647_s5 + $0xb0] ss:$8 sps:$4 sm:$0xff]  }
 0x1f9   :  { %3949 = vmatprep.subr.bf16.mxu0 %v5644_v58  ;;  %v5735_v58 = vld [vmem:[%s7647_s5 + $0xc4] ss:$8 sps:$4 sm:$0xff]   ;;  %4262 = vmatpush1.bf16.msra.mxu1 %v5730_v57 }
 0x1fa   :  { %4263 = vmatprep.subr.bf16.mxu1 %v5735_v58 }
 0x1fc   :  { %3950 = vmatpush1.bf16.msra.mxu0 %v5642_v39  ;;  %v5733_v39 = vld [vmem:[%s7647_s5 + $0xc0] ss:$8 sps:$4 sm:$0xff]  }
 0x1fd   :  { %3951 = vmatprep.subr.bf16.mxu0 %v5647_v59  ;;  %4264 = vmatpush1.bf16.msra.mxu1 %v5733_v39  ;;  %v5738_v59 = vld [vmem:[%s7647_s5 + $0xd4] ss:$8 sps:$4 sm:$0xff]  }
 0x1fe   :  { %4265 = vmatprep.subr.bf16.mxu1 %v5738_v59 }
 0x200   :  { %3952 = vmatpush1.bf16.msra.mxu0 %v5645_v60 }
 0x201   :  { %3962 = vmatprep.subr.bf16.mxu0 %v5651_v61  ;;  %v5736_v61 = vld [vmem:[%s7647_s5 + $0xd0] ss:$8 sps:$4 sm:$0xff]  }
 0x202   :  { %4266 = vmatpush1.bf16.msra.mxu1 %v5736_v61 }
 0x203   :  { %3954 = vmatmul.mubr.bf16.vlgmr.msra.gmra.mrb[0].mxu0 %v7420_v0 }
 0x204   :  { %3963 = vmatpush1.bf16.msra.mxu0 %v5649_v1  ;;  %3994 = vmatprep.mubr.bf16.mxu0 %v754_v50 }
 0x205   :  { %3964 = vmatprep.subr.bf16.mxu0 %v5654_v41  ;;  %v5741_v41 = vld [vmem:[%s7647_s5 + $0xe4] ss:$8 sps:$4 sm:$0xff]  }
 0x206   :  { %4267 = vmatprep.subr.bf16.mxu1 %v5741_v41 }
 0x208   :  { %3965 = vmatpush1.bf16.msra.mxu0 %v5652_v51  ;;  %v5739_v51 = vld [vmem:[%s7647_s5 + $0xe0] ss:$8 sps:$4 sm:$0xff]  }
 0x209   :  { %3966 = vmatprep.subr.bf16.mxu0 %v5657_v5  ;;  %4268 = vmatpush1.bf16.msra.mxu1 %v5739_v51  ;;  %v5744_v5 = vld [vmem:[%s7647_s5 + $0xf4] ss:$8 sps:$4 sm:$0xff]  }
 0x20a   :  { %4269 = vmatprep.subr.bf16.mxu1 %v5744_v5 }
 0x20c   :  { %3967 = vmatpush1.bf16.msra.mxu0 %v5655_v6  ;;  %v5742_v6 = vld [vmem:[%s7647_s5 + $0xf0] ss:$8 sps:$4 sm:$0xff]  }
 0x20d   :  { %3968 = vmatprep.subr.bf16.mxu0 %v5660_v36  ;;  %4270 = vmatpush1.bf16.msra.mxu1 %v5742_v6  ;;  %v547_v36 = vsub.s32 0, %v5947_v45 }
 0x210   :  { %3969 = vmatpush1.bf16.msra.mxu0 %v5658_v7  ;;  %v543_v7 = vld [vmem:[%s7644_s2] sm:$0x3] }
 0x211   :  { %3970 = vmatprep.subr.bf16.mxu0 %v5663_v8  ;;  %v551_v8 = vsub.s32 1, %v5947_v45 }
 0x213   :  { %v4028_v24 = vrot.slane %v4019_v63, %v551_v8 }
 0x214   :  { %3971 = vmatpush1.bf16.msra.mxu0 %v5661_v9  ;;  %v548_v9 = vrot.slane %v543_v7, %v547_v36 }
 0x215   :  { %3972 = vmatprep.subr.bf16.mxu0 %v5666_v10  ;;  %v552_v10 = vrot.slane %v543_v7, %v551_v8 }
 0x218   :  { %3973 = vmatpush1.bf16.msra.mxu0 %v5664_v12  ;;  %v4005_v12 = vld [vmem:[%s7645_s3] sm:$0x3] }
 0x219   :  { %3974 = vmatprep.subr.bf16.mxu0 %v5669_v13  ;;  %v4010_v18 = vrot.slane %v4005_v12, %v547_v36 }
 0x21c   :  { %3975 = vmatpush1.bf16.msra.mxu0 %v5667_v15 }
 0x21d   :  { %3976 = vmatprep.subr.bf16.mxu0 %v5672_v56 }
 0x220   :  { %3977 = vmatpush1.bf16.msra.mxu0 %v5670_v20 }
 0x221   :  { %3978 = vmatprep.subr.bf16.mxu0 %v5675_v62  ;;  %v4014_v62 = vrot.slane %v4005_v12, %v551_v8 }
 0x224   :  { %3979 = vmatpush1.bf16.msra.mxu0 %v5673_v23  ;;  %v4024_v23 = vrot.slane %v4019_v63, %v547_v36 }
 0x225   :  { %3980 = vmatprep.subr.bf16.mxu0 %v5678_v3 }
 0x228   :  { %3981 = vmatpush1.bf16.msra.mxu0 %v5676_v25 }
 0x229   :  { %3982 = vmatprep.subr.bf16.mxu0 %v5681_v27 }
 0x22c   :  { %3983 = vmatpush1.bf16.msra.mxu0 %v5679_v52 }
 0x22d   :  { %3984 = vmatprep.subr.bf16.mxu0 %v5684_v21  ;;  %v4067_v21 = vld [vmem:[%s7648_s6] sm:$0x3]  ;;  %s4310_s6 = sshll.u32 %s5780_s4, 4  ;;  %s4311_s6 = int_to_ptr.vmem [resolvable:$true] %s4310_s6 }
 0x22e   :  { %v4072_v30 = vrot.slane %v4067_v21, %v547_v36  ;;  %s5755_s1 = scalar_lea.vmem %s4311_s6, 64  ;;  %p5760_p1 = scmp.lt.s32.totalorder %s4311_s6, %s4311_s6 }
 0x22f   :  { %p5756_p0 = scmp.ne.s32.totalorder %s4311_s6, %s5755_s1  ;;  %p5761_p2 = scmp.lt.s32.totalorder %s5755_s1, %s5755_s1 }
 0x230   :  { %3985 = vmatpush1.bf16.msra.mxu0 %v5682_v4  ;;  %v4076_v4 = vrot.slane %v4067_v21, %v551_v8 }
 0x231   :  { %3986 = vmatprep.subr.bf16.mxu0 %v5687_v31  ;;  %p5762_p3 = por %p5761_p2, %p5760_p1 }
 0x233   :  { %p5763_p4 = pnand %p5762_p3, %p5756_p0 }
 0x234   :  { %3987 = vmatpush1.bf16.msra.mxu0 %v5685_v33 }
 0x235   :  { %3988 = vmatprep.subr.bf16.mxu0 %v5690_v35 }
 0x238   :  { %3989 = vmatpush1.bf16.msra.mxu0 %v5688_v38 }
 0x239   :  { %3990 = vmatprep.subr.bf16.mxu0 %v5693_v40 }
 0x23c   :  { %3991 = vmatpush1.bf16.msra.mxu0 %v5691_v42 }
 0x23d   :  { %3992 = vmatprep.subr.bf16.mxu0 %v5696_v44 }
 0x240   :  { %3993 = vmatpush1.bf16.msra.mxu0 %v5694_v47 }
 0x243   :  { %3995 = vmatmul.mubr.bf16.vlgmr.msra.gmra.mrb[0].mxu0 %v752_v54 }
 0x295   :  { %v3627_v60 = vpop.f32.mrb[0].mxu1 }
 0x296   :  { %v3629_v0 = vpop.f32.mrb[1].mxu1  ;;  %v4863_v13 = vadd.f32 %v3627_v60, %v548_v9 }
 0x297   :  { %v3631_v1 = vpop.f32.mrb[2].mxu1  ;;  %v4865_v15 = vadd.f32 %v3629_v0, %v552_v10 }
 0x298   :  { %v3632_v50 = vpop.f32.mrb[3].mxu1 }
 0x316   :  { %v3996_v56 = vpop.f32.mrb[0].mxu0 }
 0x317   :  { %v4864_v16 = vadd.f32 %v4863_v13, %v3996_v56  ;;  %v3998_v20 = vpop.f32.mrb[1].mxu0 }
 0x318   :  { %v4866_v2 = vadd.f32 %v4865_v15, %v3998_v20  ;;  %v4000_v22 = vpop.f32.mrb[2].mxu0 }
 0x319   :  { %v4003_v45 = vmax.f32 %v4864_v16, 0.0  ;;  %v4001_v11 = vpop.f32.mrb[3].mxu0 }
 0x31a   :  { %v4004_v3 = vmax.f32 %v4866_v2, 0.0 }
 0x31b   :  { %v4017_v25 = vmul.f32 %v4010_v18, %v4003_v45 }
 0x31c   :  { %v4018_v26 = vmul.f32 %v4014_v62, %v4004_v3 }
 0x31d   :  { %v4031_v27 = vadd.f32 %v4024_v23, %v4017_v25 }
 0x31e   :  { %v4032_v17 = vadd.f32 %v4028_v24, %v4018_v26 }
 0x31f   :  { %v4033_v29 = vpack.c.bf16 %v4031_v27, %v4031_v27 }
 0x320   :  { %v4034_v52 = vpack.c.bf16 %v4032_v17, %v4032_v17 }
 0x322   :  { %4271 = vmatprep.mubr.bf16.mxu1 %v4034_v52 }
 0x323   :  { %4272 = vmatmul.mubr.bf16.vlgmr.msra.gmra.mrb[4].mxu1 %v4033_v29 }
 0x3f6   :  { %v4273_v14 = vpop.f32.mrb[4].mxu1 }
 0x3f7   :  { %v4274_v31 = vadd.f32 %v4273_v14, %v4072_v30  ;;  %v4275_v32 = vpop.f32.mrb[5].mxu1 }
 0x3f8   :  { %v4276_v33 = vadd.f32 %v4275_v32, %v4076_v4  ;;  %v4277_v34 = vpop.f32.mrb[6].mxu1 }
 0x3f9   :  { %v4280_v35 = vsub.f32 0.0, %v4274_v31  ;;  %v4278_v37 = vpop.f32.mrb[7].mxu1 }
 0x3fa   :  { %v4281_v38 = vsub.f32 0.0, %v4276_v33 }
 0x3fb   :  { %v4282_v19 = vmul.f32 1.442695, %v4280_v35 }
 0x3fc   :  { %v4284_v40 = vmul.f32 1.442695, %v4281_v38 }
 0x3fd   :  { %5745 = vpow2.f32 %v4282_v19 }
 0x3fe   :  { %5747 = vpow2.f32 %v4284_v40 }
 0x407   :  { %v5746_v48 = vpop.eup %5745 }
 0x408   :  { %v5748_v42 = vpop.eup %5747  ;;  %v4286_v43 = vadd.f32 1.0, %v5746_v48 }
 0x409   :  { %v4287_v44 = vadd.f32 1.0, %v5748_v42 }
 0x40a   :  { %5749 = vrcp.f32 %v4286_v43 }
 0x40b   :  { %5751 = vrcp.f32 %v4287_v44 }
 0x414   :  { %v5750_v46 = vpop.eup %5749 }
 0x415   :  { %v5752_v47 = vpop.eup %5751 }
 0x416   :  { %v4294_v49 = vcombine.low %v5750_v46, %v5752_v47 }
 0x418   :  { %4862 = vst.sshfl [vmem:[#allocation2] sm:$0x33 pattern:$0x76325410] %v4294_v49 }
 0x419   :  { %5766 = shalt.err (!%p5763_p4)
}
 0x41a   :  { %s5767_s27 = scalar_lea.hbm %s7649_s7, 64 }
 0x41b   :  { %p5768_p5 = scmp.ne.s32.totalorder %s7649_s7, %s5767_s27  ;;  %p5771_p6 = scmp.lt.u32.totalorder %s5767_s27, %s7649_s7 }
 0x41d   :  { %p5773_p7 = pnand %p5771_p6, %p5768_p5 }
 0x41f   :  { %5776 = shalt.err (!%p5773_p7)
}
 0x420   :  { %4313 = dma.vmem_to_hbm [thread:$0]  %s4311_s6, 64, %s7649_s7, [#allocation3]  }
 0x421   :  { %5777 = dma.done.wait [#allocation3], 64  }
 0x422   :  { %5778 = vsyncadd [#allocation3], 4294967232 }
 0x423   :  { %4317 = vsyncpa [#allocation3], 1 }

</bundles_post_ra>
